<compile_context>
chip_gen: v6e
topology: v6e:2x2x1
jax: 0.10.0
libtpu: 0.0.40
codegen_flags: <defaults>
</compile_context>

<pallas_src>
import jax
import jax.numpy as jnp
from jax.experimental import pallas as pl
from jax.experimental.pallas import tpu as pltpu

BN_EPS = 1e-5
NEG_BIG = -1e30           # max-pool padding value (pool input is post-ReLU, >= 0)
ACT_DTYPE = jnp.bfloat16  # inter-layer activation / weight dtype

TM_CAP = 1024             # max output rows per grid step (bounds the f32 accumulator)
TN_CAP = 256              # max output-channel tile (bounds the resident weight block)
VMEM_LIMIT_BYTES = 48 * 1024 * 1024   # > v5e 16MiB / v6e-v7x 32MiB defaults, < v7x 64MiB phys

# Canonical slow_r50 configuration.
SLOW_R50_CONFIG = dict(
    stem_out=64,
    stage_depths=(3, 4, 6, 3),
    stage_outs=(256, 512, 1024, 2048),
    stage_mids=(64, 128, 256, 512),
    stage_temporal_kernels=(1, 1, 3, 3),
    stage_spatial_strides=(1, 2, 2, 2),
)

# Reduced-width instantiation of the same architecture for the small demo run.
DEMO_CONFIG = dict(
    stem_out=16,
    stage_depths=(1, 1, 1, 1),
    stage_outs=(32, 64, 128, 256),
    stage_mids=(8, 16, 32, 64),
    stage_temporal_kernels=(1, 1, 3, 3),
    stage_spatial_strides=(1, 2, 2, 2),
)


def _round_up(x, m):
    return ((x + m - 1) // m) * m


def _pick_tm(m_out):
    """Row-tile <= TM_CAP, preferring exact divisors of m_out (no pad / no output trim)."""
    if m_out <= TM_CAP:
        return m_out, m_out
    div, div8 = 0, 0
    for d in range(TM_CAP, 0, -1):
        if m_out % d == 0:
            if div == 0:
                div = d
            if d % 8 == 0:
                div8 = d
                break
    if div8 >= 256:
        return div8, m_out
    if div >= 128:
        return div, m_out
    tm = TM_CAP
    return tm, _round_up(m_out, tm)


def _pick_tn(cout):
    """Output-channel tile: divisor of cout, preferring 128-multiples <= TN_CAP."""
    if cout <= TN_CAP:
        return cout
    for d in range(TN_CAP, 127, -1):
        if cout % d == 0 and d % 128 == 0:
            return d
    for d in range(TN_CAP, 0, -1):
        if cout % d == 0:
            return d
    return cout


# ----------------------------------------------------------------------------
# Fused tap-conv + BN + (residual) + ReLU Pallas kernel
# ----------------------------------------------------------------------------
def _make_conv_kernel(offsets, tm, num_m_tiles, act, has_res, tiled_x):
    """y = act( (sum_i x[rows + off_i] @ w[i]) * scale + bias [+ res] ).

    tap mode : x_ref is a whole flattened (padded) plane; taps are unit-stride pl.ds slices.
    direct   : (tiled_x) x_ref is already the (tm, Cin) row tile (1x1x1 convs / stem).
    """
    def kernel(*refs):
        if has_res:
            x_ref, w_ref, s_ref, b_ref, r_ref, o_ref = refs
        else:
            x_ref, w_ref, s_ref, b_ref, o_ref = refs
            r_ref = None

        if not tiled_x:
            if num_m_tiles == 1:
                base = 0                      # static starts -> static slices
            else:
                base = pl.program_id(1) * tm
                if tm % 8 == 0:
                    base = pl.multiple_of(base, 8)

        acc = None
        for i, off in enumerate(offsets):
            xs = x_ref[...] if tiled_x else x_ref[pl.ds(base + off, tm), :]
            part = jnp.dot(xs, w_ref[i], preferred_element_type=jnp.float32)
            acc = part if acc is None else acc + part

        y = acc * s_ref[...] + b_ref[...]
        if has_res:
            y = y + r_ref[...].astype(jnp.float32)
        if act:
            y = jnp.maximum(y, 0.0)
        o_ref[...] = y.astype(o_ref.dtype)

    return kernel


def fused_conv(x_flat, w, scale, bias, *, offsets=(0,), m_out=None, act=True,
               res_flat=None):
    """Fused conv-as-tap-matmul.

    x_flat  : (G, L, Cin) bf16, flattened (and pre-padded) activations.
    w       : (ntaps, Cin, Cout) bf16.
    scale/bias : (Cout,) f32 folded BN affine.
    res_flat: optional (G, m_out, Cout) bf16 residual, added before ReLU.
    Returns (G, m_out, Cout) bf16.
    """
    G, L, cin = x_flat.shape
    ntaps, _, cout = w.shape
    if m_out is None:
        m_out = L
    offsets = tuple(int(o) for o in offsets)
    tiled_x = offsets == (0,)

    tm, m_pad = _pick_tm(m_out)
    num_m = m_pad // tm
    tn = _pick_tn(cout)
    num_n = cout // tn

    # Safety net only: wrappers pre-pad so these branches are normally dead.
    if tiled_x:
        if m_pad > L:
            x_flat = jnp.pad(x_flat, ((0, 0), (0, m_pad - L), (0, 0)))
    else:
        need_len = m_pad + max(offsets)
        if need_len > L:
            x_flat = jnp.pad(x_flat, ((0, 0), (0, need_len - L), (0, 0)))
    L = x_flat.shape[1]

    has_res = res_flat is not None
    if has_res and m_pad != m_out:
        res_flat = jnp.pad(res_flat, ((0, 0), (0, m_pad - m_out), (0, 0)))

    scale2 = scale.reshape(1, cout).astype(jnp.float32)
    bias2 = bias.reshape(1, cout).astype(jnp.float32)

    if tiled_x:
        x_spec = pl.BlockSpec((None, tm, cin), lambda g, m, n: (g, m, 0))
    else:
        x_spec = pl.BlockSpec((None, L, cin), lambda g, m, n: (g, 0, 0))

    in_specs = [
        x_spec,
        pl.BlockSpec((ntaps, cin, tn), lambda g, m, n: (0, 0, n)),
        pl.BlockSpec((1, tn), lambda g, m, n: (0, n)),
        pl.BlockSpec((1, tn), lambda g, m, n: (0, n)),
    ]
    args = [x_flat, w, scale2, bias2]
    if has_res:
        in_specs.append(pl.BlockSpec((None, tm, tn), lambda g, m, n: (g, m, n)))
        args.append(res_flat)

    kernel = _make_conv_kernel(offsets, tm, num_m, act, has_res, tiled_x)
    flops = int(2 * G * m_pad * cin * cout * ntaps)
    bytes_accessed = int(2 * (x_flat.size + w.size + G * m_pad * cout))

    out = pl.pallas_call(
        kernel,
        out_shape=jax.ShapeDtypeStruct((G, m_pad, cout), ACT_DTYPE),
        grid=(G, num_m, num_n),
        in_specs=in_specs,
        out_specs=pl.BlockSpec((None, tm, tn), lambda g, m, n: (g, m, n)),
        compiler_params=pltpu.CompilerParams(
            dimension_semantics=("parallel", "parallel", "parallel"),
            vmem_limit_bytes=VMEM_LIMIT_BYTES),
        cost_estimate=pl.CostEstimate(flops=flops, transcendentals=0,
                                      bytes_accessed=bytes_accessed),
    )(*args)
    if m_pad != m_out:
        out = out[:, :m_out, :]
    return out


# ----------------------------------------------------------------------------
# Max-pool (1,3,3) stride (1,2,2) pad (0,1,1): unit-stride tap-max over parity planes
# ----------------------------------------------------------------------------
def _make_pool_kernel(offsets, tm, num_m_tiles):
    def kernel(x_ref, o_ref):
        if num_m_tiles == 1:
            base = 0
        else:
            base = pl.program_id(1) * tm
            if tm % 8 == 0:
                base = pl.multiple_of(base, 8)
        acc = None
        for off in offsets:
            xs = x_ref[pl.ds(base + off, tm), :]
            acc = xs if acc is None else jnp.maximum(acc, xs)
        o_ref[...] = acc
    return kernel


def fused_maxpool(x_flat, *, offsets, m_out):
    G, L, c = x_flat.shape
    offsets = tuple(int(o) for o in offsets)
    tm, m_pad = _pick_tm(m_out)
    num_m = m_pad // tm
    need_len = m_pad + max(offsets)
    if need_len > L:   # safety net
        x_flat = jnp.pad(x_flat, ((0, 0), (0, need_len - L), (0, 0)),
                         constant_values=NEG_BIG)
    L = x_flat.shape[1]
    out = pl.pallas_call(
        _make_pool_kernel(offsets, tm, num_m),
        out_shape=jax.ShapeDtypeStruct((G, m_pad, c), x_flat.dtype),
        grid=(G, num_m),
        in_specs=[pl.BlockSpec((None, L, c), lambda g, m: (g, 0, 0))],
        out_specs=pl.BlockSpec((None, tm, c), lambda g, m: (g, m, 0)),
        compiler_params=pltpu.CompilerParams(
            dimension_semantics=("parallel", "parallel"),
            vmem_limit_bytes=VMEM_LIMIT_BYTES),
    )(x_flat)
    if m_pad != m_out:
        out = out[:, :m_out, :]
    return out


# ----------------------------------------------------------------------------
# Layout helpers (wrapper-side, single XLA pass each)
# ----------------------------------------------------------------------------
def _parity_planes(xp):
    """2x2 space-to-depth into 4 concatenated parity planes [ee, eo, oe, oo].

    xp: (G, Hp, Wp, C) with Hp, Wp even. Plane p = a*2+b holds xp[:, a::2, b::2, :]
    flattened row-major. Returns (G, 4*Hh*Wh, C), Hh, Wh."""
    G, Hp, Wp, C = xp.shape
    Hh, Wh = Hp // 2, Wp // 2
    xr = xp.reshape(G, Hh, 2, Wh, 2, C)
    planes = jnp.transpose(xr, (0, 2, 4, 1, 3, 5))        # (G, 2, 2, Hh, Wh, C)
    return planes.reshape(G, 4 * Hh * Wh, C), Hh, Wh


def _stride2_taps(Hh, Wh):
    """Unit-stride tap offsets of a 3x3/stride-2 window over the parity-concat layout."""
    hwp = Hh * Wh
    offs = []
    for dh in range(3):
        for dw in range(3):
            plane = (dh % 2) * 2 + (dw % 2)
            offs.append(plane * hwp + (dh // 2) * Wh + (dw // 2))
    return tuple(offs)


# ----------------------------------------------------------------------------
# Conv wrappers
# ----------------------------------------------------------------------------
def conv1x1_bn(x, p, *, act, spatial_stride=1, res=None):
    """1x1x1 conv + folded BN (+ fused residual) + optional ReLU. x: (B,T,H,W,C)."""
    if spatial_stride != 1:
        x = x[:, :, ::spatial_stride, ::spatial_stride, :]
    B, T, H, W, C = x.shape
    cout = p["w"].shape[-1]
    xf = x.reshape(1, B * T * H * W, C)
    rf = res.reshape(1, B * T * H * W, cout) if res is not None else None
    y = fused_conv(xf, p["w"], p["scale"], p["bias"], act=act, res_flat=rf)
    return y.reshape(B, T, H, W, cout)


def conv_spatial3_bn(x, p, *, stride, act):
    """(1,3,3) conv, padding (0,1,1), spatial stride `stride`, + BN + ReLU."""
    B, T, H, W, C = x.shape
    cout = p["w"].shape[-1]
    if stride == 1:
        # Pad H by (1,2): the extra bottom zero-row keeps every tap read inside the
        # flat plane so no in-function tail pad is needed.
        Hp, Wp = H + 3, W + 2
        xp = jnp.pad(x, ((0, 0), (0, 0), (1, 2), (1, 1), (0, 0)))
        xf = xp.reshape(B * T, Hp * Wp, C)
        offsets = tuple(dh * Wp + dw for dh in range(3) for dw in range(3))
        y = fused_conv(xf, p["w"], p["scale"], p["bias"],
                       offsets=offsets, m_out=H * Wp, act=act)
        y = y.reshape(B * T, H, Wp, cout)[:, :, :W, :]
        return y.reshape(B, T, H, W, cout)

    # stride 2: parity planes -> unit-stride taps over a compact (Ho, Wh) layout.
    assert stride == 2 and H % 2 == 0 and W % 2 == 0
    xp = jnp.pad(x, ((0, 0), (0, 0), (1, 1), (1, 1), (0, 0)))
    xf, Hh, Wh = _parity_planes(xp.reshape(B * T, H + 2, W + 2, C))
    Ho, Wo = Hh - 1, Wh - 1
    y = fused_conv(xf, p["w"], p["scale"], p["bias"],
                   offsets=_stride2_taps(Hh, Wh), m_out=Ho * Wh, act=act)
    y = y.reshape(B * T, Ho, Wh, cout)[:, :, :Wo, :]
    return y.reshape(B, T, Ho, Wo, cout)


def conv_temporal_bn(x, p, *, kt, act):
    """(kt,1,1) conv, padding (kt//2,0,0), stride 1, + BN + ReLU."""
    if kt == 1:
        return conv1x1_bn(x, p, act=act)
    B, T, H, W, C = x.shape
    cout = p["w"].shape[-1]
    pt = kt // 2
    xp = jnp.pad(x, ((0, 0), (pt, pt), (0, 0), (0, 0), (0, 0)))
    hw = H * W
    # Whole (T+2pt)*H*W plane resident in VMEM per batch item (fetched once per g);
    # vmem_limit_bytes is raised accordingly.  TODO(synk): optional T-tiling variant
    # for extra headroom on v7x.
    xf = xp.reshape(B, (T + 2 * pt) * hw, C)
    offsets = tuple(dt * hw for dt in range(kt))
    y = fused_conv(xf, p["w"], p["scale"], p["bias"],
                   offsets=offsets, m_out=T * hw, act=act)
    return y.reshape(B, T, H, W, cout)


def stem_conv_bn(x, p, *, act=True):
    """(1,7,7) conv, stride (1,2,2), padding (0,3,3) + BN + ReLU.

    cin=3 is too narrow for the MXU: 2x2 space-to-depth (C 3->12) turns the 7x7/stride-2
    conv into an equivalent 4x4/stride-1 conv; the 4 horizontal taps are folded into
    K=48, so the kernel runs only 4 unit-stride vertical taps (no 49-slice im2col)."""
    B, T, H, W, C = x.shape
    assert H % 2 == 0 and W % 2 == 0
    cout = p["w"].shape[-1]
    BT = B * T
    xp = jnp.pad(x, ((0, 0), (0, 0), (3, 3), (3, 3), (0, 0)))
    Hp, Wp = H + 6, W + 6
    Hh, Wh = Hp // 2, Wp // 2
    s2d = xp.reshape(BT, Hh, 2, Wh, 2, C)
    s2d = jnp.transpose(s2d, (0, 1, 3, 2, 4, 5)).reshape(BT, Hh, Wh, 4 * C)
    Ho, Wo = Hh - 3, Wh - 3
    # Fold the 4 horizontal (dw) taps into channels -> K = 16*C = 48.
    z = jnp.concatenate([s2d[:, :, dw:dw + Wo, :] for dw in range(4)], axis=-1)
    zf = z.reshape(BT, Hh * Wo, 16 * C)
    offsets = tuple(dh * Wo for dh in range(4))            # vertical (dh) taps
    y = fused_conv(zf, p["w"], p["scale"], p["bias"],
                   offsets=offsets, m_out=Ho * Wo, act=act)
    return y.reshape(B, T, Ho, Wo, cout)


def maxpool_3x3_s2(x):
    """MaxPool3d(kernel=(1,3,3), stride=(1,2,2), padding=(0,1,1)) — input is post-ReLU."""
    B, T, H, W, C = x.shape
    assert H % 2 == 0 and W % 2 == 0
    xp = jnp.pad(x, ((0, 0), (0, 0), (1, 1), (1, 1), (0, 0)),
                 constant_values=NEG_BIG)
    xf, Hh, Wh = _parity_planes(xp.reshape(B * T, H + 2, W + 2, C))
    Ho, Wo = Hh - 1, Wh - 1
    y = fused_maxpool(xf, offsets=_stride2_taps(Hh, Wh), m_out=Ho * Wh)
    y = y.reshape(B * T, Ho, Wh, C)[:, :, :Wo, :]
    return y.reshape(B, T, Ho, Wo, C)


# ----------------------------------------------------------------------------
# Parameters (deterministic, synthetic; frozen BN folded once at build time)
# ----------------------------------------------------------------------------
def _init_conv_bn(key, ntaps, cin, cout):
    k1, k2, k3, k4, k5 = jax.random.split(key, 5)
    fan_in = ntaps * cin
    w = (jax.random.normal(k1, (ntaps, cin, cout), jnp.float32)
         * jnp.sqrt(2.0 / fan_in)).astype(ACT_DTYPE)
    gamma = 1.0 + 0.1 * jax.random.normal(k2, (cout,), jnp.float32)
    beta = 0.1 * jax.random.normal(k3, (cout,), jnp.float32)
    mean = 0.1 * jax.random.normal(k4, (cout,), jnp.float32)
    var = jnp.abs(1.0 + 0.1 * jax.random.normal(k5, (cout,), jnp.float32))
    # Frozen / eval-mode BatchNorm folded into an exact affine epilogue (f32).
    scale = gamma * jax.lax.rsqrt(var + BN_EPS)
    bias = beta - mean * scale
    return dict(w=w, scale=scale.astype(jnp.float32), bias=bias.astype(jnp.float32))


def build_params(key, cfg):
    params = {}
    key, k = jax.random.split(key)
    # Stem weight layout matches the s2d + dw-fold taps: (4 dh taps, K = 4*4*3 = 48).
    params["stem"] = _init_conv_bn(k, 4, 4 * 4 * 3, cfg["stem_out"])
    stages = []
    cin = cfg["stem_out"]
    for s in range(4):
        mid = cfg["stage_mids"][s]
        cout = cfg["stage_outs"][s]
        kt = cfg["stage_temporal_kernels"][s]
        blocks = []
        for b in range(cfg["stage_depths"][s]):
            key, k1, k2, k3, k4 = jax.random.split(key, 5)
            block_in = cin if b == 0 else cout
            stride = cfg["stage_spatial_strides"][s] if b == 0 else 1
            blk = {}
            if block_in != cout or stride != 1:
                blk["shortcut"] = _init_conv_bn(k4, 1, block_in, cout)
            blk["conv_a"] = _init_conv_bn(k1, kt, block_in, mid)   # (kt,1,1)
            blk["conv_b"] = _init_conv_bn(k2, 9, mid, mid)         # (1,3,3)
            blk["conv_c"] = _init_conv_bn(k3, 1, mid, cout)        # (1,1,1)
            blocks.append(blk)
        stages.append(blocks)
        cin = cout
    params["stages"] = stages
    return params


# ----------------------------------------------------------------------------
# SlowOnly forward (blocks[:-1], out_indices=(4,))
# ----------------------------------------------------------------------------
def _bottleneck(x, blk, spatial_stride, temporal_kernel):
    if "shortcut" in blk:
        sc = conv1x1_bn(x, blk["shortcut"], act=False, spatial_stride=spatial_stride)
    else:
        sc = x
    a = conv_temporal_bn(x, blk["conv_a"], kt=temporal_kernel, act=True)
    b = conv_spatial3_bn(a, blk["conv_b"], stride=spatial_stride, act=True)
    # conv_c + BN + residual add + ReLU fused into a single kernel epilogue.
    return conv1x1_bn(b, blk["conv_c"], act=True, res=sc)


def slowonly_forward(params, cfg, x, out_indices=(4,)):
    """x: (B, T, H, W, C) channels-last bf16. Returns feature(s) at out_indices."""
    outs = []
    x = stem_conv_bn(x, params["stem"])       # block 0: stem conv + BN + ReLU
    x = maxpool_3x3_s2(x)                     #          + max pool
    if 0 in out_indices:
        outs.append(x)
    for s in range(4):                        # blocks 1..4: residual stages
        kt = cfg["stage_temporal_kernels"][s]
        for b, blk in enumerate(params["stages"][s]):
            stride = cfg["stage_spatial_strides"][s] if b == 0 else 1
            x = _bottleneck(x, blk, stride, kt)
        if (s + 1) in out_indices:
            outs.append(x)
    return outs[0] if len(outs) == 1 else outs


def slowonly_apply(params, cfg, x, out_indices=(4,)):
    """x: (N, num_crops, C, T, H, W) — same convention as the PyTorch module."""
    x = x.reshape((-1,) + x.shape[2:])          # crops_to_batch: view(-1, *shape[2:])
    x = jnp.transpose(x, (0, 2, 3, 4, 1))       # NCTHW -> NTHWC (internal layout)
    x = x.astype(ACT_DTYPE)
    y = slowonly_forward(params, cfg, x, out_indices)

    def to_ncthw(t):
        return jnp.transpose(t, (0, 4, 1, 2, 3)).astype(jnp.float32)

    if isinstance(y, (list, tuple)):
        return [to_ncthw(t) for t in y]
    return to_ncthw(y)


# ----------------------------------------------------------------------------
if __name__ == "__main__":
    cfg = DEMO_CONFIG  # reduced-width slow_r50; swap in SLOW_R50_CONFIG for full size
    key = jax.random.PRNGKey(0)
    kp, kx = jax.random.split(key)
    params = build_params(kp, cfg)

    N, num_crops, C, T, H, W = 1, 2, 3, 4, 32, 32
    x = jax.random.normal(kx, (N, num_crops, C, T, H, W), jnp.float32)

    fwd = jax.jit(lambda p, xx: slowonly_apply(p, cfg, xx))
    y = fwd(params, x)
    y = jax.block_until_ready(y)

    expected = (N * num_crops, cfg["stage_outs"][-1], T, H // 32, W // 32)
    assert y.shape == expected, (y.shape, expected)
    assert y.dtype == jnp.float32
    assert bool(jnp.all(jnp.isfinite(y)))
    print("KERNEL_OK")
</pallas_src>

<mosaic_0001>
module attributes {stable_mosaic.version = 11 : i64} {
  func.func @kernel(%arg0: i32, %arg1: i32, %arg2: i32, %arg3: memref<1x304x48xbf16, #tpu.memory_space<vmem>>, %arg4: memref<4x48x16xbf16, #tpu.memory_space<vmem>>, %arg5: memref<1x16xf32, #tpu.memory_space<vmem>>, %arg6: memref<1x16xf32, #tpu.memory_space<vmem>>, %arg7: memref<1x256x16xbf16, #tpu.memory_space<vmem>>) attributes {dimension_semantics = [#tpu.dimension_semantics<parallel>, #tpu.dimension_semantics<parallel>, #tpu.dimension_semantics<parallel>], iteration_bounds = array<i64: 8, 1, 1>, scalar_prefetch = 0 : i64, scratch_operands = 0 : i64, tpu.core_type = #tpu.core_type<tc>, window_params = [{transform_indices = @transform_0, window_bounds = array<i64: 1, 304, 48>}, {transform_indices = @transform_1, window_bounds = array<i64: 4, 48, 16>}, {transform_indices = @transform_2, window_bounds = array<i64: 1, 16>}, {transform_indices = @transform_3, window_bounds = array<i64: 1, 16>}, {transform_indices = @transform_4, window_bounds = array<i64: 1, 256, 16>}]} {
    %c0 = arith.constant 0 : index
    %c0_0 = arith.constant 0 : index
    %c0_1 = arith.constant 0 : index
    %0 = vector.load %arg3[%c0, %c0_0, %c0_1] : memref<1x304x48xbf16, #tpu.memory_space<vmem>>, vector<1x256x48xbf16>
    %1 = vector.shape_cast %0 : vector<1x256x48xbf16> to vector<256x48xbf16>
    %c0_2 = arith.constant 0 : index
    %c0_3 = arith.constant 0 : index
    %c0_4 = arith.constant 0 : index
    %2 = vector.load %arg4[%c0_2, %c0_3, %c0_4] : memref<4x48x16xbf16, #tpu.memory_space<vmem>>, vector<1x48x16xbf16>
    %3 = vector.shape_cast %2 : vector<1x48x16xbf16> to vector<48x16xbf16>
    %cst = arith.constant dense<0.000000e+00> : vector<256x16xf32>
    %4 = tpu.matmul %1, %3, %cst {dimension_numbers = #tpu.dot_dimension_numbers<[1], [0], [0], [1], [0, 0, 1, 1], [], []>} : vector<256x48xbf16>, vector<48x16xbf16>, vector<256x16xf32> -> vector<256x16xf32>
    %c0_5 = arith.constant 0 : index
    %c16 = arith.constant 16 : index
    %c0_6 = arith.constant 0 : index
    %5 = vector.load %arg3[%c0_5, %c16, %c0_6] : memref<1x304x48xbf16, #tpu.memory_space<vmem>>, vector<1x256x48xbf16>
    %6 = vector.shape_cast %5 : vector<1x256x48xbf16> to vector<256x48xbf16>
    %c1 = arith.constant 1 : index
    %c0_7 = arith.constant 0 : index
    %c0_8 = arith.constant 0 : index
    %7 = vector.load %arg4[%c1, %c0_7, %c0_8] : memref<4x48x16xbf16, #tpu.memory_space<vmem>>, vector<1x48x16xbf16>
    %8 = vector.shape_cast %7 : vector<1x48x16xbf16> to vector<48x16xbf16>
    %cst_9 = arith.constant dense<0.000000e+00> : vector<256x16xf32>
    %9 = tpu.matmul %6, %8, %cst_9 {dimension_numbers = #tpu.dot_dimension_numbers<[1], [0], [0], [1], [0, 0, 1, 1], [], []>} : vector<256x48xbf16>, vector<48x16xbf16>, vector<256x16xf32> -> vector<256x16xf32>
    %10 = arith.addf %4, %9 : vector<256x16xf32>
    %c0_10 = arith.constant 0 : index
    %c32 = arith.constant 32 : index
    %c0_11 = arith.constant 0 : index
    %11 = vector.load %arg3[%c0_10, %c32, %c0_11] : memref<1x304x48xbf16, #tpu.memory_space<vmem>>, vector<1x256x48xbf16>
    %12 = vector.shape_cast %11 : vector<1x256x48xbf16> to vector<256x48xbf16>
    %c2 = arith.constant 2 : index
    %c0_12 = arith.constant 0 : index
    %c0_13 = arith.constant 0 : index
    %13 = vector.load %arg4[%c2, %c0_12, %c0_13] : memref<4x48x16xbf16, #tpu.memory_space<vmem>>, vector<1x48x16xbf16>
    %14 = vector.shape_cast %13 : vector<1x48x16xbf16> to vector<48x16xbf16>
    %cst_14 = arith.constant dense<0.000000e+00> : vector<256x16xf32>
    %15 = tpu.matmul %12, %14, %cst_14 {dimension_numbers = #tpu.dot_dimension_numbers<[1], [0], [0], [1], [0, 0, 1, 1], [], []>} : vector<256x48xbf16>, vector<48x16xbf16>, vector<256x16xf32> -> vector<256x16xf32>
    %16 = arith.addf %10, %15 : vector<256x16xf32>
    %c0_15 = arith.constant 0 : index
    %c48 = arith.constant 48 : index
    %c0_16 = arith.constant 0 : index
    %17 = vector.load %arg3[%c0_15, %c48, %c0_16] : memref<1x304x48xbf16, #tpu.memory_space<vmem>>, vector<1x256x48xbf16>
    %18 = vector.shape_cast %17 : vector<1x256x48xbf16> to vector<256x48xbf16>
    %c3 = arith.constant 3 : index
    %c0_17 = arith.constant 0 : index
    %c0_18 = arith.constant 0 : index
    %19 = vector.load %arg4[%c3, %c0_17, %c0_18] : memref<4x48x16xbf16, #tpu.memory_space<vmem>>, vector<1x48x16xbf16>
    %20 = vector.shape_cast %19 : vector<1x48x16xbf16> to vector<48x16xbf16>
    %cst_19 = arith.constant dense<0.000000e+00> : vector<256x16xf32>
    %21 = tpu.matmul %18, %20, %cst_19 {dimension_numbers = #tpu.dot_dimension_numbers<[1], [0], [0], [1], [0, 0, 1, 1], [], []>} : vector<256x48xbf16>, vector<48x16xbf16>, vector<256x16xf32> -> vector<256x16xf32>
    %22 = arith.addf %16, %21 : vector<256x16xf32>
    %c0_20 = arith.constant 0 : index
    %c0_21 = arith.constant 0 : index
    %23 = vector.load %arg5[%c0_20, %c0_21] : memref<1x16xf32, #tpu.memory_space<vmem>>, vector<1x16xf32>
    %24 = vector.broadcast %23 : vector<1x16xf32> to vector<256x16xf32>
    %25 = arith.mulf %22, %24 : vector<256x16xf32>
    %c0_22 = arith.constant 0 : index
    %c0_23 = arith.constant 0 : index
    %26 = vector.load %arg6[%c0_22, %c0_23] : memref<1x16xf32, #tpu.memory_space<vmem>>, vector<1x16xf32>
    %27 = vector.broadcast %26 : vector<1x16xf32> to vector<256x16xf32>
    %28 = arith.addf %25, %27 : vector<256x16xf32>
    %cst_24 = arith.constant 0.000000e+00 : f32
    %29 = vector.broadcast %cst_24 : f32 to vector<256x16xf32>
    %30 = arith.maximumf %28, %29 : vector<256x16xf32>
    %31 = arith.truncf %30 : vector<256x16xf32> to vector<256x16xbf16>
    %c0_25 = arith.constant 0 : index
    %c0_26 = arith.constant 0 : index
    %c0_27 = arith.constant 0 : index
    %32 = vector.load %arg7[%c0_25, %c0_26, %c0_27] : memref<1x256x16xbf16, #tpu.memory_space<vmem>>, vector<1x256x16xbf16>
    %33 = vector.shape_cast %32 : vector<1x256x16xbf16> to vector<256x16xbf16>
    %34 = vector.shape_cast %31 : vector<256x16xbf16> to vector<1x256x16xbf16>
    tpu.vector_store %arg7[%c0_25, %c0_26, %c0_27], %34 {strides = array<i32>} : memref<1x256x16xbf16, #tpu.memory_space<vmem>>, vector<1x256x16xbf16>,
    return
  }
  func.func @transform_0(%arg0: i32, %arg1: i32, %arg2: i32) -> (i32, i32, i32) {
    %c0_i32 = arith.constant 0 : i32
    %c0_i32_0 = arith.constant 0 : i32
    %c0_i32_1 = arith.constant 0 : i32
    return %arg0, %c0_i32, %c0_i32_0 : i32, i32, i32
  }
  func.func @transform_1(%arg0: i32, %arg1: i32, %arg2: i32) -> (i32, i32, i32) {
    %c0_i32 = arith.constant 0 : i32
    %c0_i32_0 = arith.constant 0 : i32
    %c0_i32_1 = arith.constant 0 : i32
    return %c0_i32, %c0_i32_0, %arg2 : i32, i32, i32
  }
  func.func @transform_2(%arg0: i32, %arg1: i32, %arg2: i32) -> (i32, i32) {
    %c0_i32 = arith.constant 0 : i32
    %c0_i32_0 = arith.constant 0 : i32
    return %c0_i32, %arg2 : i32, i32
  }
  func.func @transform_3(%arg0: i32, %arg1: i32, %arg2: i32) -> (i32, i32) {
    %c0_i32 = arith.constant 0 : i32
    %c0_i32_0 = arith.constant 0 : i32
    return %c0_i32, %arg2 : i32, i32
  }
  func.func @transform_4(%arg0: i32, %arg1: i32, %arg2: i32) -> (i32, i32, i32) {
    %c0_i32 = arith.constant 0 : i32
    return %arg0, %arg1, %arg2 : i32, i32, i32
  }
}

module attributes {stable_mosaic.version = 11 : i64} {
  func.func @kernel(%arg0: i32, %arg1: i32, %arg2: memref<1x324x16xbf16, #tpu.memory_space<vmem>>, %arg3: memref<1x72x16xbf16, #tpu.memory_space<vmem>>) attributes {dimension_semantics = [#tpu.dimension_semantics<parallel>, #tpu.dimension_semantics<parallel>], iteration_bounds = array<i64: 8, 1>, scalar_prefetch = 0 : i64, scratch_operands = 0 : i64, tpu.core_type = #tpu.core_type<tc>, window_params = [{transform_indices = @transform_0, window_bounds = array<i64: 1, 324, 16>}, {transform_indices = @transform_1, window_bounds = array<i64: 1, 72, 16>}]} {
    %c0 = arith.constant 0 : index
    %c0_0 = arith.constant 0 : index
    %c0_1 = arith.constant 0 : index
    %0 = vector.load %arg2[%c0, %c0_0, %c0_1] : memref<1x324x16xbf16, #tpu.memory_space<vmem>>, vector<1x72x16xbf16>
    %1 = vector.shape_cast %0 : vector<1x72x16xbf16> to vector<72x16xbf16>
    %c0_2 = arith.constant 0 : index
    %c81 = arith.constant 81 : index
    %c0_3 = arith.constant 0 : index
    %2 = vector.load %arg2[%c0_2, %c81, %c0_3] : memref<1x324x16xbf16, #tpu.memory_space<vmem>>, vector<1x72x16xbf16>
    %3 = vector.shape_cast %2 : vector<1x72x16xbf16> to vector<72x16xbf16>
    %4 = arith.maximumf %1, %3 : vector<72x16xbf16>
    %c0_4 = arith.constant 0 : index
    %c1 = arith.constant 1 : index
    %c0_5 = arith.constant 0 : index
    %5 = vector.load %arg2[%c0_4, %c1, %c0_5] : memref<1x324x16xbf16, #tpu.memory_space<vmem>>, vector<1x72x16xbf16>
    %6 = vector.shape_cast %5 : vector<1x72x16xbf16> to vector<72x16xbf16>
    %7 = arith.maximumf %4, %6 : vector<72x16xbf16>
    %c0_6 = arith.constant 0 : index
    %c162 = arith.constant 162 : index
    %c0_7 = arith.constant 0 : index
    %8 = vector.load %arg2[%c0_6, %c162, %c0_7] : memref<1x324x16xbf16, #tpu.memory_space<vmem>>, vector<1x72x16xbf16>
    %9 = vector.shape_cast %8 : vector<1x72x16xbf16> to vector<72x16xbf16>
    %10 = arith.maximumf %7, %9 : vector<72x16xbf16>
    %c0_8 = arith.constant 0 : index
    %c243 = arith.constant 243 : index
    %c0_9 = arith.constant 0 : index
    %11 = vector.load %arg2[%c0_8, %c243, %c0_9] : memref<1x324x16xbf16, #tpu.memory_space<vmem>>, vector<1x72x16xbf16>
    %12 = vector.shape_cast %11 : vector<1x72x16xbf16> to vector<72x16xbf16>
    %13 = arith.maximumf %10, %12 : vector<72x16xbf16>
    %c0_10 = arith.constant 0 : index
    %c163 = arith.constant 163 : index
    %c0_11 = arith.constant 0 : index
    %14 = vector.load %arg2[%c0_10, %c163, %c0_11] : memref<1x324x16xbf16, #tpu.memory_space<vmem>>, vector<1x72x16xbf16>
    %15 = vector.shape_cast %14 : vector<1x72x16xbf16> to vector<72x16xbf16>
    %16 = arith.maximumf %13, %15 : vector<72x16xbf16>
    %c0_12 = arith.constant 0 : index
    %c9 = arith.constant 9 : index
    %c0_13 = arith.constant 0 : index
    %17 = vector.load %arg2[%c0_12, %c9, %c0_13] : memref<1x324x16xbf16, #tpu.memory_space<vmem>>, vector<1x72x16xbf16>
    %18 = vector.shape_cast %17 : vector<1x72x16xbf16> to vector<72x16xbf16>
    %19 = arith.maximumf %16, %18 : vector<72x16xbf16>
    %c0_14 = arith.constant 0 : index
    %c90 = arith.constant 90 : index
    %c0_15 = arith.constant 0 : index
    %20 = vector.load %arg2[%c0_14, %c90, %c0_15] : memref<1x324x16xbf16, #tpu.memory_space<vmem>>, vector<1x72x16xbf16>
    %21 = vector.shape_cast %20 : vector<1x72x16xbf16> to vector<72x16xbf16>
    %22 = arith.maximumf %19, %21 : vector<72x16xbf16>
    %c0_16 = arith.constant 0 : index
    %c10 = arith.constant 10 : index
    %c0_17 = arith.constant 0 : index
    %23 = vector.load %arg2[%c0_16, %c10, %c0_17] : memref<1x324x16xbf16, #tpu.memory_space<vmem>>, vector<1x72x16xbf16>
    %24 = vector.shape_cast %23 : vector<1x72x16xbf16> to vector<72x16xbf16>
    %25 = arith.maximumf %22, %24 : vector<72x16xbf16>
    %c0_18 = arith.constant 0 : index
    %c0_19 = arith.constant 0 : index
    %c0_20 = arith.constant 0 : index
    %26 = vector.load %arg3[%c0_18, %c0_19, %c0_20] : memref<1x72x16xbf16, #tpu.memory_space<vmem>>, vector<1x72x16xbf16>
    %27 = vector.shape_cast %26 : vector<1x72x16xbf16> to vector<72x16xbf16>
    %28 = vector.shape_cast %25 : vector<72x16xbf16> to vector<1x72x16xbf16>
    tpu.vector_store %arg3[%c0_18, %c0_19, %c0_20], %28 {strides = array<i32>} : memref<1x72x16xbf16, #tpu.memory_space<vmem>>, vector<1x72x16xbf16>,
    return
  }
  func.func @transform_0(%arg0: i32, %arg1: i32) -> (i32, i32, i32) {
    %c0_i32 = arith.constant 0 : i32
    %c0_i32_0 = arith.constant 0 : i32
    %c0_i32_1 = arith.constant 0 : i32
    return %arg0, %c0_i32, %c0_i32_0 : i32, i32, i32
  }
  func.func @transform_1(%arg0: i32, %arg1: i32) -> (i32, i32, i32) {
    %c0_i32 = arith.constant 0 : i32
    %c0_i32_0 = arith.constant 0 : i32
    return %arg0, %arg1, %c0_i32 : i32, i32, i32
  }
}

module attributes {stable_mosaic.version = 11 : i64} {
  func.func @kernel(%arg0: i32, %arg1: i32, %arg2: i32, %arg3: memref<1x512x16xbf16, #tpu.memory_space<vmem>>, %arg4: memref<1x16x8xbf16, #tpu.memory_space<vmem>>, %arg5: memref<1x8xf32, #tpu.memory_space<vmem>>, %arg6: memref<1x8xf32, #tpu.memory_space<vmem>>, %arg7: memref<1x512x8xbf16, #tpu.memory_space<vmem>>) attributes {dimension_semantics = [#tpu.dimension_semantics<parallel>, #tpu.dimension_semantics<parallel>, #tpu.dimension_semantics<parallel>], iteration_bounds = array<i64: 1, 1, 1>, scalar_prefetch = 0 : i64, scratch_operands = 0 : i64, tpu.core_type = #tpu.core_type<tc>, window_params = [{transform_indices = @transform_0, window_bounds = array<i64: 1, 512, 16>}, {transform_indices = @transform_1, window_bounds = array<i64: 1, 16, 8>}, {transform_indices = @transform_2, window_bounds = array<i64: 1, 8>}, {transform_indices = @transform_3, window_bounds = array<i64: 1, 8>}, {transform_indices = @transform_4, window_bounds = array<i64: 1, 512, 8>}]} {
    %c0 = arith.constant 0 : index
    %c0_0 = arith.constant 0 : index
    %c0_1 = arith.constant 0 : index
    %0 = vector.load %arg3[%c0, %c0_0, %c0_1] : memref<1x512x16xbf16, #tpu.memory_space<vmem>>, vector<1x512x16xbf16>
    %1 = vector.shape_cast %0 : vector<1x512x16xbf16> to vector<512x16xbf16>
    %c0_2 = arith.constant 0 : index
    %c0_3 = arith.constant 0 : index
    %c0_4 = arith.constant 0 : index
    %2 = vector.load %arg4[%c0_2, %c0_3, %c0_4] : memref<1x16x8xbf16, #tpu.memory_space<vmem>>, vector<1x16x8xbf16>
    %3 = vector.shape_cast %2 : vector<1x16x8xbf16> to vector<16x8xbf16>
    %cst = arith.constant dense<0.000000e+00> : vector<512x8xf32>
    %4 = tpu.matmul %1, %3, %cst {dimension_numbers = #tpu.dot_dimension_numbers<[1], [0], [0], [1], [0, 0, 1, 1], [], []>} : vector<512x16xbf16>, vector<16x8xbf16>, vector<512x8xf32> -> vector<512x8xf32>
    %c0_5 = arith.constant 0 : index
    %c0_6 = arith.constant 0 : index
    %5 = vector.load %arg5[%c0_5, %c0_6] : memref<1x8xf32, #tpu.memory_space<vmem>>, vector<1x8xf32>
    %6 = vector.broadcast %5 : vector<1x8xf32> to vector<512x8xf32>
    %7 = arith.mulf %4, %6 : vector<512x8xf32>
    %c0_7 = arith.constant 0 : index
    %c0_8 = arith.constant 0 : index
    %8 = vector.load %arg6[%c0_7, %c0_8] : memref<1x8xf32, #tpu.memory_space<vmem>>, vector<1x8xf32>
    %9 = vector.broadcast %8 : vector<1x8xf32> to vector<512x8xf32>
    %10 = arith.addf %7, %9 : vector<512x8xf32>
    %cst_9 = arith.constant 0.000000e+00 : f32
    %11 = vector.broadcast %cst_9 : f32 to vector<512x8xf32>
    %12 = arith.maximumf %10, %11 : vector<512x8xf32>
    %13 = arith.truncf %12 : vector<512x8xf32> to vector<512x8xbf16>
    %c0_10 = arith.constant 0 : index
    %c0_11 = arith.constant 0 : index
    %c0_12 = arith.constant 0 : index
    %14 = vector.load %arg7[%c0_10, %c0_11, %c0_12] : memref<1x512x8xbf16, #tpu.memory_space<vmem>>, vector<1x512x8xbf16>
    %15 = vector.shape_cast %14 : vector<1x512x8xbf16> to vector<512x8xbf16>
    %16 = vector.shape_cast %13 : vector<512x8xbf16> to vector<1x512x8xbf16>
    tpu.vector_store %arg7[%c0_10, %c0_11, %c0_12], %16 {strides = array<i32>} : memref<1x512x8xbf16, #tpu.memory_space<vmem>>, vector<1x512x8xbf16>,
    return
  }
  func.func @transform_0(%arg0: i32, %arg1: i32, %arg2: i32) -> (i32, i32, i32) {
    %c0_i32 = arith.constant 0 : i32
    %c0_i32_0 = arith.constant 0 : i32
    return %arg0, %arg1, %c0_i32 : i32, i32, i32
  }
  func.func @transform_1(%arg0: i32, %arg1: i32, %arg2: i32) -> (i32, i32, i32) {
    %c0_i32 = arith.constant 0 : i32
    %c0_i32_0 = arith.constant 0 : i32
    %c0_i32_1 = arith.constant 0 : i32
    return %c0_i32, %c0_i32_0, %arg2 : i32, i32, i32
  }
  func.func @transform_2(%arg0: i32, %arg1: i32, %arg2: i32) -> (i32, i32) {
    %c0_i32 = arith.constant 0 : i32
    %c0_i32_0 = arith.constant 0 : i32
    return %c0_i32, %arg2 : i32, i32
  }
  func.func @transform_3(%arg0: i32, %arg1: i32, %arg2: i32) -> (i32, i32) {
    %c0_i32 = arith.constant 0 : i32
    %c0_i32_0 = arith.constant 0 : i32
    return %c0_i32, %arg2 : i32, i32
  }
  func.func @transform_4(%arg0: i32, %arg1: i32, %arg2: i32) -> (i32, i32, i32) {
    %c0_i32 = arith.constant 0 : i32
    return %arg0, %arg1, %arg2 : i32, i32, i32
  }
}

module attributes {stable_mosaic.version = 11 : i64} {
  func.func @kernel(%arg0: i32, %arg1: i32, %arg2: i32, %arg3: memref<1x110x8xbf16, #tpu.memory_space<vmem>>, %arg4: memref<9x8x8xbf16, #tpu.memory_space<vmem>>, %arg5: memref<1x8xf32, #tpu.memory_space<vmem>>, %arg6: memref<1x8xf32, #tpu.memory_space<vmem>>, %arg7: memref<1x80x8xbf16, #tpu.memory_space<vmem>>) attributes {dimension_semantics = [#tpu.dimension_semantics<parallel>, #tpu.dimension_semantics<parallel>, #tpu.dimension_semantics<parallel>], iteration_bounds = array<i64: 8, 1, 1>, scalar_prefetch = 0 : i64, scratch_operands = 0 : i64, tpu.core_type = #tpu.core_type<tc>, window_params = [{transform_indices = @transform_0, window_bounds = array<i64: 1, 110, 8>}, {transform_indices = @transform_1, window_bounds = array<i64: 9, 8, 8>}, {transform_indices = @transform_2, window_bounds = array<i64: 1, 8>}, {transform_indices = @transform_3, window_bounds = array<i64: 1, 8>}, {transform_indices = @transform_4, window_bounds = array<i64: 1, 80, 8>}]} {
    %c0 = arith.constant 0 : index
    %c0_0 = arith.constant 0 : index
    %c0_1 = arith.constant 0 : index
    %0 = vector.load %arg3[%c0, %c0_0, %c0_1] : memref<1x110x8xbf16, #tpu.memory_space<vmem>>, vector<1x80x8xbf16>
    %1 = vector.shape_cast %0 : vector<1x80x8xbf16> to vector<80x8xbf16>
    %c0_2 = arith.constant 0 : index
    %c0_3 = arith.constant 0 : index
    %c0_4 = arith.constant 0 : index
    %2 = vector.load %arg4[%c0_2, %c0_3, %c0_4] : memref<9x8x8xbf16, #tpu.memory_space<vmem>>, vector<1x8x8xbf16>
    %3 = vector.shape_cast %2 : vector<1x8x8xbf16> to vector<8x8xbf16>
    %cst = arith.constant dense<0.000000e+00> : vector<80x8xf32>
    %4 = tpu.matmul %1, %3, %cst {dimension_numbers = #tpu.dot_dimension_numbers<[1], [0], [0], [1], [0, 0, 1, 1], [], []>} : vector<80x8xbf16>, vector<8x8xbf16>, vector<80x8xf32> -> vector<80x8xf32>
    %c0_5 = arith.constant 0 : index
    %c1 = arith.constant 1 : index
    %c0_6 = arith.constant 0 : index
    %5 = vector.load %arg3[%c0_5, %c1, %c0_6] : memref<1x110x8xbf16, #tpu.memory_space<vmem>>, vector<1x80x8xbf16>
    %6 = vector.shape_cast %5 : vector<1x80x8xbf16> to vector<80x8xbf16>
    %c1_7 = arith.constant 1 : index
    %c0_8 = arith.constant 0 : index
    %c0_9 = arith.constant 0 : index
    %7 = vector.load %arg4[%c1_7, %c0_8, %c0_9] : memref<9x8x8xbf16, #tpu.memory_space<vmem>>, vector<1x8x8xbf16>
    %8 = vector.shape_cast %7 : vector<1x8x8xbf16> to vector<8x8xbf16>
    %cst_10 = arith.constant dense<0.000000e+00> : vector<80x8xf32>
    %9 = tpu.matmul %6, %8, %cst_10 {dimension_numbers = #tpu.dot_dimension_numbers<[1], [0], [0], [1], [0, 0, 1, 1], [], []>} : vector<80x8xbf16>, vector<8x8xbf16>, vector<80x8xf32> -> vector<80x8xf32>
    %10 = arith.addf %4, %9 : vector<80x8xf32>
    %c0_11 = arith.constant 0 : index
    %c2 = arith.constant 2 : index
    %c0_12 = arith.constant 0 : index
    %11 = vector.load %arg3[%c0_11, %c2, %c0_12] : memref<1x110x8xbf16, #tpu.memory_space<vmem>>, vector<1x80x8xbf16>
    %12 = vector.shape_cast %11 : vector<1x80x8xbf16> to vector<80x8xbf16>
    %c2_13 = arith.constant 2 : index
    %c0_14 = arith.constant 0 : index
    %c0_15 = arith.constant 0 : index
    %13 = vector.load %arg4[%c2_13, %c0_14, %c0_15] : memref<9x8x8xbf16, #tpu.memory_space<vmem>>, vector<1x8x8xbf16>
    %14 = vector.shape_cast %13 : vector<1x8x8xbf16> to vector<8x8xbf16>
    %cst_16 = arith.constant dense<0.000000e+00> : vector<80x8xf32>
    %15 = tpu.matmul %12, %14, %cst_16 {dimension_numbers = #tpu.dot_dimension_numbers<[1], [0], [0], [1], [0, 0, 1, 1], [], []>} : vector<80x8xbf16>, vector<8x8xbf16>, vector<80x8xf32> -> vector<80x8xf32>
    %16 = arith.addf %10, %15 : vector<80x8xf32>
    %c0_17 = arith.constant 0 : index
    %c10 = arith.constant 10 : index
    %c0_18 = arith.constant 0 : index
    %17 = vector.load %arg3[%c0_17, %c10, %c0_18] : memref<1x110x8xbf16, #tpu.memory_space<vmem>>, vector<1x80x8xbf16>
    %18 = vector.shape_cast %17 : vector<1x80x8xbf16> to vector<80x8xbf16>
    %c3 = arith.constant 3 : index
    %c0_19 = arith.constant 0 : index
    %c0_20 = arith.constant 0 : index
    %19 = vector.load %arg4[%c3, %c0_19, %c0_20] : memref<9x8x8xbf16, #tpu.memory_space<vmem>>, vector<1x8x8xbf16>
    %20 = vector.shape_cast %19 : vector<1x8x8xbf16> to vector<8x8xbf16>
    %cst_21 = arith.constant dense<0.000000e+00> : vector<80x8xf32>
    %21 = tpu.matmul %18, %20, %cst_21 {dimension_numbers = #tpu.dot_dimension_numbers<[1], [0], [0], [1], [0, 0, 1, 1], [], []>} : vector<80x8xbf16>, vector<8x8xbf16>, vector<80x8xf32> -> vector<80x8xf32>
    %22 = arith.addf %16, %21 : vector<80x8xf32>
    %c0_22 = arith.constant 0 : index
    %c11 = arith.constant 11 : index
    %c0_23 = arith.constant 0 : index
    %23 = vector.load %arg3[%c0_22, %c11, %c0_23] : memref<1x110x8xbf16, #tpu.memory_space<vmem>>, vector<1x80x8xbf16>
    %24 = vector.shape_cast %23 : vector<1x80x8xbf16> to vector<80x8xbf16>
    %c4 = arith.constant 4 : index
    %c0_24 = arith.constant 0 : index
    %c0_25 = arith.constant 0 : index
    %25 = vector.load %arg4[%c4, %c0_24, %c0_25] : memref<9x8x8xbf16, #tpu.memory_space<vmem>>, vector<1x8x8xbf16>
    %26 = vector.shape_cast %25 : vector<1x8x8xbf16> to vector<8x8xbf16>
    %cst_26 = arith.constant dense<0.000000e+00> : vector<80x8xf32>
    %27 = tpu.matmul %24, %26, %cst_26 {dimension_numbers = #tpu.dot_dimension_numbers<[1], [0], [0], [1], [0, 0, 1, 1], [], []>} : vector<80x8xbf16>, vector<8x8xbf16>, vector<80x8xf32> -> vector<80x8xf32>
    %28 = arith.addf %22, %27 : vector<80x8xf32>
    %c0_27 = arith.constant 0 : index
    %c12 = arith.constant 12 : index
    %c0_28 = arith.constant 0 : index
    %29 = vector.load %arg3[%c0_27, %c12, %c0_28] : memref<1x110x8xbf16, #tpu.memory_space<vmem>>, vector<1x80x8xbf16>
    %30 = vector.shape_cast %29 : vector<1x80x8xbf16> to vector<80x8xbf16>
    %c5 = arith.constant 5 : index
    %c0_29 = arith.constant 0 : index
    %c0_30 = arith.constant 0 : index
    %31 = vector.load %arg4[%c5, %c0_29, %c0_30] : memref<9x8x8xbf16, #tpu.memory_space<vmem>>, vector<1x8x8xbf16>
    %32 = vector.shape_cast %31 : vector<1x8x8xbf16> to vector<8x8xbf16>
    %cst_31 = arith.constant dense<0.000000e+00> : vector<80x8xf32>
    %33 = tpu.matmul %30, %32, %cst_31 {dimension_numbers = #tpu.dot_dimension_numbers<[1], [0], [0], [1], [0, 0, 1, 1], [], []>} : vector<80x8xbf16>, vector<8x8xbf16>, vector<80x8xf32> -> vector<80x8xf32>
    %34 = arith.addf %28, %33 : vector<80x8xf32>
    %c0_32 = arith.constant 0 : index
    %c20 = arith.constant 20 : index
    %c0_33 = arith.constant 0 : index
    %35 = vector.load %arg3[%c0_32, %c20, %c0_33] : memref<1x110x8xbf16, #tpu.memory_space<vmem>>, vector<1x80x8xbf16>
    %36 = vector.shape_cast %35 : vector<1x80x8xbf16> to vector<80x8xbf16>
    %c6 = arith.constant 6 : index
    %c0_34 = arith.constant 0 : index
    %c0_35 = arith.constant 0 : index
    %37 = vector.load %arg4[%c6, %c0_34, %c0_35] : memref<9x8x8xbf16, #tpu.memory_space<vmem>>, vector<1x8x8xbf16>
    %38 = vector.shape_cast %37 : vector<1x8x8xbf16> to vector<8x8xbf16>
    %cst_36 = arith.constant dense<0.000000e+00> : vector<80x8xf32>
    %39 = tpu.matmul %36, %38, %cst_36 {dimension_numbers = #tpu.dot_dimension_numbers<[1], [0], [0], [1], [0, 0, 1, 1], [], []>} : vector<80x8xbf16>, vector<8x8xbf16>, vector<80x8xf32> -> vector<80x8xf32>
    %40 = arith.addf %34, %39 : vector<80x8xf32>
    %c0_37 = arith.constant 0 : index
    %c21 = arith.constant 21 : index
    %c0_38 = arith.constant 0 : index
    %41 = vector.load %arg3[%c0_37, %c21, %c0_38] : memref<1x110x8xbf16, #tpu.memory_space<vmem>>, vector<1x80x8xbf16>
    %42 = vector.shape_cast %41 : vector<1x80x8xbf16> to vector<80x8xbf16>
    %c7 = arith.constant 7 : index
    %c0_39 = arith.constant 0 : index
    %c0_40 = arith.constant 0 : index
    %43 = vector.load %arg4[%c7, %c0_39, %c0_40] : memref<9x8x8xbf16, #tpu.memory_space<vmem>>, vector<1x8x8xbf16>
    %44 = vector.shape_cast %43 : vector<1x8x8xbf16> to vector<8x8xbf16>
    %cst_41 = arith.constant dense<0.000000e+00> : vector<80x8xf32>
    %45 = tpu.matmul %42, %44, %cst_41 {dimension_numbers = #tpu.dot_dimension_numbers<[1], [0], [0], [1], [0, 0, 1, 1], [], []>} : vector<80x8xbf16>, vector<8x8xbf16>, vector<80x8xf32> -> vector<80x8xf32>
    %46 = arith.addf %40, %45 : vector<80x8xf32>
    %c0_42 = arith.constant 0 : index
    %c22 = arith.constant 22 : index
    %c0_43 = arith.constant 0 : index
    %47 = vector.load %arg3[%c0_42, %c22, %c0_43] : memref<1x110x8xbf16, #tpu.memory_space<vmem>>, vector<1x80x8xbf16>
    %48 = vector.shape_cast %47 : vector<1x80x8xbf16> to vector<80x8xbf16>
    %c8 = arith.constant 8 : index
    %c0_44 = arith.constant 0 : index
    %c0_45 = arith.constant 0 : index
    %49 = vector.load %arg4[%c8, %c0_44, %c0_45] : memref<9x8x8xbf16, #tpu.memory_space<vmem>>, vector<1x8x8xbf16>
    %50 = vector.shape_cast %49 : vector<1x8x8xbf16> to vector<8x8xbf16>
    %cst_46 = arith.constant dense<0.000000e+00> : vector<80x8xf32>
    %51 = tpu.matmul %48, %50, %cst_46 {dimension_numbers = #tpu.dot_dimension_numbers<[1], [0], [0], [1], [0, 0, 1, 1], [], []>} : vector<80x8xbf16>, vector<8x8xbf16>, vector<80x8xf32> -> vector<80x8xf32>
    %52 = arith.addf %46, %51 : vector<80x8xf32>
    %c0_47 = arith.constant 0 : index
    %c0_48 = arith.constant 0 : index
    %53 = vector.load %arg5[%c0_47, %c0_48] : memref<1x8xf32, #tpu.memory_space<vmem>>, vector<1x8xf32>
    %54 = vector.broadcast %53 : vector<1x8xf32> to vector<80x8xf32>
    %55 = arith.mulf %52, %54 : vector<80x8xf32>
    %c0_49 = arith.constant 0 : index
    %c0_50 = arith.constant 0 : index
    %56 = vector.load %arg6[%c0_49, %c0_50] : memref<1x8xf32, #tpu.memory_space<vmem>>, vector<1x8xf32>
    %57 = vector.broadcast %56 : vector<1x8xf32> to vector<80x8xf32>
    %58 = arith.addf %55, %57 : vector<80x8xf32>
    %cst_51 = arith.constant 0.000000e+00 : f32
    %59 = vector.broadcast %cst_51 : f32 to vector<80x8xf32>
    %60 = arith.maximumf %58, %59 : vector<80x8xf32>
    %61 = arith.truncf %60 : vector<80x8xf32> to vector<80x8xbf16>
    %c0_52 = arith.constant 0 : index
    %c0_53 = arith.constant 0 : index
    %c0_54 = arith.constant 0 : index
    %62 = vector.load %arg7[%c0_52, %c0_53, %c0_54] : memref<1x80x8xbf16, #tpu.memory_space<vmem>>, vector<1x80x8xbf16>
    %63 = vector.shape_cast %62 : vector<1x80x8xbf16> to vector<80x8xbf16>
    %64 = vector.shape_cast %61 : vector<80x8xbf16> to vector<1x80x8xbf16>
    tpu.vector_store %arg7[%c0_52, %c0_53, %c0_54], %64 {strides = array<i32>} : memref<1x80x8xbf16, #tpu.memory_space<vmem>>, vector<1x80x8xbf16>,
    return
  }
  func.func @transform_0(%arg0: i32, %arg1: i32, %arg2: i32) -> (i32, i32, i32) {
    %c0_i32 = arith.constant 0 : i32
    %c0_i32_0 = arith.constant 0 : i32
    %c0_i32_1 = arith.constant 0 : i32
    return %arg0, %c0_i32, %c0_i32_0 : i32, i32, i32
  }
  func.func @transform_1(%arg0: i32, %arg1: i32, %arg2: i32) -> (i32, i32, i32) {
    %c0_i32 = arith.constant 0 : i32
    %c0_i32_0 = arith.constant 0 : i32
    %c0_i32_1 = arith.constant 0 : i32
    return %c0_i32, %c0_i32_0, %arg2 : i32, i32, i32
  }
  func.func @transform_2(%arg0: i32, %arg1: i32, %arg2: i32) -> (i32, i32) {
    %c0_i32 = arith.constant 0 : i32
    %c0_i32_0 = arith.constant 0 : i32
    return %c0_i32, %arg2 : i32, i32
  }
  func.func @transform_3(%arg0: i32, %arg1: i32, %arg2: i32) -> (i32, i32) {
    %c0_i32 = arith.constant 0 : i32
    %c0_i32_0 = arith.constant 0 : i32
    return %c0_i32, %arg2 : i32, i32
  }
  func.func @transform_4(%arg0: i32, %arg1: i32, %arg2: i32) -> (i32, i32, i32) {
    %c0_i32 = arith.constant 0 : i32
    return %arg0, %arg1, %arg2 : i32, i32, i32
  }
}

module attributes {stable_mosaic.version = 11 : i64} {
  func.func @kernel(%arg0: i32, %arg1: i32, %arg2: i32, %arg3: memref<1x512x16xbf16, #tpu.memory_space<vmem>>, %arg4: memref<1x16x32xbf16, #tpu.memory_space<vmem>>, %arg5: memref<1x32xf32, #tpu.memory_space<vmem>>, %arg6: memref<1x32xf32, #tpu.memory_space<vmem>>, %arg7: memref<1x512x32xbf16, #tpu.memory_space<vmem>>) attributes {dimension_semantics = [#tpu.dimension_semantics<parallel>, #tpu.dimension_semantics<parallel>, #tpu.dimension_semantics<parallel>], iteration_bounds = array<i64: 1, 1, 1>, scalar_prefetch = 0 : i64, scratch_operands = 0 : i64, tpu.core_type = #tpu.core_type<tc>, window_params = [{transform_indices = @transform_0, window_bounds = array<i64: 1, 512, 16>}, {transform_indices = @transform_1, window_bounds = array<i64: 1, 16, 32>}, {transform_indices = @transform_2, window_bounds = array<i64: 1, 32>}, {transform_indices = @transform_3, window_bounds = array<i64: 1, 32>}, {transform_indices = @transform_4, window_bounds = array<i64: 1, 512, 32>}]} {
    %c0 = arith.constant 0 : index
    %c0_0 = arith.constant 0 : index
    %c0_1 = arith.constant 0 : index
    %0 = vector.load %arg3[%c0, %c0_0, %c0_1] : memref<1x512x16xbf16, #tpu.memory_space<vmem>>, vector<1x512x16xbf16>
    %1 = vector.shape_cast %0 : vector<1x512x16xbf16> to vector<512x16xbf16>
    %c0_2 = arith.constant 0 : index
    %c0_3 = arith.constant 0 : index
    %c0_4 = arith.constant 0 : index
    %2 = vector.load %arg4[%c0_2, %c0_3, %c0_4] : memref<1x16x32xbf16, #tpu.memory_space<vmem>>, vector<1x16x32xbf16>
    %3 = vector.shape_cast %2 : vector<1x16x32xbf16> to vector<16x32xbf16>
    %cst = arith.constant dense<0.000000e+00> : vector<512x32xf32>
    %4 = tpu.matmul %1, %3, %cst {dimension_numbers = #tpu.dot_dimension_numbers<[1], [0], [0], [1], [0, 0, 1, 1], [], []>} : vector<512x16xbf16>, vector<16x32xbf16>, vector<512x32xf32> -> vector<512x32xf32>
    %c0_5 = arith.constant 0 : index
    %c0_6 = arith.constant 0 : index
    %5 = vector.load %arg5[%c0_5, %c0_6] : memref<1x32xf32, #tpu.memory_space<vmem>>, vector<1x32xf32>
    %6 = vector.broadcast %5 : vector<1x32xf32> to vector<512x32xf32>
    %7 = arith.mulf %4, %6 : vector<512x32xf32>
    %c0_7 = arith.constant 0 : index
    %c0_8 = arith.constant 0 : index
    %8 = vector.load %arg6[%c0_7, %c0_8] : memref<1x32xf32, #tpu.memory_space<vmem>>, vector<1x32xf32>
    %9 = vector.broadcast %8 : vector<1x32xf32> to vector<512x32xf32>
    %10 = arith.addf %7, %9 : vector<512x32xf32>
    %11 = arith.truncf %10 : vector<512x32xf32> to vector<512x32xbf16>
    %c0_9 = arith.constant 0 : index
    %c0_10 = arith.constant 0 : index
    %c0_11 = arith.constant 0 : index
    %12 = vector.load %arg7[%c0_9, %c0_10, %c0_11] : memref<1x512x32xbf16, #tpu.memory_space<vmem>>, vector<1x512x32xbf16>
    %13 = vector.shape_cast %12 : vector<1x512x32xbf16> to vector<512x32xbf16>
    %14 = vector.shape_cast %11 : vector<512x32xbf16> to vector<1x512x32xbf16>
    tpu.vector_store %arg7[%c0_9, %c0_10, %c0_11], %14 {strides = array<i32>} : memref<1x512x32xbf16, #tpu.memory_space<vmem>>, vector<1x512x32xbf16>,
    return
  }
  func.func @transform_0(%arg0: i32, %arg1: i32, %arg2: i32) -> (i32, i32, i32) {
    %c0_i32 = arith.constant 0 : i32
    %c0_i32_0 = arith.constant 0 : i32
    return %arg0, %arg1, %c0_i32 : i32, i32, i32
  }
  func.func @transform_1(%arg0: i32, %arg1: i32, %arg2: i32) -> (i32, i32, i32) {
    %c0_i32 = arith.constant 0 : i32
    %c0_i32_0 = arith.constant 0 : i32
    %c0_i32_1 = arith.constant 0 : i32
    return %c0_i32, %c0_i32_0, %arg2 : i32, i32, i32
  }
  func.func @transform_2(%arg0: i32, %arg1: i32, %arg2: i32) -> (i32, i32) {
    %c0_i32 = arith.constant 0 : i32
    %c0_i32_0 = arith.constant 0 : i32
    return %c0_i32, %arg2 : i32, i32
  }
  func.func @transform_3(%arg0: i32, %arg1: i32, %arg2: i32) -> (i32, i32) {
    %c0_i32 = arith.constant 0 : i32
    %c0_i32_0 = arith.constant 0 : i32
    return %c0_i32, %arg2 : i32, i32
  }
  func.func @transform_4(%arg0: i32, %arg1: i32, %arg2: i32) -> (i32, i32, i32) {
    %c0_i32 = arith.constant 0 : i32
    return %arg0, %arg1, %arg2 : i32, i32, i32
  }
}

module attributes {stable_mosaic.version = 11 : i64} {
  func.func @kernel(%arg0: i32, %arg1: i32, %arg2: i32, %arg3: memref<1x512x8xbf16, #tpu.memory_space<vmem>>, %arg4: memref<1x8x32xbf16, #tpu.memory_space<vmem>>, %arg5: memref<1x32xf32, #tpu.memory_space<vmem>>, %arg6: memref<1x32xf32, #tpu.memory_space<vmem>>, %arg7: memref<1x512x32xbf16, #tpu.memory_space<vmem>>, %arg8: memref<1x512x32xbf16, #tpu.memory_space<vmem>>) attributes {dimension_semantics = [#tpu.dimension_semantics<parallel>, #tpu.dimension_semantics<parallel>, #tpu.dimension_semantics<parallel>], iteration_bounds = array<i64: 1, 1, 1>, scalar_prefetch = 0 : i64, scratch_operands = 0 : i64, tpu.core_type = #tpu.core_type<tc>, window_params = [{transform_indices = @transform_0, window_bounds = array<i64: 1, 512, 8>}, {transform_indices = @transform_1, window_bounds = array<i64: 1, 8, 32>}, {transform_indices = @transform_2, window_bounds = array<i64: 1, 32>}, {transform_indices = @transform_3, window_bounds = array<i64: 1, 32>}, {transform_indices = @transform_4, window_bounds = array<i64: 1, 512, 32>}, {transform_indices = @transform_5, window_bounds = array<i64: 1, 512, 32>}]} {
    %c0 = arith.constant 0 : index
    %c0_0 = arith.constant 0 : index
    %c0_1 = arith.constant 0 : index
    %0 = vector.load %arg3[%c0, %c0_0, %c0_1] : memref<1x512x8xbf16, #tpu.memory_space<vmem>>, vector<1x512x8xbf16>
    %1 = vector.shape_cast %0 : vector<1x512x8xbf16> to vector<512x8xbf16>
    %c0_2 = arith.constant 0 : index
    %c0_3 = arith.constant 0 : index
    %c0_4 = arith.constant 0 : index
    %2 = vector.load %arg4[%c0_2, %c0_3, %c0_4] : memref<1x8x32xbf16, #tpu.memory_space<vmem>>, vector<1x8x32xbf16>
    %3 = vector.shape_cast %2 : vector<1x8x32xbf16> to vector<8x32xbf16>
    %cst = arith.constant dense<0.000000e+00> : vector<512x32xf32>
    %4 = tpu.matmul %1, %3, %cst {dimension_numbers = #tpu.dot_dimension_numbers<[1], [0], [0], [1], [0, 0, 1, 1], [], []>} : vector<512x8xbf16>, vector<8x32xbf16>, vector<512x32xf32> -> vector<512x32xf32>
    %c0_5 = arith.constant 0 : index
    %c0_6 = arith.constant 0 : index
    %5 = vector.load %arg5[%c0_5, %c0_6] : memref<1x32xf32, #tpu.memory_space<vmem>>, vector<1x32xf32>
    %6 = vector.broadcast %5 : vector<1x32xf32> to vector<512x32xf32>
    %7 = arith.mulf %4, %6 : vector<512x32xf32>
    %c0_7 = arith.constant 0 : index
    %c0_8 = arith.constant 0 : index
    %8 = vector.load %arg6[%c0_7, %c0_8] : memref<1x32xf32, #tpu.memory_space<vmem>>, vector<1x32xf32>
    %9 = vector.broadcast %8 : vector<1x32xf32> to vector<512x32xf32>
    %10 = arith.addf %7, %9 : vector<512x32xf32>
    %c0_9 = arith.constant 0 : index
    %c0_10 = arith.constant 0 : index
    %c0_11 = arith.constant 0 : index
    %11 = vector.load %arg7[%c0_9, %c0_10, %c0_11] : memref<1x512x32xbf16, #tpu.memory_space<vmem>>, vector<1x512x32xbf16>
    %12 = vector.shape_cast %11 : vector<1x512x32xbf16> to vector<512x32xbf16>
    %13 = arith.extf %12 : vector<512x32xbf16> to vector<512x32xf32>
    %14 = arith.addf %10, %13 : vector<512x32xf32>
    %cst_12 = arith.constant 0.000000e+00 : f32
    %15 = vector.broadcast %cst_12 : f32 to vector<512x32xf32>
    %16 = arith.maximumf %14, %15 : vector<512x32xf32>
    %17 = arith.truncf %16 : vector<512x32xf32> to vector<512x32xbf16>
    %c0_13 = arith.constant 0 : index
    %c0_14 = arith.constant 0 : index
    %c0_15 = arith.constant 0 : index
    %18 = vector.load %arg8[%c0_13, %c0_14, %c0_15] : memref<1x512x32xbf16, #tpu.memory_space<vmem>>, vector<1x512x32xbf16>
    %19 = vector.shape_cast %18 : vector<1x512x32xbf16> to vector<512x32xbf16>
    %20 = vector.shape_cast %17 : vector<512x32xbf16> to vector<1x512x32xbf16>
    tpu.vector_store %arg8[%c0_13, %c0_14, %c0_15], %20 {strides = array<i32>} : memref<1x512x32xbf16, #tpu.memory_space<vmem>>, vector<1x512x32xbf16>,
    return
  }
  func.func @transform_0(%arg0: i32, %arg1: i32, %arg2: i32) -> (i32, i32, i32) {
    %c0_i32 = arith.constant 0 : i32
    %c0_i32_0 = arith.constant 0 : i32
    return %arg0, %arg1, %c0_i32 : i32, i32, i32
  }
  func.func @transform_1(%arg0: i32, %arg1: i32, %arg2: i32) -> (i32, i32, i32) {
    %c0_i32 = arith.constant 0 : i32
    %c0_i32_0 = arith.constant 0 : i32
    %c0_i32_1 = arith.constant 0 : i32
    return %c0_i32, %c0_i32_0, %arg2 : i32, i32, i32
  }
  func.func @transform_2(%arg0: i32, %arg1: i32, %arg2: i32) -> (i32, i32) {
    %c0_i32 = arith.constant 0 : i32
    %c0_i32_0 = arith.constant 0 : i32
    return %c0_i32, %arg2 : i32, i32
  }
  func.func @transform_3(%arg0: i32, %arg1: i32, %arg2: i32) -> (i32, i32) {
    %c0_i32 = arith.constant 0 : i32
    %c0_i32_0 = arith.constant 0 : i32
    return %c0_i32, %arg2 : i32, i32
  }
  func.func @transform_4(%arg0: i32, %arg1: i32, %arg2: i32) -> (i32, i32, i32) {
    %c0_i32 = arith.constant 0 : i32
    return %arg0, %arg1, %arg2 : i32, i32, i32
  }
  func.func @transform_5(%arg0: i32, %arg1: i32, %arg2: i32) -> (i32, i32, i32) {
    %c0_i32 = arith.constant 0 : i32
    return %arg0, %arg1, %arg2 : i32, i32, i32
  }
}

module attributes {stable_mosaic.version = 11 : i64} {
  func.func @kernel(%arg0: i32, %arg1: i32, %arg2: i32, %arg3: memref<1x512x32xbf16, #tpu.memory_space<vmem>>, %arg4: memref<1x32x16xbf16, #tpu.memory_space<vmem>>, %arg5: memref<1x16xf32, #tpu.memory_space<vmem>>, %arg6: memref<1x16xf32, #tpu.memory_space<vmem>>, %arg7: memref<1x512x16xbf16, #tpu.memory_space<vmem>>) attributes {dimension_semantics = [#tpu.dimension_semantics<parallel>, #tpu.dimension_semantics<parallel>, #tpu.dimension_semantics<parallel>], iteration_bounds = array<i64: 1, 1, 1>, scalar_prefetch = 0 : i64, scratch_operands = 0 : i64, tpu.core_type = #tpu.core_type<tc>, window_params = [{transform_indices = @transform_0, window_bounds = array<i64: 1, 512, 32>}, {transform_indices = @transform_1, window_bounds = array<i64: 1, 32, 16>}, {transform_indices = @transform_2, window_bounds = array<i64: 1, 16>}, {transform_indices = @transform_3, window_bounds = array<i64: 1, 16>}, {transform_indices = @transform_4, window_bounds = array<i64: 1, 512, 16>}]} {
    %c0 = arith.constant 0 : index
    %c0_0 = arith.constant 0 : index
    %c0_1 = arith.constant 0 : index
    %0 = vector.load %arg3[%c0, %c0_0, %c0_1] : memref<1x512x32xbf16, #tpu.memory_space<vmem>>, vector<1x512x32xbf16>
    %1 = vector.shape_cast %0 : vector<1x512x32xbf16> to vector<512x32xbf16>
    %c0_2 = arith.constant 0 : index
    %c0_3 = arith.constant 0 : index
    %c0_4 = arith.constant 0 : index
    %2 = vector.load %arg4[%c0_2, %c0_3, %c0_4] : memref<1x32x16xbf16, #tpu.memory_space<vmem>>, vector<1x32x16xbf16>
    %3 = vector.shape_cast %2 : vector<1x32x16xbf16> to vector<32x16xbf16>
    %cst = arith.constant dense<0.000000e+00> : vector<512x16xf32>
    %4 = tpu.matmul %1, %3, %cst {dimension_numbers = #tpu.dot_dimension_numbers<[1], [0], [0], [1], [0, 0, 1, 1], [], []>} : vector<512x32xbf16>, vector<32x16xbf16>, vector<512x16xf32> -> vector<512x16xf32>
    %c0_5 = arith.constant 0 : index
    %c0_6 = arith.constant 0 : index
    %5 = vector.load %arg5[%c0_5, %c0_6] : memref<1x16xf32, #tpu.memory_space<vmem>>, vector<1x16xf32>
    %6 = vector.broadcast %5 : vector<1x16xf32> to vector<512x16xf32>
    %7 = arith.mulf %4, %6 : vector<512x16xf32>
    %c0_7 = arith.constant 0 : index
    %c0_8 = arith.constant 0 : index
    %8 = vector.load %arg6[%c0_7, %c0_8] : memref<1x16xf32, #tpu.memory_space<vmem>>, vector<1x16xf32>
    %9 = vector.broadcast %8 : vector<1x16xf32> to vector<512x16xf32>
    %10 = arith.addf %7, %9 : vector<512x16xf32>
    %cst_9 = arith.constant 0.000000e+00 : f32
    %11 = vector.broadcast %cst_9 : f32 to vector<512x16xf32>
    %12 = arith.maximumf %10, %11 : vector<512x16xf32>
    %13 = arith.truncf %12 : vector<512x16xf32> to vector<512x16xbf16>
    %c0_10 = arith.constant 0 : index
    %c0_11 = arith.constant 0 : index
    %c0_12 = arith.constant 0 : index
    %14 = vector.load %arg7[%c0_10, %c0_11, %c0_12] : memref<1x512x16xbf16, #tpu.memory_space<vmem>>, vector<1x512x16xbf16>
    %15 = vector.shape_cast %14 : vector<1x512x16xbf16> to vector<512x16xbf16>
    %16 = vector.shape_cast %13 : vector<512x16xbf16> to vector<1x512x16xbf16>
    tpu.vector_store %arg7[%c0_10, %c0_11, %c0_12], %16 {strides = array<i32>} : memref<1x512x16xbf16, #tpu.memory_space<vmem>>, vector<1x512x16xbf16>,
    return
  }
  func.func @transform_0(%arg0: i32, %arg1: i32, %arg2: i32) -> (i32, i32, i32) {
    %c0_i32 = arith.constant 0 : i32
    %c0_i32_0 = arith.constant 0 : i32
    return %arg0, %arg1, %c0_i32 : i32, i32, i32
  }
  func.func @transform_1(%arg0: i32, %arg1: i32, %arg2: i32) -> (i32, i32, i32) {
    %c0_i32 = arith.constant 0 : i32
    %c0_i32_0 = arith.constant 0 : i32
    %c0_i32_1 = arith.constant 0 : i32
    return %c0_i32, %c0_i32_0, %arg2 : i32, i32, i32
  }
  func.func @transform_2(%arg0: i32, %arg1: i32, %arg2: i32) -> (i32, i32) {
    %c0_i32 = arith.constant 0 : i32
    %c0_i32_0 = arith.constant 0 : i32
    return %c0_i32, %arg2 : i32, i32
  }
  func.func @transform_3(%arg0: i32, %arg1: i32, %arg2: i32) -> (i32, i32) {
    %c0_i32 = arith.constant 0 : i32
    %c0_i32_0 = arith.constant 0 : i32
    return %c0_i32, %arg2 : i32, i32
  }
  func.func @transform_4(%arg0: i32, %arg1: i32, %arg2: i32) -> (i32, i32, i32) {
    %c0_i32 = arith.constant 0 : i32
    return %arg0, %arg1, %arg2 : i32, i32, i32
  }
}

module attributes {stable_mosaic.version = 11 : i64} {
  func.func @kernel(%arg0: i32, %arg1: i32, %arg2: i32, %arg3: memref<1x100x16xbf16, #tpu.memory_space<vmem>>, %arg4: memref<9x16x16xbf16, #tpu.memory_space<vmem>>, %arg5: memref<1x16xf32, #tpu.memory_space<vmem>>, %arg6: memref<1x16xf32, #tpu.memory_space<vmem>>, %arg7: memref<1x20x16xbf16, #tpu.memory_space<vmem>>) attributes {dimension_semantics = [#tpu.dimension_semantics<parallel>, #tpu.dimension_semantics<parallel>, #tpu.dimension_semantics<parallel>], iteration_bounds = array<i64: 8, 1, 1>, scalar_prefetch = 0 : i64, scratch_operands = 0 : i64, tpu.core_type = #tpu.core_type<tc>, window_params = [{transform_indices = @transform_0, window_bounds = array<i64: 1, 100, 16>}, {transform_indices = @transform_1, window_bounds = array<i64: 9, 16, 16>}, {transform_indices = @transform_2, window_bounds = array<i64: 1, 16>}, {transform_indices = @transform_3, window_bounds = array<i64: 1, 16>}, {transform_indices = @transform_4, window_bounds = array<i64: 1, 20, 16>}]} {
    %c0 = arith.constant 0 : index
    %c0_0 = arith.constant 0 : index
    %c0_1 = arith.constant 0 : index
    %0 = vector.load %arg3[%c0, %c0_0, %c0_1] : memref<1x100x16xbf16, #tpu.memory_space<vmem>>, vector<1x20x16xbf16>
    %1 = vector.shape_cast %0 : vector<1x20x16xbf16> to vector<20x16xbf16>
    %c0_2 = arith.constant 0 : index
    %c0_3 = arith.constant 0 : index
    %c0_4 = arith.constant 0 : index
    %2 = vector.load %arg4[%c0_2, %c0_3, %c0_4] : memref<9x16x16xbf16, #tpu.memory_space<vmem>>, vector<1x16x16xbf16>
    %3 = vector.shape_cast %2 : vector<1x16x16xbf16> to vector<16x16xbf16>
    %cst = arith.constant dense<0.000000e+00> : vector<20x16xf32>
    %4 = tpu.matmul %1, %3, %cst {dimension_numbers = #tpu.dot_dimension_numbers<[1], [0], [0], [1], [0, 0, 1, 1], [], []>} : vector<20x16xbf16>, vector<16x16xbf16>, vector<20x16xf32> -> vector<20x16xf32>
    %c0_5 = arith.constant 0 : index
    %c25 = arith.constant 25 : index
    %c0_6 = arith.constant 0 : index
    %5 = vector.load %arg3[%c0_5, %c25, %c0_6] : memref<1x100x16xbf16, #tpu.memory_space<vmem>>, vector<1x20x16xbf16>
    %6 = vector.shape_cast %5 : vector<1x20x16xbf16> to vector<20x16xbf16>
    %c1 = arith.constant 1 : index
    %c0_7 = arith.constant 0 : index
    %c0_8 = arith.constant 0 : index
    %7 = vector.load %arg4[%c1, %c0_7, %c0_8] : memref<9x16x16xbf16, #tpu.memory_space<vmem>>, vector<1x16x16xbf16>
    %8 = vector.shape_cast %7 : vector<1x16x16xbf16> to vector<16x16xbf16>
    %cst_9 = arith.constant dense<0.000000e+00> : vector<20x16xf32>
    %9 = tpu.matmul %6, %8, %cst_9 {dimension_numbers = #tpu.dot_dimension_numbers<[1], [0], [0], [1], [0, 0, 1, 1], [], []>} : vector<20x16xbf16>, vector<16x16xbf16>, vector<20x16xf32> -> vector<20x16xf32>
    %10 = arith.addf %4, %9 : vector<20x16xf32>
    %c0_10 = arith.constant 0 : index
    %c1_11 = arith.constant 1 : index
    %c0_12 = arith.constant 0 : index
    %11 = vector.load %arg3[%c0_10, %c1_11, %c0_12] : memref<1x100x16xbf16, #tpu.memory_space<vmem>>, vector<1x20x16xbf16>
    %12 = vector.shape_cast %11 : vector<1x20x16xbf16> to vector<20x16xbf16>
    %c2 = arith.constant 2 : index
    %c0_13 = arith.constant 0 : index
    %c0_14 = arith.constant 0 : index
    %13 = vector.load %arg4[%c2, %c0_13, %c0_14] : memref<9x16x16xbf16, #tpu.memory_space<vmem>>, vector<1x16x16xbf16>
    %14 = vector.shape_cast %13 : vector<1x16x16xbf16> to vector<16x16xbf16>
    %cst_15 = arith.constant dense<0.000000e+00> : vector<20x16xf32>
    %15 = tpu.matmul %12, %14, %cst_15 {dimension_numbers = #tpu.dot_dimension_numbers<[1], [0], [0], [1], [0, 0, 1, 1], [], []>} : vector<20x16xbf16>, vector<16x16xbf16>, vector<20x16xf32> -> vector<20x16xf32>
    %16 = arith.addf %10, %15 : vector<20x16xf32>
    %c0_16 = arith.constant 0 : index
    %c50 = arith.constant 50 : index
    %c0_17 = arith.constant 0 : index
    %17 = vector.load %arg3[%c0_16, %c50, %c0_17] : memref<1x100x16xbf16, #tpu.memory_space<vmem>>, vector<1x20x16xbf16>
    %18 = vector.shape_cast %17 : vector<1x20x16xbf16> to vector<20x16xbf16>
    %c3 = arith.constant 3 : index
    %c0_18 = arith.constant 0 : index
    %c0_19 = arith.constant 0 : index
    %19 = vector.load %arg4[%c3, %c0_18, %c0_19] : memref<9x16x16xbf16, #tpu.memory_space<vmem>>, vector<1x16x16xbf16>
    %20 = vector.shape_cast %19 : vector<1x16x16xbf16> to vector<16x16xbf16>
    %cst_20 = arith.constant dense<0.000000e+00> : vector<20x16xf32>
    %21 = tpu.matmul %18, %20, %cst_20 {dimension_numbers = #tpu.dot_dimension_numbers<[1], [0], [0], [1], [0, 0, 1, 1], [], []>} : vector<20x16xbf16>, vector<16x16xbf16>, vector<20x16xf32> -> vector<20x16xf32>
    %22 = arith.addf %16, %21 : vector<20x16xf32>
    %c0_21 = arith.constant 0 : index
    %c75 = arith.constant 75 : index
    %c0_22 = arith.constant 0 : index
    %23 = vector.load %arg3[%c0_21, %c75, %c0_22] : memref<1x100x16xbf16, #tpu.memory_space<vmem>>, vector<1x20x16xbf16>
    %24 = vector.shape_cast %23 : vector<1x20x16xbf16> to vector<20x16xbf16>
    %c4 = arith.constant 4 : index
    %c0_23 = arith.constant 0 : index
    %c0_24 = arith.constant 0 : index
    %25 = vector.load %arg4[%c4, %c0_23, %c0_24] : memref<9x16x16xbf16, #tpu.memory_space<vmem>>, vector<1x16x16xbf16>
    %26 = vector.shape_cast %25 : vector<1x16x16xbf16> to vector<16x16xbf16>
    %cst_25 = arith.constant dense<0.000000e+00> : vector<20x16xf32>
    %27 = tpu.matmul %24, %26, %cst_25 {dimension_numbers = #tpu.dot_dimension_numbers<[1], [0], [0], [1], [0, 0, 1, 1], [], []>} : vector<20x16xbf16>, vector<16x16xbf16>, vector<20x16xf32> -> vector<20x16xf32>
    %28 = arith.addf %22, %27 : vector<20x16xf32>
    %c0_26 = arith.constant 0 : index
    %c51 = arith.constant 51 : index
    %c0_27 = arith.constant 0 : index
    %29 = vector.load %arg3[%c0_26, %c51, %c0_27] : memref<1x100x16xbf16, #tpu.memory_space<vmem>>, vector<1x20x16xbf16>
    %30 = vector.shape_cast %29 : vector<1x20x16xbf16> to vector<20x16xbf16>
    %c5 = arith.constant 5 : index
    %c0_28 = arith.constant 0 : index
    %c0_29 = arith.constant 0 : index
    %31 = vector.load %arg4[%c5, %c0_28, %c0_29] : memref<9x16x16xbf16, #tpu.memory_space<vmem>>, vector<1x16x16xbf16>
    %32 = vector.shape_cast %31 : vector<1x16x16xbf16> to vector<16x16xbf16>
    %cst_30 = arith.constant dense<0.000000e+00> : vector<20x16xf32>
    %33 = tpu.matmul %30, %32, %cst_30 {dimension_numbers = #tpu.dot_dimension_numbers<[1], [0], [0], [1], [0, 0, 1, 1], [], []>} : vector<20x16xbf16>, vector<16x16xbf16>, vector<20x16xf32> -> vector<20x16xf32>
    %34 = arith.addf %28, %33 : vector<20x16xf32>
    %c0_31 = arith.constant 0 : index
    %c5_32 = arith.constant 5 : index
    %c0_33 = arith.constant 0 : index
    %35 = vector.load %arg3[%c0_31, %c5_32, %c0_33] : memref<1x100x16xbf16, #tpu.memory_space<vmem>>, vector<1x20x16xbf16>
    %36 = vector.shape_cast %35 : vector<1x20x16xbf16> to vector<20x16xbf16>
    %c6 = arith.constant 6 : index
    %c0_34 = arith.constant 0 : index
    %c0_35 = arith.constant 0 : index
    %37 = vector.load %arg4[%c6, %c0_34, %c0_35] : memref<9x16x16xbf16, #tpu.memory_space<vmem>>, vector<1x16x16xbf16>
    %38 = vector.shape_cast %37 : vector<1x16x16xbf16> to vector<16x16xbf16>
    %cst_36 = arith.constant dense<0.000000e+00> : vector<20x16xf32>
    %39 = tpu.matmul %36, %38, %cst_36 {dimension_numbers = #tpu.dot_dimension_numbers<[1], [0], [0], [1], [0, 0, 1, 1], [], []>} : vector<20x16xbf16>, vector<16x16xbf16>, vector<20x16xf32> -> vector<20x16xf32>
    %40 = arith.addf %34, %39 : vector<20x16xf32>
    %c0_37 = arith.constant 0 : index
    %c30 = arith.constant 30 : index
    %c0_38 = arith.constant 0 : index
    %41 = vector.load %arg3[%c0_37, %c30, %c0_38] : memref<1x100x16xbf16, #tpu.memory_space<vmem>>, vector<1x20x16xbf16>
    %42 = vector.shape_cast %41 : vector<1x20x16xbf16> to vector<20x16xbf16>
    %c7 = arith.constant 7 : index
    %c0_39 = arith.constant 0 : index
    %c0_40 = arith.constant 0 : index
    %43 = vector.load %arg4[%c7, %c0_39, %c0_40] : memref<9x16x16xbf16, #tpu.memory_space<vmem>>, vector<1x16x16xbf16>
    %44 = vector.shape_cast %43 : vector<1x16x16xbf16> to vector<16x16xbf16>
    %cst_41 = arith.constant dense<0.000000e+00> : vector<20x16xf32>
    %45 = tpu.matmul %42, %44, %cst_41 {dimension_numbers = #tpu.dot_dimension_numbers<[1], [0], [0], [1], [0, 0, 1, 1], [], []>} : vector<20x16xbf16>, vector<16x16xbf16>, vector<20x16xf32> -> vector<20x16xf32>
    %46 = arith.addf %40, %45 : vector<20x16xf32>
    %c0_42 = arith.constant 0 : index
    %c6_43 = arith.constant 6 : index
    %c0_44 = arith.constant 0 : index
    %47 = vector.load %arg3[%c0_42, %c6_43, %c0_44] : memref<1x100x16xbf16, #tpu.memory_space<vmem>>, vector<1x20x16xbf16>
    %48 = vector.shape_cast %47 : vector<1x20x16xbf16> to vector<20x16xbf16>
    %c8 = arith.constant 8 : index
    %c0_45 = arith.constant 0 : index
    %c0_46 = arith.constant 0 : index
    %49 = vector.load %arg4[%c8, %c0_45, %c0_46] : memref<9x16x16xbf16, #tpu.memory_space<vmem>>, vector<1x16x16xbf16>
    %50 = vector.shape_cast %49 : vector<1x16x16xbf16> to vector<16x16xbf16>
    %cst_47 = arith.constant dense<0.000000e+00> : vector<20x16xf32>
    %51 = tpu.matmul %48, %50, %cst_47 {dimension_numbers = #tpu.dot_dimension_numbers<[1], [0], [0], [1], [0, 0, 1, 1], [], []>} : vector<20x16xbf16>, vector<16x16xbf16>, vector<20x16xf32> -> vector<20x16xf32>
    %52 = arith.addf %46, %51 : vector<20x16xf32>
    %c0_48 = arith.constant 0 : index
    %c0_49 = arith.constant 0 : index
    %53 = vector.load %arg5[%c0_48, %c0_49] : memref<1x16xf32, #tpu.memory_space<vmem>>, vector<1x16xf32>
    %54 = vector.broadcast %53 : vector<1x16xf32> to vector<20x16xf32>
    %55 = arith.mulf %52, %54 : vector<20x16xf32>
    %c0_50 = arith.constant 0 : index
    %c0_51 = arith.constant 0 : index
    %56 = vector.load %arg6[%c0_50, %c0_51] : memref<1x16xf32, #tpu.memory_space<vmem>>, vector<1x16xf32>
    %57 = vector.broadcast %56 : vector<1x16xf32> to vector<20x16xf32>
    %58 = arith.addf %55, %57 : vector<20x16xf32>
    %cst_52 = arith.constant 0.000000e+00 : f32
    %59 = vector.broadcast %cst_52 : f32 to vector<20x16xf32>
    %60 = arith.maximumf %58, %59 : vector<20x16xf32>
    %61 = arith.truncf %60 : vector<20x16xf32> to vector<20x16xbf16>
    %c0_53 = arith.constant 0 : index
    %c0_54 = arith.constant 0 : index
    %c0_55 = arith.constant 0 : index
    %62 = vector.load %arg7[%c0_53, %c0_54, %c0_55] : memref<1x20x16xbf16, #tpu.memory_space<vmem>>, vector<1x20x16xbf16>
    %63 = vector.shape_cast %62 : vector<1x20x16xbf16> to vector<20x16xbf16>
    %64 = vector.shape_cast %61 : vector<20x16xbf16> to vector<1x20x16xbf16>
    tpu.vector_store %arg7[%c0_53, %c0_54, %c0_55], %64 {strides = array<i32>} : memref<1x20x16xbf16, #tpu.memory_space<vmem>>, vector<1x20x16xbf16>,
    return
  }
  func.func @transform_0(%arg0: i32, %arg1: i32, %arg2: i32) -> (i32, i32, i32) {
    %c0_i32 = arith.constant 0 : i32
    %c0_i32_0 = arith.constant 0 : i32
    %c0_i32_1 = arith.constant 0 : i32
    return %arg0, %c0_i32, %c0_i32_0 : i32, i32, i32
  }
  func.func @transform_1(%arg0: i32, %arg1: i32, %arg2: i32) -> (i32, i32, i32) {
    %c0_i32 = arith.constant 0 : i32
    %c0_i32_0 = arith.constant 0 : i32
    %c0_i32_1 = arith.constant 0 : i32
    return %c0_i32, %c0_i32_0, %arg2 : i32, i32, i32
  }
  func.func @transform_2(%arg0: i32, %arg1: i32, %arg2: i32) -> (i32, i32) {
    %c0_i32 = arith.constant 0 : i32
    %c0_i32_0 = arith.constant 0 : i32
    return %c0_i32, %arg2 : i32, i32
  }
  func.func @transform_3(%arg0: i32, %arg1: i32, %arg2: i32) -> (i32, i32) {
    %c0_i32 = arith.constant 0 : i32
    %c0_i32_0 = arith.constant 0 : i32
    return %c0_i32, %arg2 : i32, i32
  }
  func.func @transform_4(%arg0: i32, %arg1: i32, %arg2: i32) -> (i32, i32, i32) {
    %c0_i32 = arith.constant 0 : i32
    return %arg0, %arg1, %arg2 : i32, i32, i32
  }
}

module attributes {stable_mosaic.version = 11 : i64} {
  func.func @kernel(%arg0: i32, %arg1: i32, %arg2: i32, %arg3: memref<1x128x32xbf16, #tpu.memory_space<vmem>>, %arg4: memref<1x32x64xbf16, #tpu.memory_space<vmem>>, %arg5: memref<1x64xf32, #tpu.memory_space<vmem>>, %arg6: memref<1x64xf32, #tpu.memory_space<vmem>>, %arg7: memref<1x128x64xbf16, #tpu.memory_space<vmem>>) attributes {dimension_semantics = [#tpu.dimension_semantics<parallel>, #tpu.dimension_semantics<parallel>, #tpu.dimension_semantics<parallel>], iteration_bounds = array<i64: 1, 1, 1>, scalar_prefetch = 0 : i64, scratch_operands = 0 : i64, tpu.core_type = #tpu.core_type<tc>, window_params = [{transform_indices = @transform_0, window_bounds = array<i64: 1, 128, 32>}, {transform_indices = @transform_1, window_bounds = array<i64: 1, 32, 64>}, {transform_indices = @transform_2, window_bounds = array<i64: 1, 64>}, {transform_indices = @transform_3, window_bounds = array<i64: 1, 64>}, {transform_indices = @transform_4, window_bounds = array<i64: 1, 128, 64>}]} {
    %c0 = arith.constant 0 : index
    %c0_0 = arith.constant 0 : index
    %c0_1 = arith.constant 0 : index
    %0 = vector.load %arg3[%c0, %c0_0, %c0_1] : memref<1x128x32xbf16, #tpu.memory_space<vmem>>, vector<1x128x32xbf16>
    %1 = vector.shape_cast %0 : vector<1x128x32xbf16> to vector<128x32xbf16>
    %c0_2 = arith.constant 0 : index
    %c0_3 = arith.constant 0 : index
    %c0_4 = arith.constant 0 : index
    %2 = vector.load %arg4[%c0_2, %c0_3, %c0_4] : memref<1x32x64xbf16, #tpu.memory_space<vmem>>, vector<1x32x64xbf16>
    %3 = vector.shape_cast %2 : vector<1x32x64xbf16> to vector<32x64xbf16>
    %cst = arith.constant dense<0.000000e+00> : vector<128x64xf32>
    %4 = tpu.matmul %1, %3, %cst {dimension_numbers = #tpu.dot_dimension_numbers<[1], [0], [0], [1], [0, 0, 1, 1], [], []>} : vector<128x32xbf16>, vector<32x64xbf16>, vector<128x64xf32> -> vector<128x64xf32>
    %c0_5 = arith.constant 0 : index
    %c0_6 = arith.constant 0 : index
    %5 = vector.load %arg5[%c0_5, %c0_6] : memref<1x64xf32, #tpu.memory_space<vmem>>, vector<1x64xf32>
    %6 = vector.broadcast %5 : vector<1x64xf32> to vector<128x64xf32>
    %7 = arith.mulf %4, %6 : vector<128x64xf32>
    %c0_7 = arith.constant 0 : index
    %c0_8 = arith.constant 0 : index
    %8 = vector.load %arg6[%c0_7, %c0_8] : memref<1x64xf32, #tpu.memory_space<vmem>>, vector<1x64xf32>
    %9 = vector.broadcast %8 : vector<1x64xf32> to vector<128x64xf32>
    %10 = arith.addf %7, %9 : vector<128x64xf32>
    %11 = arith.truncf %10 : vector<128x64xf32> to vector<128x64xbf16>
    %c0_9 = arith.constant 0 : index
    %c0_10 = arith.constant 0 : index
    %c0_11 = arith.constant 0 : index
    %12 = vector.load %arg7[%c0_9, %c0_10, %c0_11] : memref<1x128x64xbf16, #tpu.memory_space<vmem>>, vector<1x128x64xbf16>
    %13 = vector.shape_cast %12 : vector<1x128x64xbf16> to vector<128x64xbf16>
    %14 = vector.shape_cast %11 : vector<128x64xbf16> to vector<1x128x64xbf16>
    tpu.vector_store %arg7[%c0_9, %c0_10, %c0_11], %14 {strides = array<i32>} : memref<1x128x64xbf16, #tpu.memory_space<vmem>>, vector<1x128x64xbf16>,
    return
  }
  func.func @transform_0(%arg0: i32, %arg1: i32, %arg2: i32) -> (i32, i32, i32) {
    %c0_i32 = arith.constant 0 : i32
    %c0_i32_0 = arith.constant 0 : i32
    return %arg0, %arg1, %c0_i32 : i32, i32, i32
  }
  func.func @transform_1(%arg0: i32, %arg1: i32, %arg2: i32) -> (i32, i32, i32) {
    %c0_i32 = arith.constant 0 : i32
    %c0_i32_0 = arith.constant 0 : i32
    %c0_i32_1 = arith.constant 0 : i32
    return %c0_i32, %c0_i32_0, %arg2 : i32, i32, i32
  }
  func.func @transform_2(%arg0: i32, %arg1: i32, %arg2: i32) -> (i32, i32) {
    %c0_i32 = arith.constant 0 : i32
    %c0_i32_0 = arith.constant 0 : i32
    return %c0_i32, %arg2 : i32, i32
  }
  func.func @transform_3(%arg0: i32, %arg1: i32, %arg2: i32) -> (i32, i32) {
    %c0_i32 = arith.constant 0 : i32
    %c0_i32_0 = arith.constant 0 : i32
    return %c0_i32, %arg2 : i32, i32
  }
  func.func @transform_4(%arg0: i32, %arg1: i32, %arg2: i32) -> (i32, i32, i32) {
    %c0_i32 = arith.constant 0 : i32
    return %arg0, %arg1, %arg2 : i32, i32, i32
  }
}

module attributes {stable_mosaic.version = 11 : i64} {
  func.func @kernel(%arg0: i32, %arg1: i32, %arg2: i32, %arg3: memref<1x128x16xbf16, #tpu.memory_space<vmem>>, %arg4: memref<1x16x64xbf16, #tpu.memory_space<vmem>>, %arg5: memref<1x64xf32, #tpu.memory_space<vmem>>, %arg6: memref<1x64xf32, #tpu.memory_space<vmem>>, %arg7: memref<1x128x64xbf16, #tpu.memory_space<vmem>>, %arg8: memref<1x128x64xbf16, #tpu.memory_space<vmem>>) attributes {dimension_semantics = [#tpu.dimension_semantics<parallel>, #tpu.dimension_semantics<parallel>, #tpu.dimension_semantics<parallel>], iteration_bounds = array<i64: 1, 1, 1>, scalar_prefetch = 0 : i64, scratch_operands = 0 : i64, tpu.core_type = #tpu.core_type<tc>, window_params = [{transform_indices = @transform_0, window_bounds = array<i64: 1, 128, 16>}, {transform_indices = @transform_1, window_bounds = array<i64: 1, 16, 64>}, {transform_indices = @transform_2, window_bounds = array<i64: 1, 64>}, {transform_indices = @transform_3, window_bounds = array<i64: 1, 64>}, {transform_indices = @transform_4, window_bounds = array<i64: 1, 128, 64>}, {transform_indices = @transform_5, window_bounds = array<i64: 1, 128, 64>}]} {
    %c0 = arith.constant 0 : index
    %c0_0 = arith.constant 0 : index
    %c0_1 = arith.constant 0 : index
    %0 = vector.load %arg3[%c0, %c0_0, %c0_1] : memref<1x128x16xbf16, #tpu.memory_space<vmem>>, vector<1x128x16xbf16>
    %1 = vector.shape_cast %0 : vector<1x128x16xbf16> to vector<128x16xbf16>
    %c0_2 = arith.constant 0 : index
    %c0_3 = arith.constant 0 : index
    %c0_4 = arith.constant 0 : index
    %2 = vector.load %arg4[%c0_2, %c0_3, %c0_4] : memref<1x16x64xbf16, #tpu.memory_space<vmem>>, vector<1x16x64xbf16>
    %3 = vector.shape_cast %2 : vector<1x16x64xbf16> to vector<16x64xbf16>
    %cst = arith.constant dense<0.000000e+00> : vector<128x64xf32>
    %4 = tpu.matmul %1, %3, %cst {dimension_numbers = #tpu.dot_dimension_numbers<[1], [0], [0], [1], [0, 0, 1, 1], [], []>} : vector<128x16xbf16>, vector<16x64xbf16>, vector<128x64xf32> -> vector<128x64xf32>
    %c0_5 = arith.constant 0 : index
    %c0_6 = arith.constant 0 : index
    %5 = vector.load %arg5[%c0_5, %c0_6] : memref<1x64xf32, #tpu.memory_space<vmem>>, vector<1x64xf32>
    %6 = vector.broadcast %5 : vector<1x64xf32> to vector<128x64xf32>
    %7 = arith.mulf %4, %6 : vector<128x64xf32>
    %c0_7 = arith.constant 0 : index
    %c0_8 = arith.constant 0 : index
    %8 = vector.load %arg6[%c0_7, %c0_8] : memref<1x64xf32, #tpu.memory_space<vmem>>, vector<1x64xf32>
    %9 = vector.broadcast %8 : vector<1x64xf32> to vector<128x64xf32>
    %10 = arith.addf %7, %9 : vector<128x64xf32>
    %c0_9 = arith.constant 0 : index
    %c0_10 = arith.constant 0 : index
    %c0_11 = arith.constant 0 : index
    %11 = vector.load %arg7[%c0_9, %c0_10, %c0_11] : memref<1x128x64xbf16, #tpu.memory_space<vmem>>, vector<1x128x64xbf16>
    %12 = vector.shape_cast %11 : vector<1x128x64xbf16> to vector<128x64xbf16>
    %13 = arith.extf %12 : vector<128x64xbf16> to vector<128x64xf32>
    %14 = arith.addf %10, %13 : vector<128x64xf32>
    %cst_12 = arith.constant 0.000000e+00 : f32
    %15 = vector.broadcast %cst_12 : f32 to vector<128x64xf32>
    %16 = arith.maximumf %14, %15 : vector<128x64xf32>
    %17 = arith.truncf %16 : vector<128x64xf32> to vector<128x64xbf16>
    %c0_13 = arith.constant 0 : index
    %c0_14 = arith.constant 0 : index
    %c0_15 = arith.constant 0 : index
    %18 = vector.load %arg8[%c0_13, %c0_14, %c0_15] : memref<1x128x64xbf16, #tpu.memory_space<vmem>>, vector<1x128x64xbf16>
    %19 = vector.shape_cast %18 : vector<1x128x64xbf16> to vector<128x64xbf16>
    %20 = vector.shape_cast %17 : vector<128x64xbf16> to vector<1x128x64xbf16>
    tpu.vector_store %arg8[%c0_13, %c0_14, %c0_15], %20 {strides = array<i32>} : memref<1x128x64xbf16, #tpu.memory_space<vmem>>, vector<1x128x64xbf16>,
    return
  }
  func.func @transform_0(%arg0: i32, %arg1: i32, %arg2: i32) -> (i32, i32, i32) {
    %c0_i32 = arith.constant 0 : i32
    %c0_i32_0 = arith.constant 0 : i32
    return %arg0, %arg1, %c0_i32 : i32, i32, i32
  }
  func.func @transform_1(%arg0: i32, %arg1: i32, %arg2: i32) -> (i32, i32, i32) {
    %c0_i32 = arith.constant 0 : i32
    %c0_i32_0 = arith.constant 0 : i32
    %c0_i32_1 = arith.constant 0 : i32
    return %c0_i32, %c0_i32_0, %arg2 : i32, i32, i32
  }
  func.func @transform_2(%arg0: i32, %arg1: i32, %arg2: i32) -> (i32, i32) {
    %c0_i32 = arith.constant 0 : i32
    %c0_i32_0 = arith.constant 0 : i32
    return %c0_i32, %arg2 : i32, i32
  }
  func.func @transform_3(%arg0: i32, %arg1: i32, %arg2: i32) -> (i32, i32) {
    %c0_i32 = arith.constant 0 : i32
    %c0_i32_0 = arith.constant 0 : i32
    return %c0_i32, %arg2 : i32, i32
  }
  func.func @transform_4(%arg0: i32, %arg1: i32, %arg2: i32) -> (i32, i32, i32) {
    %c0_i32 = arith.constant 0 : i32
    return %arg0, %arg1, %arg2 : i32, i32, i32
  }
  func.func @transform_5(%arg0: i32, %arg1: i32, %arg2: i32) -> (i32, i32, i32) {
    %c0_i32 = arith.constant 0 : i32
    return %arg0, %arg1, %arg2 : i32, i32, i32
  }
}

module attributes {stable_mosaic.version = 11 : i64} {
  func.func @kernel(%arg0: i32, %arg1: i32, %arg2: i32, %arg3: memref<1x96x64xbf16, #tpu.memory_space<vmem>>, %arg4: memref<3x64x32xbf16, #tpu.memory_space<vmem>>, %arg5: memref<1x32xf32, #tpu.memory_space<vmem>>, %arg6: memref<1x32xf32, #tpu.memory_space<vmem>>, %arg7: memref<1x64x32xbf16, #tpu.memory_space<vmem>>) attributes {dimension_semantics = [#tpu.dimension_semantics<parallel>, #tpu.dimension_semantics<parallel>, #tpu.dimension_semantics<parallel>], iteration_bounds = array<i64: 2, 1, 1>, scalar_prefetch = 0 : i64, scratch_operands = 0 : i64, tpu.core_type = #tpu.core_type<tc>, window_params = [{transform_indices = @transform_0, window_bounds = array<i64: 1, 96, 64>}, {transform_indices = @transform_1, window_bounds = array<i64: 3, 64, 32>}, {transform_indices = @transform_2, window_bounds = array<i64: 1, 32>}, {transform_indices = @transform_3, window_bounds = array<i64: 1, 32>}, {transform_indices = @transform_4, window_bounds = array<i64: 1, 64, 32>}]} {
    %c0 = arith.constant 0 : index
    %c0_0 = arith.constant 0 : index
    %c0_1 = arith.constant 0 : index
    %0 = vector.load %arg3[%c0, %c0_0, %c0_1] : memref<1x96x64xbf16, #tpu.memory_space<vmem>>, vector<1x64x64xbf16>
    %1 = vector.shape_cast %0 : vector<1x64x64xbf16> to vector<64x64xbf16>
    %c0_2 = arith.constant 0 : index
    %c0_3 = arith.constant 0 : index
    %c0_4 = arith.constant 0 : index
    %2 = vector.load %arg4[%c0_2, %c0_3, %c0_4] : memref<3x64x32xbf16, #tpu.memory_space<vmem>>, vector<1x64x32xbf16>
    %3 = vector.shape_cast %2 : vector<1x64x32xbf16> to vector<64x32xbf16>
    %cst = arith.constant dense<0.000000e+00> : vector<64x32xf32>
    %4 = tpu.matmul %1, %3, %cst {dimension_numbers = #tpu.dot_dimension_numbers<[1], [0], [0], [1], [0, 0, 1, 1], [], []>} : vector<64x64xbf16>, vector<64x32xbf16>, vector<64x32xf32> -> vector<64x32xf32>
    %c0_5 = arith.constant 0 : index
    %c16 = arith.constant 16 : index
    %c0_6 = arith.constant 0 : index
    %5 = vector.load %arg3[%c0_5, %c16, %c0_6] : memref<1x96x64xbf16, #tpu.memory_space<vmem>>, vector<1x64x64xbf16>
    %6 = vector.shape_cast %5 : vector<1x64x64xbf16> to vector<64x64xbf16>
    %c1 = arith.constant 1 : index
    %c0_7 = arith.constant 0 : index
    %c0_8 = arith.constant 0 : index
    %7 = vector.load %arg4[%c1, %c0_7, %c0_8] : memref<3x64x32xbf16, #tpu.memory_space<vmem>>, vector<1x64x32xbf16>
    %8 = vector.shape_cast %7 : vector<1x64x32xbf16> to vector<64x32xbf16>
    %cst_9 = arith.constant dense<0.000000e+00> : vector<64x32xf32>
    %9 = tpu.matmul %6, %8, %cst_9 {dimension_numbers = #tpu.dot_dimension_numbers<[1], [0], [0], [1], [0, 0, 1, 1], [], []>} : vector<64x64xbf16>, vector<64x32xbf16>, vector<64x32xf32> -> vector<64x32xf32>
    %10 = arith.addf %4, %9 : vector<64x32xf32>
    %c0_10 = arith.constant 0 : index
    %c32 = arith.constant 32 : index
    %c0_11 = arith.constant 0 : index
    %11 = vector.load %arg3[%c0_10, %c32, %c0_11] : memref<1x96x64xbf16, #tpu.memory_space<vmem>>, vector<1x64x64xbf16>
    %12 = vector.shape_cast %11 : vector<1x64x64xbf16> to vector<64x64xbf16>
    %c2 = arith.constant 2 : index
    %c0_12 = arith.constant 0 : index
    %c0_13 = arith.constant 0 : index
    %13 = vector.load %arg4[%c2, %c0_12, %c0_13] : memref<3x64x32xbf16, #tpu.memory_space<vmem>>, vector<1x64x32xbf16>
    %14 = vector.shape_cast %13 : vector<1x64x32xbf16> to vector<64x32xbf16>
    %cst_14 = arith.constant dense<0.000000e+00> : vector<64x32xf32>
    %15 = tpu.matmul %12, %14, %cst_14 {dimension_numbers = #tpu.dot_dimension_numbers<[1], [0], [0], [1], [0, 0, 1, 1], [], []>} : vector<64x64xbf16>, vector<64x32xbf16>, vector<64x32xf32> -> vector<64x32xf32>
    %16 = arith.addf %10, %15 : vector<64x32xf32>
    %c0_15 = arith.constant 0 : index
    %c0_16 = arith.constant 0 : index
    %17 = vector.load %arg5[%c0_15, %c0_16] : memref<1x32xf32, #tpu.memory_space<vmem>>, vector<1x32xf32>
    %18 = vector.broadcast %17 : vector<1x32xf32> to vector<64x32xf32>
    %19 = arith.mulf %16, %18 : vector<64x32xf32>
    %c0_17 = arith.constant 0 : index
    %c0_18 = arith.constant 0 : index
    %20 = vector.load %arg6[%c0_17, %c0_18] : memref<1x32xf32, #tpu.memory_space<vmem>>, vector<1x32xf32>
    %21 = vector.broadcast %20 : vector<1x32xf32> to vector<64x32xf32>
    %22 = arith.addf %19, %21 : vector<64x32xf32>
    %cst_19 = arith.constant 0.000000e+00 : f32
    %23 = vector.broadcast %cst_19 : f32 to vector<64x32xf32>
    %24 = arith.maximumf %22, %23 : vector<64x32xf32>
    %25 = arith.truncf %24 : vector<64x32xf32> to vector<64x32xbf16>
    %c0_20 = arith.constant 0 : index
    %c0_21 = arith.constant 0 : index
    %c0_22 = arith.constant 0 : index
    %26 = vector.load %arg7[%c0_20, %c0_21, %c0_22] : memref<1x64x32xbf16, #tpu.memory_space<vmem>>, vector<1x64x32xbf16>
    %27 = vector.shape_cast %26 : vector<1x64x32xbf16> to vector<64x32xbf16>
    %28 = vector.shape_cast %25 : vector<64x32xbf16> to vector<1x64x32xbf16>
    tpu.vector_store %arg7[%c0_20, %c0_21, %c0_22], %28 {strides = array<i32>} : memref<1x64x32xbf16, #tpu.memory_space<vmem>>, vector<1x64x32xbf16>,
    return
  }
  func.func @transform_0(%arg0: i32, %arg1: i32, %arg2: i32) -> (i32, i32, i32) {
    %c0_i32 = arith.constant 0 : i32
    %c0_i32_0 = arith.constant 0 : i32
    %c0_i32_1 = arith.constant 0 : i32
    return %arg0, %c0_i32, %c0_i32_0 : i32, i32, i32
  }
  func.func @transform_1(%arg0: i32, %arg1: i32, %arg2: i32) -> (i32, i32, i32) {
    %c0_i32 = arith.constant 0 : i32
    %c0_i32_0 = arith.constant 0 : i32
    %c0_i32_1 = arith.constant 0 : i32
    return %c0_i32, %c0_i32_0, %arg2 : i32, i32, i32
  }
  func.func @transform_2(%arg0: i32, %arg1: i32, %arg2: i32) -> (i32, i32) {
    %c0_i32 = arith.constant 0 : i32
    %c0_i32_0 = arith.constant 0 : i32
    return %c0_i32, %arg2 : i32, i32
  }
  func.func @transform_3(%arg0: i32, %arg1: i32, %arg2: i32) -> (i32, i32) {
    %c0_i32 = arith.constant 0 : i32
    %c0_i32_0 = arith.constant 0 : i32
    return %c0_i32, %arg2 : i32, i32
  }
  func.func @transform_4(%arg0: i32, %arg1: i32, %arg2: i32) -> (i32, i32, i32) {
    %c0_i32 = arith.constant 0 : i32
    return %arg0, %arg1, %arg2 : i32, i32, i32
  }
}

module attributes {stable_mosaic.version = 11 : i64} {
  func.func @kernel(%arg0: i32, %arg1: i32, %arg2: i32, %arg3: memref<1x36x32xbf16, #tpu.memory_space<vmem>>, %arg4: memref<9x32x32xbf16, #tpu.memory_space<vmem>>, %arg5: memref<1x32xf32, #tpu.memory_space<vmem>>, %arg6: memref<1x32xf32, #tpu.memory_space<vmem>>, %arg7: memref<1x6x32xbf16, #tpu.memory_space<vmem>>) attributes {dimension_semantics = [#tpu.dimension_semantics<parallel>, #tpu.dimension_semantics<parallel>, #tpu.dimension_semantics<parallel>], iteration_bounds = array<i64: 8, 1, 1>, scalar_prefetch = 0 : i64, scratch_operands = 0 : i64, tpu.core_type = #tpu.core_type<tc>, window_params = [{transform_indices = @transform_0, window_bounds = array<i64: 1, 36, 32>}, {transform_indices = @transform_1, window_bounds = array<i64: 9, 32, 32>}, {transform_indices = @transform_2, window_bounds = array<i64: 1, 32>}, {transform_indices = @transform_3, window_bounds = array<i64: 1, 32>}, {transform_indices = @transform_4, window_bounds = array<i64: 1, 6, 32>}]} {
    %c0 = arith.constant 0 : index
    %c0_0 = arith.constant 0 : index
    %c0_1 = arith.constant 0 : index
    %0 = vector.load %arg3[%c0, %c0_0, %c0_1] : memref<1x36x32xbf16, #tpu.memory_space<vmem>>, vector<1x6x32xbf16>
    %1 = vector.shape_cast %0 : vector<1x6x32xbf16> to vector<6x32xbf16>
    %c0_2 = arith.constant 0 : index
    %c0_3 = arith.constant 0 : index
    %c0_4 = arith.constant 0 : index
    %2 = vector.load %arg4[%c0_2, %c0_3, %c0_4] : memref<9x32x32xbf16, #tpu.memory_space<vmem>>, vector<1x32x32xbf16>
    %3 = vector.shape_cast %2 : vector<1x32x32xbf16> to vector<32x32xbf16>
    %cst = arith.constant dense<0.000000e+00> : vector<6x32xf32>
    %4 = tpu.matmul %1, %3, %cst {dimension_numbers = #tpu.dot_dimension_numbers<[1], [0], [0], [1], [0, 0, 1, 1], [], []>} : vector<6x32xbf16>, vector<32x32xbf16>, vector<6x32xf32> -> vector<6x32xf32>
    %c0_5 = arith.constant 0 : index
    %c9 = arith.constant 9 : index
    %c0_6 = arith.constant 0 : index
    %5 = vector.load %arg3[%c0_5, %c9, %c0_6] : memref<1x36x32xbf16, #tpu.memory_space<vmem>>, vector<1x6x32xbf16>
    %6 = vector.shape_cast %5 : vector<1x6x32xbf16> to vector<6x32xbf16>
    %c1 = arith.constant 1 : index
    %c0_7 = arith.constant 0 : index
    %c0_8 = arith.constant 0 : index
    %7 = vector.load %arg4[%c1, %c0_7, %c0_8] : memref<9x32x32xbf16, #tpu.memory_space<vmem>>, vector<1x32x32xbf16>
    %8 = vector.shape_cast %7 : vector<1x32x32xbf16> to vector<32x32xbf16>
    %cst_9 = arith.constant dense<0.000000e+00> : vector<6x32xf32>
    %9 = tpu.matmul %6, %8, %cst_9 {dimension_numbers = #tpu.dot_dimension_numbers<[1], [0], [0], [1], [0, 0, 1, 1], [], []>} : vector<6x32xbf16>, vector<32x32xbf16>, vector<6x32xf32> -> vector<6x32xf32>
    %10 = arith.addf %4, %9 : vector<6x32xf32>
    %c0_10 = arith.constant 0 : index
    %c1_11 = arith.constant 1 : index
    %c0_12 = arith.constant 0 : index
    %11 = vector.load %arg3[%c0_10, %c1_11, %c0_12] : memref<1x36x32xbf16, #tpu.memory_space<vmem>>, vector<1x6x32xbf16>
    %12 = vector.shape_cast %11 : vector<1x6x32xbf16> to vector<6x32xbf16>
    %c2 = arith.constant 2 : index
    %c0_13 = arith.constant 0 : index
    %c0_14 = arith.constant 0 : index
    %13 = vector.load %arg4[%c2, %c0_13, %c0_14] : memref<9x32x32xbf16, #tpu.memory_space<vmem>>, vector<1x32x32xbf16>
    %14 = vector.shape_cast %13 : vector<1x32x32xbf16> to vector<32x32xbf16>
    %cst_15 = arith.constant dense<0.000000e+00> : vector<6x32xf32>
    %15 = tpu.matmul %12, %14, %cst_15 {dimension_numbers = #tpu.dot_dimension_numbers<[1], [0], [0], [1], [0, 0, 1, 1], [], []>} : vector<6x32xbf16>, vector<32x32xbf16>, vector<6x32xf32> -> vector<6x32xf32>
    %16 = arith.addf %10, %15 : vector<6x32xf32>
    %c0_16 = arith.constant 0 : index
    %c18 = arith.constant 18 : index
    %c0_17 = arith.constant 0 : index
    %17 = vector.load %arg3[%c0_16, %c18, %c0_17] : memref<1x36x32xbf16, #tpu.memory_space<vmem>>, vector<1x6x32xbf16>
    %18 = vector.shape_cast %17 : vector<1x6x32xbf16> to vector<6x32xbf16>
    %c3 = arith.constant 3 : index
    %c0_18 = arith.constant 0 : index
    %c0_19 = arith.constant 0 : index
    %19 = vector.load %arg4[%c3, %c0_18, %c0_19] : memref<9x32x32xbf16, #tpu.memory_space<vmem>>, vector<1x32x32xbf16>
    %20 = vector.shape_cast %19 : vector<1x32x32xbf16> to vector<32x32xbf16>
    %cst_20 = arith.constant dense<0.000000e+00> : vector<6x32xf32>
    %21 = tpu.matmul %18, %20, %cst_20 {dimension_numbers = #tpu.dot_dimension_numbers<[1], [0], [0], [1], [0, 0, 1, 1], [], []>} : vector<6x32xbf16>, vector<32x32xbf16>, vector<6x32xf32> -> vector<6x32xf32>
    %22 = arith.addf %16, %21 : vector<6x32xf32>
    %c0_21 = arith.constant 0 : index
    %c27 = arith.constant 27 : index
    %c0_22 = arith.constant 0 : index
    %23 = vector.load %arg3[%c0_21, %c27, %c0_22] : memref<1x36x32xbf16, #tpu.memory_space<vmem>>, vector<1x6x32xbf16>
    %24 = vector.shape_cast %23 : vector<1x6x32xbf16> to vector<6x32xbf16>
    %c4 = arith.constant 4 : index
    %c0_23 = arith.constant 0 : index
    %c0_24 = arith.constant 0 : index
    %25 = vector.load %arg4[%c4, %c0_23, %c0_24] : memref<9x32x32xbf16, #tpu.memory_space<vmem>>, vector<1x32x32xbf16>
    %26 = vector.shape_cast %25 : vector<1x32x32xbf16> to vector<32x32xbf16>
    %cst_25 = arith.constant dense<0.000000e+00> : vector<6x32xf32>
    %27 = tpu.matmul %24, %26, %cst_25 {dimension_numbers = #tpu.dot_dimension_numbers<[1], [0], [0], [1], [0, 0, 1, 1], [], []>} : vector<6x32xbf16>, vector<32x32xbf16>, vector<6x32xf32> -> vector<6x32xf32>
    %28 = arith.addf %22, %27 : vector<6x32xf32>
    %c0_26 = arith.constant 0 : index
    %c19 = arith.constant 19 : index
    %c0_27 = arith.constant 0 : index
    %29 = vector.load %arg3[%c0_26, %c19, %c0_27] : memref<1x36x32xbf16, #tpu.memory_space<vmem>>, vector<1x6x32xbf16>
    %30 = vector.shape_cast %29 : vector<1x6x32xbf16> to vector<6x32xbf16>
    %c5 = arith.constant 5 : index
    %c0_28 = arith.constant 0 : index
    %c0_29 = arith.constant 0 : index
    %31 = vector.load %arg4[%c5, %c0_28, %c0_29] : memref<9x32x32xbf16, #tpu.memory_space<vmem>>, vector<1x32x32xbf16>
    %32 = vector.shape_cast %31 : vector<1x32x32xbf16> to vector<32x32xbf16>
    %cst_30 = arith.constant dense<0.000000e+00> : vector<6x32xf32>
    %33 = tpu.matmul %30, %32, %cst_30 {dimension_numbers = #tpu.dot_dimension_numbers<[1], [0], [0], [1], [0, 0, 1, 1], [], []>} : vector<6x32xbf16>, vector<32x32xbf16>, vector<6x32xf32> -> vector<6x32xf32>
    %34 = arith.addf %28, %33 : vector<6x32xf32>
    %c0_31 = arith.constant 0 : index
    %c3_32 = arith.constant 3 : index
    %c0_33 = arith.constant 0 : index
    %35 = vector.load %arg3[%c0_31, %c3_32, %c0_33] : memref<1x36x32xbf16, #tpu.memory_space<vmem>>, vector<1x6x32xbf16>
    %36 = vector.shape_cast %35 : vector<1x6x32xbf16> to vector<6x32xbf16>
    %c6 = arith.constant 6 : index
    %c0_34 = arith.constant 0 : index
    %c0_35 = arith.constant 0 : index
    %37 = vector.load %arg4[%c6, %c0_34, %c0_35] : memref<9x32x32xbf16, #tpu.memory_space<vmem>>, vector<1x32x32xbf16>
    %38 = vector.shape_cast %37 : vector<1x32x32xbf16> to vector<32x32xbf16>
    %cst_36 = arith.constant dense<0.000000e+00> : vector<6x32xf32>
    %39 = tpu.matmul %36, %38, %cst_36 {dimension_numbers = #tpu.dot_dimension_numbers<[1], [0], [0], [1], [0, 0, 1, 1], [], []>} : vector<6x32xbf16>, vector<32x32xbf16>, vector<6x32xf32> -> vector<6x32xf32>
    %40 = arith.addf %34, %39 : vector<6x32xf32>
    %c0_37 = arith.constant 0 : index
    %c12 = arith.constant 12 : index
    %c0_38 = arith.constant 0 : index
    %41 = vector.load %arg3[%c0_37, %c12, %c0_38] : memref<1x36x32xbf16, #tpu.memory_space<vmem>>, vector<1x6x32xbf16>
    %42 = vector.shape_cast %41 : vector<1x6x32xbf16> to vector<6x32xbf16>
    %c7 = arith.constant 7 : index
    %c0_39 = arith.constant 0 : index
    %c0_40 = arith.constant 0 : index
    %43 = vector.load %arg4[%c7, %c0_39, %c0_40] : memref<9x32x32xbf16, #tpu.memory_space<vmem>>, vector<1x32x32xbf16>
    %44 = vector.shape_cast %43 : vector<1x32x32xbf16> to vector<32x32xbf16>
    %cst_41 = arith.constant dense<0.000000e+00> : vector<6x32xf32>
    %45 = tpu.matmul %42, %44, %cst_41 {dimension_numbers = #tpu.dot_dimension_numbers<[1], [0], [0], [1], [0, 0, 1, 1], [], []>} : vector<6x32xbf16>, vector<32x32xbf16>, vector<6x32xf32> -> vector<6x32xf32>
    %46 = arith.addf %40, %45 : vector<6x32xf32>
    %c0_42 = arith.constant 0 : index
    %c4_43 = arith.constant 4 : index
    %c0_44 = arith.constant 0 : index
    %47 = vector.load %arg3[%c0_42, %c4_43, %c0_44] : memref<1x36x32xbf16, #tpu.memory_space<vmem>>, vector<1x6x32xbf16>
    %48 = vector.shape_cast %47 : vector<1x6x32xbf16> to vector<6x32xbf16>
    %c8 = arith.constant 8 : index
    %c0_45 = arith.constant 0 : index
    %c0_46 = arith.constant 0 : index
    %49 = vector.load %arg4[%c8, %c0_45, %c0_46] : memref<9x32x32xbf16, #tpu.memory_space<vmem>>, vector<1x32x32xbf16>
    %50 = vector.shape_cast %49 : vector<1x32x32xbf16> to vector<32x32xbf16>
    %cst_47 = arith.constant dense<0.000000e+00> : vector<6x32xf32>
    %51 = tpu.matmul %48, %50, %cst_47 {dimension_numbers = #tpu.dot_dimension_numbers<[1], [0], [0], [1], [0, 0, 1, 1], [], []>} : vector<6x32xbf16>, vector<32x32xbf16>, vector<6x32xf32> -> vector<6x32xf32>
    %52 = arith.addf %46, %51 : vector<6x32xf32>
    %c0_48 = arith.constant 0 : index
    %c0_49 = arith.constant 0 : index
    %53 = vector.load %arg5[%c0_48, %c0_49] : memref<1x32xf32, #tpu.memory_space<vmem>>, vector<1x32xf32>
    %54 = vector.broadcast %53 : vector<1x32xf32> to vector<6x32xf32>
    %55 = arith.mulf %52, %54 : vector<6x32xf32>
    %c0_50 = arith.constant 0 : index
    %c0_51 = arith.constant 0 : index
    %56 = vector.load %arg6[%c0_50, %c0_51] : memref<1x32xf32, #tpu.memory_space<vmem>>, vector<1x32xf32>
    %57 = vector.broadcast %56 : vector<1x32xf32> to vector<6x32xf32>
    %58 = arith.addf %55, %57 : vector<6x32xf32>
    %cst_52 = arith.constant 0.000000e+00 : f32
    %59 = vector.broadcast %cst_52 : f32 to vector<6x32xf32>
    %60 = arith.maximumf %58, %59 : vector<6x32xf32>
    %61 = arith.truncf %60 : vector<6x32xf32> to vector<6x32xbf16>
    %c0_53 = arith.constant 0 : index
    %c0_54 = arith.constant 0 : index
    %c0_55 = arith.constant 0 : index
    %62 = vector.load %arg7[%c0_53, %c0_54, %c0_55] : memref<1x6x32xbf16, #tpu.memory_space<vmem>>, vector<1x6x32xbf16>
    %63 = vector.shape_cast %62 : vector<1x6x32xbf16> to vector<6x32xbf16>
    %64 = vector.shape_cast %61 : vector<6x32xbf16> to vector<1x6x32xbf16>
    tpu.vector_store %arg7[%c0_53, %c0_54, %c0_55], %64 {strides = array<i32>} : memref<1x6x32xbf16, #tpu.memory_space<vmem>>, vector<1x6x32xbf16>,
    return
  }
  func.func @transform_0(%arg0: i32, %arg1: i32, %arg2: i32) -> (i32, i32, i32) {
    %c0_i32 = arith.constant 0 : i32
    %c0_i32_0 = arith.constant 0 : i32
    %c0_i32_1 = arith.constant 0 : i32
    return %arg0, %c0_i32, %c0_i32_0 : i32, i32, i32
  }
  func.func @transform_1(%arg0: i32, %arg1: i32, %arg2: i32) -> (i32, i32, i32) {
    %c0_i32 = arith.constant 0 : i32
    %c0_i32_0 = arith.constant 0 : i32
    %c0_i32_1 = arith.constant 0 : i32
    return %c0_i32, %c0_i32_0, %arg2 : i32, i32, i32
  }
  func.func @transform_2(%arg0: i32, %arg1: i32, %arg2: i32) -> (i32, i32) {
    %c0_i32 = arith.constant 0 : i32
    %c0_i32_0 = arith.constant 0 : i32
    return %c0_i32, %arg2 : i32, i32
  }
  func.func @transform_3(%arg0: i32, %arg1: i32, %arg2: i32) -> (i32, i32) {
    %c0_i32 = arith.constant 0 : i32
    %c0_i32_0 = arith.constant 0 : i32
    return %c0_i32, %arg2 : i32, i32
  }
  func.func @transform_4(%arg0: i32, %arg1: i32, %arg2: i32) -> (i32, i32, i32) {
    %c0_i32 = arith.constant 0 : i32
    return %arg0, %arg1, %arg2 : i32, i32, i32
  }
}

module attributes {stable_mosaic.version = 11 : i64} {
  func.func @kernel(%arg0: i32, %arg1: i32, %arg2: i32, %arg3: memref<1x32x64xbf16, #tpu.memory_space<vmem>>, %arg4: memref<1x64x128xbf16, #tpu.memory_space<vmem>>, %arg5: memref<1x128xf32, #tpu.memory_space<vmem>>, %arg6: memref<1x128xf32, #tpu.memory_space<vmem>>, %arg7: memref<1x32x128xbf16, #tpu.memory_space<vmem>>) attributes {dimension_semantics = [#tpu.dimension_semantics<parallel>, #tpu.dimension_semantics<parallel>, #tpu.dimension_semantics<parallel>], iteration_bounds = array<i64: 1, 1, 1>, scalar_prefetch = 0 : i64, scratch_operands = 0 : i64, tpu.core_type = #tpu.core_type<tc>, window_params = [{transform_indices = @transform_0, window_bounds = array<i64: 1, 32, 64>}, {transform_indices = @transform_1, window_bounds = array<i64: 1, 64, 128>}, {transform_indices = @transform_2, window_bounds = array<i64: 1, 128>}, {transform_indices = @transform_3, window_bounds = array<i64: 1, 128>}, {transform_indices = @transform_4, window_bounds = array<i64: 1, 32, 128>}]} {
    %c0 = arith.constant 0 : index
    %c0_0 = arith.constant 0 : index
    %c0_1 = arith.constant 0 : index
    %0 = vector.load %arg3[%c0, %c0_0, %c0_1] : memref<1x32x64xbf16, #tpu.memory_space<vmem>>, vector<1x32x64xbf16>
    %1 = vector.shape_cast %0 : vector<1x32x64xbf16> to vector<32x64xbf16>
    %c0_2 = arith.constant 0 : index
    %c0_3 = arith.constant 0 : index
    %c0_4 = arith.constant 0 : index
    %2 = vector.load %arg4[%c0_2, %c0_3, %c0_4] : memref<1x64x128xbf16, #tpu.memory_space<vmem>>, vector<1x64x128xbf16>
    %3 = vector.shape_cast %2 : vector<1x64x128xbf16> to vector<64x128xbf16>
    %cst = arith.constant dense<0.000000e+00> : vector<32x128xf32>
    %4 = tpu.matmul %1, %3, %cst {dimension_numbers = #tpu.dot_dimension_numbers<[1], [0], [0], [1], [0, 0, 1, 1], [], []>} : vector<32x64xbf16>, vector<64x128xbf16>, vector<32x128xf32> -> vector<32x128xf32>
    %c0_5 = arith.constant 0 : index
    %c0_6 = arith.constant 0 : index
    %5 = vector.load %arg5[%c0_5, %c0_6] : memref<1x128xf32, #tpu.memory_space<vmem>>, vector<1x128xf32>
    %6 = vector.broadcast %5 : vector<1x128xf32> to vector<32x128xf32>
    %7 = arith.mulf %4, %6 : vector<32x128xf32>
    %c0_7 = arith.constant 0 : index
    %c0_8 = arith.constant 0 : index
    %8 = vector.load %arg6[%c0_7, %c0_8] : memref<1x128xf32, #tpu.memory_space<vmem>>, vector<1x128xf32>
    %9 = vector.broadcast %8 : vector<1x128xf32> to vector<32x128xf32>
    %10 = arith.addf %7, %9 : vector<32x128xf32>
    %11 = arith.truncf %10 : vector<32x128xf32> to vector<32x128xbf16>
    %c0_9 = arith.constant 0 : index
    %c0_10 = arith.constant 0 : index
    %c0_11 = arith.constant 0 : index
    %12 = vector.load %arg7[%c0_9, %c0_10, %c0_11] : memref<1x32x128xbf16, #tpu.memory_space<vmem>>, vector<1x32x128xbf16>
    %13 = vector.shape_cast %12 : vector<1x32x128xbf16> to vector<32x128xbf16>
    %14 = vector.shape_cast %11 : vector<32x128xbf16> to vector<1x32x128xbf16>
    tpu.vector_store %arg7[%c0_9, %c0_10, %c0_11], %14 {strides = array<i32>} : memref<1x32x128xbf16, #tpu.memory_space<vmem>>, vector<1x32x128xbf16>,
    return
  }
  func.func @transform_0(%arg0: i32, %arg1: i32, %arg2: i32) -> (i32, i32, i32) {
    %c0_i32 = arith.constant 0 : i32
    %c0_i32_0 = arith.constant 0 : i32
    return %arg0, %arg1, %c0_i32 : i32, i32, i32
  }
  func.func @transform_1(%arg0: i32, %arg1: i32, %arg2: i32) -> (i32, i32, i32) {
    %c0_i32 = arith.constant 0 : i32
    %c0_i32_0 = arith.constant 0 : i32
    %c0_i32_1 = arith.constant 0 : i32
    return %c0_i32, %c0_i32_0, %arg2 : i32, i32, i32
  }
  func.func @transform_2(%arg0: i32, %arg1: i32, %arg2: i32) -> (i32, i32) {
    %c0_i32 = arith.constant 0 : i32
    %c0_i32_0 = arith.constant 0 : i32
    return %c0_i32, %arg2 : i32, i32
  }
  func.func @transform_3(%arg0: i32, %arg1: i32, %arg2: i32) -> (i32, i32) {
    %c0_i32 = arith.constant 0 : i32
    %c0_i32_0 = arith.constant 0 : i32
    return %c0_i32, %arg2 : i32, i32
  }
  func.func @transform_4(%arg0: i32, %arg1: i32, %arg2: i32) -> (i32, i32, i32) {
    %c0_i32 = arith.constant 0 : i32
    return %arg0, %arg1, %arg2 : i32, i32, i32
  }
}

module attributes {stable_mosaic.version = 11 : i64} {
  func.func @kernel(%arg0: i32, %arg1: i32, %arg2: i32, %arg3: memref<1x32x32xbf16, #tpu.memory_space<vmem>>, %arg4: memref<1x32x128xbf16, #tpu.memory_space<vmem>>, %arg5: memref<1x128xf32, #tpu.memory_space<vmem>>, %arg6: memref<1x128xf32, #tpu.memory_space<vmem>>, %arg7: memref<1x32x128xbf16, #tpu.memory_space<vmem>>, %arg8: memref<1x32x128xbf16, #tpu.memory_space<vmem>>) attributes {dimension_semantics = [#tpu.dimension_semantics<parallel>, #tpu.dimension_semantics<parallel>, #tpu.dimension_semantics<parallel>], iteration_bounds = array<i64: 1, 1, 1>, scalar_prefetch = 0 : i64, scratch_operands = 0 : i64, tpu.core_type = #tpu.core_type<tc>, window_params = [{transform_indices = @transform_0, window_bounds = array<i64: 1, 32, 32>}, {transform_indices = @transform_1, window_bounds = array<i64: 1, 32, 128>}, {transform_indices = @transform_2, window_bounds = array<i64: 1, 128>}, {transform_indices = @transform_3, window_bounds = array<i64: 1, 128>}, {transform_indices = @transform_4, window_bounds = array<i64: 1, 32, 128>}, {transform_indices = @transform_5, window_bounds = array<i64: 1, 32, 128>}]} {
    %c0 = arith.constant 0 : index
    %c0_0 = arith.constant 0 : index
    %c0_1 = arith.constant 0 : index
    %0 = vector.load %arg3[%c0, %c0_0, %c0_1] : memref<1x32x32xbf16, #tpu.memory_space<vmem>>, vector<1x32x32xbf16>
    %1 = vector.shape_cast %0 : vector<1x32x32xbf16> to vector<32x32xbf16>
    %c0_2 = arith.constant 0 : index
    %c0_3 = arith.constant 0 : index
    %c0_4 = arith.constant 0 : index
    %2 = vector.load %arg4[%c0_2, %c0_3, %c0_4] : memref<1x32x128xbf16, #tpu.memory_space<vmem>>, vector<1x32x128xbf16>
    %3 = vector.shape_cast %2 : vector<1x32x128xbf16> to vector<32x128xbf16>
    %cst = arith.constant dense<0.000000e+00> : vector<32x128xf32>
    %4 = tpu.matmul %1, %3, %cst {dimension_numbers = #tpu.dot_dimension_numbers<[1], [0], [0], [1], [0, 0, 1, 1], [], []>} : vector<32x32xbf16>, vector<32x128xbf16>, vector<32x128xf32> -> vector<32x128xf32>
    %c0_5 = arith.constant 0 : index
    %c0_6 = arith.constant 0 : index
    %5 = vector.load %arg5[%c0_5, %c0_6] : memref<1x128xf32, #tpu.memory_space<vmem>>, vector<1x128xf32>
    %6 = vector.broadcast %5 : vector<1x128xf32> to vector<32x128xf32>
    %7 = arith.mulf %4, %6 : vector<32x128xf32>
    %c0_7 = arith.constant 0 : index
    %c0_8 = arith.constant 0 : index
    %8 = vector.load %arg6[%c0_7, %c0_8] : memref<1x128xf32, #tpu.memory_space<vmem>>, vector<1x128xf32>
    %9 = vector.broadcast %8 : vector<1x128xf32> to vector<32x128xf32>
    %10 = arith.addf %7, %9 : vector<32x128xf32>
    %c0_9 = arith.constant 0 : index
    %c0_10 = arith.constant 0 : index
    %c0_11 = arith.constant 0 : index
    %11 = vector.load %arg7[%c0_9, %c0_10, %c0_11] : memref<1x32x128xbf16, #tpu.memory_space<vmem>>, vector<1x32x128xbf16>
    %12 = vector.shape_cast %11 : vector<1x32x128xbf16> to vector<32x128xbf16>
    %13 = arith.extf %12 : vector<32x128xbf16> to vector<32x128xf32>
    %14 = arith.addf %10, %13 : vector<32x128xf32>
    %cst_12 = arith.constant 0.000000e+00 : f32
    %15 = vector.broadcast %cst_12 : f32 to vector<32x128xf32>
    %16 = arith.maximumf %14, %15 : vector<32x128xf32>
    %17 = arith.truncf %16 : vector<32x128xf32> to vector<32x128xbf16>
    %c0_13 = arith.constant 0 : index
    %c0_14 = arith.constant 0 : index
    %c0_15 = arith.constant 0 : index
    %18 = vector.load %arg8[%c0_13, %c0_14, %c0_15] : memref<1x32x128xbf16, #tpu.memory_space<vmem>>, vector<1x32x128xbf16>
    %19 = vector.shape_cast %18 : vector<1x32x128xbf16> to vector<32x128xbf16>
    %20 = vector.shape_cast %17 : vector<32x128xbf16> to vector<1x32x128xbf16>
    tpu.vector_store %arg8[%c0_13, %c0_14, %c0_15], %20 {strides = array<i32>} : memref<1x32x128xbf16, #tpu.memory_space<vmem>>, vector<1x32x128xbf16>,
    return
  }
  func.func @transform_0(%arg0: i32, %arg1: i32, %arg2: i32) -> (i32, i32, i32) {
    %c0_i32 = arith.constant 0 : i32
    %c0_i32_0 = arith.constant 0 : i32
    return %arg0, %arg1, %c0_i32 : i32, i32, i32
  }
  func.func @transform_1(%arg0: i32, %arg1: i32, %arg2: i32) -> (i32, i32, i32) {
    %c0_i32 = arith.constant 0 : i32
    %c0_i32_0 = arith.constant 0 : i32
    %c0_i32_1 = arith.constant 0 : i32
    return %c0_i32, %c0_i32_0, %arg2 : i32, i32, i32
  }
  func.func @transform_2(%arg0: i32, %arg1: i32, %arg2: i32) -> (i32, i32) {
    %c0_i32 = arith.constant 0 : i32
    %c0_i32_0 = arith.constant 0 : i32
    return %c0_i32, %arg2 : i32, i32
  }
  func.func @transform_3(%arg0: i32, %arg1: i32, %arg2: i32) -> (i32, i32) {
    %c0_i32 = arith.constant 0 : i32
    %c0_i32_0 = arith.constant 0 : i32
    return %c0_i32, %arg2 : i32, i32
  }
  func.func @transform_4(%arg0: i32, %arg1: i32, %arg2: i32) -> (i32, i32, i32) {
    %c0_i32 = arith.constant 0 : i32
    return %arg0, %arg1, %arg2 : i32, i32, i32
  }
  func.func @transform_5(%arg0: i32, %arg1: i32, %arg2: i32) -> (i32, i32, i32) {
    %c0_i32 = arith.constant 0 : i32
    return %arg0, %arg1, %arg2 : i32, i32, i32
  }
}

module attributes {stable_mosaic.version = 11 : i64} {
  func.func @kernel(%arg0: i32, %arg1: i32, %arg2: i32, %arg3: memref<1x24x128xbf16, #tpu.memory_space<vmem>>, %arg4: memref<3x128x64xbf16, #tpu.memory_space<vmem>>, %arg5: memref<1x64xf32, #tpu.memory_space<vmem>>, %arg6: memref<1x64xf32, #tpu.memory_space<vmem>>, %arg7: memref<1x16x64xbf16, #tpu.memory_space<vmem>>) attributes {dimension_semantics = [#tpu.dimension_semantics<parallel>, #tpu.dimension_semantics<parallel>, #tpu.dimension_semantics<parallel>], iteration_bounds = array<i64: 2, 1, 1>, scalar_prefetch = 0 : i64, scratch_operands = 0 : i64, tpu.core_type = #tpu.core_type<tc>, window_params = [{transform_indices = @transform_0, window_bounds = array<i64: 1, 24, 128>}, {transform_indices = @transform_1, window_bounds = array<i64: 3, 128, 64>}, {transform_indices = @transform_2, window_bounds = array<i64: 1, 64>}, {transform_indices = @transform_3, window_bounds = array<i64: 1, 64>}, {transform_indices = @transform_4, window_bounds = array<i64: 1, 16, 64>}]} {
    %c0 = arith.constant 0 : index
    %c0_0 = arith.constant 0 : index
    %c0_1 = arith.constant 0 : index
    %0 = vector.load %arg3[%c0, %c0_0, %c0_1] : memref<1x24x128xbf16, #tpu.memory_space<vmem>>, vector<1x16x128xbf16>
    %1 = vector.shape_cast %0 : vector<1x16x128xbf16> to vector<16x128xbf16>
    %c0_2 = arith.constant 0 : index
    %c0_3 = arith.constant 0 : index
    %c0_4 = arith.constant 0 : index
    %2 = vector.load %arg4[%c0_2, %c0_3, %c0_4] : memref<3x128x64xbf16, #tpu.memory_space<vmem>>, vector<1x128x64xbf16>
    %3 = vector.shape_cast %2 : vector<1x128x64xbf16> to vector<128x64xbf16>
    %cst = arith.constant dense<0.000000e+00> : vector<16x64xf32>
    %4 = tpu.matmul %1, %3, %cst {dimension_numbers = #tpu.dot_dimension_numbers<[1], [0], [0], [1], [0, 0, 1, 1], [], []>} : vector<16x128xbf16>, vector<128x64xbf16>, vector<16x64xf32> -> vector<16x64xf32>
    %c0_5 = arith.constant 0 : index
    %c4 = arith.constant 4 : index
    %c0_6 = arith.constant 0 : index
    %5 = vector.load %arg3[%c0_5, %c4, %c0_6] : memref<1x24x128xbf16, #tpu.memory_space<vmem>>, vector<1x16x128xbf16>
    %6 = vector.shape_cast %5 : vector<1x16x128xbf16> to vector<16x128xbf16>
    %c1 = arith.constant 1 : index
    %c0_7 = arith.constant 0 : index
    %c0_8 = arith.constant 0 : index
    %7 = vector.load %arg4[%c1, %c0_7, %c0_8] : memref<3x128x64xbf16, #tpu.memory_space<vmem>>, vector<1x128x64xbf16>
    %8 = vector.shape_cast %7 : vector<1x128x64xbf16> to vector<128x64xbf16>
    %cst_9 = arith.constant dense<0.000000e+00> : vector<16x64xf32>
    %9 = tpu.matmul %6, %8, %cst_9 {dimension_numbers = #tpu.dot_dimension_numbers<[1], [0], [0], [1], [0, 0, 1, 1], [], []>} : vector<16x128xbf16>, vector<128x64xbf16>, vector<16x64xf32> -> vector<16x64xf32>
    %10 = arith.addf %4, %9 : vector<16x64xf32>
    %c0_10 = arith.constant 0 : index
    %c8 = arith.constant 8 : index
    %c0_11 = arith.constant 0 : index
    %11 = vector.load %arg3[%c0_10, %c8, %c0_11] : memref<1x24x128xbf16, #tpu.memory_space<vmem>>, vector<1x16x128xbf16>
    %12 = vector.shape_cast %11 : vector<1x16x128xbf16> to vector<16x128xbf16>
    %c2 = arith.constant 2 : index
    %c0_12 = arith.constant 0 : index
    %c0_13 = arith.constant 0 : index
    %13 = vector.load %arg4[%c2, %c0_12, %c0_13] : memref<3x128x64xbf16, #tpu.memory_space<vmem>>, vector<1x128x64xbf16>
    %14 = vector.shape_cast %13 : vector<1x128x64xbf16> to vector<128x64xbf16>
    %cst_14 = arith.constant dense<0.000000e+00> : vector<16x64xf32>
    %15 = tpu.matmul %12, %14, %cst_14 {dimension_numbers = #tpu.dot_dimension_numbers<[1], [0], [0], [1], [0, 0, 1, 1], [], []>} : vector<16x128xbf16>, vector<128x64xbf16>, vector<16x64xf32> -> vector<16x64xf32>
    %16 = arith.addf %10, %15 : vector<16x64xf32>
    %c0_15 = arith.constant 0 : index
    %c0_16 = arith.constant 0 : index
    %17 = vector.load %arg5[%c0_15, %c0_16] : memref<1x64xf32, #tpu.memory_space<vmem>>, vector<1x64xf32>
    %18 = vector.broadcast %17 : vector<1x64xf32> to vector<16x64xf32>
    %19 = arith.mulf %16, %18 : vector<16x64xf32>
    %c0_17 = arith.constant 0 : index
    %c0_18 = arith.constant 0 : index
    %20 = vector.load %arg6[%c0_17, %c0_18] : memref<1x64xf32, #tpu.memory_space<vmem>>, vector<1x64xf32>
    %21 = vector.broadcast %20 : vector<1x64xf32> to vector<16x64xf32>
    %22 = arith.addf %19, %21 : vector<16x64xf32>
    %cst_19 = arith.constant 0.000000e+00 : f32
    %23 = vector.broadcast %cst_19 : f32 to vector<16x64xf32>
    %24 = arith.maximumf %22, %23 : vector<16x64xf32>
    %25 = arith.truncf %24 : vector<16x64xf32> to vector<16x64xbf16>
    %c0_20 = arith.constant 0 : index
    %c0_21 = arith.constant 0 : index
    %c0_22 = arith.constant 0 : index
    %26 = vector.load %arg7[%c0_20, %c0_21, %c0_22] : memref<1x16x64xbf16, #tpu.memory_space<vmem>>, vector<1x16x64xbf16>
    %27 = vector.shape_cast %26 : vector<1x16x64xbf16> to vector<16x64xbf16>
    %28 = vector.shape_cast %25 : vector<16x64xbf16> to vector<1x16x64xbf16>
    tpu.vector_store %arg7[%c0_20, %c0_21, %c0_22], %28 {strides = array<i32>} : memref<1x16x64xbf16, #tpu.memory_space<vmem>>, vector<1x16x64xbf16>,
    return
  }
  func.func @transform_0(%arg0: i32, %arg1: i32, %arg2: i32) -> (i32, i32, i32) {
    %c0_i32 = arith.constant 0 : i32
    %c0_i32_0 = arith.constant 0 : i32
    %c0_i32_1 = arith.constant 0 : i32
    return %arg0, %c0_i32, %c0_i32_0 : i32, i32, i32
  }
  func.func @transform_1(%arg0: i32, %arg1: i32, %arg2: i32) -> (i32, i32, i32) {
    %c0_i32 = arith.constant 0 : i32
    %c0_i32_0 = arith.constant 0 : i32
    %c0_i32_1 = arith.constant 0 : i32
    return %c0_i32, %c0_i32_0, %arg2 : i32, i32, i32
  }
  func.func @transform_2(%arg0: i32, %arg1: i32, %arg2: i32) -> (i32, i32) {
    %c0_i32 = arith.constant 0 : i32
    %c0_i32_0 = arith.constant 0 : i32
    return %c0_i32, %arg2 : i32, i32
  }
  func.func @transform_3(%arg0: i32, %arg1: i32, %arg2: i32) -> (i32, i32) {
    %c0_i32 = arith.constant 0 : i32
    %c0_i32_0 = arith.constant 0 : i32
    return %c0_i32, %arg2 : i32, i32
  }
  func.func @transform_4(%arg0: i32, %arg1: i32, %arg2: i32) -> (i32, i32, i32) {
    %c0_i32 = arith.constant 0 : i32
    return %arg0, %arg1, %arg2 : i32, i32, i32
  }
}

module attributes {stable_mosaic.version = 11 : i64} {
  func.func @kernel(%arg0: i32, %arg1: i32, %arg2: i32, %arg3: memref<1x16x64xbf16, #tpu.memory_space<vmem>>, %arg4: memref<9x64x64xbf16, #tpu.memory_space<vmem>>, %arg5: memref<1x64xf32, #tpu.memory_space<vmem>>, %arg6: memref<1x64xf32, #tpu.memory_space<vmem>>, %arg7: memref<1x2x64xbf16, #tpu.memory_space<vmem>>) attributes {dimension_semantics = [#tpu.dimension_semantics<parallel>, #tpu.dimension_semantics<parallel>, #tpu.dimension_semantics<parallel>], iteration_bounds = array<i64: 8, 1, 1>, scalar_prefetch = 0 : i64, scratch_operands = 0 : i64, tpu.core_type = #tpu.core_type<tc>, window_params = [{transform_indices = @transform_0, window_bounds = array<i64: 1, 16, 64>}, {transform_indices = @transform_1, window_bounds = array<i64: 9, 64, 64>}, {transform_indices = @transform_2, window_bounds = array<i64: 1, 64>}, {transform_indices = @transform_3, window_bounds = array<i64: 1, 64>}, {transform_indices = @transform_4, window_bounds = array<i64: 1, 2, 64>}]} {
    %c0 = arith.constant 0 : index
    %c0_0 = arith.constant 0 : index
    %c0_1 = arith.constant 0 : index
    %0 = vector.load %arg3[%c0, %c0_0, %c0_1] : memref<1x16x64xbf16, #tpu.memory_space<vmem>>, vector<1x2x64xbf16>
    %1 = vector.shape_cast %0 : vector<1x2x64xbf16> to vector<2x64xbf16>
    %c0_2 = arith.constant 0 : index
    %c0_3 = arith.constant 0 : index
    %c0_4 = arith.constant 0 : index
    %2 = vector.load %arg4[%c0_2, %c0_3, %c0_4] : memref<9x64x64xbf16, #tpu.memory_space<vmem>>, vector<1x64x64xbf16>
    %3 = vector.shape_cast %2 : vector<1x64x64xbf16> to vector<64x64xbf16>
    %cst = arith.constant dense<0.000000e+00> : vector<2x64xf32>
    %4 = tpu.matmul %1, %3, %cst {dimension_numbers = #tpu.dot_dimension_numbers<[1], [0], [0], [1], [0, 0, 1, 1], [], []>} : vector<2x64xbf16>, vector<64x64xbf16>, vector<2x64xf32> -> vector<2x64xf32>
    %c0_5 = arith.constant 0 : index
    %c4 = arith.constant 4 : index
    %c0_6 = arith.constant 0 : index
    %5 = vector.load %arg3[%c0_5, %c4, %c0_6] : memref<1x16x64xbf16, #tpu.memory_space<vmem>>, vector<1x2x64xbf16>
    %6 = vector.shape_cast %5 : vector<1x2x64xbf16> to vector<2x64xbf16>
    %c1 = arith.constant 1 : index
    %c0_7 = arith.constant 0 : index
    %c0_8 = arith.constant 0 : index
    %7 = vector.load %arg4[%c1, %c0_7, %c0_8] : memref<9x64x64xbf16, #tpu.memory_space<vmem>>, vector<1x64x64xbf16>
    %8 = vector.shape_cast %7 : vector<1x64x64xbf16> to vector<64x64xbf16>
    %cst_9 = arith.constant dense<0.000000e+00> : vector<2x64xf32>
    %9 = tpu.matmul %6, %8, %cst_9 {dimension_numbers = #tpu.dot_dimension_numbers<[1], [0], [0], [1], [0, 0, 1, 1], [], []>} : vector<2x64xbf16>, vector<64x64xbf16>, vector<2x64xf32> -> vector<2x64xf32>
    %10 = arith.addf %4, %9 : vector<2x64xf32>
    %c0_10 = arith.constant 0 : index
    %c1_11 = arith.constant 1 : index
    %c0_12 = arith.constant 0 : index
    %11 = vector.load %arg3[%c0_10, %c1_11, %c0_12] : memref<1x16x64xbf16, #tpu.memory_space<vmem>>, vector<1x2x64xbf16>
    %12 = vector.shape_cast %11 : vector<1x2x64xbf16> to vector<2x64xbf16>
    %c2 = arith.constant 2 : index
    %c0_13 = arith.constant 0 : index
    %c0_14 = arith.constant 0 : index
    %13 = vector.load %arg4[%c2, %c0_13, %c0_14] : memref<9x64x64xbf16, #tpu.memory_space<vmem>>, vector<1x64x64xbf16>
    %14 = vector.shape_cast %13 : vector<1x64x64xbf16> to vector<64x64xbf16>
    %cst_15 = arith.constant dense<0.000000e+00> : vector<2x64xf32>
    %15 = tpu.matmul %12, %14, %cst_15 {dimension_numbers = #tpu.dot_dimension_numbers<[1], [0], [0], [1], [0, 0, 1, 1], [], []>} : vector<2x64xbf16>, vector<64x64xbf16>, vector<2x64xf32> -> vector<2x64xf32>
    %16 = arith.addf %10, %15 : vector<2x64xf32>
    %c0_16 = arith.constant 0 : index
    %c8 = arith.constant 8 : index
    %c0_17 = arith.constant 0 : index
    %17 = vector.load %arg3[%c0_16, %c8, %c0_17] : memref<1x16x64xbf16, #tpu.memory_space<vmem>>, vector<1x2x64xbf16>
    %18 = vector.shape_cast %17 : vector<1x2x64xbf16> to vector<2x64xbf16>
    %c3 = arith.constant 3 : index
    %c0_18 = arith.constant 0 : index
    %c0_19 = arith.constant 0 : index
    %19 = vector.load %arg4[%c3, %c0_18, %c0_19] : memref<9x64x64xbf16, #tpu.memory_space<vmem>>, vector<1x64x64xbf16>
    %20 = vector.shape_cast %19 : vector<1x64x64xbf16> to vector<64x64xbf16>
    %cst_20 = arith.constant dense<0.000000e+00> : vector<2x64xf32>
    %21 = tpu.matmul %18, %20, %cst_20 {dimension_numbers = #tpu.dot_dimension_numbers<[1], [0], [0], [1], [0, 0, 1, 1], [], []>} : vector<2x64xbf16>, vector<64x64xbf16>, vector<2x64xf32> -> vector<2x64xf32>
    %22 = arith.addf %16, %21 : vector<2x64xf32>
    %c0_21 = arith.constant 0 : index
    %c12 = arith.constant 12 : index
    %c0_22 = arith.constant 0 : index
    %23 = vector.load %arg3[%c0_21, %c12, %c0_22] : memref<1x16x64xbf16, #tpu.memory_space<vmem>>, vector<1x2x64xbf16>
    %24 = vector.shape_cast %23 : vector<1x2x64xbf16> to vector<2x64xbf16>
    %c4_23 = arith.constant 4 : index
    %c0_24 = arith.constant 0 : index
    %c0_25 = arith.constant 0 : index
    %25 = vector.load %arg4[%c4_23, %c0_24, %c0_25] : memref<9x64x64xbf16, #tpu.memory_space<vmem>>, vector<1x64x64xbf16>
    %26 = vector.shape_cast %25 : vector<1x64x64xbf16> to vector<64x64xbf16>
    %cst_26 = arith.constant dense<0.000000e+00> : vector<2x64xf32>
    %27 = tpu.matmul %24, %26, %cst_26 {dimension_numbers = #tpu.dot_dimension_numbers<[1], [0], [0], [1], [0, 0, 1, 1], [], []>} : vector<2x64xbf16>, vector<64x64xbf16>, vector<2x64xf32> -> vector<2x64xf32>
    %28 = arith.addf %22, %27 : vector<2x64xf32>
    %c0_27 = arith.constant 0 : index
    %c9 = arith.constant 9 : index
    %c0_28 = arith.constant 0 : index
    %29 = vector.load %arg3[%c0_27, %c9, %c0_28] : memref<1x16x64xbf16, #tpu.memory_space<vmem>>, vector<1x2x64xbf16>
    %30 = vector.shape_cast %29 : vector<1x2x64xbf16> to vector<2x64xbf16>
    %c5 = arith.constant 5 : index
    %c0_29 = arith.constant 0 : index
    %c0_30 = arith.constant 0 : index
    %31 = vector.load %arg4[%c5, %c0_29, %c0_30] : memref<9x64x64xbf16, #tpu.memory_space<vmem>>, vector<1x64x64xbf16>
    %32 = vector.shape_cast %31 : vector<1x64x64xbf16> to vector<64x64xbf16>
    %cst_31 = arith.constant dense<0.000000e+00> : vector<2x64xf32>
    %33 = tpu.matmul %30, %32, %cst_31 {dimension_numbers = #tpu.dot_dimension_numbers<[1], [0], [0], [1], [0, 0, 1, 1], [], []>} : vector<2x64xbf16>, vector<64x64xbf16>, vector<2x64xf32> -> vector<2x64xf32>
    %34 = arith.addf %28, %33 : vector<2x64xf32>
    %c0_32 = arith.constant 0 : index
    %c2_33 = arith.constant 2 : index
    %c0_34 = arith.constant 0 : index
    %35 = vector.load %arg3[%c0_32, %c2_33, %c0_34] : memref<1x16x64xbf16, #tpu.memory_space<vmem>>, vector<1x2x64xbf16>
    %36 = vector.shape_cast %35 : vector<1x2x64xbf16> to vector<2x64xbf16>
    %c6 = arith.constant 6 : index
    %c0_35 = arith.constant 0 : index
    %c0_36 = arith.constant 0 : index
    %37 = vector.load %arg4[%c6, %c0_35, %c0_36] : memref<9x64x64xbf16, #tpu.memory_space<vmem>>, vector<1x64x64xbf16>
    %38 = vector.shape_cast %37 : vector<1x64x64xbf16> to vector<64x64xbf16>
    %cst_37 = arith.constant dense<0.000000e+00> : vector<2x64xf32>
    %39 = tpu.matmul %36, %38, %cst_37 {dimension_numbers = #tpu.dot_dimension_numbers<[1], [0], [0], [1], [0, 0, 1, 1], [], []>} : vector<2x64xbf16>, vector<64x64xbf16>, vector<2x64xf32> -> vector<2x64xf32>
    %40 = arith.addf %34, %39 : vector<2x64xf32>
    %c0_38 = arith.constant 0 : index
    %c6_39 = arith.constant 6 : index
    %c0_40 = arith.constant 0 : index
    %41 = vector.load %arg3[%c0_38, %c6_39, %c0_40] : memref<1x16x64xbf16, #tpu.memory_space<vmem>>, vector<1x2x64xbf16>
    %42 = vector.shape_cast %41 : vector<1x2x64xbf16> to vector<2x64xbf16>
    %c7 = arith.constant 7 : index
    %c0_41 = arith.constant 0 : index
    %c0_42 = arith.constant 0 : index
    %43 = vector.load %arg4[%c7, %c0_41, %c0_42] : memref<9x64x64xbf16, #tpu.memory_space<vmem>>, vector<1x64x64xbf16>
    %44 = vector.shape_cast %43 : vector<1x64x64xbf16> to vector<64x64xbf16>
    %cst_43 = arith.constant dense<0.000000e+00> : vector<2x64xf32>
    %45 = tpu.matmul %42, %44, %cst_43 {dimension_numbers = #tpu.dot_dimension_numbers<[1], [0], [0], [1], [0, 0, 1, 1], [], []>} : vector<2x64xbf16>, vector<64x64xbf16>, vector<2x64xf32> -> vector<2x64xf32>
    %46 = arith.addf %40, %45 : vector<2x64xf32>
    %c0_44 = arith.constant 0 : index
    %c3_45 = arith.constant 3 : index
    %c0_46 = arith.constant 0 : index
    %47 = vector.load %arg3[%c0_44, %c3_45, %c0_46] : memref<1x16x64xbf16, #tpu.memory_space<vmem>>, vector<1x2x64xbf16>
    %48 = vector.shape_cast %47 : vector<1x2x64xbf16> to vector<2x64xbf16>
    %c8_47 = arith.constant 8 : index
    %c0_48 = arith.constant 0 : index
    %c0_49 = arith.constant 0 : index
    %49 = vector.load %arg4[%c8_47, %c0_48, %c0_49] : memref<9x64x64xbf16, #tpu.memory_space<vmem>>, vector<1x64x64xbf16>
    %50 = vector.shape_cast %49 : vector<1x64x64xbf16> to vector<64x64xbf16>
    %cst_50 = arith.constant dense<0.000000e+00> : vector<2x64xf32>
    %51 = tpu.matmul %48, %50, %cst_50 {dimension_numbers = #tpu.dot_dimension_numbers<[1], [0], [0], [1], [0, 0, 1, 1], [], []>} : vector<2x64xbf16>, vector<64x64xbf16>, vector<2x64xf32> -> vector<2x64xf32>
    %52 = arith.addf %46, %51 : vector<2x64xf32>
    %c0_51 = arith.constant 0 : index
    %c0_52 = arith.constant 0 : index
    %53 = vector.load %arg5[%c0_51, %c0_52] : memref<1x64xf32, #tpu.memory_space<vmem>>, vector<1x64xf32>
    %54 = vector.broadcast %53 : vector<1x64xf32> to vector<2x64xf32>
    %55 = arith.mulf %52, %54 : vector<2x64xf32>
    %c0_53 = arith.constant 0 : index
    %c0_54 = arith.constant 0 : index
    %56 = vector.load %arg6[%c0_53, %c0_54] : memref<1x64xf32, #tpu.memory_space<vmem>>, vector<1x64xf32>
    %57 = vector.broadcast %56 : vector<1x64xf32> to vector<2x64xf32>
    %58 = arith.addf %55, %57 : vector<2x64xf32>
    %cst_55 = arith.constant 0.000000e+00 : f32
    %59 = vector.broadcast %cst_55 : f32 to vector<2x64xf32>
    %60 = arith.maximumf %58, %59 : vector<2x64xf32>
    %61 = arith.truncf %60 : vector<2x64xf32> to vector<2x64xbf16>
    %c0_56 = arith.constant 0 : index
    %c0_57 = arith.constant 0 : index
    %c0_58 = arith.constant 0 : index
    %62 = vector.load %arg7[%c0_56, %c0_57, %c0_58] : memref<1x2x64xbf16, #tpu.memory_space<vmem>>, vector<1x2x64xbf16>
    %63 = vector.shape_cast %62 : vector<1x2x64xbf16> to vector<2x64xbf16>
    %64 = vector.shape_cast %61 : vector<2x64xbf16> to vector<1x2x64xbf16>
    tpu.vector_store %arg7[%c0_56, %c0_57, %c0_58], %64 {strides = array<i32>} : memref<1x2x64xbf16, #tpu.memory_space<vmem>>, vector<1x2x64xbf16>,
    return
  }
  func.func @transform_0(%arg0: i32, %arg1: i32, %arg2: i32) -> (i32, i32, i32) {
    %c0_i32 = arith.constant 0 : i32
    %c0_i32_0 = arith.constant 0 : i32
    %c0_i32_1 = arith.constant 0 : i32
    return %arg0, %c0_i32, %c0_i32_0 : i32, i32, i32
  }
  func.func @transform_1(%arg0: i32, %arg1: i32, %arg2: i32) -> (i32, i32, i32) {
    %c0_i32 = arith.constant 0 : i32
    %c0_i32_0 = arith.constant 0 : i32
    %c0_i32_1 = arith.constant 0 : i32
    return %c0_i32, %c0_i32_0, %arg2 : i32, i32, i32
  }
  func.func @transform_2(%arg0: i32, %arg1: i32, %arg2: i32) -> (i32, i32) {
    %c0_i32 = arith.constant 0 : i32
    %c0_i32_0 = arith.constant 0 : i32
    return %c0_i32, %arg2 : i32, i32
  }
  func.func @transform_3(%arg0: i32, %arg1: i32, %arg2: i32) -> (i32, i32) {
    %c0_i32 = arith.constant 0 : i32
    %c0_i32_0 = arith.constant 0 : i32
    return %c0_i32, %arg2 : i32, i32
  }
  func.func @transform_4(%arg0: i32, %arg1: i32, %arg2: i32) -> (i32, i32, i32) {
    %c0_i32 = arith.constant 0 : i32
    return %arg0, %arg1, %arg2 : i32, i32, i32
  }
}

module attributes {stable_mosaic.version = 11 : i64} {
  func.func @kernel(%arg0: i32, %arg1: i32, %arg2: i32, %arg3: memref<1x8x128xbf16, #tpu.memory_space<vmem>>, %arg4: memref<1x128x256xbf16, #tpu.memory_space<vmem>>, %arg5: memref<1x256xf32, #tpu.memory_space<vmem>>, %arg6: memref<1x256xf32, #tpu.memory_space<vmem>>, %arg7: memref<1x8x256xbf16, #tpu.memory_space<vmem>>) attributes {dimension_semantics = [#tpu.dimension_semantics<parallel>, #tpu.dimension_semantics<parallel>, #tpu.dimension_semantics<parallel>], iteration_bounds = array<i64: 1, 1, 1>, scalar_prefetch = 0 : i64, scratch_operands = 0 : i64, tpu.core_type = #tpu.core_type<tc>, window_params = [{transform_indices = @transform_0, window_bounds = array<i64: 1, 8, 128>}, {transform_indices = @transform_1, window_bounds = array<i64: 1, 128, 256>}, {transform_indices = @transform_2, window_bounds = array<i64: 1, 256>}, {transform_indices = @transform_3, window_bounds = array<i64: 1, 256>}, {transform_indices = @transform_4, window_bounds = array<i64: 1, 8, 256>}]} {
    %c0 = arith.constant 0 : index
    %c0_0 = arith.constant 0 : index
    %c0_1 = arith.constant 0 : index
    %0 = vector.load %arg3[%c0, %c0_0, %c0_1] : memref<1x8x128xbf16, #tpu.memory_space<vmem>>, vector<1x8x128xbf16>
    %1 = vector.shape_cast %0 : vector<1x8x128xbf16> to vector<8x128xbf16>
    %c0_2 = arith.constant 0 : index
    %c0_3 = arith.constant 0 : index
    %c0_4 = arith.constant 0 : index
    %2 = vector.load %arg4[%c0_2, %c0_3, %c0_4] : memref<1x128x256xbf16, #tpu.memory_space<vmem>>, vector<1x128x256xbf16>
    %3 = vector.shape_cast %2 : vector<1x128x256xbf16> to vector<128x256xbf16>
    %cst = arith.constant dense<0.000000e+00> : vector<8x256xf32>
    %4 = tpu.matmul %1, %3, %cst {dimension_numbers = #tpu.dot_dimension_numbers<[1], [0], [0], [1], [0, 0, 1, 1], [], []>} : vector<8x128xbf16>, vector<128x256xbf16>, vector<8x256xf32> -> vector<8x256xf32>
    %c0_5 = arith.constant 0 : index
    %c0_6 = arith.constant 0 : index
    %5 = vector.load %arg5[%c0_5, %c0_6] : memref<1x256xf32, #tpu.memory_space<vmem>>, vector<1x256xf32>
    %6 = vector.broadcast %5 : vector<1x256xf32> to vector<8x256xf32>
    %7 = arith.mulf %4, %6 : vector<8x256xf32>
    %c0_7 = arith.constant 0 : index
    %c0_8 = arith.constant 0 : index
    %8 = vector.load %arg6[%c0_7, %c0_8] : memref<1x256xf32, #tpu.memory_space<vmem>>, vector<1x256xf32>
    %9 = vector.broadcast %8 : vector<1x256xf32> to vector<8x256xf32>
    %10 = arith.addf %7, %9 : vector<8x256xf32>
    %11 = arith.truncf %10 : vector<8x256xf32> to vector<8x256xbf16>
    %c0_9 = arith.constant 0 : index
    %c0_10 = arith.constant 0 : index
    %c0_11 = arith.constant 0 : index
    %12 = vector.load %arg7[%c0_9, %c0_10, %c0_11] : memref<1x8x256xbf16, #tpu.memory_space<vmem>>, vector<1x8x256xbf16>
    %13 = vector.shape_cast %12 : vector<1x8x256xbf16> to vector<8x256xbf16>
    %14 = vector.shape_cast %11 : vector<8x256xbf16> to vector<1x8x256xbf16>
    tpu.vector_store %arg7[%c0_9, %c0_10, %c0_11], %14 {strides = array<i32>} : memref<1x8x256xbf16, #tpu.memory_space<vmem>>, vector<1x8x256xbf16>,
    return
  }
  func.func @transform_0(%arg0: i32, %arg1: i32, %arg2: i32) -> (i32, i32, i32) {
    %c0_i32 = arith.constant 0 : i32
    %c0_i32_0 = arith.constant 0 : i32
    return %arg0, %arg1, %c0_i32 : i32, i32, i32
  }
  func.func @transform_1(%arg0: i32, %arg1: i32, %arg2: i32) -> (i32, i32, i32) {
    %c0_i32 = arith.constant 0 : i32
    %c0_i32_0 = arith.constant 0 : i32
    %c0_i32_1 = arith.constant 0 : i32
    return %c0_i32, %c0_i32_0, %arg2 : i32, i32, i32
  }
  func.func @transform_2(%arg0: i32, %arg1: i32, %arg2: i32) -> (i32, i32) {
    %c0_i32 = arith.constant 0 : i32
    %c0_i32_0 = arith.constant 0 : i32
    return %c0_i32, %arg2 : i32, i32
  }
  func.func @transform_3(%arg0: i32, %arg1: i32, %arg2: i32) -> (i32, i32) {
    %c0_i32 = arith.constant 0 : i32
    %c0_i32_0 = arith.constant 0 : i32
    return %c0_i32, %arg2 : i32, i32
  }
  func.func @transform_4(%arg0: i32, %arg1: i32, %arg2: i32) -> (i32, i32, i32) {
    %c0_i32 = arith.constant 0 : i32
    return %arg0, %arg1, %arg2 : i32, i32, i32
  }
}

module attributes {stable_mosaic.version = 11 : i64} {
  func.func @kernel(%arg0: i32, %arg1: i32, %arg2: i32, %arg3: memref<1x8x64xbf16, #tpu.memory_space<vmem>>, %arg4: memref<1x64x256xbf16, #tpu.memory_space<vmem>>, %arg5: memref<1x256xf32, #tpu.memory_space<vmem>>, %arg6: memref<1x256xf32, #tpu.memory_space<vmem>>, %arg7: memref<1x8x256xbf16, #tpu.memory_space<vmem>>, %arg8: memref<1x8x256xbf16, #tpu.memory_space<vmem>>) attributes {dimension_semantics = [#tpu.dimension_semantics<parallel>, #tpu.dimension_semantics<parallel>, #tpu.dimension_semantics<parallel>], iteration_bounds = array<i64: 1, 1, 1>, scalar_prefetch = 0 : i64, scratch_operands = 0 : i64, tpu.core_type = #tpu.core_type<tc>, window_params = [{transform_indices = @transform_0, window_bounds = array<i64: 1, 8, 64>}, {transform_indices = @transform_1, window_bounds = array<i64: 1, 64, 256>}, {transform_indices = @transform_2, window_bounds = array<i64: 1, 256>}, {transform_indices = @transform_3, window_bounds = array<i64: 1, 256>}, {transform_indices = @transform_4, window_bounds = array<i64: 1, 8, 256>}, {transform_indices = @transform_5, window_bounds = array<i64: 1, 8, 256>}]} {
    %c0 = arith.constant 0 : index
    %c0_0 = arith.constant 0 : index
    %c0_1 = arith.constant 0 : index
    %0 = vector.load %arg3[%c0, %c0_0, %c0_1] : memref<1x8x64xbf16, #tpu.memory_space<vmem>>, vector<1x8x64xbf16>
    %1 = vector.shape_cast %0 : vector<1x8x64xbf16> to vector<8x64xbf16>
    %c0_2 = arith.constant 0 : index
    %c0_3 = arith.constant 0 : index
    %c0_4 = arith.constant 0 : index
    %2 = vector.load %arg4[%c0_2, %c0_3, %c0_4] : memref<1x64x256xbf16, #tpu.memory_space<vmem>>, vector<1x64x256xbf16>
    %3 = vector.shape_cast %2 : vector<1x64x256xbf16> to vector<64x256xbf16>
    %cst = arith.constant dense<0.000000e+00> : vector<8x256xf32>
    %4 = tpu.matmul %1, %3, %cst {dimension_numbers = #tpu.dot_dimension_numbers<[1], [0], [0], [1], [0, 0, 1, 1], [], []>} : vector<8x64xbf16>, vector<64x256xbf16>, vector<8x256xf32> -> vector<8x256xf32>
    %c0_5 = arith.constant 0 : index
    %c0_6 = arith.constant 0 : index
    %5 = vector.load %arg5[%c0_5, %c0_6] : memref<1x256xf32, #tpu.memory_space<vmem>>, vector<1x256xf32>
    %6 = vector.broadcast %5 : vector<1x256xf32> to vector<8x256xf32>
    %7 = arith.mulf %4, %6 : vector<8x256xf32>
    %c0_7 = arith.constant 0 : index
    %c0_8 = arith.constant 0 : index
    %8 = vector.load %arg6[%c0_7, %c0_8] : memref<1x256xf32, #tpu.memory_space<vmem>>, vector<1x256xf32>
    %9 = vector.broadcast %8 : vector<1x256xf32> to vector<8x256xf32>
    %10 = arith.addf %7, %9 : vector<8x256xf32>
    %c0_9 = arith.constant 0 : index
    %c0_10 = arith.constant 0 : index
    %c0_11 = arith.constant 0 : index
    %11 = vector.load %arg7[%c0_9, %c0_10, %c0_11] : memref<1x8x256xbf16, #tpu.memory_space<vmem>>, vector<1x8x256xbf16>
    %12 = vector.shape_cast %11 : vector<1x8x256xbf16> to vector<8x256xbf16>
    %13 = arith.extf %12 : vector<8x256xbf16> to vector<8x256xf32>
    %14 = arith.addf %10, %13 : vector<8x256xf32>
    %cst_12 = arith.constant 0.000000e+00 : f32
    %15 = vector.broadcast %cst_12 : f32 to vector<8x256xf32>
    %16 = arith.maximumf %14, %15 : vector<8x256xf32>
    %17 = arith.truncf %16 : vector<8x256xf32> to vector<8x256xbf16>
    %c0_13 = arith.constant 0 : index
    %c0_14 = arith.constant 0 : index
    %c0_15 = arith.constant 0 : index
    %18 = vector.load %arg8[%c0_13, %c0_14, %c0_15] : memref<1x8x256xbf16, #tpu.memory_space<vmem>>, vector<1x8x256xbf16>
    %19 = vector.shape_cast %18 : vector<1x8x256xbf16> to vector<8x256xbf16>
    %20 = vector.shape_cast %17 : vector<8x256xbf16> to vector<1x8x256xbf16>
    tpu.vector_store %arg8[%c0_13, %c0_14, %c0_15], %20 {strides = array<i32>} : memref<1x8x256xbf16, #tpu.memory_space<vmem>>, vector<1x8x256xbf16>,
    return
  }
  func.func @transform_0(%arg0: i32, %arg1: i32, %arg2: i32) -> (i32, i32, i32) {
    %c0_i32 = arith.constant 0 : i32
    %c0_i32_0 = arith.constant 0 : i32
    return %arg0, %arg1, %c0_i32 : i32, i32, i32
  }
  func.func @transform_1(%arg0: i32, %arg1: i32, %arg2: i32) -> (i32, i32, i32) {
    %c0_i32 = arith.constant 0 : i32
    %c0_i32_0 = arith.constant 0 : i32
    %c0_i32_1 = arith.constant 0 : i32
    return %c0_i32, %c0_i32_0, %arg2 : i32, i32, i32
  }
  func.func @transform_2(%arg0: i32, %arg1: i32, %arg2: i32) -> (i32, i32) {
    %c0_i32 = arith.constant 0 : i32
    %c0_i32_0 = arith.constant 0 : i32
    return %c0_i32, %arg2 : i32, i32
  }
  func.func @transform_3(%arg0: i32, %arg1: i32, %arg2: i32) -> (i32, i32) {
    %c0_i32 = arith.constant 0 : i32
    %c0_i32_0 = arith.constant 0 : i32
    return %c0_i32, %arg2 : i32, i32
  }
  func.func @transform_4(%arg0: i32, %arg1: i32, %arg2: i32) -> (i32, i32, i32) {
    %c0_i32 = arith.constant 0 : i32
    return %arg0, %arg1, %arg2 : i32, i32, i32
  }
  func.func @transform_5(%arg0: i32, %arg1: i32, %arg2: i32) -> (i32, i32, i32) {
    %c0_i32 = arith.constant 0 : i32
    return %arg0, %arg1, %arg2 : i32, i32, i32
  }
}

</mosaic_0001>

<bundles_post_ra>
// kernel: _lambda_.18
= control target key start
LH: loop header
LB: loop body
LE: loop exit
PB: predicated region body
PF: predicated region fallthrough
CT: control target
= control target key end

     0   :  { %s2570_s15 = smov 0   ;;  %s2572_s16 = smov 0   ;;  %s3087_s0 = inlined_call_operand.vmem [shape: bf16[8,304,48], index: 0, kind: input, shape index: {}]   ;;  %s3088_s1 = inlined_call_operand.vmem [shape: bf16[4,48,16], index: 1, kind: input, shape index: {}]   ;;  %s3089_s2 = inlined_call_operand.vmem [shape: f32[1,16], index: 2, kind: input, shape index: {}]   ;;  %s3090_s3 = inlined_call_operand.vmem [shape: f32[1,16], index: 3, kind: input, shape index: {}]   ;;  %s3091_s4 = inlined_call_operand.vmem [shape: bf16[8,256,16], index: 4, kind: output, shape index: {}]  }
   0x1   :  { %s2574_s17 = smov 0  }
   0x2 LB: > { %s33_s18 = sadd.s32 1, %s2539_s16  ;;  %p1991_p0 = scmp.ge.s32.totalorder %s2543_s17, 1  ;;  %s2543_s17 = sphi %s2574_s17, %s14_s17   ;;  %s2539_s16 = sphi %s2572_s16, %s3123_s16   ;;  %s2535_s15 = sphi %s2570_s15, %s3122_s15  }
   0x3   : > { %p35_p1 = scmp.ge.s32.totalorder %s33_s18, 8  ;;  %p210_p2 = scmp.lt.s32.totalorder %s2543_s17, 9 }
   0x5   : > { %s3125_s18 = smov (%p35_p1, %s33_s18), 0  ;;  %p211_p3 = pnand %p1991_p0, %p210_p2 }
   0x7   : > { %214 = sbr.rel (%p211_p3) target bundleno = 357 (0x165), region = 36 }
   0xc   : > { %v2460_v0 = vld [vmem:[%s3088_s1 + $0x28] sm:$0xff]   ;;  %p253_p4 = scmp.lt.s32.totalorder %s2535_s15, 7  ;;  %v2461_v1 = vld [vmem:[%s3088_s1 + $0x10] sm:$0xff]   ;;  %v2462_v2 = vld [vmem:[%s3088_s1 + $0x20] sm:$0xff]   ;;  %vm427_vm0 = vcmask 392192   ;;  %vm1818_vm1 = vcmask 125952  }
   0xd   : > { %2283 = vmatprep.subr.bf16.mxu0 %v2460_v0  ;;  %2321 = vmatprep.subr.bf16.mxu1 %v2461_v1  ;;  %v2463_v3 = vld [vmem:[%s3088_s1 + $0x8] sm:$0xff]   ;;  %v2464_v4 = vld [vmem:[%s3088_s1 + $0x18] sm:$0xff]   ;;  %v2465_v5 = vld [vmem:[%s3088_s1] sm:$0xff]  }
   0xe   : > { %s3127_s15 = smov (!%p253_p4, %s2535_s15), 7  ;;  %2284 = vmatpush3.bf16.msra.mxu0 %v2460_v0  ;;  %2322 = vmatpush3.bf16.msra.mxu1 %v2461_v1  ;;  %v2469_v6 = vld [vmem:[%s3088_s1 + $0x40] sm:$0xff]   ;;  %v2470_v10 = vld [vmem:[%s3088_s1 + $0x58] sm:$0xff]   ;;  %v2478_v14 = vld [vmem:[%s3088_s1 + $0x50] sm:$0xff]  }
   0xf   : > { %2285 = vmatprep.subr.bf16.mxu0 %v2462_v2  ;;  %s2435_s29 = smul.u32 152, %s3127_s15  ;;  %2323 = vmatprep.subr.bf16.mxu1 %v2463_v3  ;;  %v2475_v12 = vld [vmem:[%s3088_s1 + $0x38] sm:$0xff]   ;;  %v2483_v16 = vld [vmem:[%s3088_s1 + $0x30] sm:$0xff]   ;;  %v2484_v17 = vld [vmem:[%s3088_s1 + $0x48] sm:$0xff]  }
  0x11   : > { %s2612_s8 = scalar_lea.vmem %s3087_s0, %s2435_s29  ;;  %s2174_s29 = sshll.u32 %s3127_s15, 7 }
  0x12   : > { %2286 = vmatpush3.bf16.msra.mxu0 %v2462_v2  ;;  %v2466_v7 = vld [vmem:[%s2612_s8 + $0x8] sm:$0xff]   ;;  %2324 = vmatpush3.bf16.msra.mxu1 %v2463_v3  ;;  %v2467_v8 = vld [vmem:[%s2612_s8] sm:$0xff]   ;;  %v2468_v9 = vld [vmem:[%s2612_s8 + $0x10] sm:$0xff]   ;;  %s2903_s5 = scalar_lea.vmem %s3091_s4, %s2174_s29 }
  0x13   : > { %2287 = vmatprep.subr.bf16.mxu0 %v2464_v4  ;;  %2325 = vmatprep.subr.bf16.mxu1 %v2465_v5  ;;  %v2471_v11 = vld [vmem:[%s2612_s8 + $0x18] sm:$0xff]   ;;  %v2472_v13 = vld [vmem:[%s2612_s8 + $0x20] sm:$0xff]   ;;  %v2473_v15 = vld [vmem:[%s2612_s8 + $0x28] sm:$0xff]  }
  0x14   : > { %2289 = vmatprep.mubr.msk.bf16.mxu0 %vm427_vm0, %v2466_v7  ;;  %2327 = vmatprep.mubr.msk.bf16.mxu1 %vm427_vm0, %v2467_v8  ;;  %v2474_v18 = vld [vmem:[%s2612_s8 + $0x30] sm:$0xff]   ;;  %v2476_v19 = vld [vmem:[%s2612_s8 + $0x38] sm:$0xff]   ;;  %v2477_v20 = vld [vmem:[%s2612_s8 + $0x40] sm:$0xff]  }
  0x15   : > { %v2479_v21 = vld [vmem:[%s2612_s8 + $0x48] sm:$0xff]   ;;  %v2480_v22 = vld [vmem:[%s2612_s8 + $0x50] sm:$0xff]   ;;  %v2481_v23 = vld [vmem:[%s2612_s8 + $0x58] sm:$0xff]  }
  0x16   : > { %2288 = vmatpush3.bf16.msra.mxu0 %v2464_v4  ;;  %2326 = vmatpush3.bf16.msra.mxu1 %v2465_v5  ;;  %v2482_v24 = vld [vmem:[%s2612_s8 + $0x60] sm:$0xff]   ;;  %v2485_v25 = vld [vmem:[%s2612_s8 + $0x68] sm:$0xff]   ;;  %v2486_v26 = vld [vmem:[%s2612_s8 + $0x70] sm:$0xff]  }
  0x17   : > { %2359 = vmatprep.subr.bf16.mxu0 %v2469_v6  ;;  %2397 = vmatprep.subr.bf16.mxu1 %v2470_v10  ;;  %v2487_v27 = vld [vmem:[%s2612_s8 + $0x78] sm:$0xff]   ;;  %v2488_v28 = vld [vmem:[%s2612_s8 + $0x80] sm:$0xff]   ;;  %v2489_v29 = vld [vmem:[%s2612_s8 + $0x10] sm:$0xff]  }
  0x18   : > { %v2490_v30 = vld [vmem:[%s2612_s8 + $0x18] sm:$0xff]   ;;  %v2492_v32 = vld [vmem:[%s2612_s8 + $0x20] sm:$0xff]   ;;  %v2494_v34 = vld [vmem:[%s2612_s8 + $0x28] sm:$0xff]  }
  0x19   : > { %2290 = vmatmul.mubr.msk.bf16.vlgmr.msra.gmra.mxu0 %vm427_vm0, %v2468_v9  ;;  %2328 = vmatmul.mubr.msk.bf16.vlgmr.msra.gmra.mxu1 %vm427_vm0, %v2466_v7  ;;  %v2491_v31 = vld [vmem:[%s2612_s8 + $0x18] sm:$0xff]   ;;  %v2493_v33 = vld [vmem:[%s2612_s8 + $0x20] sm:$0xff]   ;;  %v2495_v35 = vld [vmem:[%s2612_s8 + $0x28] sm:$0xff]  }
  0x1a   : > { %2360 = vmatpush3.bf16.msra.mxu0 %v2469_v6  ;;  %2398 = vmatpush3.bf16.msra.mxu1 %v2470_v10  ;;  %v2496_v36 = vld [vmem:[%s2612_s8 + $0x30] sm:$0xff]   ;;  %v2498_v38 = vld [vmem:[%s2612_s8 + $0x38] sm:$0xff]   ;;  %v2500_v40 = vld [vmem:[%s2612_s8 + $0x40] sm:$0xff]  }
  0x1b   : > { %2293 = vmatprep.mubr.msk.bf16.mxu0 %vm427_vm0, %v2471_v11  ;;  %2331 = vmatprep.mubr.msk.bf16.mxu1 %vm427_vm0, %v2468_v9  ;;  %v2497_v37 = vld [vmem:[%s2612_s8 + $0x30] sm:$0xff]   ;;  %v2499_v39 = vld [vmem:[%s2612_s8 + $0x38] sm:$0xff]   ;;  %v2501_v41 = vld [vmem:[%s2612_s8 + $0x40] sm:$0xff]  }
  0x1c   : > { %2361 = vmatprep.subr.bf16.mxu0 %v2475_v12  ;;  %2399 = vmatprep.subr.bf16.mxu1 %v2478_v14  ;;  %v2502_v42 = vld [vmem:[%s2612_s8 + $0x48] sm:$0xff]   ;;  %v2504_v44 = vld [vmem:[%s2612_s8 + $0x50] sm:$0xff]   ;;  %v2506_v46 = vld [vmem:[%s2612_s8 + $0x58] sm:$0xff]  }
  0x1d   : > { %v2503_v43 = vld [vmem:[%s2612_s8 + $0x48] sm:$0xff]   ;;  %v2505_v45 = vld [vmem:[%s2612_s8 + $0x50] sm:$0xff]   ;;  %v2507_v47 = vld [vmem:[%s2612_s8 + $0x58] sm:$0xff]  }
  0x1e   : > { %2362 = vmatpush3.bf16.msra.mxu0 %v2475_v12  ;;  %2400 = vmatpush3.bf16.msra.mxu1 %v2478_v14  ;;  %v2508_v48 = vld [vmem:[%s2612_s8 + $0x60] sm:$0xff]   ;;  %v2510_v50 = vld [vmem:[%s2612_s8 + $0x68] sm:$0xff]   ;;  %v2512_v52 = vld [vmem:[%s2612_s8 + $0x70] sm:$0xff]  }
  0x1f   : > { %2363 = vmatprep.subr.bf16.mxu0 %v2483_v16  ;;  %2401 = vmatprep.subr.bf16.mxu1 %v2484_v17  ;;  %v2509_v49 = vld [vmem:[%s2612_s8 + $0x60] sm:$0xff]   ;;  %v2511_v51 = vld [vmem:[%s2612_s8 + $0x68] sm:$0xff]   ;;  %v2513_v53 = vld [vmem:[%s2612_s8 + $0x70] sm:$0xff]  }
  0x20   : > { %v2514_v54 = vld [vmem:[%s2612_s8 + $0x78] sm:$0xff]   ;;  %v2516_v56 = vld [vmem:[%s2612_s8 + $0x80] sm:$0xff]   ;;  %v2518_v58 = vld [vmem:[%s2612_s8 + $0x88] sm:$0xff]  }
  0x21   : > { %2294 = vmatmul.mubr.msk.bf16.gmra.mxu0 %vm427_vm0, %v2472_v13  ;;  %2332 = vmatmul.mubr.msk.bf16.gmra.mxu1 %vm427_vm0, %v2471_v11  ;;  %v2515_v55 = vld [vmem:[%s2612_s8 + $0x78] sm:$0xff]   ;;  %v2517_v57 = vld [vmem:[%s2612_s8 + $0x80] sm:$0xff]   ;;  %v2519_v59 = vld [vmem:[%s2612_s8 + $0x88] sm:$0xff]  }
  0x22   : > { %2297 = vmatprep.mubr.msk.bf16.mxu0 %vm427_vm0, %v2473_v15  ;;  %2335 = vmatprep.mubr.msk.bf16.mxu1 %vm427_vm0, %v2472_v13  ;;  %v2520_v60 = vld [vmem:[%s2612_s8 + $0x90] sm:$0xff]  }
  0x23   : > { %2364 = vmatpush3.bf16.msra.mxu0 %v2483_v16  ;;  %2402 = vmatpush3.bf16.msra.mxu1 %v2484_v17 }
  0x29   : > { %2298 = vmatmul.mubr.msk.bf16.gmra.mxu0 %vm427_vm0, %v2474_v18  ;;  %2336 = vmatmul.mubr.msk.bf16.gmra.mxu1 %vm427_vm0, %v2473_v15 }
  0x2a   : > { %2301 = vmatprep.mubr.msk.bf16.mxu0 %vm427_vm0, %v2476_v19  ;;  %2339 = vmatprep.mubr.msk.bf16.mxu1 %vm427_vm0, %v2474_v18 }
  0x31   : > { %2302 = vmatmul.mubr.msk.bf16.gmra.mxu0 %vm427_vm0, %v2477_v20  ;;  %2340 = vmatmul.mubr.msk.bf16.gmra.mxu1 %vm427_vm0, %v2476_v19 }
  0x32   : > { %2305 = vmatprep.mubr.msk.bf16.mxu0 %vm427_vm0, %v2479_v21  ;;  %2343 = vmatprep.mubr.msk.bf16.mxu1 %vm427_vm0, %v2477_v20 }
  0x39   : > { %2306 = vmatmul.mubr.msk.bf16.gmra.mxu0 %vm427_vm0, %v2480_v22  ;;  %2344 = vmatmul.mubr.msk.bf16.gmra.mxu1 %vm427_vm0, %v2479_v21 }
  0x3a   : > { %2309 = vmatprep.mubr.msk.bf16.mxu0 %vm427_vm0, %v2481_v23  ;;  %2347 = vmatprep.mubr.msk.bf16.mxu1 %vm427_vm0, %v2480_v22 }
  0x41   : > { %2310 = vmatmul.mubr.msk.bf16.gmra.mxu0 %vm427_vm0, %v2482_v24  ;;  %2348 = vmatmul.mubr.msk.bf16.gmra.mxu1 %vm427_vm0, %v2481_v23 }
  0x42   : > { %2313 = vmatprep.mubr.msk.bf16.mxu0 %vm427_vm0, %v2485_v25  ;;  %2351 = vmatprep.mubr.msk.bf16.mxu1 %vm427_vm0, %v2482_v24 }
  0x49   : > { %2314 = vmatmul.mubr.msk.bf16.gmra.mxu0 %vm427_vm0, %v2486_v26  ;;  %2352 = vmatmul.mubr.msk.bf16.gmra.mxu1 %vm427_vm0, %v2485_v25 }
  0x4a   : > { %2317 = vmatprep.mubr.msk.bf16.mxu0 %vm427_vm0, %v2487_v27  ;;  %2355 = vmatprep.mubr.msk.bf16.mxu1 %vm427_vm0, %v2486_v26 }
  0x51   : > { %2318 = vmatmul.mubr.msk.bf16.gmra.mxu0 %vm427_vm0, %v2488_v28  ;;  %2356 = vmatmul.mubr.msk.bf16.gmra.mxu1 %vm427_vm0, %v2487_v27 }
  0x52   : > { %2365 = vmatprep.mubr.msk.bf16.mxu0 %vm427_vm0, %v2489_v29  ;;  %2403 = vmatprep.mubr.msk.bf16.mxu1 %vm427_vm0, %v2490_v30 }
  0x59   : > { %2366 = vmatmul.mubr.msk.bf16.vlgmr.msra.gmra.mxu0 %vm427_vm0, %v2491_v31  ;;  %2404 = vmatmul.mubr.msk.bf16.vlgmr.msra.gmra.mxu1 %vm427_vm0, %v2492_v32 }
  0x5a   : > { %2369 = vmatprep.mubr.msk.bf16.mxu0 %vm427_vm0, %v2493_v33  ;;  %2407 = vmatprep.mubr.msk.bf16.mxu1 %vm427_vm0, %v2494_v34 }
  0x61   : > { %2370 = vmatmul.mubr.msk.bf16.gmra.mxu0 %vm427_vm0, %v2495_v35  ;;  %2408 = vmatmul.mubr.msk.bf16.gmra.mxu1 %vm427_vm0, %v2496_v36 }
  0x62   : > { %2373 = vmatprep.mubr.msk.bf16.mxu0 %vm427_vm0, %v2497_v37  ;;  %2411 = vmatprep.mubr.msk.bf16.mxu1 %vm427_vm0, %v2498_v38 }
  0x69   : > { %2374 = vmatmul.mubr.msk.bf16.gmra.mxu0 %vm427_vm0, %v2499_v39  ;;  %2412 = vmatmul.mubr.msk.bf16.gmra.mxu1 %vm427_vm0, %v2500_v40 }
  0x6a   : > { %2377 = vmatprep.mubr.msk.bf16.mxu0 %vm427_vm0, %v2501_v41  ;;  %2415 = vmatprep.mubr.msk.bf16.mxu1 %vm427_vm0, %v2502_v42 }
  0x71   : > { %2378 = vmatmul.mubr.msk.bf16.gmra.mxu0 %vm427_vm0, %v2503_v43  ;;  %2416 = vmatmul.mubr.msk.bf16.gmra.mxu1 %vm427_vm0, %v2504_v44 }
  0x72   : > { %2381 = vmatprep.mubr.msk.bf16.mxu0 %vm427_vm0, %v2505_v45  ;;  %2419 = vmatprep.mubr.msk.bf16.mxu1 %vm427_vm0, %v2506_v46 }
  0x79   : > { %2382 = vmatmul.mubr.msk.bf16.gmra.mxu0 %vm427_vm0, %v2507_v47  ;;  %2420 = vmatmul.mubr.msk.bf16.gmra.mxu1 %vm427_vm0, %v2508_v48 }
  0x7a   : > { %2385 = vmatprep.mubr.msk.bf16.mxu0 %vm427_vm0, %v2509_v49  ;;  %2423 = vmatprep.mubr.msk.bf16.mxu1 %vm427_vm0, %v2510_v50 }
  0x81   : > { %2386 = vmatmul.mubr.msk.bf16.gmra.mxu0 %vm427_vm0, %v2511_v51  ;;  %2424 = vmatmul.mubr.msk.bf16.gmra.mxu1 %vm427_vm0, %v2512_v52 }
  0x82   : > { %2389 = vmatprep.mubr.msk.bf16.mxu0 %vm427_vm0, %v2513_v53  ;;  %2427 = vmatprep.mubr.msk.bf16.mxu1 %vm427_vm0, %v2514_v54 }
  0x89   : > { %2390 = vmatmul.mubr.msk.bf16.gmra.mxu0 %vm427_vm0, %v2515_v55  ;;  %2428 = vmatmul.mubr.msk.bf16.gmra.mxu1 %vm427_vm0, %v2516_v56 }
  0x8a   : > { %2393 = vmatprep.mubr.msk.bf16.mxu0 %vm427_vm0, %v2517_v57  ;;  %2431 = vmatprep.mubr.msk.bf16.mxu1 %vm427_vm0, %v2518_v58 }
  0x91   : > { %2394 = vmatmul.mubr.msk.bf16.gmra.mxu0 %vm427_vm0, %v2519_v59  ;;  %2432 = vmatmul.mubr.msk.bf16.gmra.mxu1 %vm427_vm0, %v2520_v60 }
  0xd9   : > { %v2745_v61 = vpop.f32.mrf.mxu0  ;;  %v2329_v62 = vpop.f32.mrf.mxu1 }
  0xda   : > { %v706_v60 = vadd.f32 %v2329_v62, %v2745_v61 }
  0xdb   : > { %v2747_v63 = vpop.f32.mrf.mxu0  ;;  %v2749_v0 = vpop.f32.mrf.mxu1 }
  0xdd   : > { %v2751_v1 = vpop.f32.mrf.mxu0  ;;  %v2753_v2 = vpop.f32.mrf.mxu1 }
  0xdf   : > { %v2755_v3 = vpop.f32.mrf.mxu0  ;;  %v2757_v4 = vpop.f32.mrf.mxu1 }
  0xe1   : > { %v2759_v5 = vpop.f32.mrf.mxu0  ;;  %v2761_v6 = vpop.f32.mrf.mxu1 }
  0xe3   : > { %v2763_v7 = vpop.f32.mrf.mxu0  ;;  %v2765_v8 = vpop.f32.mrf.mxu1 }
  0xe5   : > { %v2767_v9 = vpop.f32.mrf.mxu0  ;;  %v2769_v10 = vpop.f32.mrf.mxu1 }
  0xe7   : > { %v2771_v11 = vpop.f32.mrf.mxu0  ;;  %v2773_v12 = vpop.f32.mrf.mxu1 }
  0xe9   : > { %v2775_v13 = vpop.f32.mrf.mxu0  ;;  %v2777_v14 = vpop.f32.mrf.mxu1 }
  0xeb   : > { %v2779_v15 = vpop.f32.mrf.mxu0  ;;  %v2781_v16 = vpop.f32.mrf.mxu1 }
  0xed   : > { %v2783_v17 = vpop.f32.mrf.mxu0  ;;  %v2785_v18 = vpop.f32.mrf.mxu1 }
  0xef   : > { %v2787_v19 = vpop.f32.mrf.mxu0  ;;  %v2789_v20 = vpop.f32.mrf.mxu1 }
  0xf1   : > { %v2791_v21 = vpop.f32.mrf.mxu0  ;;  %v2793_v22 = vpop.f32.mrf.mxu1 }
  0xf3   : > { %v2795_v23 = vpop.f32.mrf.mxu0  ;;  %v2797_v24 = vpop.f32.mrf.mxu1 }
  0xf5   : > { %v2799_v25 = vpop.f32.mrf.mxu0  ;;  %v2801_v26 = vpop.f32.mrf.mxu1 }
  0xf7   : > { %v2803_v27 = vpop.f32.mrf.mxu0  ;;  %v2805_v28 = vpop.f32.mrf.mxu1 }
  0xf9   : > { %v2807_v29 = vpop.f32.mrf.mxu0  ;;  %v2809_v30 = vpop.f32.mrf.mxu1 }
  0xfb   : > { %v2811_v31 = vpop.f32.mrf.mxu0  ;;  %v2813_v32 = vpop.f32.mrf.mxu1 }
  0xfd   : > { %v2815_v33 = vpop.f32.mrf.mxu0  ;;  %v2817_v34 = vpop.f32.mrf.mxu1 }
  0xff   : > { %v2819_v35 = vpop.f32.mrf.mxu0  ;;  %v2821_v36 = vpop.f32.mrf.mxu1 }
 0x101   : > { %v2823_v37 = vpop.f32.mrf.mxu0  ;;  %v2825_v38 = vpop.f32.mrf.mxu1 }
 0x103   : > { %v2827_v39 = vpop.f32.mrf.mxu0  ;;  %v2829_v40 = vpop.f32.mrf.mxu1 }
 0x105   : > { %v2831_v41 = vpop.f32.mrf.mxu0  ;;  %v2833_v42 = vpop.f32.mrf.mxu1 }
 0x107   : > { %v2835_v43 = vpop.f32.mrf.mxu0  ;;  %v2837_v44 = vpop.f32.mrf.mxu1 }
 0x109   : > { %v2839_v45 = vpop.f32.mrf.mxu0  ;;  %v2841_v46 = vpop.f32.mrf.mxu1 }
 0x10a   : > { %3092 = vst [vmem:[#allocation2_spill] sm:$0xff] %v2841_v46 }
 0x10b   : > { %v2843_v47 = vpop.f32.mrf.mxu0  ;;  %v2845_v48 = vpop.f32.mrf.mxu1 }
 0x10c   : > { %3093 = vst [vmem:[#allocation3_spill] sm:$0xff] %v2843_v47  ;;  %3094 = vst [vmem:[#allocation4_spill] sm:$0xff] %v2845_v48 }
 0x10d   : > { %v2847_v49 = vpop.f32.mrf.mxu0  ;;  %v2849_v50 = vpop.f32.mrf.mxu1 }
 0x10e   : > { %3095 = vst [vmem:[#allocation5_spill] sm:$0xff] %v2847_v49  ;;  %3096 = vst [vmem:[#allocation6_spill] sm:$0xff] %v2849_v50 }
 0x10f   : > { %v2851_v51 = vpop.f32.mrf.mxu0  ;;  %v2853_v52 = vpop.f32.mrf.mxu1 }
 0x110   : > { %3097 = vst [vmem:[#allocation7_spill] sm:$0xff] %v2851_v51  ;;  %3098 = vst [vmem:[#allocation8_spill] sm:$0xff] %v2853_v52 }
 0x111   : > { %v2855_v53 = vpop.f32.mrf.mxu0  ;;  %v2857_v54 = vpop.f32.mrf.mxu1 }
 0x112   : > { %3099 = vst [vmem:[#allocation9_spill] sm:$0xff] %v2855_v53  ;;  %3100 = vst [vmem:[#allocation10_spill] sm:$0xff] %v2857_v54  ;;  %v698_v53 = vadd.f32 %v2749_v0, %v2747_v63  ;;  %v701_v0 = vadd.f32 %v2757_v4, %v2755_v3 }
 0x113   : > { %v2859_v55 = vpop.f32.mrf.mxu0  ;;  %v2861_v56 = vpop.f32.mrf.mxu1 }
 0x114   : > { %3101 = vst [vmem:[#allocation11_spill] sm:$0xff] %v2859_v55  ;;  %3102 = vst [vmem:[#allocation12_spill] sm:$0xff] %v2861_v56  ;;  %v2877_v56 = vld [vmem:[%s3089_s2] ss:$0 sm:$0xff] }
 0x115   : > { %v2863_v57 = vpop.f32.mrf.mxu0  ;;  %v2865_v58 = vpop.f32.mrf.mxu1 }
 0x116   : > { %3103 = vst [vmem:[#allocation13_spill] sm:$0xff] %v2863_v57  ;;  %3104 = vst [vmem:[#allocation14_spill] sm:$0xff] %v2865_v58 }
 0x117   : > { %v2867_v59 = vpop.f32.mrf.mxu0  ;;  %v2870_v50 = vpop.f32.mrf.mxu1 }
 0x118   : > { %3105 = vst [vmem:[#allocation15_spill] sm:$0xff] %v2867_v59  ;;  %3106 = vst [vmem:[#allocation16_spill] sm:$0xff] %v2870_v50  ;;  %v709_v59 = vadd.f32 %v2753_v2, %v2751_v1  ;;  %v2884_v50 = vld [vmem:[%s3090_s3] ss:$0 sm:$0xff] }
 0x119   : > { %v2367_v51 = vpop.f32.mrf.mxu0  ;;  %v2405_v54 = vpop.f32.mrf.mxu1 }
 0x11a   : > { %v1172_v52 = vadd.f32 %v2367_v51, %v706_v60 }
 0x11b   : > { %v1043_v57 = vpop.f32.mrf.mxu0  ;;  %v1421_v62 = vpop.f32.mrf.mxu1 }
 0x11c   : > { %v1550_v58 = vadd.f32 %v2405_v54, %v1172_v52  ;;  %v1170_v61 = vadd.f32 %v1043_v57, %v698_v53  ;;  %v722_v57 = vadd.f32 %v2761_v6, %v2759_v5 }
 0x11d   : > { %v2368_v63 = vpop.f32.mrf.mxu0  ;;  %v2406_v49 = vpop.f32.mrf.mxu1 }
 0x11e   : > { %v1589_v51 = vmul.f32 %v2877_v56, %v1550_v58  ;;  %v1548_v60 = vadd.f32 %v1421_v62, %v1170_v61  ;;  %v1173_v55 = vadd.f32 %v2368_v63, %v709_v59  ;;  %v714_v61 = vadd.f32 %v2765_v8, %v2763_v7 }
 0x11f   : > { %v1046_v48 = vpop.f32.mrf.mxu0  ;;  %v1424_v54 = vpop.f32.mrf.mxu1  ;;  %v725_v62 = vadd.f32 %v2769_v10, %v2767_v9  ;;  %v717_v8 = vadd.f32 %v2773_v12, %v2771_v11 }
 0x120   : > { %v1628_v1 = vadd.f32 %v2884_v50, %v1589_v51  ;;  %v1587_v2 = vmul.f32 %v2877_v56, %v1548_v60  ;;  %v1551_v52 = vadd.f32 %v2406_v49, %v1173_v55  ;;  %v1171_v53 = vadd.f32 %v1046_v48, %v701_v0 }
 0x121   : > { %v2371_v47 = vpop.f32.mrf.mxu0  ;;  %v2409_v59 = vpop.f32.mrf.mxu1 }
 0x122   : > { %v1660_v46 = vmax.f32 %v1628_v1, 0.0  ;;  %v1626_v3 = vadd.f32 %v2884_v50, %v1587_v2  ;;  %v1590_v4 = vmul.f32 %v2877_v56, %v1551_v52  ;;  %v1549_v58 = vadd.f32 %v1424_v54, %v1171_v53 }
 0x123   : > { %v1176_v5 = vadd.f32 %v2371_v47, %v722_v57  ;;  %v1059_v6 = vpop.f32.mrf.mxu0  ;;  %v1437_v7 = vpop.f32.mrf.mxu1  ;;  %v738_v2 = vadd.f32 %v2777_v14, %v2775_v13 }
 0x124   : > { %v2177_v48 = vpack.c.bf16 %v1660_v46, %v1660_v46  ;;  %v1658_v49 = vmax.f32 %v1626_v3, 0.0  ;;  %v1629_v55 = vadd.f32 %v2884_v50, %v1590_v4  ;;  %v1588_v63 = vmul.f32 %v2877_v56, %v1549_v58 }
 0x125   : > { %v1554_v9 = vadd.f32 %v2409_v59, %v1176_v5  ;;  %v1174_v10 = vadd.f32 %v1059_v6, %v714_v61  ;;  %v2372_v0 = vpop.f32.mrf.mxu0  ;;  %v2410_v1 = vpop.f32.mrf.mxu1  ;;  %v730_v58 = vadd.f32 %v2781_v16, %v2779_v15 }
 0x126   : > { %1821 = vst.msk [vmem:[%s2903_s5 + $0x8] sm:$0xf] %vm1818_vm1, %v2177_v48  ;;  %v2175_v51 = vpack.c.bf16 %v1658_v49, %v1658_v49  ;;  %v1661_v60 = vmax.f32 %v1629_v55, 0.0  ;;  %v1627_v47 = vadd.f32 %v2884_v50, %v1588_v63  ;;  %v1177_v46 = vadd.f32 %v2372_v0, %v725_v62 }
 0x127   : > { %v1593_v52 = vmul.f32 %v2877_v56, %v1554_v9  ;;  %v1552_v53 = vadd.f32 %v1437_v7, %v1174_v10  ;;  %v1062_v54 = vpop.f32.mrf.mxu0  ;;  %v1440_v4 = vpop.f32.mrf.mxu1  ;;  %v741_v10 = vadd.f32 %v2785_v18, %v2783_v17 }
 0x128   : > { %1819 = vst.msk [vmem:[%s2903_s5] sm:$0xf] %vm1818_vm1, %v2175_v51  ;;  %v2178_v11 = vpack.c.bf16 %v1661_v60, %v1661_v60  ;;  %v1659_v12 = vmax.f32 %v1627_v47, 0.0  ;;  %v1555_v57 = vadd.f32 %v2410_v1, %v1177_v46  ;;  %v1175_v3 = vadd.f32 %v1062_v54, %v717_v8 }
 0x129   : > { %v1632_v59 = vadd.f32 %v2884_v50, %v1593_v52  ;;  %v1591_v61 = vmul.f32 %v2877_v56, %v1552_v53  ;;  %v2375_v13 = vpop.f32.mrf.mxu0  ;;  %v2413_v48 = vpop.f32.mrf.mxu1  ;;  %v733_v53 = vadd.f32 %v2789_v20, %v2787_v19  ;;  %v754_v54 = vadd.f32 %v2793_v22, %v2791_v21 }
 0x12a   : > { %1822 = vst.msk [vmem:[%s2903_s5 + $0xc] sm:$0xf] %vm1818_vm1, %v2178_v11  ;;  %v2176_v14 = vpack.c.bf16 %v1659_v12, %v1659_v12  ;;  %v1594_v62 = vmul.f32 %v2877_v56, %v1555_v57  ;;  %v1553_v5 = vadd.f32 %v1440_v4, %v1175_v3  ;;  %v1180_v6 = vadd.f32 %v2375_v13, %v738_v2 }
 0x12b   : > { %v1664_v49 = vmax.f32 %v1632_v59, 0.0  ;;  %v1630_v55 = vadd.f32 %v2884_v50, %v1591_v61  ;;  %v1075_v63 = vpop.f32.mrf.mxu0  ;;  %v1453_v9 = vpop.f32.mrf.mxu1  ;;  %v746_v19 = vadd.f32 %v2797_v24, %v2795_v23 }
 0x12c   : > { %1820 = vst.msk [vmem:[%s2903_s5 + $0x4] sm:$0xf] %vm1818_vm1, %v2176_v14  ;;  %v1633_v15 = vadd.f32 %v2884_v50, %v1594_v62  ;;  %v1592_v16 = vmul.f32 %v2877_v56, %v1553_v5  ;;  %v1558_v7 = vadd.f32 %v2413_v48, %v1180_v6  ;;  %v1178_v8 = vadd.f32 %v1075_v63, %v730_v58 }
 0x12d   : > { %v2181_v0 = vpack.c.bf16 %v1664_v49, %v1664_v49  ;;  %v1662_v51 = vmax.f32 %v1630_v55, 0.0  ;;  %v2376_v60 = vpop.f32.mrf.mxu0  ;;  %v2414_v52 = vpop.f32.mrf.mxu1  ;;  %v757_v5 = vadd.f32 %v2801_v26, %v2799_v25 }
 0x12e   : > { %v1665_v47 = vmax.f32 %v1633_v15, 0.0  ;;  %v1631_v46 = vadd.f32 %v2884_v50, %v1592_v16  ;;  %v1597_v1 = vmul.f32 %v2877_v56, %v1558_v7  ;;  %v1556_v2 = vadd.f32 %v1453_v9, %v1178_v8 }
 0x12f   : > { %1825 = vst.msk [vmem:[%s2903_s5 + $0x18] sm:$0xf] %vm1818_vm1, %v2181_v0  ;;  %v2179_v17 = vpack.c.bf16 %v1662_v51, %v1662_v51  ;;  %v1181_v18 = vadd.f32 %v2376_v60, %v741_v10  ;;  %v1078_v11 = vpop.f32.mrf.mxu0  ;;  %v1456_v58 = vpop.f32.mrf.mxu1  ;;  %v749_v16 = vadd.f32 %v2805_v28, %v2803_v27 }
 0x130   : > { %v2182_v12 = vpack.c.bf16 %v1665_v47, %v1665_v47  ;;  %v1663_v57 = vmax.f32 %v1631_v46, 0.0  ;;  %v1636_v3 = vadd.f32 %v2884_v50, %v1597_v1  ;;  %v1595_v4 = vmul.f32 %v2877_v56, %v1556_v2 }
 0x131   : > { %1823 = vst.msk [vmem:[%s2903_s5 + $0x10] sm:$0xf] %vm1818_vm1, %v2179_v17  ;;  %v1559_v20 = vadd.f32 %v2414_v52, %v1181_v18  ;;  %v1179_v21 = vadd.f32 %v1078_v11, %v733_v53  ;;  %v2379_v22 = vpop.f32.mrf.mxu0  ;;  %v2417_v62 = vpop.f32.mrf.mxu1  ;;  %v770_v53 = vadd.f32 %v2809_v30, %v2807_v29 }
 0x132   : > { %1826 = vst.msk [vmem:[%s2903_s5 + $0x1c] sm:$0xf] %vm1818_vm1, %v2182_v12  ;;  %v2180_v59 = vpack.c.bf16 %v1663_v57, %v1663_v57  ;;  %v1668_v61 = vmax.f32 %v1636_v3, 0.0  ;;  %v1634_v13 = vadd.f32 %v2884_v50, %v1595_v4  ;;  %v1184_v14 = vadd.f32 %v2379_v22, %v754_v54 }
 0x133   : > { %v1598_v6 = vmul.f32 %v2877_v56, %v1559_v20  ;;  %v1557_v23 = vadd.f32 %v1456_v58, %v1179_v21  ;;  %v1091_v24 = vpop.f32.mrf.mxu0  ;;  %v1469_v15 = vpop.f32.mrf.mxu1  ;;  %v762_v58 = vadd.f32 %v2813_v32, %v2811_v31  ;;  %v765_v31 = vadd.f32 %v2821_v36, %v2819_v35 }
 0x134   : > { %1824 = vst.msk [vmem:[%s2903_s5 + $0x14] sm:$0xf] %vm1818_vm1, %v2180_v59  ;;  %v2185_v48 = vpack.c.bf16 %v1668_v61, %v1668_v61  ;;  %v1666_v49 = vmax.f32 %v1634_v13, 0.0  ;;  %v1562_v55 = vadd.f32 %v2417_v62, %v1184_v14  ;;  %v1182_v63 = vadd.f32 %v1091_v24, %v746_v19 }
 0x135   : > { %v1637_v7 = vadd.f32 %v2884_v50, %v1598_v6  ;;  %v1596_v8 = vmul.f32 %v2877_v56, %v1557_v23  ;;  %v2380_v25 = vpop.f32.mrf.mxu0  ;;  %v2418_v51 = vpop.f32.mrf.mxu1  ;;  %v773_v19 = vadd.f32 %v2817_v34, %v2815_v33  ;;  %v786_v24 = vadd.f32 %v2825_v38, %v2823_v37 }
 0x136   : > { %1829 = vst.msk [vmem:[%s2903_s5 + $0x28] sm:$0xf] %vm1818_vm1, %v2185_v48  ;;  %v2183_v26 = vpack.c.bf16 %v1666_v49, %v1666_v49  ;;  %v1601_v9 = vmul.f32 %v2877_v56, %v1562_v55  ;;  %v1560_v10 = vadd.f32 %v1469_v15, %v1182_v63  ;;  %v1185_v0 = vadd.f32 %v2380_v25, %v757_v5 }
 0x137   : > { %v1669_v60 = vmax.f32 %v1637_v7, 0.0  ;;  %v1635_v47 = vadd.f32 %v2884_v50, %v1596_v8  ;;  %v1094_v46 = vpop.f32.mrf.mxu0  ;;  %v1472_v52 = vpop.f32.mrf.mxu1  ;;  %v778_v7 = vadd.f32 %v2829_v40, %v2827_v39 }
 0x138   : > { %1827 = vst.msk [vmem:[%s2903_s5 + $0x20] sm:$0xf] %vm1818_vm1, %v2183_v26  ;;  %v1640_v27 = vadd.f32 %v2884_v50, %v1601_v9  ;;  %v1599_v28 = vmul.f32 %v2877_v56, %v1560_v10  ;;  %v1563_v1 = vadd.f32 %v2418_v51, %v1185_v0  ;;  %v1183_v2 = vadd.f32 %v1094_v46, %v749_v16 }
 0x139   : > { %v2186_v54 = vpack.c.bf16 %v1669_v60, %v1669_v60  ;;  %v1667_v17 = vmax.f32 %v1635_v47, 0.0  ;;  %v2383_v18 = vpop.f32.mrf.mxu0  ;;  %v2421_v4 = vpop.f32.mrf.mxu1 }
 0x13a   : > { %v1672_v11 = vmax.f32 %v1640_v27, 0.0  ;;  %v1638_v12 = vadd.f32 %v2884_v50, %v1599_v28  ;;  %v1602_v57 = vmul.f32 %v2877_v56, %v1563_v1  ;;  %v1561_v3 = vadd.f32 %v1472_v52, %v1183_v2 }
 0x13b   : > { %1830 = vst.msk [vmem:[%s2903_s5 + $0x2c] sm:$0xf] %vm1818_vm1, %v2186_v54  ;;  %v2184_v29 = vpack.c.bf16 %v1667_v17, %v1667_v17  ;;  %v1188_v30 = vadd.f32 %v2383_v18, %v770_v53  ;;  %v1107_v20 = vpop.f32.mrf.mxu0  ;;  %v1485_v13 = vpop.f32.mrf.mxu1  ;;  %v789_v1 = vadd.f32 %v2833_v42, %v2831_v41 }
 0x13c   : > { %v2189_v21 = vpack.c.bf16 %v1672_v11, %v1672_v11  ;;  %v1670_v22 = vmax.f32 %v1638_v12, 0.0  ;;  %v1641_v59 = vadd.f32 %v2884_v50, %v1602_v57  ;;  %v1600_v61 = vmul.f32 %v2877_v56, %v1561_v3  ;;  %v3107_v3 = vld [vmem:[#allocation2_spill] sm:$0xff] }
 0x13d   : > { %1828 = vst.msk [vmem:[%s2903_s5 + $0x24] sm:$0xf] %vm1818_vm1, %v2184_v29  ;;  %v1566_v32 = vadd.f32 %v2421_v4, %v1188_v30  ;;  %v1186_v33 = vadd.f32 %v1107_v20, %v762_v58  ;;  %v2384_v34 = vpop.f32.mrf.mxu0  ;;  %v2422_v23 = vpop.f32.mrf.mxu1  ;;  %v781_v57 = vadd.f32 %v2837_v44, %v2835_v43  ;;  %v802_v4 = vadd.f32 %v3107_v3, %v2839_v45  ;;  %v3116_v3 = vld [vmem:[#allocation11_spill] sm:$0xff] }
 0x13e   : > { %1833 = vst.msk [vmem:[%s2903_s5 + $0x38] sm:$0xf] %vm1818_vm1, %v2189_v21  ;;  %v2187_v14 = vpack.c.bf16 %v1670_v22, %v1670_v22  ;;  %v1673_v62 = vmax.f32 %v1641_v59, 0.0  ;;  %v1639_v5 = vadd.f32 %v2884_v50, %v1600_v61  ;;  %v1189_v6 = vadd.f32 %v2384_v34, %v773_v19  ;;  %v3108_v22 = vld [vmem:[#allocation3_spill] sm:$0xff]  ;;  %v3109_v59 = vld [vmem:[#allocation4_spill] sm:$0xff] }
 0x13f   : > { %v1605_v48 = vmul.f32 %v2877_v56, %v1566_v32  ;;  %v1564_v35 = vadd.f32 %v1485_v13, %v1186_v33  ;;  %v1110_v36 = vpop.f32.mrf.mxu0  ;;  %v1488_v16 = vpop.f32.mrf.mxu1  ;;  %v794_v43 = vadd.f32 %v3109_v59, %v3108_v22 }
 0x140   : > { %1831 = vst.msk [vmem:[%s2903_s5 + $0x30] sm:$0xf] %vm1818_vm1, %v2187_v14  ;;  %v2190_v49 = vpack.c.bf16 %v1673_v62, %v1673_v62  ;;  %v1671_v55 = vmax.f32 %v1639_v5, 0.0  ;;  %v1567_v63 = vadd.f32 %v2422_v23, %v1189_v6  ;;  %v1187_v15 = vadd.f32 %v1110_v36, %v765_v31  ;;  %v3110_v14 = vld [vmem:[#allocation5_spill] sm:$0xff]  ;;  %v3111_v62 = vld [vmem:[#allocation6_spill] sm:$0xff] }
 0x141   : > { %v1644_v8 = vadd.f32 %v2884_v50, %v1605_v48  ;;  %v1603_v25 = vmul.f32 %v2877_v56, %v1564_v35  ;;  %v2387_v37 = vpop.f32.mrf.mxu0  ;;  %v2425_v0 = vpop.f32.mrf.mxu1  ;;  %v805_v5 = vadd.f32 %v3111_v62, %v3110_v14 }
 0x142   : > { %1834 = vst.msk [vmem:[%s2903_s5 + $0x3c] sm:$0xf] %vm1818_vm1, %v2190_v49  ;;  %v2188_v38 = vpack.c.bf16 %v1671_v55, %v1671_v55  ;;  %v1606_v26 = vmul.f32 %v2877_v56, %v1567_v63  ;;  %v1565_v9 = vadd.f32 %v1488_v16, %v1187_v15  ;;  %v1192_v10 = vadd.f32 %v2387_v37, %v786_v24  ;;  %v3112_v63 = vld [vmem:[#allocation7_spill] sm:$0xff]  ;;  %v3113_v15 = vld [vmem:[#allocation8_spill] sm:$0xff] }
 0x143   : > { %v1676_v51 = vmax.f32 %v1644_v8, 0.0  ;;  %v1642_v60 = vadd.f32 %v2884_v50, %v1603_v25  ;;  %v1123_v47 = vpop.f32.mrf.mxu0  ;;  %v1501_v28 = vpop.f32.mrf.mxu1  ;;  %v797_v16 = vadd.f32 %v3113_v15, %v3112_v63 }
 0x144   : > { %1832 = vst.msk [vmem:[%s2903_s5 + $0x34] sm:$0xf] %vm1818_vm1, %v2188_v38  ;;  %v1645_v39 = vadd.f32 %v2884_v50, %v1606_v26  ;;  %v1604_v40 = vmul.f32 %v2877_v56, %v1565_v9  ;;  %v1570_v46 = vadd.f32 %v2425_v0, %v1192_v10  ;;  %v1190_v27 = vadd.f32 %v1123_v47, %v778_v7 }
 0x145   : > { %v2193_v2 = vpack.c.bf16 %v1676_v51, %v1676_v51  ;;  %v1674_v52 = vmax.f32 %v1642_v60, 0.0  ;;  %v2388_v53 = vpop.f32.mrf.mxu0  ;;  %v2426_v12 = vpop.f32.mrf.mxu1 }
 0x146   : > { %v1677_v54 = vmax.f32 %v1645_v39, 0.0  ;;  %v1643_v17 = vadd.f32 %v2884_v50, %v1604_v40  ;;  %v1609_v18 = vmul.f32 %v2877_v56, %v1570_v46  ;;  %v1568_v11 = vadd.f32 %v1501_v28, %v1190_v27  ;;  %v3114_v28 = vld [vmem:[#allocation9_spill] sm:$0xff] }
 0x147   : > { %1837 = vst.msk [vmem:[%s2903_s5 + $0x48] sm:$0xf] %vm1818_vm1, %v2193_v2  ;;  %v2191_v41 = vpack.c.bf16 %v1674_v52, %v1674_v52  ;;  %v1193_v42 = vadd.f32 %v2388_v53, %v789_v1  ;;  %v1126_v58 = vpop.f32.mrf.mxu0  ;;  %v1504_v21 = vpop.f32.mrf.mxu1  ;;  %v3115_v1 = vld [vmem:[#allocation10_spill] sm:$0xff] }
 0x148   : > { %v2194_v19 = vpack.c.bf16 %v1677_v54, %v1677_v54  ;;  %v1675_v29 = vmax.f32 %v1643_v17, 0.0  ;;  %v1648_v30 = vadd.f32 %v2884_v50, %v1609_v18  ;;  %v1607_v20 = vmul.f32 %v2877_v56, %v1568_v11 }
 0x149   : > { %1835 = vst.msk [vmem:[%s2903_s5 + $0x40] sm:$0xf] %vm1818_vm1, %v2191_v41  ;;  %v1571_v44 = vadd.f32 %v2426_v12, %v1193_v42  ;;  %v1191_v45 = vadd.f32 %v1126_v58, %v781_v57  ;;  %v2391_v61 = vpop.f32.mrf.mxu0  ;;  %v2429_v34 = vpop.f32.mrf.mxu1  ;;  %v818_v2 = vadd.f32 %v3115_v1, %v3114_v28  ;;  %v3118_v42 = vld [vmem:[#allocation13_spill] sm:$0xff]  ;;  %v3119_v58 = vld [vmem:[#allocation14_spill] sm:$0xff] }
 0x14a   : > { %1838 = vst.msk [vmem:[%s2903_s5 + $0x4c] sm:$0xf] %vm1818_vm1, %v2194_v19  ;;  %v2192_v13 = vpack.c.bf16 %v1675_v29, %v1675_v29  ;;  %v1680_v31 = vmax.f32 %v1648_v30, 0.0  ;;  %v1646_v32 = vadd.f32 %v2884_v50, %v1607_v20  ;;  %v1196_v33 = vadd.f32 %v2391_v61, %v802_v4  ;;  %v3117_v4 = vld [vmem:[#allocation12_spill] sm:$0xff] }
 0x14b   : > { %v1610_v6 = vmul.f32 %v2877_v56, %v1571_v44  ;;  %v1569_v23 = vadd.f32 %v1504_v21, %v1191_v45  ;;  %v1139_v24 = vpop.f32.mrf.mxu0  ;;  %v1517_v55 = vpop.f32.mrf.mxu1  ;;  %v810_v41 = vadd.f32 %v3117_v4, %v3116_v3  ;;  %v821_v19 = vadd.f32 %v3119_v58, %v3118_v42  ;;  %v3120_v45 = vld [vmem:[#allocation15_spill] sm:$0xff]  ;;  %v3121_v61 = vld [vmem:[#allocation16_spill] sm:$0xff] }
 0x14c   : > { %1836 = vst.msk [vmem:[%s2903_s5 + $0x44] sm:$0xf] %vm1818_vm1, %v2192_v13  ;;  %v2197_v48 = vpack.c.bf16 %v1680_v31, %v1680_v31  ;;  %v1678_v35 = vmax.f32 %v1646_v32, 0.0  ;;  %v1574_v36 = vadd.f32 %v2429_v34, %v1196_v33  ;;  %v1194_v49 = vadd.f32 %v1139_v24, %v794_v43 }
 0x14d   : > { %v1649_v7 = vadd.f32 %v2884_v50, %v1610_v6  ;;  %v1608_v8 = vmul.f32 %v2877_v56, %v1569_v23  ;;  %v2392_v25 = vpop.f32.mrf.mxu0  ;;  %v2430_v10 = vpop.f32.mrf.mxu1  ;;  %v813_v13 = vadd.f32 %v3121_v61, %v3120_v45 }
 0x14e   : > { %1841 = vst.msk [vmem:[%s2903_s5 + $0x58] sm:$0xf] %vm1818_vm1, %v2197_v48  ;;  %v2195_v37 = vpack.c.bf16 %v1678_v35, %v1678_v35  ;;  %v1613_v38 = vmul.f32 %v2877_v56, %v1574_v36  ;;  %v1572_v26 = vadd.f32 %v1517_v55, %v1194_v49  ;;  %v1197_v9 = vadd.f32 %v2392_v25, %v805_v5 }
 0x14f   : > { %v1681_v0 = vmax.f32 %v1649_v7, 0.0  ;;  %v1647_v51 = vadd.f32 %v2884_v50, %v1608_v8  ;;  %v1142_v60 = vpop.f32.mrf.mxu0  ;;  %v1520_v27 = vpop.f32.mrf.mxu1 }
 0x150   : > { %1839 = vst.msk [vmem:[%s2903_s5 + $0x50] sm:$0xf] %vm1818_vm1, %v2195_v37  ;;  %v1652_v47 = vadd.f32 %v2884_v50, %v1613_v38  ;;  %v1611_v39 = vmul.f32 %v2877_v56, %v1572_v26  ;;  %v1575_v40 = vadd.f32 %v2430_v10, %v1197_v9  ;;  %v1195_v46 = vadd.f32 %v1142_v60, %v797_v16 }
 0x151   : > { %v2198_v52 = vpack.c.bf16 %v1681_v0, %v1681_v0  ;;  %v1679_v53 = vmax.f32 %v1647_v51, 0.0  ;;  %v2395_v54 = vpop.f32.mrf.mxu0  ;;  %v2433_v57 = vpop.f32.mrf.mxu1 }
 0x152   : > { %v1684_v17 = vmax.f32 %v1652_v47, 0.0  ;;  %v1650_v18 = vadd.f32 %v2884_v50, %v1611_v39  ;;  %v1614_v11 = vmul.f32 %v2877_v56, %v1575_v40  ;;  %v1573_v12 = vadd.f32 %v1520_v27, %v1195_v46 }
 0x153   : > { %1842 = vst.msk [vmem:[%s2903_s5 + $0x5c] sm:$0xf] %vm1818_vm1, %v2198_v52  ;;  %v2196_v29 = vpack.c.bf16 %v1679_v53, %v1679_v53  ;;  %v1200_v30 = vadd.f32 %v2395_v54, %v818_v2  ;;  %v1155_v20 = vpop.f32.mrf.mxu0  ;;  %v1533_v44 = vpop.f32.mrf.mxu1 }
 0x154   : > { %v2201_v21 = vpack.c.bf16 %v1684_v17, %v1684_v17  ;;  %v1682_v22 = vmax.f32 %v1650_v18, 0.0  ;;  %v1653_v59 = vadd.f32 %v2884_v50, %v1614_v11  ;;  %v1612_v43 = vmul.f32 %v2877_v56, %v1573_v12 }
 0x155   : > { %1840 = vst.msk [vmem:[%s2903_s5 + $0x54] sm:$0xf] %vm1818_vm1, %v2196_v29  ;;  %v1578_v31 = vadd.f32 %v2433_v57, %v1200_v30  ;;  %v1198_v32 = vadd.f32 %v1155_v20, %v810_v41  ;;  %v2396_v33 = vpop.f32.mrf.mxu0  ;;  %v2434_v6 = vpop.f32.mrf.mxu1 }
 0x156   : > { %1845 = vst.msk [vmem:[%s2903_s5 + $0x68] sm:$0xf] %vm1818_vm1, %v2201_v21  ;;  %v2199_v34 = vpack.c.bf16 %v1682_v22, %v1682_v22  ;;  %v1685_v14 = vmax.f32 %v1653_v59, 0.0  ;;  %v1651_v62 = vadd.f32 %v2884_v50, %v1612_v43  ;;  %v1201_v5 = vadd.f32 %v2396_v33, %v821_v19 }
 0x157   : > { %v1617_v23 = vmul.f32 %v2877_v56, %v1578_v31  ;;  %v1576_v24 = vadd.f32 %v1533_v44, %v1198_v32  ;;  %v1158_v48 = vpop.f32.mrf.mxu0  ;;  %v1536_v16 = vpop.f32.mrf.mxu1 }
 0x158   : > { %1843 = vst.msk [vmem:[%s2903_s5 + $0x60] sm:$0xf] %vm1818_vm1, %v2199_v34  ;;  %v2202_v35 = vpack.c.bf16 %v1685_v14, %v1685_v14  ;;  %v1683_v36 = vmax.f32 %v1651_v62, 0.0  ;;  %v1579_v49 = vadd.f32 %v2434_v6, %v1201_v5  ;;  %v1199_v55 = vadd.f32 %v1158_v48, %v813_v13 }
 0x159   : > { %v1656_v63 = vadd.f32 %v2884_v50, %v1617_v23  ;;  %v1615_v15 = vmul.f32 %v2877_v56, %v1576_v24 }
 0x15a   : > { %1846 = vst.msk [vmem:[%s2903_s5 + $0x6c] sm:$0xf] %vm1818_vm1, %v2202_v35  ;;  %v2200_v7 = vpack.c.bf16 %v1683_v36, %v1683_v36  ;;  %v1618_v8 = vmul.f32 %v2877_v56, %v1579_v49  ;;  %v1577_v25 = vadd.f32 %v1536_v16, %v1199_v55 }
 0x15b   : > { %v1688_v37 = vmax.f32 %v1656_v63, 0.0  ;;  %v1654_v38 = vadd.f32 %v2884_v50, %v1615_v15 }
 0x15c   : > { %1844 = vst.msk [vmem:[%s2903_s5 + $0x64] sm:$0xf] %vm1818_vm1, %v2200_v7  ;;  %v1657_v26 = vadd.f32 %v2884_v50, %v1618_v8  ;;  %v1616_v9 = vmul.f32 %v2877_v56, %v1577_v25 }
 0x15d   : > { %v2205_v10 = vpack.c.bf16 %v1688_v37, %v1688_v37  ;;  %v1686_v0 = vmax.f32 %v1654_v38, 0.0 }
 0x15e   : > { %v1689_v51 = vmax.f32 %v1657_v26, 0.0  ;;  %v1655_v60 = vadd.f32 %v2884_v50, %v1616_v9 }
 0x15f   : > { %1849 = vst.msk [vmem:[%s2903_s5 + $0x78] sm:$0xf] %vm1818_vm1, %v2205_v10  ;;  %v2203_v47 = vpack.c.bf16 %v1686_v0, %v1686_v0 }
 0x160   : > { %v2206_v39 = vpack.c.bf16 %v1689_v51, %v1689_v51  ;;  %v1687_v40 = vmax.f32 %v1655_v60, 0.0 }
 0x161   : > { %1847 = vst.msk [vmem:[%s2903_s5 + $0x70] sm:$0xf] %vm1818_vm1, %v2203_v47 }
 0x162   : > { %1850 = vst.msk [vmem:[%s2903_s5 + $0x7c] sm:$0xf] %vm1818_vm1, %v2206_v39  ;;  %v2204_v46 = vpack.c.bf16 %v1687_v40, %v1687_v40 }
 0x164   : > { %1848 = vst.msk [vmem:[%s2903_s5 + $0x74] sm:$0xf] %vm1818_vm1, %v2204_v46 }
 0x165 PF: > { %s14_s17 = sadd.s32 1, %s2543_s17   ;;  %s3122_s15 = smov %s2539_s16 }
 0x166   : > { %p11_p5 = scmp.ge.s32.totalorder %s14_s17, 10   ;;  %s3123_s16 = smov %s3125_s18 }
 0x168   :  { %13 = sbr.rel (!%p11_p5) target bundleno = 2 (0x2), region = 78 }

// kernel: _lambda_.19
= control target key start
LH: loop header
LB: loop body
LE: loop exit
PB: predicated region body
PF: predicated region fallthrough
CT: control target
= control target key end

     0   :  { %s1009_s6 = smov 0   ;;  %s1011_s7 = smov 0   ;;  %s1452_s0 = inlined_call_operand.vmem [shape: bf16[8,324,16], index: 0, kind: input, shape index: {}]   ;;  %s1453_s1 = inlined_call_operand.vmem [shape: bf16[8,72,16], index: 1, kind: output, shape index: {}]  }
   0x1   :  { %s1013_s8 = smov 0  }
   0x2 LB: > { %s23_s9 = sadd.s32 1, %s993_s7  ;;  %p941_p0 = scmp.ge.s32.totalorder %s997_s8, 1  ;;  %s997_s8 = sphi %s1013_s8, %s11_s8   ;;  %s993_s7 = sphi %s1011_s7, %s1461_s7   ;;  %s989_s6 = sphi %s1009_s6, %s1460_s6  }
   0x3   : > { %p25_p1 = scmp.ge.s32.totalorder %s23_s9, 8  ;;  %p101_p2 = scmp.lt.s32.totalorder %s997_s8, 9 }
   0x5   : > { %s1463_s9 = smov (%p25_p1, %s23_s9), 0  ;;  %p102_p3 = pnand %p941_p0, %p101_p2 }
   0x6   : > { %p125_p4 = scmp.lt.s32.totalorder (!%p102_p3), %s989_s6, 7 }
   0x7   : > { %105 = sbr.rel (%p102_p3) target bundleno = 134 (0x86), region = 24 }
   0xc   : > { %s1465_s6 = smov (!%p125_p4, %s989_s6), 7  ;;  %vm159_vm0 = vsmask.f32 3328  ;;  %vm160_vm1 = vsmask.f32 7440  ;;  %vm407_vm2 = vcmask 1042432  }
   0xd   : > { %s949_s10 = smul.u32 164, %s1465_s6  ;;  %vm408_vm3 = vcmask 1046532   ;;  %vm466_vm5 = vsmask.f32 2304  ;;  %vm467_vm6 = vsmask.f32 6416  ;;  %vm1063_vm7 = vmor %vm159_vm0, %vm160_vm1 }
   0xe   : > { %vm1057_vm4 = vmor %vm407_vm2, %vm408_vm3  ;;  %vm846_vm9 = vcmask 125952   ;;  %s950_s14 = smul.u32 36, %s1465_s6 }
   0xf   : > { %s1033_s13 = scalar_lea.vmem %s1452_s0, %s949_s10  ;;  %vm1099_vm8 = vmor %vm466_vm5, %vm467_vm6 }
  0x10   : > { %v140_v0 = vld [vmem:[%s1033_s13] sm:$0xf]  ;;  %v149_v1 = vld [vmem:[%s1033_s13 + $0x28] sm:$0xf]  ;;  %v150_v2 = vld [vmem:[%s1033_s13 + $0x2c] sm:$0xf]  ;;  %s1150_s17 = scalar_lea.vmem %s1453_s1, %s950_s14 }
  0x11   : > { %v1039_v3 = vld [vmem:[%s1033_s13 + $0x30] sm:$0xf]  ;;  %v141_v4 = vld [vmem:[%s1033_s13 + $0x4] sm:$0xf]  ;;  %v163_v5 = vshrl.u32 %v149_v1, 16  ;;  %v166_v6 = vshll.u32 %v149_v1, 16 }
  0x12   : > { %v172_v7 = vshll.u32 %v150_v2, 16  ;;  %v176_v8 = vshrl.u32 %v150_v2, 16  ;;  %v1043_v9 = vld [vmem:[%s1033_s13 + $0x8] sm:$0xf]  ;;  %v182_v10 = vshll.u32 %v1039_v3, 16  ;;  %v186_v11 = vshrl.u32 %v1039_v3, 16 }
  0x13   : > { %v276_v12 = vshrl.u32 %v140_v0, 16  ;;  %v279_v13 = vshll.u32 %v140_v0, 16  ;;  %v165_v14 = vrot.slane %v163_v5, 4  ;;  %v168_v15 = vrot.slane %v166_v6, 5  ;;  %v1048_v18 = vld [vmem:[%s1033_s13 + $0x54] sm:$0xf] }
  0x14   : > { %v174_v16 = vrot.slane %v172_v7, 5  ;;  %v178_v17 = vrot.slane %v176_v8, 4  ;;  %v1050_v19 = vrot.slane %v182_v10, 5  ;;  %v1052_v20 = vrot.slane %v186_v11, 4  ;;  %v387_v27 = vld [vmem:[%s1033_s13 + $0x50] sm:$0xe] }
  0x15   : > { %v278_v21 = vrot.slane %v276_v12, 4  ;;  %v281_v22 = vrot.slane %v279_v13, 5  ;;  %v169_v23 = vor.u32 %v168_v15, %v165_v14  ;;  %v285_v25 = vshll.u32 %v141_v4, 16  ;;  %v1069_v32 = vld [vmem:[%s1033_s13 + $0x58] sm:$0xf] }
  0x16   : > { %v179_v24 = vor.u32 %v178_v17, %v174_v16  ;;  %v289_v26 = vshrl.u32 %v141_v4, 16  ;;  %v295_v31 = vshll.u32 %v1043_v9, 16  ;;  %v944_v33 = vrot.slane %v387_v27, 9  ;;  %v456_v39 = vld [vmem:[%s1033_s13 + $0x78] sm:$0xe] }
  0x17   : > { %v282_v30 = vor.u32 %v281_v22, %v278_v21  ;;  %v412_v34 = vrot.slane %v1048_v18, 5  ;;  %v170_v35 = vrot.slane %v169_v23, 4  ;;  %v287_v37 = vrot.slane %v285_v25, 5  ;;  %v457_v44 = vld [vmem:[%s1033_s13 + $0x7c] sm:$0xf] }
  0x18   : > { %v180_v36 = vrot.slane %v179_v24, 4  ;;  %v291_v38 = vrot.slane %v289_v26, 4  ;;  %v1073_v41 = vrot.slane %v295_v31, 5  ;;  %v415_v48 = vrot.slane %v1069_v32, 5  ;;  %v730_v1 = vld [vmem:[%s1033_s13 + $0x2c] sm:$0xe] }
  0x19   : > { %v283_v40 = vrot.slane %v282_v30, 4  ;;  %v413_v42 = vsel %vm1057_vm4, %v944_v33, %v412_v34  ;;  %v414_v43 = vrot.slane %v412_v34, 4  ;;  %v175_v45 = vsel %vm1063_vm7, %v170_v35, %v174_v16  ;;  %v789_v12 = vld [vmem:[%s1033_s13 + $0x4] sm:$0xe]  ;;  %v1107_v21 = vld [vmem:[%s1033_s13 + $0x34] sm:$0xf] }
  0x1a   : > { %v185_v46 = vsel %vm1063_vm7, %v180_v36, %v1050_v19  ;;  %v292_v47 = vor.u32 %v291_v38, %v287_v37  ;;  %v265_v49 = vmax.bf16 %v175_v45, %v140_v0  ;;  %v470_v52 = vshrl.u32 %v456_v39, 16  ;;  %v1113_v30 = vld [vmem:[%s1033_s13 + $0xc] sm:$0xf]  ;;  %v1124_v36 = vld [vmem:[%s1033_s13 + $0x5c] sm:$0xf] }
  0x1b   : > { %v266_v50 = vmax.bf16 %v185_v46, %v141_v4  ;;  %v288_v51 = vsel %vm1063_vm7, %v283_v40, %v287_v37  ;;  %v416_v54 = vsel %vm1057_vm4, %v414_v43, %v415_v48  ;;  %v473_v55 = vshll.u32 %v456_v39, 16 }
  0x1c   : > { %v293_v53 = vrot.slane %v292_v47, 4  ;;  %v479_v56 = vshrl.u32 %v457_v44, 16  ;;  %v378_v57 = vmax.bf16 %v288_v51, %v265_v49  ;;  %v472_v58 = vrot.slane %v470_v52, 5 }
  0x1d   : > { %v482_v59 = vshll.u32 %v457_v44, 16  ;;  %v587_v60 = vshrl.u32 %v387_v27, 16  ;;  %v475_v62 = vrot.slane %v473_v55, 6  ;;  %v590_v0 = vshll.u32 %v387_v27, 16  ;;  %v458_v44 = vld [vmem:[%s1033_s13 + $0x80] sm:$0xf] }
  0x1e   : > { %v298_v61 = vsel %vm1063_vm7, %v293_v53, %v1073_v41  ;;  %v481_v63 = vrot.slane %v479_v56, 5  ;;  %v447_v4 = vmax.bf16 %v413_v42, %v378_v57  ;;  %v596_v10 = vshrl.u32 %v1048_v18, 16 }
  0x1f   : > { %v379_v2 = vmax.bf16 %v298_v61, %v266_v50  ;;  %v484_v5 = vrot.slane %v482_v59, 6  ;;  %v589_v6 = vrot.slane %v587_v60, 5  ;;  %v476_v7 = vor.u32 %v475_v62, %v472_v58 }
  0x20   : > { %v592_v8 = vrot.slane %v590_v0, 6  ;;  %v599_v11 = vshll.u32 %v1048_v18, 16  ;;  %v945_v16 = vrot.slane %v730_v1, 9  ;;  %v745_v17 = vrot.slane %v1039_v3, 5 }
  0x21   : > { %v1095_v13 = vmax.bf16 %v416_v54, %v379_v2  ;;  %v1103_v15 = vor.u32 %v484_v5, %v481_v63  ;;  %v477_v22 = vrot.slane %v476_v7, 4  ;;  %v598_v18 = vrot.slane %v596_v10, 5 }
  0x22   : > { %v593_v23 = vor.u32 %v592_v8, %v589_v6  ;;  %v601_v24 = vrot.slane %v599_v11, 6  ;;  %v746_v25 = vsel %vm1057_vm4, %v945_v16, %v745_v17  ;;  %v946_v26 = vrot.slane %v789_v12, 9 }
  0x23   : > { %v802_v27 = vrot.slane %v1043_v9, 5  ;;  %v189_v31 = vor.u32 %v1052_v20, %v1050_v19  ;;  %v486_v3 = vsel %vm1099_vm8, %v477_v22, %v1103_v15  ;;  %v192_v35 = vshll.u32 %v1107_v21, 16 }
  0x24   : > { %v594_v33 = vrot.slane %v593_v23, 4  ;;  %v1120_v34 = vor.u32 %v601_v24, %v598_v18  ;;  %v576_v37 = vmax.bf16 %v486_v3, %v447_v4  ;;  %v196_v19 = vshrl.u32 %v1107_v21, 16  ;;  %v1154_v4 = vld [vmem:[%s1033_s13 + $0x38] sm:$0xf] }
  0x25   : > { %v803_v38 = vsel %vm1057_vm4, %v946_v26, %v802_v27  ;;  %v190_v39 = vrot.slane %v189_v31, 4  ;;  %v194_v40 = vrot.slane %v192_v35, 5  ;;  %v299_v42 = vshrl.u32 %v1043_v9, 16  ;;  %v1174_v26 = vld [vmem:[%s1033_s13 + $0x60] sm:$0xf] }
  0x26   : > { %v603_v20 = vsel %vm1099_vm8, %v594_v33, %v1120_v34  ;;  %v305_v43 = vshll.u32 %v1113_v30, 16  ;;  %v198_v46 = vrot.slane %v196_v19, 4  ;;  %v417_v47 = vrot.slane %v415_v48, 4 }
  0x27   : > { %v693_v45 = vmax.bf16 %v603_v20, %v576_v37  ;;  %v418_v49 = vrot.slane %v1124_v36, 5  ;;  %v195_v50 = vsel %vm1063_vm7, %v190_v39, %v194_v40  ;;  %v301_v51 = vrot.slane %v299_v42, 4 }
  0x28   : > { %v307_v52 = vrot.slane %v305_v43, 5  ;;  %v487_v53 = vrot.slane %v1103_v15, 4  ;;  %v267_v55 = vmax.bf16 %v195_v50, %v1043_v9  ;;  %v489_v57 = vshrl.u32 %v458_v44, 16 }
  0x29   : > { %v721_v54 = vmax.bf16 %v693_v45, %v298_v61  ;;  %v419_v56 = vsel %vm1057_vm4, %v417_v47, %v418_v49  ;;  %v302_v48 = vor.u32 %v301_v51, %v1073_v41  ;;  %v492_v58 = vshll.u32 %v458_v44, 16 }
  0x2a   : > { %v604_v59 = vrot.slane %v1120_v34, 4  ;;  %v606_v60 = vshrl.u32 %v1069_v32, 16  ;;  %v491_v63 = vrot.slane %v489_v57, 5  ;;  %v609_v0 = vshll.u32 %v1069_v32, 16  ;;  %v459_v34 = vld [vmem:[%s1033_s13 + $0x84] sm:$0xf] }
  0x2b   : > { %v780_v62 = vmax.bf16 %v746_v25, %v721_v54  ;;  %v747_v1 = vrot.slane %v745_v17, 4  ;;  %v303_v9 = vrot.slane %v302_v48, 4  ;;  %v494_v61 = vrot.slane %v492_v58, 6  ;;  %v1191_v48 = vld [vmem:[%s1033_s13 + $0x3c] sm:$0xf] }
  0x2c   : > { %v608_v41 = vrot.slane %v606_v60, 5  ;;  %v748_v2 = vrot.slane %v1107_v21, 5  ;;  %v611_v6 = vrot.slane %v609_v0, 6  ;;  %v804_v7 = vrot.slane %v802_v27, 4  ;;  %v1166_v21 = vld [vmem:[%s1033_s13 + $0x10] sm:$0xf] }
  0x2d   : > { %v837_v5 = vmax.bf16 %v803_v38, %v780_v62  ;;  %v805_v32 = vrot.slane %v1113_v30, 5  ;;  %v308_v8 = vsel %vm1063_vm7, %v303_v9, %v307_v52  ;;  %v495_v10 = vor.u32 %v494_v61, %v491_v63 }
  0x2e   : > { %v749_v11 = vsel %vm1057_vm4, %v747_v1, %v748_v2  ;;  %v199_v12 = vor.u32 %v198_v46, %v194_v40  ;;  %v380_v15 = vmax.bf16 %v308_v8, %v267_v55  ;;  %v612_v16 = vor.u32 %v611_v6, %v608_v41  ;;  %v1201_v41 = vld [vmem:[%s1033_s13 + $0x14] sm:$0xf] }
  0x2f   : > { %847 = vst.msk [vmem:[%s1150_s17] sm:$0xf] %vm846_vm9, %v837_v5  ;;  %v806_v17 = vsel %vm1057_vm4, %v804_v7, %v805_v32  ;;  %v202_v22 = vshll.u32 %v1154_v4, 16  ;;  %v496_v23 = vsel %vm1099_vm8, %v487_v53, %v495_v10  ;;  %v206_v24 = vshrl.u32 %v1154_v4, 16 }
  0x30   : > { %v200_v18 = vrot.slane %v199_v12, 4  ;;  %v309_v25 = vshrl.u32 %v1113_v30, 16  ;;  %v449_v27 = vmax.bf16 %v419_v56, %v380_v15  ;;  %v577_v31 = vmax.bf16 %v496_v23, %v1095_v13 }
  0x31   : > { %v613_v3 = vsel %vm1099_vm8, %v604_v59, %v612_v16  ;;  %v204_v33 = vrot.slane %v202_v22, 5  ;;  %v208_v35 = vrot.slane %v206_v24, 4  ;;  %v315_v38 = vshll.u32 %v1166_v21, 16 }
  0x32   : > { %v311_v37 = vrot.slane %v309_v25, 4  ;;  %v420_v39 = vrot.slane %v418_v49, 4  ;;  %v694_v19 = vmax.bf16 %v613_v3, %v577_v31  ;;  %v421_v40 = vrot.slane %v1174_v26, 5 }
  0x33   : > { %v205_v20 = vsel %vm1063_vm7, %v200_v18, %v204_v33  ;;  %v497_v42 = vrot.slane %v495_v10, 4  ;;  %v317_v44 = vrot.slane %v315_v38, 5  ;;  %v499_v45 = vshrl.u32 %v459_v34, 16 }
  0x34   : > { %v268_v43 = vmax.bf16 %v205_v20, %v1113_v30  ;;  %v312_v13 = vor.u32 %v311_v37, %v307_v52  ;;  %v722_v46 = vmax.bf16 %v694_v19, %v308_v8  ;;  %v422_v47 = vsel %vm1057_vm4, %v420_v39, %v421_v40  ;;  %v1213_v8 = vld [vmem:[%s1033_s13 + $0x64] sm:$0xf] }
  0x35   : > { %v502_v50 = vshll.u32 %v459_v34, 16  ;;  %v614_v51 = vrot.slane %v612_v16, 4  ;;  %v501_v53 = vrot.slane %v499_v45, 5  ;;  %v616_v54 = vshrl.u32 %v1124_v36, 16  ;;  %v460_v16 = vld [vmem:[%s1033_s13 + $0x88] sm:$0xf] }
  0x36   : > { %v313_v49 = vrot.slane %v312_v13, 4  ;;  %v619_v55 = vshll.u32 %v1124_v36, 16  ;;  %v781_v56 = vmax.bf16 %v749_v11, %v722_v46  ;;  %v750_v30 = vrot.slane %v748_v2, 4 }
  0x37   : > { %v504_v57 = vrot.slane %v502_v50, 6  ;;  %v751_v52 = vrot.slane %v1154_v4, 5  ;;  %v618_v59 = vrot.slane %v616_v54, 5  ;;  %v807_v62 = vrot.slane %v805_v32, 4 }
  0x38   : > { %v318_v58 = vsel %vm1063_vm7, %v313_v49, %v317_v44  ;;  %v621_v60 = vrot.slane %v619_v55, 6  ;;  %v838_v63 = vmax.bf16 %v806_v17, %v781_v56  ;;  %v808_v61 = vrot.slane %v1166_v21, 5 }
  0x39   : > { %v381_v0 = vmax.bf16 %v318_v58, %v268_v43  ;;  %v505_v1 = vor.u32 %v504_v57, %v501_v53  ;;  %v752_v36 = vsel %vm1057_vm4, %v750_v30, %v751_v52  ;;  %v209_v2 = vor.u32 %v208_v35, %v204_v33  ;;  %v1244_v30 = vld [vmem:[%s1033_s13 + $0x18] sm:$0xf] }
  0x3a   : > { %v1197_v9 = vor.u32 %v621_v60, %v618_v59  ;;  %v212_v4 = vshll.u32 %v1191_v48, 16  ;;  %848 = vst.msk [vmem:[%s1150_s17 + $0x4] sm:$0xf] %vm846_vm9, %v838_v63  ;;  %v216_v7 = vshrl.u32 %v1191_v48, 16  ;;  %v319_v32 = vshrl.u32 %v1166_v21, 16 }
  0x3b   : > { %v1206_v5 = vmax.bf16 %v422_v47, %v381_v0  ;;  %v506_v6 = vsel %vm1099_vm8, %v497_v42, %v505_v1  ;;  %v809_v12 = vsel %vm1057_vm4, %v807_v62, %v808_v61  ;;  %v210_v15 = vrot.slane %v209_v2, 4  ;;  %v1234_v47 = vld [vmem:[%s1033_s13 + $0x40] sm:$0xf]  ;;  %v1255_v63 = vld [vmem:[%s1033_s13 + $0x68] sm:$0xf] }
  0x3c   : > { %v578_v10 = vmax.bf16 %v506_v6, %v449_v27  ;;  %v623_v11 = vsel %vm1099_vm8, %v614_v51, %v1197_v9  ;;  %v214_v17 = vrot.slane %v212_v4, 5  ;;  %v218_v22 = vrot.slane %v216_v7, 4  ;;  %v461_v7 = vld [vmem:[%s1033_s13 + $0x8c] sm:$0xf] }
  0x3d   : > { %v321_v23 = vrot.slane %v319_v32, 4  ;;  %v325_v18 = vshll.u32 %v1201_v41, 16  ;;  %v423_v25 = vrot.slane %v421_v40, 4  ;;  %v424_v31 = vrot.slane %v1213_v8, 5 }
  0x3e   : > { %v695_v24 = vmax.bf16 %v623_v11, %v578_v10  ;;  %v507_v3 = vrot.slane %v505_v1, 4  ;;  %v215_v27 = vsel %vm1063_vm7, %v210_v15, %v214_v17  ;;  %v509_v35 = vshrl.u32 %v460_v16, 16 }
  0x3f   : > { %v322_v33 = vor.u32 %v321_v23, %v317_v44  ;;  %v1225_v34 = vrot.slane %v325_v18, 5  ;;  %v269_v38 = vmax.bf16 %v215_v27, %v1166_v21  ;;  %v425_v39 = vsel %vm1057_vm4, %v423_v25, %v424_v31 }
  0x40   : > { %v723_v37 = vmax.bf16 %v695_v24, %v318_v58  ;;  %v512_v19 = vshll.u32 %v460_v16, 16  ;;  %v511_v40 = vrot.slane %v509_v35, 5  ;;  %v624_v42 = vrot.slane %v1197_v9, 4 }
  0x41   : > { %v323_v20 = vrot.slane %v322_v33, 4  ;;  %v626_v43 = vshrl.u32 %v1174_v26, 16  ;;  %v629_v44 = vshll.u32 %v1174_v26, 16  ;;  %v753_v46 = vrot.slane %v751_v52, 4 }
  0x42   : > { %v782_v13 = vmax.bf16 %v752_v36, %v723_v37  ;;  %v514_v45 = vrot.slane %v512_v19, 6  ;;  %v754_v51 = vrot.slane %v1191_v48, 5  ;;  %v810_v49 = vrot.slane %v808_v61, 4 }
  0x43   : > { %v328_v21 = vsel %vm1063_vm7, %v323_v20, %v1225_v34  ;;  %v628_v50 = vrot.slane %v626_v43, 5  ;;  %v631_v56 = vrot.slane %v629_v44, 6  ;;  %v811_v57 = vrot.slane %v1201_v41, 5 }
  0x44   : > { %v839_v53 = vmax.bf16 %v809_v12, %v782_v13  ;;  %v382_v54 = vmax.bf16 %v328_v21, %v269_v38  ;;  %v515_v55 = vor.u32 %v514_v45, %v511_v40  ;;  %v755_v26 = vsel %vm1057_vm4, %v753_v46, %v754_v51  ;;  %v1278_v40 = vld [vmem:[%s1033_s13 + $0x44] sm:$0xf]  ;;  %v1291_v46 = vld [vmem:[%s1033_s13 + $0x1c] sm:$0xf] }
  0x45   : > { %v219_v52 = vor.u32 %v218_v22, %v214_v17  ;;  %v222_v58 = vshll.u32 %v1234_v47, 16  ;;  %v632_v60 = vor.u32 %v631_v56, %v628_v50  ;;  %v226_v62 = vshrl.u32 %v1234_v47, 16 }
  0x46   : > { %849 = vst.msk [vmem:[%s1150_s17 + $0x8] sm:$0xf] %vm846_vm9, %v839_v53  ;;  %v1249_v48 = vmax.bf16 %v425_v39, %v382_v54  ;;  %v516_v59 = vsel %vm1099_vm8, %v507_v3, %v515_v55  ;;  %v812_v1 = vsel %vm1057_vm4, %v810_v49, %v811_v57  ;;  %v329_v4 = vshrl.u32 %v1201_v41, 16  ;;  %v1302_v53 = vld [vmem:[%s1033_s13 + $0x6c] sm:$0xf] }
  0x47   : > { %v579_v0 = vmax.bf16 %v516_v59, %v1206_v5  ;;  %v220_v36 = vrot.slane %v219_v52, 4  ;;  %v224_v9 = vrot.slane %v222_v58, 5  ;;  %v633_v61 = vsel %vm1099_vm8, %v624_v42, %v632_v60 }
  0x48   : > { %v228_v2 = vrot.slane %v226_v62, 4  ;;  %v335_v6 = vshll.u32 %v1244_v30, 16  ;;  %v426_v11 = vrot.slane %v424_v31, 4  ;;  %v427_v5 = vrot.slane %v1255_v63, 5 }
  0x49   : > { %v696_v32 = vmax.bf16 %v633_v61, %v579_v0  ;;  %v225_v10 = vsel %vm1063_vm7, %v220_v36, %v224_v9  ;;  %v331_v15 = vrot.slane %v329_v4, 4  ;;  %v517_v17 = vrot.slane %v515_v55, 4 }
  0x4a   : > { %v270_v12 = vmax.bf16 %v225_v10, %v1201_v41  ;;  %v1269_v16 = vrot.slane %v335_v6, 5  ;;  %v428_v23 = vsel %vm1057_vm4, %v426_v11, %v427_v5  ;;  %v519_v18 = vshrl.u32 %v461_v7, 16 }
  0x4b   : > { %v724_v22 = vmax.bf16 %v696_v32, %v328_v21  ;;  %v522_v24 = vshll.u32 %v461_v7, 16  ;;  %v332_v25 = vor.u32 %v331_v15, %v1225_v34  ;;  %v634_v3 = vrot.slane %v632_v60, 4  ;;  %v462_v60 = vld [vmem:[%s1033_s13 + $0x90] sm:$0xf] }
  0x4c   : > { %v636_v31 = vshrl.u32 %v1213_v8, 16  ;;  %v639_v27 = vshll.u32 %v1213_v8, 16  ;;  %v521_v41 = vrot.slane %v519_v18, 5  ;;  %v756_v37 = vrot.slane %v754_v51, 4 }
  0x4d   : > { %v783_v33 = vmax.bf16 %v755_v26, %v724_v22  ;;  %v524_v35 = vrot.slane %v522_v24, 6  ;;  %v333_v38 = vrot.slane %v332_v25, 4  ;;  %v757_v20 = vrot.slane %v1234_v47, 5 }
  0x4e   : > { %v638_v39 = vrot.slane %v636_v31, 5  ;;  %v641_v19 = vrot.slane %v639_v27, 6  ;;  %v813_v43 = vrot.slane %v811_v57, 4  ;;  %v814_v8 = vrot.slane %v1244_v30, 5 }
  0x4f   : > { %v840_v34 = vmax.bf16 %v812_v1, %v783_v33  ;;  %v1280_v42 = vor.u32 %v524_v35, %v521_v41  ;;  %v338_v13 = vsel %vm1063_vm7, %v333_v38, %v1269_v16  ;;  %v758_v44 = vsel %vm1057_vm4, %v756_v37, %v757_v20  ;;  %v158_v41 = vld [vmem:[%s1033_s13 + $0x4c] sm:$0x1] }
  0x50   : > { %v1286_v45 = vor.u32 %v641_v19, %v638_v39  ;;  %v229_v47 = vor.u32 %v228_v2, %v224_v9  ;;  %v383_v21 = vmax.bf16 %v338_v13, %v270_v12  ;;  %v815_v51 = vsel %vm1057_vm4, %v813_v43, %v814_v8 }
  0x51   : > { %850 = vst.msk [vmem:[%s1150_s17 + $0xc] sm:$0xf] %vm846_vm9, %v840_v34  ;;  %v526_v50 = vsel %vm1099_vm8, %v517_v17, %v1280_v42  ;;  %v232_v49 = vshll.u32 %v1278_v40, 16  ;;  %v236_v26 = vshrl.u32 %v1278_v40, 16  ;;  %v339_v58 = vshrl.u32 %v1244_v30, 16 }
  0x52   : > { %v580_v54 = vmax.bf16 %v526_v50, %v1249_v48  ;;  %v643_v55 = vsel %vm1099_vm8, %v634_v3, %v1286_v45  ;;  %v230_v56 = vrot.slane %v229_v47, 4  ;;  %v452_v57 = vmax.bf16 %v428_v23, %v383_v21  ;;  %v1327_v3 = vld [vmem:[%s1033_s13 + $0x48] sm:$0xf] }
  0x53   : > { %v234_v52 = vrot.slane %v232_v49, 5  ;;  %v345_v59 = vshll.u32 %v1291_v46, 16  ;;  %v238_v0 = vrot.slane %v236_v26, 4  ;;  %v429_v1 = vrot.slane %v427_v5, 4 }
  0x54   : > { %v697_v62 = vmax.bf16 %v643_v55, %v580_v54  ;;  %v430_v36 = vrot.slane %v1302_v53, 5  ;;  %v341_v9 = vrot.slane %v339_v58, 4  ;;  %v527_v2 = vrot.slane %v1280_v42, 4 }
  0x55   : > { %v235_v48 = vsel %vm1063_vm7, %v230_v56, %v234_v52  ;;  %v1315_v61 = vrot.slane %v345_v59, 5  ;;  %v529_v32 = vshrl.u32 %v462_v60, 16  ;;  %v532_v11 = vshll.u32 %v462_v60, 16  ;;  %v463_v56 = vld [vmem:[%s1033_s13 + $0x94] sm:$0xf] }
  0x56   : > { %v725_v4 = vmax.bf16 %v697_v62, %v338_v13  ;;  %v271_v6 = vmax.bf16 %v235_v48, %v1244_v30  ;;  %v431_v7 = vsel %vm1057_vm4, %v429_v1, %v430_v36  ;;  %v342_v10 = vor.u32 %v341_v9, %v1269_v16 }
  0x57   : > { %v644_v5 = vrot.slane %v1286_v45, 4  ;;  %v646_v12 = vshrl.u32 %v1255_v63, 16  ;;  %v531_v17 = vrot.slane %v529_v32, 5  ;;  %v649_v22 = vshll.u32 %v1255_v63, 16  ;;  %v1353_v45 = vld [vmem:[%s1033_s13 + $0x70] sm:$0xf] }
  0x58   : > { %v784_v15 = vmax.bf16 %v758_v44, %v725_v4  ;;  %v759_v23 = vrot.slane %v757_v20, 4  ;;  %v343_v18 = vrot.slane %v342_v10, 4  ;;  %v534_v30 = vrot.slane %v532_v11, 6 }
  0x59   : > { %v648_v24 = vrot.slane %v646_v12, 5  ;;  %v760_v25 = vrot.slane %v1278_v40, 5  ;;  %v651_v31 = vrot.slane %v649_v22, 6  ;;  %v816_v27 = vrot.slane %v814_v8, 4  ;;  %v1345_v40 = vld [vmem:[%s1033_s13 + $0x20] sm:$0xf] }
  0x5a   : > { %v841_v16 = vmax.bf16 %v815_v51, %v784_v15  ;;  %v817_v33 = vrot.slane %v1291_v46, 5  ;;  %v348_v63 = vsel %vm1063_vm7, %v343_v18, %v1315_v61  ;;  %v1334_v35 = vor.u32 %v534_v30, %v531_v17  ;;  %v464_v30 = vld [vmem:[%s1033_s13 + $0x98] sm:$0xf] }
  0x5b   : > { %v761_v37 = vsel %vm1057_vm4, %v759_v23, %v760_v25  ;;  %v239_v38 = vor.u32 %v238_v0, %v234_v52  ;;  %v384_v39 = vmax.bf16 %v348_v63, %v271_v6  ;;  %v1340_v19 = vor.u32 %v651_v31, %v648_v24 }
  0x5c   : > { %851 = vst.msk [vmem:[%s1150_s17 + $0x10] sm:$0xf] %vm846_vm9, %v841_v16  ;;  %v818_v20 = vsel %vm1057_vm4, %v816_v27, %v817_v33  ;;  %v242_v34 = vshll.u32 %v1327_v3, 16  ;;  %v536_v42 = vsel %vm1099_vm8, %v527_v2, %v1334_v35  ;;  %v246_v8 = vshrl.u32 %v1327_v3, 16 }
  0x5d   : > { %v240_v43 = vrot.slane %v239_v38, 4  ;;  %v252_v13 = vshll.u32 %v158_v41, 16  ;;  %v453_v44 = vmax.bf16 %v431_v7, %v384_v39  ;;  %v581_v47 = vmax.bf16 %v536_v42, %v452_v57 }
  0x5e   : > { %v653_v21 = vsel %vm1099_vm8, %v644_v5, %v1340_v19  ;;  %v244_v50 = vrot.slane %v242_v34, 5  ;;  %v248_v51 = vrot.slane %v246_v8, 4  ;;  %v349_v54 = vshrl.u32 %v1291_v46, 16 }
  0x5f   : > { %v254_v49 = vrot.slane %v252_v13, 5  ;;  %v355_v55 = vshll.u32 %v1345_v40, 16  ;;  %v698_v26 = vmax.bf16 %v653_v21, %v581_v47  ;;  %v432_v58 = vrot.slane %v430_v36, 4 }
  0x60   : > { %v245_v52 = vsel %vm1063_vm7, %v240_v43, %v244_v50  ;;  %v433_v59 = vrot.slane %v1353_v45, 5  ;;  %v249_v57 = vor.u32 %v248_v51, %v244_v50  ;;  %v351_v62 = vrot.slane %v349_v54, 4  ;;  %v731_v51 = vld [vmem:[%s1033_s13 + $0x4c] sm:$0xf] }
  0x61   : > { %v272_v60 = vmax.bf16 %v245_v52, %v1291_v46  ;;  %v357_v0 = vrot.slane %v355_v55, 5  ;;  %v726_v1 = vmax.bf16 %v698_v26, %v348_v63  ;;  %v537_v9 = vrot.slane %v1334_v35, 4 }
  0x62   : > { %v434_v48 = vsel %vm1057_vm4, %v432_v58, %v433_v59  ;;  %v539_v2 = vshrl.u32 %v463_v56, 16  ;;  %v250_v4 = vrot.slane %v249_v57, 4  ;;  %v352_v36 = vor.u32 %v351_v62, %v1315_v61  ;;  %v274_v57 = vld [vmem:[%s1033_s13 + $0x24] sm:$0x1] }
  0x63   : > { %v542_v6 = vshll.u32 %v463_v56, 16  ;;  %v654_v7 = vrot.slane %v1340_v19, 4  ;;  %v785_v32 = vmax.bf16 %v761_v37, %v726_v1  ;;  %v656_v10 = vshrl.u32 %v1302_v53, 16  ;;  %v1392_v19 = vld [vmem:[%s1033_s13 + $0x24] sm:$0xf] }
  0x64   : > { %v541_v46 = vrot.slane %v539_v2, 5  ;;  %v659_v11 = vshll.u32 %v1302_v53, 16  ;;  %v255_v5 = vsel %vm1063_vm7, %v250_v4, %v254_v49  ;;  %v353_v12 = vrot.slane %v352_v36, 4  ;;  %v396_v36 = vld [vmem:[%s1033_s13 + $0x74] sm:$0x1] }
  0x65   : > { %v544_v15 = vrot.slane %v542_v6, 6  ;;  %v762_v17 = vrot.slane %v760_v25, 4  ;;  %v842_v22 = vmax.bf16 %v818_v20, %v785_v32  ;;  %v1377_v23 = vmax.bf16 %v255_v5, %v1345_v40 }
  0x66   : > { %v658_v61 = vrot.slane %v656_v10, 5  ;;  %v661_v18 = vrot.slane %v659_v11, 6  ;;  %v358_v24 = vsel %vm1063_vm7, %v353_v12, %v357_v0  ;;  %v763_v53 = vrot.slane %v1327_v3, 5  ;;  %v465_v10 = vld [vmem:[%s1033_s13 + $0x9c] sm:$0x3] }
  0x67   : > { %v545_v16 = vor.u32 %v544_v15, %v541_v46  ;;  %v819_v31 = vrot.slane %v817_v33, 4  ;;  %852 = vst.msk [vmem:[%s1150_s17 + $0x14] sm:$0xf] %vm846_vm9, %v842_v22  ;;  %v385_v27 = vmax.bf16 %v358_v24, %v272_v60  ;;  %v820_v25 = vrot.slane %v1345_v40, 5 }
  0x68   : > { %v662_v41 = vor.u32 %v661_v18, %v658_v61  ;;  %v359_v63 = vshrl.u32 %v1345_v40, 16  ;;  %v764_v37 = vsel %vm1057_vm4, %v762_v17, %v763_v53  ;;  %v549_v39 = vshrl.u32 %v464_v30, 16  ;;  %v585_v17 = vld [vmem:[%s1033_s13 + $0x74] sm:$0x3] }
  0x69   : > { %v546_v35 = vsel %vm1099_vm8, %v537_v9, %v545_v16  ;;  %v547_v38 = vrot.slane %v545_v16, 4  ;;  %v454_v3 = vmax.bf16 %v434_v48, %v385_v27  ;;  %v821_v34 = vsel %vm1057_vm4, %v819_v31, %v820_v25  ;;  %v703_v27 = vld [vmem:[%s1033_s13 + $0x28] sm:$0x1] }
  0x6a   : > { %v582_v33 = vmax.bf16 %v546_v35, %v453_v44  ;;  %v663_v20 = vsel %vm1099_vm8, %v654_v7, %v662_v41  ;;  %v361_v40 = vrot.slane %v359_v63, 4  ;;  %v551_v42 = vrot.slane %v549_v39, 5 }
  0x6b   : > { %v552_v43 = vshll.u32 %v464_v30, 16  ;;  %v664_v8 = vrot.slane %v662_v41, 4  ;;  %v666_v47 = vshrl.u32 %v1353_v45, 16  ;;  %v669_v21 = vshll.u32 %v1353_v45, 16 }
  0x6c   : > { %v699_v13 = vmax.bf16 %v663_v20, %v582_v33  ;;  %v705_v50 = vshll.u32 %v1392_v19, 16  ;;  %v362_v44 = vor.u32 %v361_v40, %v357_v0  ;;  %v709_v54 = vshrl.u32 %v1392_v19, 16  ;;  %v732_v20 = vld [vmem:[%s1033_s13 + $0x50] sm:$0x1] }
  0x6d   : > { %v554_v49 = vrot.slane %v552_v43, 6  ;;  %v765_v55 = vrot.slane %v763_v53, 4  ;;  %v668_v26 = vrot.slane %v666_v47, 5  ;;  %v671_v52 = vrot.slane %v669_v21, 6 }
  0x6e   : > { %v727_v56 = vmax.bf16 %v699_v13, %v358_v24  ;;  %v707_v58 = vrot.slane %v705_v50, 5  ;;  %v363_v60 = vrot.slane %v362_v44, 4  ;;  %v711_v1 = vrot.slane %v709_v54, 4 }
  0x6f   : > { %v555_v62 = vor.u32 %v554_v49, %v551_v42  ;;  %v766_v48 = vrot.slane %v731_v51, 5  ;;  %v672_v2 = vor.u32 %v671_v52, %v668_v26  ;;  %v822_v4 = vrot.slane %v820_v25, 4 }
  0x70   : > { %v786_v9 = vmax.bf16 %v764_v37, %v727_v56  ;;  %v823_v0 = vrot.slane %v1392_v19, 5  ;;  %v708_v7 = vsel %vm1063_vm7, %v363_v60, %v707_v58  ;;  %v365_v46 = vshll.u32 %v274_v57, 16 }
  0x71   : > { %v556_v6 = vsel %vm1099_vm8, %v547_v38, %v555_v62  ;;  %v767_v32 = vsel %vm1057_vm4, %v765_v55, %v766_v48  ;;  %v673_v12 = vsel %vm1099_vm8, %v664_v8, %v672_v2  ;;  %v435_v61 = vrot.slane %v433_v59, 4 }
  0x72   : > { %v843_v11 = vmax.bf16 %v821_v34, %v786_v9  ;;  %v583_v5 = vmax.bf16 %v556_v6, %v454_v3  ;;  %v824_v15 = vsel %vm1057_vm4, %v822_v4, %v823_v0  ;;  %v367_v22 = vrot.slane %v365_v46, 5 }
  0x73   : > { %v436_v18 = vrot.slane %v396_v36, 5  ;;  %v557_v30 = vrot.slane %v555_v62, 4  ;;  %v559_v16 = vshrl.u32 %v465_v10, 16  ;;  %v562_v53 = vshll.u32 %v465_v10, 16 }
  0x74   : > { %853 = vst.msk [vmem:[%s1150_s17 + $0x18] sm:$0xf] %vm846_vm9, %v843_v11  ;;  %v700_v24 = vmax.bf16 %v673_v12, %v583_v5  ;;  %v674_v31 = vrot.slane %v672_v2, 4  ;;  %v368_v41 = vsel %vm1063_vm7, %v363_v60, %v367_v22  ;;  %v676_v63 = vshrl.u32 %v585_v17, 16 }
  0x75   : > { %v437_v25 = vsel %vm1057_vm4, %v435_v61, %v436_v18  ;;  %v679_v35 = vshll.u32 %v585_v17, 16  ;;  %v386_v59 = vmax.bf16 %v368_v41, %v1377_v23  ;;  %v561_v37 = vrot.slane %v559_v16, 5 }
  0x76   : > { %v728_v45 = vmax.bf16 %v708_v7, %v700_v24  ;;  %v564_v38 = vrot.slane %v562_v53, 6  ;;  %v678_v39 = vrot.slane %v676_v63, 5  ;;  %v712_v3 = vor.u32 %v711_v1, %v707_v58 }
  0x77   : > { %v681_v19 = vrot.slane %v679_v35, 6  ;;  %v715_v33 = vshll.u32 %v703_v27, 16  ;;  %v455_v40 = vmax.bf16 %v437_v25, %v386_v59  ;;  %v768_v23 = vrot.slane %v766_v48, 4 }
  0x78   : > { %v787_v34 = vmax.bf16 %v767_v32, %v728_v45  ;;  %v565_v42 = vor.u32 %v564_v38, %v561_v37  ;;  %v713_v8 = vrot.slane %v712_v3, 4  ;;  %v769_v50 = vrot.slane %v732_v20, 5 }
  0x79   : > { %v682_v43 = vor.u32 %v681_v19, %v678_v39  ;;  %v717_v13 = vrot.slane %v715_v33, 5  ;;  %v825_v54 = vrot.slane %v823_v0, 4  ;;  %v826_v55 = vrot.slane %v703_v27, 5 }
  0x7a   : > { %v844_v47 = vmax.bf16 %v824_v15, %v787_v34  ;;  %v566_v21 = vsel %vm1099_vm8, %v557_v30, %v565_v42  ;;  %v770_v26 = vsel %vm1057_vm4, %v768_v23, %v769_v50 }
  0x7b   : > { %v584_v51 = vmax.bf16 %v566_v21, %v455_v40  ;;  %v683_v44 = vsel %vm1099_vm8, %v674_v31, %v682_v43  ;;  %v718_v49 = vsel %vm1063_vm7, %v713_v8, %v717_v13  ;;  %v827_v58 = vsel %vm1057_vm4, %v825_v54, %v826_v55 }
  0x7c   : > { %854 = vst.msk [vmem:[%s1150_s17 + $0x1c] sm:$0xf] %vm846_vm9, %v844_v47 }
  0x7d   : > { %v701_v56 = vmax.bf16 %v683_v44, %v584_v51 }
  0x7f   : > { %v729_v52 = vmax.bf16 %v718_v49, %v701_v56 }
  0x81   : > { %v788_v57 = vmax.bf16 %v770_v26, %v729_v52 }
  0x83   : > { %v845_v60 = vmax.bf16 %v827_v58, %v788_v57 }
  0x85   : > { %855 = vst.msk [vmem:[%s1150_s17 + $0x20] sm:$0xf] %vm846_vm9, %v845_v60 }
  0x86 PF: > { %s11_s8 = sadd.s32 1, %s997_s8   ;;  %s1460_s6 = smov %s993_s7 }
  0x87   : > { %p8_p5 = scmp.ge.s32.totalorder %s11_s8, 10   ;;  %s1461_s7 = smov %s1463_s9 }
  0x89   :  { %10 = sbr.rel (!%p8_p5) target bundleno = 2 (0x2), region = 54 }

// kernel: _lambda_.21
= control target key start
LH: loop header
LB: loop body
LE: loop exit
PB: predicated region body
PF: predicated region fallthrough
CT: control target
= control target key end

     0   :  { %vm250_vm0 = vcmask 130048   ;;  %vm1098_vm1 = vcmask 60416   ;;  %s2046_s1 = inlined_call_operand.vmem [shape: bf16[1,16,8], index: 1, kind: input, shape index: {}]   ;;  %s2047_s0 = inlined_call_operand.vmem [shape: bf16[1,512,16], index: 0, kind: input, shape index: {}]   ;;  %s2048_s2 = inlined_call_operand.vmem [shape: f32[1,8], index: 2, kind: input, shape index: {}]   ;;  %s2049_s3 = inlined_call_operand.vmem [shape: f32[1,8], index: 3, kind: input, shape index: {}]   ;;  %s2050_s4 = inlined_call_operand.vmem [shape: bf16[1,512,8], index: 4, kind: output, shape index: {}]  }
   0x1   :  { %v1463_v0 = vld [vmem:[%s2046_s1] sm:$0xff]   ;;  %v1466_v3 = vld [vmem:[%s2047_s0 + $0x8] sm:$0xff]   ;;  %v1468_v5 = vld [vmem:[%s2047_s0 + $0x10] sm:$0xff]  }
   0x2   :  { %v1464_v1 = vld [vmem:[%s2047_s0] sm:$0xff]   ;;  %1395 = vmatprep.subr.bf16.mxu0 %v1463_v0  ;;  %1461 = vmatprep.subr.bf16.mxu1 %v1463_v0  ;;  %v1467_v4 = vld [vmem:[%s2047_s0 + $0x88] sm:$0xff]   ;;  %v1469_v6 = vld [vmem:[%s2047_s0 + $0x90] sm:$0xff]  }
   0x3   :  { %v1465_v2 = vld [vmem:[%s2047_s0 + $0x80] sm:$0xff]   ;;  %1396 = vmatpush3.bf16.msra.mxu0 %v1463_v0  ;;  %1462 = vmatpush3.bf16.msra.mxu1 %v1463_v0  ;;  %v1470_v7 = vld [vmem:[%s2047_s0 + $0x18] sm:$0xff]   ;;  %v1474_v11 = vld [vmem:[%s2047_s0 + $0x28] sm:$0xff]  }
   0x4   :  { %1397 = vmatprep.mubr.msk.bf16.mxu0 %vm250_vm0, %v1464_v1  ;;  %1429 = vmatprep.mubr.msk.bf16.mxu1 %vm250_vm0, %v1465_v2  ;;  %v1471_v8 = vld [vmem:[%s2047_s0 + $0x98] sm:$0xff]   ;;  %v1472_v9 = vld [vmem:[%s2047_s0 + $0x20] sm:$0xff]   ;;  %v1475_v12 = vld [vmem:[%s2047_s0 + $0xa8] sm:$0xff]  }
   0x5   :  { %v1473_v10 = vld [vmem:[%s2047_s0 + $0xa0] sm:$0xff]   ;;  %v1476_v13 = vld [vmem:[%s2047_s0 + $0x30] sm:$0xff]   ;;  %v1478_v15 = vld [vmem:[%s2047_s0 + $0x38] sm:$0xff]  }
   0x6   :  { %1398 = vmatmul.mubr.msk.bf16.vlgmr.msra.gmra.mxu0 %vm250_vm0, %v1466_v3  ;;  %1430 = vmatmul.mubr.msk.bf16.vlgmr.msra.gmra.mxu1 %vm250_vm0, %v1467_v4  ;;  %v1477_v14 = vld [vmem:[%s2047_s0 + $0xb0] sm:$0xff]   ;;  %v1479_v16 = vld [vmem:[%s2047_s0 + $0xb8] sm:$0xff]   ;;  %v1480_v17 = vld [vmem:[%s2047_s0 + $0x40] sm:$0xff]  }
   0x7   :  { %1401 = vmatprep.mubr.msk.bf16.mxu0 %vm250_vm0, %v1468_v5  ;;  %1433 = vmatprep.mubr.msk.bf16.mxu1 %vm250_vm0, %v1469_v6  ;;  %v1481_v18 = vld [vmem:[%s2047_s0 + $0xc0] sm:$0xff]   ;;  %v1482_v19 = vld [vmem:[%s2047_s0 + $0x48] sm:$0xff]   ;;  %v1484_v21 = vld [vmem:[%s2047_s0 + $0x50] sm:$0xff]  }
   0x8   :  { %v1483_v20 = vld [vmem:[%s2047_s0 + $0xc8] sm:$0xff]   ;;  %v1485_v22 = vld [vmem:[%s2047_s0 + $0xd0] sm:$0xff]   ;;  %v1486_v23 = vld [vmem:[%s2047_s0 + $0x58] sm:$0xff]  }
   0x9   :  { %v1487_v24 = vld [vmem:[%s2047_s0 + $0xd8] sm:$0xff]   ;;  %v1488_v25 = vld [vmem:[%s2047_s0 + $0x60] sm:$0xff]   ;;  %v1490_v27 = vld [vmem:[%s2047_s0 + $0x68] sm:$0xff]  }
   0xa   :  { %v1489_v26 = vld [vmem:[%s2047_s0 + $0xe0] sm:$0xff]   ;;  %v1491_v28 = vld [vmem:[%s2047_s0 + $0xe8] sm:$0xff]   ;;  %v1492_v29 = vld [vmem:[%s2047_s0 + $0x70] sm:$0xff]  }
   0xb   :  { %v1493_v30 = vld [vmem:[%s2047_s0 + $0xf0] sm:$0xff]   ;;  %v1494_v31 = vld [vmem:[%s2047_s0 + $0x78] sm:$0xff]   ;;  %v1655_v33 = vld [vmem:[%s2048_s2] ss:$0 sm:$0xff] }
   0xc   :  { %v1495_v32 = vld [vmem:[%s2047_s0 + $0xf8] sm:$0xff]   ;;  %v1660_v35 = vld [vmem:[%s2049_s3] ss:$0 sm:$0xff] }
   0xe   :  { %1402 = vmatmul.mubr.msk.bf16.gmra.mxu0 %vm250_vm0, %v1470_v7  ;;  %1434 = vmatmul.mubr.msk.bf16.gmra.mxu1 %vm250_vm0, %v1471_v8 }
   0xf   :  { %1405 = vmatprep.mubr.msk.bf16.mxu0 %vm250_vm0, %v1472_v9  ;;  %1437 = vmatprep.mubr.msk.bf16.mxu1 %vm250_vm0, %v1473_v10 }
  0x16   :  { %1406 = vmatmul.mubr.msk.bf16.gmra.mxu0 %vm250_vm0, %v1474_v11  ;;  %1438 = vmatmul.mubr.msk.bf16.gmra.mxu1 %vm250_vm0, %v1475_v12 }
  0x17   :  { %1409 = vmatprep.mubr.msk.bf16.mxu0 %vm250_vm0, %v1476_v13  ;;  %1441 = vmatprep.mubr.msk.bf16.mxu1 %vm250_vm0, %v1477_v14 }
  0x1e   :  { %1410 = vmatmul.mubr.msk.bf16.gmra.mxu0 %vm250_vm0, %v1478_v15  ;;  %1442 = vmatmul.mubr.msk.bf16.gmra.mxu1 %vm250_vm0, %v1479_v16 }
  0x1f   :  { %1413 = vmatprep.mubr.msk.bf16.mxu0 %vm250_vm0, %v1480_v17  ;;  %1445 = vmatprep.mubr.msk.bf16.mxu1 %vm250_vm0, %v1481_v18 }
  0x26   :  { %1414 = vmatmul.mubr.msk.bf16.gmra.mxu0 %vm250_vm0, %v1482_v19  ;;  %1446 = vmatmul.mubr.msk.bf16.gmra.mxu1 %vm250_vm0, %v1483_v20 }
  0x27   :  { %1417 = vmatprep.mubr.msk.bf16.mxu0 %vm250_vm0, %v1484_v21  ;;  %1449 = vmatprep.mubr.msk.bf16.mxu1 %vm250_vm0, %v1485_v22 }
  0x2e   :  { %1418 = vmatmul.mubr.msk.bf16.gmra.mxu0 %vm250_vm0, %v1486_v23  ;;  %1450 = vmatmul.mubr.msk.bf16.gmra.mxu1 %vm250_vm0, %v1487_v24 }
  0x2f   :  { %1421 = vmatprep.mubr.msk.bf16.mxu0 %vm250_vm0, %v1488_v25  ;;  %1453 = vmatprep.mubr.msk.bf16.mxu1 %vm250_vm0, %v1489_v26 }
  0x36   :  { %1422 = vmatmul.mubr.msk.bf16.gmra.mxu0 %vm250_vm0, %v1490_v27  ;;  %1454 = vmatmul.mubr.msk.bf16.gmra.mxu1 %vm250_vm0, %v1491_v28 }
  0x37   :  { %1425 = vmatprep.mubr.msk.bf16.mxu0 %vm250_vm0, %v1492_v29  ;;  %1457 = vmatprep.mubr.msk.bf16.mxu1 %vm250_vm0, %v1493_v30 }
  0x3e   :  { %1426 = vmatmul.mubr.msk.bf16.gmra.mxu0 %vm250_vm0, %v1494_v31  ;;  %1458 = vmatmul.mubr.msk.bf16.gmra.mxu1 %vm250_vm0, %v1495_v32 }
  0xc6   :  { %v1399_v34 = vpop.f32.mrf.mxu0  ;;  %v1431_v36 = vpop.f32.mrf.mxu1 }
  0xc7   :  { %v645_v37 = vmul.f32 %v1399_v34, %v1655_v33  ;;  %v677_v38 = vmul.f32 %v1431_v36, %v1655_v33 }
  0xc8   :  { %v381_v39 = vpop.f32.mrf.mxu0  ;;  %v509_v40 = vpop.f32.mrf.mxu1 }
  0xc9   :  { %v716_v41 = vadd.f32 %v1660_v35, %v645_v37  ;;  %v748_v42 = vadd.f32 %v1660_v35, %v677_v38  ;;  %v643_v43 = vmul.f32 %v1655_v33, %v381_v39  ;;  %v675_v44 = vmul.f32 %v1655_v33, %v509_v40 }
  0xca   :  { %v1400_v45 = vpop.f32.mrf.mxu0  ;;  %v1432_v46 = vpop.f32.mrf.mxu1 }
  0xcb   :  { %v780_v47 = vmax.f32 %v716_v41, 0.0  ;;  %v812_v48 = vmax.f32 %v748_v42, 0.0  ;;  %v714_v49 = vadd.f32 %v1660_v35, %v643_v43  ;;  %v746_v50 = vadd.f32 %v1660_v35, %v675_v44 }
  0xcc   :  { %v646_v51 = vmul.f32 %v1400_v45, %v1655_v33  ;;  %v678_v52 = vmul.f32 %v1432_v46, %v1655_v33  ;;  %v384_v53 = vpop.f32.mrf.mxu0  ;;  %v512_v54 = vpop.f32.mrf.mxu1 }
  0xcd   :  { %v1300_v55 = vpack.c.bf16 %v780_v47, %v780_v47  ;;  %v1332_v56 = vpack.c.bf16 %v812_v48, %v812_v48  ;;  %v778_v57 = vmax.f32 %v714_v49, 0.0  ;;  %v810_v58 = vmax.f32 %v746_v50, 0.0 }
  0xce   :  { %v717_v59 = vadd.f32 %v1660_v35, %v646_v51  ;;  %v749_v60 = vadd.f32 %v1660_v35, %v678_v52  ;;  %v644_v61 = vmul.f32 %v1655_v33, %v384_v53  ;;  %v676_v62 = vmul.f32 %v1655_v33, %v512_v54  ;;  %v1403_v63 = vpop.f32.mrf.mxu0  ;;  %v1435_v0 = vpop.f32.mrf.mxu1 }
  0xcf   :  { %1101 = vst.msk [vmem:[%s2050_s4 + $0x8] sm:$0xf] %vm1098_vm1, %v1300_v55  ;;  %1133 = vst.msk [vmem:[%s2050_s4 + $0x88] sm:$0xf] %vm1098_vm1, %v1332_v56  ;;  %v1298_v1 = vpack.c.bf16 %v778_v57, %v778_v57  ;;  %v1330_v2 = vpack.c.bf16 %v810_v58, %v810_v58  ;;  %v649_v3 = vmul.f32 %v1403_v63, %v1655_v33 }
  0xd0   :  { %v681_v4 = vmul.f32 %v1435_v0, %v1655_v33  ;;  %v781_v5 = vmax.f32 %v717_v59, 0.0  ;;  %v813_v6 = vmax.f32 %v749_v60, 0.0  ;;  %v715_v7 = vadd.f32 %v1660_v35, %v644_v61  ;;  %v397_v9 = vpop.f32.mrf.mxu0  ;;  %v525_v10 = vpop.f32.mrf.mxu1 }
  0xd1   :  { %v747_v8 = vadd.f32 %v1660_v35, %v676_v62  ;;  %1099 = vst.msk [vmem:[%s2050_s4] sm:$0xf] %vm1098_vm1, %v1298_v1  ;;  %1131 = vst.msk [vmem:[%s2050_s4 + $0x80] sm:$0xf] %vm1098_vm1, %v1330_v2  ;;  %v720_v11 = vadd.f32 %v1660_v35, %v649_v3  ;;  %v647_v13 = vmul.f32 %v1655_v33, %v397_v9 }
  0xd2   :  { %v752_v12 = vadd.f32 %v1660_v35, %v681_v4  ;;  %v679_v14 = vmul.f32 %v1655_v33, %v525_v10  ;;  %v1301_v15 = vpack.c.bf16 %v781_v5, %v781_v5  ;;  %v1333_v16 = vpack.c.bf16 %v813_v6, %v813_v6  ;;  %v1404_v19 = vpop.f32.mrf.mxu0  ;;  %v1436_v20 = vpop.f32.mrf.mxu1 }
  0xd3   :  { %v779_v17 = vmax.f32 %v715_v7, 0.0  ;;  %v811_v18 = vmax.f32 %v747_v8, 0.0  ;;  %v784_v21 = vmax.f32 %v720_v11, 0.0  ;;  %v718_v23 = vadd.f32 %v1660_v35, %v647_v13 }
  0xd4   :  { %v816_v22 = vmax.f32 %v752_v12, 0.0  ;;  %v750_v24 = vadd.f32 %v1660_v35, %v679_v14  ;;  %1102 = vst.msk [vmem:[%s2050_s4 + $0xc] sm:$0xf] %vm1098_vm1, %v1301_v15  ;;  %1134 = vst.msk [vmem:[%s2050_s4 + $0x8c] sm:$0xf] %vm1098_vm1, %v1333_v16  ;;  %v650_v27 = vmul.f32 %v1404_v19, %v1655_v33  ;;  %v682_v28 = vmul.f32 %v1436_v20, %v1655_v33  ;;  %v400_v29 = vpop.f32.mrf.mxu0  ;;  %v528_v30 = vpop.f32.mrf.mxu1 }
  0xd5   :  { %v1299_v25 = vpack.c.bf16 %v779_v17, %v779_v17  ;;  %v1331_v26 = vpack.c.bf16 %v811_v18, %v811_v18  ;;  %v1304_v31 = vpack.c.bf16 %v784_v21, %v784_v21  ;;  %v782_v34 = vmax.f32 %v718_v23, 0.0 }
  0xd6   :  { %v1336_v32 = vpack.c.bf16 %v816_v22, %v816_v22  ;;  %v814_v36 = vmax.f32 %v750_v24, 0.0  ;;  %v721_v37 = vadd.f32 %v1660_v35, %v650_v27  ;;  %v753_v38 = vadd.f32 %v1660_v35, %v682_v28  ;;  %v1407_v41 = vpop.f32.mrf.mxu0  ;;  %v1439_v42 = vpop.f32.mrf.mxu1 }
  0xd7   :  { %1100 = vst.msk [vmem:[%s2050_s4 + $0x4] sm:$0xf] %vm1098_vm1, %v1299_v25  ;;  %1132 = vst.msk [vmem:[%s2050_s4 + $0x84] sm:$0xf] %vm1098_vm1, %v1331_v26  ;;  %v648_v39 = vmul.f32 %v1655_v33, %v400_v29  ;;  %v680_v40 = vmul.f32 %v1655_v33, %v528_v30  ;;  %v1302_v43 = vpack.c.bf16 %v782_v34, %v782_v34 }
  0xd8   :  { %1105 = vst.msk [vmem:[%s2050_s4 + $0x18] sm:$0xf] %vm1098_vm1, %v1304_v31  ;;  %1137 = vst.msk [vmem:[%s2050_s4 + $0x98] sm:$0xf] %vm1098_vm1, %v1336_v32  ;;  %v1334_v44 = vpack.c.bf16 %v814_v36, %v814_v36  ;;  %v653_v45 = vmul.f32 %v1407_v41, %v1655_v33  ;;  %v685_v46 = vmul.f32 %v1439_v42, %v1655_v33  ;;  %v785_v47 = vmax.f32 %v721_v37, 0.0  ;;  %v413_v51 = vpop.f32.mrf.mxu0  ;;  %v541_v52 = vpop.f32.mrf.mxu1 }
  0xd9   :  { %v817_v48 = vmax.f32 %v753_v38, 0.0  ;;  %v719_v49 = vadd.f32 %v1660_v35, %v648_v39  ;;  %v751_v50 = vadd.f32 %v1660_v35, %v680_v40  ;;  %1103 = vst.msk [vmem:[%s2050_s4 + $0x10] sm:$0xf] %vm1098_vm1, %v1302_v43  ;;  %v651_v55 = vmul.f32 %v1655_v33, %v413_v51 }
  0xda   :  { %1135 = vst.msk [vmem:[%s2050_s4 + $0x90] sm:$0xf] %vm1098_vm1, %v1334_v44  ;;  %v724_v53 = vadd.f32 %v1660_v35, %v653_v45  ;;  %v756_v54 = vadd.f32 %v1660_v35, %v685_v46  ;;  %v683_v56 = vmul.f32 %v1655_v33, %v541_v52  ;;  %v1305_v57 = vpack.c.bf16 %v785_v47, %v785_v47  ;;  %v1408_v61 = vpop.f32.mrf.mxu0  ;;  %v1440_v62 = vpop.f32.mrf.mxu1 }
  0xdb   :  { %v1337_v58 = vpack.c.bf16 %v817_v48, %v817_v48  ;;  %v783_v59 = vmax.f32 %v719_v49, 0.0  ;;  %v815_v60 = vmax.f32 %v751_v50, 0.0  ;;  %v722_v1 = vadd.f32 %v1660_v35, %v651_v55 }
  0xdc   :  { %v788_v63 = vmax.f32 %v724_v53, 0.0  ;;  %v820_v0 = vmax.f32 %v756_v54, 0.0  ;;  %v754_v2 = vadd.f32 %v1660_v35, %v683_v56  ;;  %1106 = vst.msk [vmem:[%s2050_s4 + $0x1c] sm:$0xf] %vm1098_vm1, %v1305_v57  ;;  %v654_v5 = vmul.f32 %v1408_v61, %v1655_v33  ;;  %v416_v7 = vpop.f32.mrf.mxu0  ;;  %v544_v8 = vpop.f32.mrf.mxu1 }
  0xdd   :  { %1138 = vst.msk [vmem:[%s2050_s4 + $0x9c] sm:$0xf] %vm1098_vm1, %v1337_v58  ;;  %v1303_v3 = vpack.c.bf16 %v783_v59, %v783_v59  ;;  %v1335_v4 = vpack.c.bf16 %v815_v60, %v815_v60  ;;  %v686_v6 = vmul.f32 %v1440_v62, %v1655_v33  ;;  %v786_v11 = vmax.f32 %v722_v1, 0.0 }
  0xde   :  { %v1308_v9 = vpack.c.bf16 %v788_v63, %v788_v63  ;;  %v1340_v10 = vpack.c.bf16 %v820_v0, %v820_v0  ;;  %v818_v12 = vmax.f32 %v754_v2, 0.0  ;;  %v725_v13 = vadd.f32 %v1660_v35, %v654_v5  ;;  %v1411_v17 = vpop.f32.mrf.mxu0  ;;  %v1443_v18 = vpop.f32.mrf.mxu1 }
  0xdf   :  { %1104 = vst.msk [vmem:[%s2050_s4 + $0x14] sm:$0xf] %vm1098_vm1, %v1303_v3  ;;  %1136 = vst.msk [vmem:[%s2050_s4 + $0x94] sm:$0xf] %vm1098_vm1, %v1335_v4  ;;  %v757_v14 = vadd.f32 %v1660_v35, %v686_v6  ;;  %v652_v15 = vmul.f32 %v1655_v33, %v416_v7  ;;  %v684_v16 = vmul.f32 %v1655_v33, %v544_v8 }
  0xe0   :  { %1109 = vst.msk [vmem:[%s2050_s4 + $0x28] sm:$0xf] %vm1098_vm1, %v1308_v9  ;;  %1141 = vst.msk [vmem:[%s2050_s4 + $0xa8] sm:$0xf] %vm1098_vm1, %v1340_v10  ;;  %v1306_v19 = vpack.c.bf16 %v786_v11, %v786_v11  ;;  %v1338_v20 = vpack.c.bf16 %v818_v12, %v818_v12  ;;  %v657_v21 = vmul.f32 %v1411_v17, %v1655_v33  ;;  %v789_v23 = vmax.f32 %v725_v13, 0.0  ;;  %v429_v27 = vpop.f32.mrf.mxu0  ;;  %v557_v28 = vpop.f32.mrf.mxu1 }
  0xe1   :  { %v689_v22 = vmul.f32 %v1443_v18, %v1655_v33  ;;  %v821_v24 = vmax.f32 %v757_v14, 0.0  ;;  %v723_v25 = vadd.f32 %v1660_v35, %v652_v15  ;;  %v755_v26 = vadd.f32 %v1660_v35, %v684_v16 }
  0xe2   :  { %1107 = vst.msk [vmem:[%s2050_s4 + $0x20] sm:$0xf] %vm1098_vm1, %v1306_v19  ;;  %1139 = vst.msk [vmem:[%s2050_s4 + $0xa0] sm:$0xf] %vm1098_vm1, %v1338_v20  ;;  %v728_v29 = vadd.f32 %v1660_v35, %v657_v21  ;;  %v655_v31 = vmul.f32 %v1655_v33, %v429_v27  ;;  %v687_v32 = vmul.f32 %v1655_v33, %v557_v28  ;;  %v1412_v39 = vpop.f32.mrf.mxu0  ;;  %v1444_v40 = vpop.f32.mrf.mxu1 }
  0xe3   :  { %v760_v30 = vadd.f32 %v1660_v35, %v689_v22  ;;  %v1309_v34 = vpack.c.bf16 %v789_v23, %v789_v23  ;;  %v1341_v36 = vpack.c.bf16 %v821_v24, %v821_v24  ;;  %v787_v37 = vmax.f32 %v723_v25, 0.0 }
  0xe4   :  { %v819_v38 = vmax.f32 %v755_v26, 0.0  ;;  %v792_v41 = vmax.f32 %v728_v29, 0.0  ;;  %v726_v43 = vadd.f32 %v1660_v35, %v655_v31  ;;  %v758_v44 = vadd.f32 %v1660_v35, %v687_v32  ;;  %v432_v49 = vpop.f32.mrf.mxu0  ;;  %v560_v50 = vpop.f32.mrf.mxu1 }
  0xe5   :  { %v824_v42 = vmax.f32 %v760_v30, 0.0  ;;  %1110 = vst.msk [vmem:[%s2050_s4 + $0x2c] sm:$0xf] %vm1098_vm1, %v1309_v34  ;;  %1142 = vst.msk [vmem:[%s2050_s4 + $0xac] sm:$0xf] %vm1098_vm1, %v1341_v36  ;;  %v1307_v45 = vpack.c.bf16 %v787_v37, %v787_v37  ;;  %v658_v47 = vmul.f32 %v1412_v39, %v1655_v33  ;;  %v690_v48 = vmul.f32 %v1444_v40, %v1655_v33 }
  0xe6   :  { %v1339_v46 = vpack.c.bf16 %v819_v38, %v819_v38  ;;  %v1312_v51 = vpack.c.bf16 %v792_v41, %v792_v41  ;;  %v790_v53 = vmax.f32 %v726_v43, 0.0  ;;  %v822_v54 = vmax.f32 %v758_v44, 0.0  ;;  %v1415_v59 = vpop.f32.mrf.mxu0  ;;  %v1447_v60 = vpop.f32.mrf.mxu1 }
  0xe7   :  { %v1344_v52 = vpack.c.bf16 %v824_v42, %v824_v42  ;;  %1108 = vst.msk [vmem:[%s2050_s4 + $0x24] sm:$0xf] %vm1098_vm1, %v1307_v45  ;;  %v729_v55 = vadd.f32 %v1660_v35, %v658_v47  ;;  %v761_v56 = vadd.f32 %v1660_v35, %v690_v48  ;;  %v656_v57 = vmul.f32 %v1655_v33, %v432_v49 }
  0xe8   :  { %1140 = vst.msk [vmem:[%s2050_s4 + $0xa4] sm:$0xf] %vm1098_vm1, %v1339_v46  ;;  %v688_v58 = vmul.f32 %v1655_v33, %v560_v50  ;;  %1113 = vst.msk [vmem:[%s2050_s4 + $0x38] sm:$0xf] %vm1098_vm1, %v1312_v51  ;;  %v1310_v61 = vpack.c.bf16 %v790_v53, %v790_v53  ;;  %v1342_v62 = vpack.c.bf16 %v822_v54, %v822_v54  ;;  %v445_v5 = vpop.f32.mrf.mxu0  ;;  %v573_v6 = vpop.f32.mrf.mxu1 }
  0xe9   :  { %1145 = vst.msk [vmem:[%s2050_s4 + $0xb8] sm:$0xf] %vm1098_vm1, %v1344_v52  ;;  %v661_v63 = vmul.f32 %v1415_v59, %v1655_v33  ;;  %v693_v0 = vmul.f32 %v1447_v60, %v1655_v33  ;;  %v793_v1 = vmax.f32 %v729_v55, 0.0  ;;  %v825_v2 = vmax.f32 %v761_v56, 0.0 }
  0xea   :  { %v727_v3 = vadd.f32 %v1660_v35, %v656_v57  ;;  %v759_v4 = vadd.f32 %v1660_v35, %v688_v58  ;;  %1111 = vst.msk [vmem:[%s2050_s4 + $0x30] sm:$0xf] %vm1098_vm1, %v1310_v61  ;;  %1143 = vst.msk [vmem:[%s2050_s4 + $0xb0] sm:$0xf] %vm1098_vm1, %v1342_v62  ;;  %v659_v9 = vmul.f32 %v1655_v33, %v445_v5  ;;  %v1416_v15 = vpop.f32.mrf.mxu0  ;;  %v1448_v16 = vpop.f32.mrf.mxu1 }
  0xeb   :  { %v732_v7 = vadd.f32 %v1660_v35, %v661_v63  ;;  %v764_v8 = vadd.f32 %v1660_v35, %v693_v0  ;;  %v691_v10 = vmul.f32 %v1655_v33, %v573_v6  ;;  %v1313_v11 = vpack.c.bf16 %v793_v1, %v793_v1 }
  0xec   :  { %v1345_v12 = vpack.c.bf16 %v825_v2, %v825_v2  ;;  %v791_v13 = vmax.f32 %v727_v3, 0.0  ;;  %v823_v14 = vmax.f32 %v759_v4, 0.0  ;;  %v730_v19 = vadd.f32 %v1660_v35, %v659_v9  ;;  %v448_v25 = vpop.f32.mrf.mxu0  ;;  %v576_v26 = vpop.f32.mrf.mxu1 }
  0xed   :  { %v796_v17 = vmax.f32 %v732_v7, 0.0  ;;  %v828_v18 = vmax.f32 %v764_v8, 0.0  ;;  %v762_v20 = vadd.f32 %v1660_v35, %v691_v10  ;;  %1114 = vst.msk [vmem:[%s2050_s4 + $0x3c] sm:$0xf] %vm1098_vm1, %v1313_v11  ;;  %v662_v23 = vmul.f32 %v1416_v15, %v1655_v33 }
  0xee   :  { %1146 = vst.msk [vmem:[%s2050_s4 + $0xbc] sm:$0xf] %vm1098_vm1, %v1345_v12  ;;  %v1311_v21 = vpack.c.bf16 %v791_v13, %v791_v13  ;;  %v1343_v22 = vpack.c.bf16 %v823_v14, %v823_v14  ;;  %v694_v24 = vmul.f32 %v1448_v16, %v1655_v33  ;;  %v794_v29 = vmax.f32 %v730_v19, 0.0  ;;  %v1419_v37 = vpop.f32.mrf.mxu0  ;;  %v1451_v38 = vpop.f32.mrf.mxu1 }
  0xef   :  { %v1316_v27 = vpack.c.bf16 %v796_v17, %v796_v17  ;;  %v1348_v28 = vpack.c.bf16 %v828_v18, %v828_v18  ;;  %v826_v30 = vmax.f32 %v762_v20, 0.0  ;;  %v733_v31 = vadd.f32 %v1660_v35, %v662_v23 }
  0xf0   :  { %1112 = vst.msk [vmem:[%s2050_s4 + $0x34] sm:$0xf] %vm1098_vm1, %v1311_v21  ;;  %1144 = vst.msk [vmem:[%s2050_s4 + $0xb4] sm:$0xf] %vm1098_vm1, %v1343_v22  ;;  %v765_v32 = vadd.f32 %v1660_v35, %v694_v24  ;;  %v660_v34 = vmul.f32 %v1655_v33, %v448_v25  ;;  %v692_v36 = vmul.f32 %v1655_v33, %v576_v26  ;;  %v461_v47 = vpop.f32.mrf.mxu0  ;;  %v589_v48 = vpop.f32.mrf.mxu1 }
  0xf1   :  { %1117 = vst.msk [vmem:[%s2050_s4 + $0x48] sm:$0xf] %vm1098_vm1, %v1316_v27  ;;  %1149 = vst.msk [vmem:[%s2050_s4 + $0xc8] sm:$0xf] %vm1098_vm1, %v1348_v28  ;;  %v1314_v39 = vpack.c.bf16 %v794_v29, %v794_v29  ;;  %v1346_v40 = vpack.c.bf16 %v826_v30, %v826_v30  ;;  %v665_v41 = vmul.f32 %v1419_v37, %v1655_v33  ;;  %v797_v43 = vmax.f32 %v733_v31, 0.0 }
  0xf2   :  { %v697_v42 = vmul.f32 %v1451_v38, %v1655_v33  ;;  %v829_v44 = vmax.f32 %v765_v32, 0.0  ;;  %v731_v45 = vadd.f32 %v1660_v35, %v660_v34  ;;  %v763_v46 = vadd.f32 %v1660_v35, %v692_v36  ;;  %v1420_v57 = vpop.f32.mrf.mxu0  ;;  %v1452_v58 = vpop.f32.mrf.mxu1 }
  0xf3   :  { %1115 = vst.msk [vmem:[%s2050_s4 + $0x40] sm:$0xf] %vm1098_vm1, %v1314_v39  ;;  %1147 = vst.msk [vmem:[%s2050_s4 + $0xc0] sm:$0xf] %vm1098_vm1, %v1346_v40  ;;  %v736_v49 = vadd.f32 %v1660_v35, %v665_v41  ;;  %v663_v51 = vmul.f32 %v1655_v33, %v461_v47  ;;  %v695_v52 = vmul.f32 %v1655_v33, %v589_v48 }
  0xf4   :  { %v768_v50 = vadd.f32 %v1660_v35, %v697_v42  ;;  %v1317_v53 = vpack.c.bf16 %v797_v43, %v797_v43  ;;  %v1349_v54 = vpack.c.bf16 %v829_v44, %v829_v44  ;;  %v795_v55 = vmax.f32 %v731_v45, 0.0  ;;  %v464_v3 = vpop.f32.mrf.mxu0  ;;  %v592_v4 = vpop.f32.mrf.mxu1 }
  0xf5   :  { %v827_v56 = vmax.f32 %v763_v46, 0.0  ;;  %v800_v59 = vmax.f32 %v736_v49, 0.0  ;;  %v734_v61 = vadd.f32 %v1660_v35, %v663_v51  ;;  %v766_v62 = vadd.f32 %v1660_v35, %v695_v52 }
  0xf6   :  { %v832_v60 = vmax.f32 %v768_v50, 0.0  ;;  %1118 = vst.msk [vmem:[%s2050_s4 + $0x4c] sm:$0xf] %vm1098_vm1, %v1317_v53  ;;  %1150 = vst.msk [vmem:[%s2050_s4 + $0xcc] sm:$0xf] %vm1098_vm1, %v1349_v54  ;;  %v1315_v63 = vpack.c.bf16 %v795_v55, %v795_v55  ;;  %v666_v1 = vmul.f32 %v1420_v57, %v1655_v33  ;;  %v698_v2 = vmul.f32 %v1452_v58, %v1655_v33  ;;  %v1423_v13 = vpop.f32.mrf.mxu0  ;;  %v1455_v14 = vpop.f32.mrf.mxu1 }
  0xf7   :  { %v1347_v0 = vpack.c.bf16 %v827_v56, %v827_v56  ;;  %v1320_v5 = vpack.c.bf16 %v800_v59, %v800_v59  ;;  %v798_v7 = vmax.f32 %v734_v61, 0.0  ;;  %v830_v8 = vmax.f32 %v766_v62, 0.0 }
  0xf8   :  { %v1352_v6 = vpack.c.bf16 %v832_v60, %v832_v60  ;;  %1116 = vst.msk [vmem:[%s2050_s4 + $0x44] sm:$0xf] %vm1098_vm1, %v1315_v63  ;;  %v737_v9 = vadd.f32 %v1660_v35, %v666_v1  ;;  %v769_v10 = vadd.f32 %v1660_v35, %v698_v2  ;;  %v664_v11 = vmul.f32 %v1655_v33, %v464_v3  ;;  %v477_v23 = vpop.f32.mrf.mxu0  ;;  %v605_v24 = vpop.f32.mrf.mxu1 }
  0xf9   :  { %1148 = vst.msk [vmem:[%s2050_s4 + $0xc4] sm:$0xf] %vm1098_vm1, %v1347_v0  ;;  %v696_v12 = vmul.f32 %v1655_v33, %v592_v4  ;;  %1121 = vst.msk [vmem:[%s2050_s4 + $0x58] sm:$0xf] %vm1098_vm1, %v1320_v5  ;;  %v1318_v15 = vpack.c.bf16 %v798_v7, %v798_v7  ;;  %v1350_v16 = vpack.c.bf16 %v830_v8, %v830_v8 }
  0xfa   :  { %1153 = vst.msk [vmem:[%s2050_s4 + $0xd8] sm:$0xf] %vm1098_vm1, %v1352_v6  ;;  %v669_v17 = vmul.f32 %v1423_v13, %v1655_v33  ;;  %v701_v18 = vmul.f32 %v1455_v14, %v1655_v33  ;;  %v801_v19 = vmax.f32 %v737_v9, 0.0  ;;  %v833_v20 = vmax.f32 %v769_v10, 0.0  ;;  %v1424_v34 = vpop.f32.mrf.mxu0  ;;  %v1456_v36 = vpop.f32.mrf.mxu1 }
  0xfb   :  { %v735_v21 = vadd.f32 %v1660_v35, %v664_v11  ;;  %v767_v22 = vadd.f32 %v1660_v35, %v696_v12  ;;  %1119 = vst.msk [vmem:[%s2050_s4 + $0x50] sm:$0xf] %vm1098_vm1, %v1318_v15  ;;  %1151 = vst.msk [vmem:[%s2050_s4 + $0xd0] sm:$0xf] %vm1098_vm1, %v1350_v16  ;;  %v667_v27 = vmul.f32 %v1655_v33, %v477_v23 }
  0xfc   :  { %v740_v25 = vadd.f32 %v1660_v35, %v669_v17  ;;  %v772_v26 = vadd.f32 %v1660_v35, %v701_v18  ;;  %v699_v28 = vmul.f32 %v1655_v33, %v605_v24  ;;  %v1321_v29 = vpack.c.bf16 %v801_v19, %v801_v19  ;;  %v480_v45 = vpop.f32.mrf.mxu0  ;;  %v608_v46 = vpop.f32.mrf.mxu1 }
  0xfd   :  { %v1353_v30 = vpack.c.bf16 %v833_v20, %v833_v20  ;;  %v799_v31 = vmax.f32 %v735_v21, 0.0  ;;  %v831_v32 = vmax.f32 %v767_v22, 0.0  ;;  %v738_v39 = vadd.f32 %v1660_v35, %v667_v27 }
  0xfe   :  { %v804_v37 = vmax.f32 %v740_v25, 0.0  ;;  %v836_v38 = vmax.f32 %v772_v26, 0.0  ;;  %v770_v40 = vadd.f32 %v1660_v35, %v699_v28  ;;  %1122 = vst.msk [vmem:[%s2050_s4 + $0x5c] sm:$0xf] %vm1098_vm1, %v1321_v29  ;;  %v670_v43 = vmul.f32 %v1424_v34, %v1655_v33  ;;  %v1427_v55 = vpop.f32.mrf.mxu0  ;;  %v1459_v56 = vpop.f32.mrf.mxu1 }
  0xff   :  { %1154 = vst.msk [vmem:[%s2050_s4 + $0xdc] sm:$0xf] %vm1098_vm1, %v1353_v30  ;;  %v1319_v41 = vpack.c.bf16 %v799_v31, %v799_v31  ;;  %v1351_v42 = vpack.c.bf16 %v831_v32, %v831_v32  ;;  %v702_v44 = vmul.f32 %v1456_v36, %v1655_v33  ;;  %v802_v49 = vmax.f32 %v738_v39, 0.0 }
 0x100   :  { %v1324_v47 = vpack.c.bf16 %v804_v37, %v804_v37  ;;  %v1356_v48 = vpack.c.bf16 %v836_v38, %v836_v38  ;;  %v834_v50 = vmax.f32 %v770_v40, 0.0  ;;  %v741_v51 = vadd.f32 %v1660_v35, %v670_v43  ;;  %v493_v1 = vpop.f32.mrf.mxu0  ;;  %v621_v2 = vpop.f32.mrf.mxu1 }
 0x101   :  { %1120 = vst.msk [vmem:[%s2050_s4 + $0x54] sm:$0xf] %vm1098_vm1, %v1319_v41  ;;  %1152 = vst.msk [vmem:[%s2050_s4 + $0xd4] sm:$0xf] %vm1098_vm1, %v1351_v42  ;;  %v773_v52 = vadd.f32 %v1660_v35, %v702_v44  ;;  %v668_v53 = vmul.f32 %v1655_v33, %v480_v45  ;;  %v700_v54 = vmul.f32 %v1655_v33, %v608_v46 }
 0x102   :  { %1125 = vst.msk [vmem:[%s2050_s4 + $0x68] sm:$0xf] %vm1098_vm1, %v1324_v47  ;;  %1157 = vst.msk [vmem:[%s2050_s4 + $0xe8] sm:$0xf] %vm1098_vm1, %v1356_v48  ;;  %v1322_v57 = vpack.c.bf16 %v802_v49, %v802_v49  ;;  %v1354_v58 = vpack.c.bf16 %v834_v50, %v834_v50  ;;  %v673_v59 = vmul.f32 %v1427_v55, %v1655_v33  ;;  %v805_v61 = vmax.f32 %v741_v51, 0.0  ;;  %v1428_v11 = vpop.f32.mrf.mxu0  ;;  %v1460_v12 = vpop.f32.mrf.mxu1 }
 0x103   :  { %v705_v60 = vmul.f32 %v1459_v56, %v1655_v33  ;;  %v837_v62 = vmax.f32 %v773_v52, 0.0  ;;  %v739_v63 = vadd.f32 %v1660_v35, %v668_v53  ;;  %v771_v0 = vadd.f32 %v1660_v35, %v700_v54 }
 0x104   :  { %1123 = vst.msk [vmem:[%s2050_s4 + $0x60] sm:$0xf] %vm1098_vm1, %v1322_v57  ;;  %1155 = vst.msk [vmem:[%s2050_s4 + $0xe0] sm:$0xf] %vm1098_vm1, %v1354_v58  ;;  %v744_v3 = vadd.f32 %v1660_v35, %v673_v59  ;;  %v671_v5 = vmul.f32 %v1655_v33, %v493_v1  ;;  %v703_v6 = vmul.f32 %v1655_v33, %v621_v2  ;;  %v496_v21 = vpop.f32.mrf.mxu0  ;;  %v624_v22 = vpop.f32.mrf.mxu1 }
 0x105   :  { %v776_v4 = vadd.f32 %v1660_v35, %v705_v60  ;;  %v1325_v7 = vpack.c.bf16 %v805_v61, %v805_v61  ;;  %v1357_v8 = vpack.c.bf16 %v837_v62, %v837_v62  ;;  %v803_v9 = vmax.f32 %v739_v63, 0.0 }
 0x106   :  { %v835_v10 = vmax.f32 %v771_v0, 0.0  ;;  %v808_v13 = vmax.f32 %v744_v3, 0.0  ;;  %v742_v15 = vadd.f32 %v1660_v35, %v671_v5  ;;  %v774_v16 = vadd.f32 %v1660_v35, %v703_v6 }
 0x107   :  { %v840_v14 = vmax.f32 %v776_v4, 0.0  ;;  %1126 = vst.msk [vmem:[%s2050_s4 + $0x6c] sm:$0xf] %vm1098_vm1, %v1325_v7  ;;  %1158 = vst.msk [vmem:[%s2050_s4 + $0xec] sm:$0xf] %vm1098_vm1, %v1357_v8  ;;  %v1323_v17 = vpack.c.bf16 %v803_v9, %v803_v9  ;;  %v674_v19 = vmul.f32 %v1428_v11, %v1655_v33  ;;  %v706_v20 = vmul.f32 %v1460_v12, %v1655_v33 }
 0x108   :  { %v1355_v18 = vpack.c.bf16 %v835_v10, %v835_v10  ;;  %v1328_v23 = vpack.c.bf16 %v808_v13, %v808_v13  ;;  %v806_v25 = vmax.f32 %v742_v15, 0.0  ;;  %v838_v26 = vmax.f32 %v774_v16, 0.0 }
 0x109   :  { %v1360_v24 = vpack.c.bf16 %v840_v14, %v840_v14  ;;  %1124 = vst.msk [vmem:[%s2050_s4 + $0x64] sm:$0xf] %vm1098_vm1, %v1323_v17  ;;  %v745_v27 = vadd.f32 %v1660_v35, %v674_v19  ;;  %v777_v28 = vadd.f32 %v1660_v35, %v706_v20  ;;  %v672_v29 = vmul.f32 %v1655_v33, %v496_v21 }
 0x10a   :  { %1156 = vst.msk [vmem:[%s2050_s4 + $0xe4] sm:$0xf] %vm1098_vm1, %v1355_v18  ;;  %v704_v30 = vmul.f32 %v1655_v33, %v624_v22  ;;  %1129 = vst.msk [vmem:[%s2050_s4 + $0x78] sm:$0xf] %vm1098_vm1, %v1328_v23  ;;  %v1326_v31 = vpack.c.bf16 %v806_v25, %v806_v25  ;;  %v1358_v32 = vpack.c.bf16 %v838_v26, %v838_v26 }
 0x10b   :  { %1161 = vst.msk [vmem:[%s2050_s4 + $0xf8] sm:$0xf] %vm1098_vm1, %v1360_v24  ;;  %v809_v34 = vmax.f32 %v745_v27, 0.0  ;;  %v841_v36 = vmax.f32 %v777_v28, 0.0  ;;  %v743_v37 = vadd.f32 %v1660_v35, %v672_v29 }
 0x10c   :  { %v775_v38 = vadd.f32 %v1660_v35, %v704_v30  ;;  %1127 = vst.msk [vmem:[%s2050_s4 + $0x70] sm:$0xf] %vm1098_vm1, %v1326_v31  ;;  %1159 = vst.msk [vmem:[%s2050_s4 + $0xf0] sm:$0xf] %vm1098_vm1, %v1358_v32 }
 0x10d   :  { %v1329_v33 = vpack.c.bf16 %v809_v34, %v809_v34  ;;  %v1361_v39 = vpack.c.bf16 %v841_v36, %v841_v36  ;;  %v807_v40 = vmax.f32 %v743_v37, 0.0 }
 0x10e   :  { %v839_v41 = vmax.f32 %v775_v38, 0.0 }
 0x10f   :  { %1130 = vst.msk [vmem:[%s2050_s4 + $0x7c] sm:$0xf] %vm1098_vm1, %v1329_v33  ;;  %1162 = vst.msk [vmem:[%s2050_s4 + $0xfc] sm:$0xf] %vm1098_vm1, %v1361_v39  ;;  %v1327_v35 = vpack.c.bf16 %v807_v40, %v807_v40 }
 0x110   :  { %v1359_v42 = vpack.c.bf16 %v839_v41, %v839_v41 }
 0x111   :  { %1128 = vst.msk [vmem:[%s2050_s4 + $0x74] sm:$0xf] %vm1098_vm1, %v1327_v35 }
 0x112   :  { %1160 = vst.msk [vmem:[%s2050_s4 + $0xf4] sm:$0xf] %vm1098_vm1, %v1359_v42 }

// kernel: _lambda_.22
= control target key start
LH: loop header
LB: loop body
LE: loop exit
PB: predicated region body
PF: predicated region fallthrough
CT: control target
= control target key end

     0   :  { %s2227_s15 = smov 0   ;;  %s2229_s16 = smov 0   ;;  %s2736_s0 = inlined_call_operand.vmem [shape: bf16[8,110,8], index: 0, kind: input, shape index: {}]   ;;  %s2737_s1 = inlined_call_operand.vmem [shape: bf16[9,8,8], index: 1, kind: input, shape index: {}]   ;;  %s2738_s2 = inlined_call_operand.vmem [shape: f32[1,8], index: 2, kind: input, shape index: {}]   ;;  %s2739_s3 = inlined_call_operand.vmem [shape: f32[1,8], index: 3, kind: input, shape index: {}]   ;;  %s2740_s4 = inlined_call_operand.vmem [shape: bf16[8,80,8], index: 4, kind: output, shape index: {}]  }
   0x1   :  { %s2231_s17 = smov 0  }
   0x2 LB: > { %s33_s18 = sadd.s32 1, %s2194_s16  ;;  %p1768_p0 = scmp.ge.s32.totalorder %s2198_s17, 1  ;;  %s2198_s17 = sphi %s2231_s17, %s14_s17   ;;  %s2194_s16 = sphi %s2229_s16, %s2742_s16   ;;  %s2190_s15 = sphi %s2227_s15, %s2741_s15  }
   0x3   : > { %p35_p1 = scmp.ge.s32.totalorder %s33_s18, 8  ;;  %p210_p2 = scmp.lt.s32.totalorder %s2198_s17, 9 }
   0x5   : > { %s2744_s18 = smov (%p35_p1, %s33_s18), 0  ;;  %p211_p3 = pnand %p1768_p0, %p210_p2 }
   0x6   : > { %p253_p4 = scmp.lt.s32.totalorder (!%p211_p3), %s2190_s15, 7 }
   0x7   : > { %214 = sbr.rel (%p211_p3) target bundleno = 410 (0x19a), region = 36 }
   0xc   : > { %v1771_v0 = vld [vmem:[%s2737_s1 + $0x4] sm:$0xf]  ;;  %vm385_vm0 = vcmask 1043456   ;;  %v2200_v1 = vmov 0.0   ;;  %s2746_s15 = smov (!%p253_p4, %s2190_s15), 7  ;;  %vm2201_vm1 = vmmov 0  }
   0xd   : > { %1925 = vmatprep.subr.bf16.mxu0 %v2200_v1  ;;  %2123 = vmatprep.subr.bf16.mxu1 %v2200_v1  ;;  %v387_v2 = vsel %vm385_vm0, %v1771_v0, 0  ;;  %s2125_s21 = smul.u32 56, %s2746_s15  ;;  %vm324_vm2 = vsmask.f32 7424  ;;  %v1788_v13 = vld [vmem:[%s2737_s1 + $0x8] sm:$0xf] }
   0xe   : > { %1926 = vmatpush3.bf16.msra.mxu0 %v387_v2  ;;  %2124 = vmatpush3.bf16.msra.mxu1 %v387_v2  ;;  %vm369_vm3 = vcmask 64512   ;;  %v292_v22 = vld [vmem:[%s2737_s1] sm:$0xf]  ;;  %v582_v26 = vsel %vm385_vm0, %v1788_v13, 0  ;;  %vm554_vm4 = vcmask 1046528   ;;  %vm987_vm6 = vcmask 1045504  }
   0xf   : > { %1927 = vmatprep.mubr.msk.bf16.mxu0 %vm2201_vm1, %v2200_v1  ;;  %1939 = vmatprep.mubr.msk.bf16.mxu1 %vm2201_vm1, %v2200_v1  ;;  %s2263_s24 = scalar_lea.vmem %s2736_s0, %s2125_s21  ;;  %v473_v31 = vsel %vm385_vm0, %v292_v22, 0  ;;  %v1795_v48 = vld [vmem:[%s2737_s1 + $0xc] sm:$0xf]  ;;  %v1807_v53 = vld [vmem:[%s2737_s1 + $0x10] sm:$0xf]  ;;  %vm1420_vm8 = vcmask 1044480  }
  0x10   : > { %1969 = vmatprep.subr.bf16.mxu0 %v2200_v1  ;;  %1947 = vmatprep.subr.bf16.mxu1 %v2200_v1  ;;  %v282_v3 = vld [vmem:[%s2263_s24] sm:$0xf]  ;;  %v2267_v4 = vld [vmem:[%s2263_s24 + $0x4] sm:$0xf]  ;;  %v2273_v6 = vld [vmem:[%s2263_s24 + $0x8] sm:$0xff]   ;;  %v735_v50 = vsel %vm385_vm0, %v1795_v48, 0 }
  0x11   : > { %v2270_v5 = vcombine.low %v282_v3, %v2267_v4  ;;  %v333_v9 = vshll.u32 %v2273_v6, 16  ;;  %v2279_v10 = vld [vmem:[%s2263_s24 + $0x18] sm:$0xff]   ;;  %v2282_v11 = vld [vmem:[%s2263_s24 + $0x20] sm:$0xff]   ;;  %v2285_v12 = vld [vmem:[%s2263_s24 + $0x10] sm:$0xff]   ;;  %v337_v23 = vshrl.u32 %v2273_v6, 16  ;;  %v556_v52 = vrot.slane %v2273_v6, 1 }
  0x12   : > { %v349_v16 = vshll.u32 %v2279_v10, 16  ;;  %v353_v17 = vshrl.u32 %v2279_v10, 16  ;;  %v357_v18 = vshll.u32 %v2282_v11, 16  ;;  %v2294_v19 = vld [vmem:[%s2263_s24 + $0x28] ss:$0 sps:$4 sm:$0x11]  }
  0x13   : > { %v326_v7 = vshrl.u32 %v2270_v5, 16  ;;  %v328_v8 = vshll.u32 %v2270_v5, 16  ;;  %v335_v15 = vrot.slane %v333_v9, 1  ;;  %v341_v24 = vshll.u32 %v2285_v12, 16  ;;  %v2318_v39 = vld [vmem:[%s2263_s24 + $0x24] sm:$0xff]   ;;  %v2389_v2 = vld [vmem:[%s2263_s24 + $0xc] sm:$0xff]  }
  0x14   : > { %v351_v21 = vrot.slane %v349_v16, 1  ;;  %v359_v25 = vrot.slane %v357_v18, 1  ;;  %v361_v29 = vshrl.u32 %v2282_v11, 16  ;;  %v365_v30 = vshll.u32 %v2294_v19, 16  ;;  %v548_v43 = vld [vmem:[%s2263_s24] sm:$0xe] }
  0x15   : > { %v330_v14 = vrot.slane %v328_v8, 1  ;;  %v339_v33 = vor.u32 %v337_v23, %v335_v15  ;;  %v343_v34 = vrot.slane %v341_v24, 1  ;;  %v345_v38 = vshrl.u32 %v2285_v12, 16  ;;  %v2165_v40 = vld [vmem:[%s2263_s24 + $0x2c] ss:$0 sps:$4 sm:$0x11]  }
  0x16   : > { %v355_v28 = vor.u32 %v353_v17, %v351_v21  ;;  %v363_v35 = vor.u32 %v361_v29, %v359_v25  ;;  %v367_v36 = vrot.slane %v365_v30, 1  ;;  %v715_v44 = vrot.slane %v2318_v39, 1  ;;  %v667_v61 = vld [vmem:[%s2263_s24 + $0x4] sm:$0xe]  ;;  %v2384_v62 = vld [vmem:[%s2263_s24 + $0x8] sm:$0xf] }
  0x17   : > { %v331_v20 = vor.u32 %v330_v14, %v326_v7  ;;  %v344_v37 = vsel %vm324_vm2, %v339_v33, %v343_v34  ;;  %v347_v42 = vor.u32 %v345_v38, %v343_v34  ;;  %v717_v45 = vrot.slane %v2165_v40, 1  ;;  %v2408_v18 = vld [vmem:[%s2263_s24 + $0x14] sm:$0xff]   ;;  %v2428_v30 = vld [vmem:[%s2263_s24 + $0x1c] sm:$0xff]   ;;  %v2452_v48 = vld [vmem:[%s2263_s24 + $0x2c] ss:$0 sps:$4 sm:$0x33]  }
  0x18   : > { %v360_v32 = vsel %vm324_vm2, %v355_v28, %v359_v25  ;;  %v368_v41 = vsel %vm324_vm2, %v363_v35, %v367_v36  ;;  %v1789_v49 = vcombine.low %v548_v43, %v2267_v4  ;;  %v896_v55 = vsel %vm385_vm0, %v1807_v53, 0  ;;  %v1821_v24 = vld [vmem:[%s2737_s1 + $0x18] sm:$0xf]  ;;  %v981_v53 = vld [vmem:[%s2263_s24 + $0x4] sm:$0xc]  ;;  %s2126_s23 = smul.u32 40, %s2746_s15 }
  0x19   : > { %v336_v27 = vsel %vm324_vm2, %v331_v20, %v335_v15  ;;  %1940 = vmatmul.mubr.msk.bf16.vlgmr.msra.gmra.mxu1 %vm369_vm3, %v360_v32  ;;  %v2333_v46 = vsel %vm554_vm4, %v715_v44, %v717_v45  ;;  %v352_v47 = vsel %vm324_vm2, %v347_v42, %v351_v21  ;;  %v558_v56 = vrot.slane %v2285_v12, 1 }
  0x1a   : > { %1928 = vmatmul.mubr.msk.bf16.vlgmr.msra.gmra.mxu0 %vm369_vm3, %v336_v27  ;;  %1948 = vmatpush3.bf16.msra.mxu1 %v473_v31  ;;  %v555_v51 = vrot.slane %v1789_v49, 1  ;;  %v560_v58 = vrot.slane %v2279_v10, 1  ;;  %v562_v60 = vrot.slane %v2282_v11, 1  ;;  %v1796_v0 = vcombine.low %v667_v61, %v2384_v62  ;;  %s2670_s26 = scalar_lea.vmem %s2740_s4, %s2126_s23 }
  0x1b   : > { %1970 = vmatpush3.bf16.msra.mxu0 %v582_v26  ;;  %1931 = vmatprep.mubr.msk.bf16.mxu0 %vm2201_vm1, %v2200_v1  ;;  %v559_v57 = vsel %vm554_vm4, %v556_v52, %v558_v56  ;;  %v564_v3 = vrot.slane %v2294_v19, 1  ;;  %v839_v7 = vshll.u32 %v2389_v2, 16  ;;  %v709_v9 = vrot.slane %v2389_v2, 1 }
  0x1c   : > { %2013 = vmatprep.subr.bf16.mxu0 %v2200_v1  ;;  %1943 = vmatprep.mubr.msk.bf16.mxu1 %vm2201_vm1, %v2200_v1  ;;  %v557_v54 = vsel %vm554_vm4, %v555_v51, %v556_v52  ;;  %v561_v59 = vsel %vm554_vm4, %v558_v56, %v560_v58  ;;  %v563_v63 = vsel %vm554_vm4, %v560_v58, %v562_v60  ;;  %v828_v4 = vshrl.u32 %v1796_v0, 16  ;;  %v1100_v58 = vld [vmem:[%s2263_s24 + $0x8] sm:$0xc] }
  0x1d   : > { %1991 = vmatprep.subr.bf16.mxu1 %v2200_v1  ;;  %v708_v8 = vrot.slane %v1796_v0, 1  ;;  %v841_v16 = vrot.slane %v839_v7, 2  ;;  %v845_v21 = vshrl.u32 %v2408_v18, 16  ;;  %v848_v22 = vshll.u32 %v2408_v18, 16  ;;  %v1840_v7 = vld [vmem:[%s2737_s1 + $0x20] sm:$0xf] }
  0x1e   : > { %v830_v13 = vrot.slane %v828_v4, 1  ;;  %vm826_vm5 = vsmask.f32 6400  ;;  %v711_v23 = vrot.slane %v2408_v18, 1  ;;  %v1168_v28 = vsel %vm385_vm0, %v1821_v24, 0 }
  0x1f   : > { %v710_v17 = vsel %vm554_vm4, %v708_v8, %v709_v9  ;;  %v847_v26 = vrot.slane %v845_v21, 1  ;;  %v850_v27 = vrot.slane %v848_v22, 2  ;;  %v854_v32 = vshrl.u32 %v2428_v30, 16 }
  0x20   : > { %v712_v29 = vsel %vm554_vm4, %v709_v9, %v711_v23  ;;  %v857_v33 = vshll.u32 %v2428_v30, 16  ;;  %v713_v34 = vrot.slane %v2428_v30, 1  ;;  %v866_v42 = vshll.u32 %v2318_v39, 16  ;;  %v2503_v9 = vld [vmem:[%s2263_s24 + $0x18] sm:$0xff]  }
  0x21   : > { %1944 = vmatmul.mubr.msk.bf16.gmra.mxu1 %vm369_vm3, %v368_v41  ;;  %v851_v31 = vor.u32 %v850_v27, %v847_v26  ;;  %v856_v36 = vrot.slane %v854_v32, 1  ;;  %v863_v41 = vshrl.u32 %v2318_v39, 16  ;;  %v872_v51 = vshrl.u32 %v2452_v48, 16 }
  0x22   : > { %1932 = vmatmul.mubr.msk.bf16.gmra.mxu0 %vm369_vm3, %v344_v37  ;;  %1949 = vmatprep.mubr.msk.bf16.mxu1 %vm2201_vm1, %v2200_v1  ;;  %v859_v37 = vrot.slane %v857_v33, 2  ;;  %v714_v38 = vsel %vm554_vm4, %v711_v23, %v713_v34  ;;  %v716_v49 = vsel %vm554_vm4, %v713_v34, %v715_v44  ;;  %v875_v52 = vshll.u32 %v2452_v48, 16 }
  0x23   : > { %1935 = vmatprep.mubr.msk.bf16.mxu0 %vm2201_vm1, %v2200_v1  ;;  %v865_v45 = vrot.slane %v863_v41, 1  ;;  %v1815_v56 = vcombine.low %v981_v53, %v2384_v62  ;;  %v989_v61 = vrot.slane %v2389_v2, 2  ;;  %v997_v23 = vrot.slane %v2452_v48, 2 }
  0x24   : > { %v860_v40 = vor.u32 %v859_v37, %v856_v36  ;;  %vm1259_vm7 = vsmask.f32 5376  ;;  %vm1617_vm9 = vcmask 60416  }
  0x26   : > { %v861_v43 = vsel %vm826_vm5, %v851_v31, %v860_v40 }
  0x29   : > { %1950 = vmatmul.mubr.msk.bf16.vlgmr.msra.gmra.mxu1 %vm369_vm3, %v2270_v5  ;;  %v831_v5 = vshll.u32 %v1796_v0, 16 }
  0x2a   : > { %1936 = vmatmul.mubr.msk.bf16.gmra.mxu0 %vm369_vm3, %v352_v47  ;;  %1992 = vmatpush3.bf16.msra.mxu1 %v735_v50  ;;  %v868_v47 = vrot.slane %v866_v42, 2 }
  0x2b   : > { %1971 = vmatprep.mubr.msk.bf16.mxu0 %vm2201_vm1, %v2200_v1  ;;  %1953 = vmatprep.mubr.msk.bf16.mxu1 %vm2201_vm1, %v2200_v1  ;;  %v833_v14 = vrot.slane %v831_v5, 2 }
  0x2c   : > { %2035 = vmatprep.subr.bf16.mxu1 %v2200_v1  ;;  %v869_v50 = vor.u32 %v868_v47, %v865_v45 }
  0x2d   : > { %v834_v19 = vor.u32 %v833_v14, %v830_v13  ;;  %v1144_v13 = vrot.slane %v2503_v9, 2  ;;  %v993_v14 = vrot.slane %v2428_v30, 2 }
  0x2e   : > { %v870_v44 = vsel %vm826_vm5, %v860_v40, %v869_v50  ;;  %v1281_v40 = vshll.u32 %v2503_v9, 16 }
  0x30   : > { %v1283_v47 = vrot.slane %v1281_v40, 3 }
  0x31   : > { %1954 = vmatmul.mubr.msk.bf16.gmra.mxu1 %vm369_vm3, %v2273_v6  ;;  %v836_v6 = vshrl.u32 %v2389_v2, 16 }
  0x32   : > { %1972 = vmatmul.mubr.msk.bf16.vlgmr.msra.gmra.mxu0 %vm369_vm3, %v557_v54  ;;  %1957 = vmatprep.mubr.msk.bf16.mxu1 %vm2201_vm1, %v2200_v1  ;;  %v874_v54 = vrot.slane %v872_v51, 1 }
  0x33   : > { %2014 = vmatpush3.bf16.msra.mxu0 %v896_v55  ;;  %1975 = vmatprep.mubr.msk.bf16.mxu0 %vm2201_vm1, %v2200_v1  ;;  %v838_v15 = vrot.slane %v836_v6, 1  ;;  %v877_v55 = vrot.slane %v875_v52, 2  ;;  %v991_v6 = vrot.slane %v2408_v18, 2 }
  0x34   : > { %2057 = vmatprep.subr.bf16.mxu0 %v2200_v1 }
  0x35   : > { %v842_v20 = vor.u32 %v841_v16, %v838_v15  ;;  %v2517_v16 = vld [vmem:[%s2263_s24 + $0x20] sm:$0xff]  }
  0x36   : > { %v1146_v18 = vrot.slane %v2517_v16, 2  ;;  %v1287_v51 = vshrl.u32 %v2517_v16, 16  ;;  %v1290_v52 = vshll.u32 %v2517_v16, 16 }
  0x37   : > { %v843_v25 = vsel %vm826_vm5, %v834_v19, %v842_v20  ;;  %v852_v35 = vsel %vm826_vm5, %v842_v20, %v851_v31  ;;  %v2530_v20 = vld [vmem:[%s2263_s24 + $0x28] sm:$0xff]  }
  0x38   : > { %v1147_v19 = vsel %vm987_vm6, %v1144_v13, %v1146_v18  ;;  %v1148_v22 = vrot.slane %v2530_v20, 2 }
  0x39   : > { %1958 = vmatmul.mubr.msk.bf16.gmra.mxu1 %vm369_vm3, %v2285_v12  ;;  %v1814_v12 = vld [vmem:[%s2737_s1 + $0x14] sm:$0xf] }
  0x3a   : > { %1976 = vmatmul.mubr.msk.bf16.gmra.mxu0 %vm369_vm3, %v559_v57  ;;  %1961 = vmatprep.mubr.msk.bf16.mxu1 %vm2201_vm1, %v2200_v1  ;;  %v878_v57 = vor.u32 %v877_v55, %v874_v54  ;;  %v1149_v27 = vsel %vm987_vm6, %v1146_v18, %v1148_v22  ;;  %v1289_v54 = vrot.slane %v1287_v51, 2  ;;  %v1292_v55 = vrot.slane %v1290_v52, 3 }
  0x3b   : > { %1979 = vmatprep.mubr.msk.bf16.mxu0 %vm2201_vm1, %v2200_v1 }
  0x3c   : > { %v879_v62 = vsel %vm826_vm5, %v869_v50, %v878_v57  ;;  %v1293_v57 = vor.u32 %v1292_v55, %v1289_v54 }
  0x41   : > { %1962 = vmatmul.mubr.msk.bf16.gmra.mxu1 %vm369_vm3, %v2279_v10  ;;  %v565_v10 = vsel %vm554_vm4, %v562_v60, %v564_v3  ;;  %v988_v60 = vrot.slane %v1815_v56, 2  ;;  %v1424_v56 = vrot.slane %v2503_v9, 3 }
  0x42   : > { %1980 = vmatmul.mubr.msk.bf16.gmra.mxu0 %vm369_vm3, %v561_v59  ;;  %1965 = vmatprep.mubr.msk.bf16.mxu1 %vm2201_vm1, %v2200_v1  ;;  %v2475_v59 = vld [vmem:[%s2263_s24 + $0xc] sm:$0xf] }
  0x43   : > { %1983 = vmatprep.mubr.msk.bf16.mxu0 %vm2201_vm1, %v2200_v1  ;;  %v1822_v0 = vcombine.low %v1100_v58, %v2475_v59  ;;  %v990_v3 = vsel %vm987_vm6, %v988_v60, %v989_v61  ;;  %v1296_v58 = vshrl.u32 %v2530_v20, 16 }
  0x45   : > { %v1141_v2 = vrot.slane %v1822_v0, 2  ;;  %v1264_v24 = vshll.u32 %v1822_v0, 16 }
  0x47   : > { %v1266_v31 = vrot.slane %v1264_v24, 3 }
  0x49   : > { %1966 = vmatmul.mubr.msk.bf16.gmra.mxu1 %vm369_vm3, %v2282_v11  ;;  %v1015_v11 = vsel %vm385_vm0, %v1814_v12, 0  ;;  %v992_v12 = vsel %vm987_vm6, %v989_v61, %v991_v6 }
  0x4a   : > { %1984 = vmatmul.mubr.msk.bf16.gmra.mxu0 %vm369_vm3, %v563_v63  ;;  %1993 = vmatprep.mubr.msk.bf16.mxu1 %vm2201_vm1, %v2200_v1  ;;  %v1833_v63 = vld [vmem:[%s2737_s1 + $0x1c] sm:$0xf] }
  0x4b   : > { %1987 = vmatprep.mubr.msk.bf16.mxu0 %vm2201_vm1, %v2200_v1  ;;  %v1329_v4 = vsel %vm385_vm0, %v1833_v63, 0 }
  0x51   : > { %1994 = vmatmul.mubr.msk.bf16.vlgmr.msra.gmra.mxu1 %vm369_vm3, %v710_v17  ;;  %v994_v17 = vsel %vm987_vm6, %v991_v6, %v993_v14 }
  0x52   : > { %1988 = vmatmul.mubr.msk.bf16.gmra.mxu0 %vm369_vm3, %v565_v10  ;;  %2036 = vmatpush3.bf16.msra.mxu1 %v1015_v11  ;;  %v1448_v10 = vsel %vm385_vm0, %v1840_v7, 0  ;;  %v995_v11 = vrot.slane %v2318_v39, 2  ;;  %v1261_v39 = vshrl.u32 %v1822_v0, 16  ;;  %v2175_v0 = vld [vmem:[%s2263_s24 + $0x30] ss:$0 sps:$4 sm:$0x77]  }
  0x53   : > { %2015 = vmatprep.mubr.msk.bf16.mxu0 %vm2201_vm1, %v2200_v1  ;;  %1997 = vmatprep.mubr.msk.bf16.mxu1 %vm2201_vm1, %v2200_v1 }
  0x54   : > { %2079 = vmatprep.subr.bf16.mxu1 %v2200_v1  ;;  %v996_v21 = vsel %vm987_vm6, %v993_v14, %v995_v11  ;;  %v1263_v30 = vrot.slane %v1261_v39, 2  ;;  %v1430_v14 = vrot.slane %v2175_v0, 3 }
  0x56   : > { %v1267_v36 = vor.u32 %v1266_v31, %v1263_v30 }
  0x59   : > { %1998 = vmatmul.mubr.msk.bf16.gmra.mxu1 %vm369_vm3, %v712_v29  ;;  %v998_v29 = vsel %vm987_vm6, %v995_v11, %v997_v23 }
  0x5a   : > { %2016 = vmatmul.mubr.msk.bf16.vlgmr.msra.gmra.mxu0 %vm369_vm3, %v843_v25  ;;  %2001 = vmatprep.mubr.msk.bf16.mxu1 %vm2201_vm1, %v2200_v1 }
  0x5b   : > { %2058 = vmatpush3.bf16.msra.mxu0 %v1168_v28  ;;  %2019 = vmatprep.mubr.msk.bf16.mxu0 %vm2201_vm1, %v2200_v1  ;;  %v2173_v28 = vld [vmem:[%s2263_s24 + $0x30] ss:$0 sps:$4 sm:$0x33]  }
  0x5c   : > { %2101 = vmatprep.subr.bf16.mxu0 %v2200_v1  ;;  %v1150_v34 = vrot.slane %v2173_v28, 2 }
  0x5e   : > { %v1151_v41 = vsel %vm987_vm6, %v1148_v22, %v1150_v34 }
  0x61   : > { %2002 = vmatmul.mubr.msk.bf16.gmra.mxu1 %vm369_vm3, %v714_v38  ;;  %v1278_v38 = vshrl.u32 %v2503_v9, 16  ;;  %v1428_v9 = vrot.slane %v2530_v20, 3 }
  0x62   : > { %2020 = vmatmul.mubr.msk.bf16.gmra.mxu0 %vm369_vm3, %v852_v35  ;;  %2005 = vmatprep.mubr.msk.bf16.mxu1 %vm2201_vm1, %v2200_v1  ;;  %v1414_v35 = vld [vmem:[%s2263_s24 + $0x8] sm:$0x8] }
  0x63   : > { %2023 = vmatprep.mubr.msk.bf16.mxu0 %vm2201_vm1, %v2200_v1  ;;  %v1841_v42 = vcombine.low %v1414_v35, %v2475_v59  ;;  %v1280_v45 = vrot.slane %v1278_v38, 2  ;;  %v1299_v59 = vshll.u32 %v2530_v20, 16 }
  0x65   : > { %v1421_v48 = vrot.slane %v1841_v42, 3  ;;  %v1284_v50 = vor.u32 %v1283_v47, %v1280_v45  ;;  %v1301_v63 = vrot.slane %v1299_v59, 3 }
  0x67   : > { %v1294_v61 = vsel %vm1259_vm7, %v1284_v50, %v1293_v57 }
  0x69   : > { %2006 = vmatmul.mubr.msk.bf16.gmra.mxu1 %vm369_vm3, %v716_v49 }
  0x6a   : > { %2024 = vmatmul.mubr.msk.bf16.gmra.mxu0 %vm369_vm3, %v861_v43  ;;  %2009 = vmatprep.mubr.msk.bf16.mxu1 %vm2201_vm1, %v2200_v1 }
  0x6b   : > { %2027 = vmatprep.mubr.msk.bf16.mxu0 %vm2201_vm1, %v2200_v1 }
  0x71   : > { %2010 = vmatmul.mubr.msk.bf16.gmra.mxu1 %vm369_vm3, %v2333_v46  ;;  %v2486_v46 = vld [vmem:[%s2263_s24 + $0x10] sm:$0xff]  }
  0x72   : > { %2028 = vmatmul.mubr.msk.bf16.gmra.mxu0 %vm369_vm3, %v870_v44  ;;  %2037 = vmatprep.mubr.msk.bf16.mxu1 %vm2201_vm1, %v2200_v1  ;;  %v1142_v5 = vrot.slane %v2486_v46, 2  ;;  %v1269_v25 = vshrl.u32 %v2486_v46, 16  ;;  %v1272_v26 = vshll.u32 %v2486_v46, 16  ;;  %v1422_v49 = vrot.slane %v2486_v46, 3 }
  0x73   : > { %2031 = vmatprep.mubr.msk.bf16.mxu0 %vm2201_vm1, %v2200_v1  ;;  %v1426_v46 = vrot.slane %v2517_v16, 3 }
  0x74   : > { %v1143_v8 = vsel %vm987_vm6, %v1141_v2, %v1142_v5  ;;  %v1145_v15 = vsel %vm987_vm6, %v1142_v5, %v1144_v13  ;;  %v1271_v32 = vrot.slane %v1269_v25, 2  ;;  %v1274_v33 = vrot.slane %v1272_v26, 3 }
  0x75   : > { %v1423_v53 = vsel %vm1420_vm8, %v1421_v48, %v1422_v49  ;;  %v1425_v60 = vsel %vm1420_vm8, %v1422_v49, %v1424_v56  ;;  %v1308_v2 = vshll.u32 %v2175_v0, 16  ;;  %v1427_v5 = vsel %vm1420_vm8, %v1424_v56, %v1426_v46 }
  0x76   : > { %v1275_v37 = vor.u32 %v1274_v33, %v1271_v32 }
  0x78   : > { %v1276_v43 = vsel %vm1259_vm7, %v1267_v36, %v1275_v37  ;;  %v1285_v44 = vsel %vm1259_vm7, %v1275_v37, %v1284_v50 }
  0x79   : > { %2038 = vmatmul.mubr.msk.bf16.vlgmr.msra.gmra.mxu1 %vm369_vm3, %v990_v3 }
  0x7a   : > { %2032 = vmatmul.mubr.msk.bf16.gmra.mxu0 %vm369_vm3, %v879_v62  ;;  %2080 = vmatpush3.bf16.msra.mxu1 %v1329_v4  ;;  %v1298_v62 = vrot.slane %v1296_v58, 2  ;;  %v1305_v4 = vshrl.u32 %v2175_v0, 16 }
  0x7b   : > { %2059 = vmatprep.mubr.msk.bf16.mxu0 %vm2201_vm1, %v2200_v1  ;;  %2041 = vmatprep.mubr.msk.bf16.mxu1 %vm2201_vm1, %v2200_v1 }
  0x7c   : > { %v1302_v3 = vor.u32 %v1301_v63, %v1298_v62  ;;  %v1307_v7 = vrot.slane %v1305_v4, 2 }
  0x7e   : > { %v1303_v6 = vsel %vm1259_vm7, %v1293_v57, %v1302_v3 }
  0x81   : > { %2042 = vmatmul.mubr.msk.bf16.gmra.mxu1 %vm369_vm3, %v992_v12  ;;  %v1429_v12 = vsel %vm1420_vm8, %v1426_v46, %v1428_v9 }
  0x82   : > { %2060 = vmatmul.mubr.msk.bf16.vlgmr.msra.gmra.mxu0 %vm369_vm3, %v1143_v8  ;;  %2045 = vmatprep.mubr.msk.bf16.mxu1 %vm2201_vm1, %v2200_v1  ;;  %v1310_v8 = vrot.slane %v1308_v2, 3 }
  0x83   : > { %2102 = vmatpush3.bf16.msra.mxu0 %v1448_v10  ;;  %2063 = vmatprep.mubr.msk.bf16.mxu0 %vm2201_vm1, %v2200_v1 }
  0x84   : > { %v1311_v10 = vor.u32 %v1310_v8, %v1307_v7 }
  0x86   : > { %v1312_v13 = vsel %vm1259_vm7, %v1302_v3, %v1311_v10 }
  0x89   : > { %2046 = vmatmul.mubr.msk.bf16.gmra.mxu1 %vm369_vm3, %v994_v17 }
  0x8a   : > { %2064 = vmatmul.mubr.msk.bf16.gmra.mxu0 %vm369_vm3, %v1145_v15  ;;  %2049 = vmatprep.mubr.msk.bf16.mxu1 %vm2201_vm1, %v2200_v1  ;;  %v1431_v15 = vsel %vm1420_vm8, %v1428_v9, %v1430_v14 }
  0x8b   : > { %2067 = vmatprep.mubr.msk.bf16.mxu0 %vm2201_vm1, %v2200_v1 }
  0x91   : > { %2050 = vmatmul.mubr.msk.bf16.gmra.mxu1 %vm369_vm3, %v996_v21 }
  0x92   : > { %2068 = vmatmul.mubr.msk.bf16.gmra.mxu0 %vm369_vm3, %v1147_v19  ;;  %2053 = vmatprep.mubr.msk.bf16.mxu1 %vm2201_vm1, %v2200_v1 }
  0x93   : > { %2071 = vmatprep.mubr.msk.bf16.mxu0 %vm2201_vm1, %v2200_v1 }
  0x99   : > { %2054 = vmatmul.mubr.msk.bf16.gmra.mxu1 %vm369_vm3, %v998_v29 }
  0x9a   : > { %2072 = vmatmul.mubr.msk.bf16.gmra.mxu0 %vm369_vm3, %v1149_v27  ;;  %2081 = vmatprep.mubr.msk.bf16.mxu1 %vm2201_vm1, %v2200_v1 }
  0x9b   : > { %2075 = vmatprep.mubr.msk.bf16.mxu0 %vm2201_vm1, %v2200_v1 }
  0xa1   : > { %2082 = vmatmul.mubr.msk.bf16.vlgmr.msra.gmra.mxu1 %vm369_vm3, %v1276_v43 }
  0xa2   : > { %2076 = vmatmul.mubr.msk.bf16.gmra.mxu0 %vm369_vm3, %v1151_v41  ;;  %2085 = vmatprep.mubr.msk.bf16.mxu1 %vm2201_vm1, %v2200_v1 }
  0xa3   : > { %2103 = vmatprep.mubr.msk.bf16.mxu0 %vm2201_vm1, %v2200_v1 }
  0xa9   : > { %2086 = vmatmul.mubr.msk.bf16.gmra.mxu1 %vm369_vm3, %v1285_v44 }
  0xaa   : > { %2104 = vmatmul.mubr.msk.bf16.vlgmr.msra.gmra.mxu0 %vm369_vm3, %v1423_v53  ;;  %2089 = vmatprep.mubr.msk.bf16.mxu1 %vm2201_vm1, %v2200_v1 }
  0xab   : > { %2107 = vmatprep.mubr.msk.bf16.mxu0 %vm2201_vm1, %v2200_v1 }
  0xb1   : > { %2090 = vmatmul.mubr.msk.bf16.gmra.mxu1 %vm369_vm3, %v1294_v61 }
  0xb2   : > { %2108 = vmatmul.mubr.msk.bf16.gmra.mxu0 %vm369_vm3, %v1425_v60  ;;  %2093 = vmatprep.mubr.msk.bf16.mxu1 %vm2201_vm1, %v2200_v1 }
  0xb3   : > { %2111 = vmatprep.mubr.msk.bf16.mxu0 %vm2201_vm1, %v2200_v1 }
  0xb9   : > { %2094 = vmatmul.mubr.msk.bf16.gmra.mxu1 %vm369_vm3, %v1303_v6 }
  0xba   : > { %2112 = vmatmul.mubr.msk.bf16.gmra.mxu0 %vm369_vm3, %v1427_v5  ;;  %2097 = vmatprep.mubr.msk.bf16.mxu1 %vm2201_vm1, %v2200_v1 }
  0xbb   : > { %2115 = vmatprep.mubr.msk.bf16.mxu0 %vm2201_vm1, %v2200_v1 }
  0xc1   : > { %2098 = vmatmul.mubr.msk.bf16.gmra.mxu1 %vm369_vm3, %v1312_v13 }
  0xc2   : > { %2116 = vmatmul.mubr.msk.bf16.gmra.mxu0 %vm369_vm3, %v1429_v12 }
  0xc3   : > { %2119 = vmatprep.mubr.msk.bf16.mxu0 %vm2201_vm1, %v2200_v1 }
  0xca   : > { %2120 = vmatmul.mubr.msk.bf16.gmra.mxu0 %vm369_vm3, %v1431_v15 }
  0xd9   : > { %v447_v17 = vpop.f32.mrf.mxu1 }
  0xda   : > { %v423_v16 = vpop.f32.mrf.mxu0 }
  0xdb   : > { %v1941_v11 = vpop.f32.mrf.mxu1 }
  0xdc   : > { %v1929_v18 = vpop.f32.mrf.mxu0 }
  0xdd   : > { %v450_v20 = vpop.f32.mrf.mxu1 }
  0xde   : > { %v426_v19 = vpop.f32.mrf.mxu0 }
  0xdf   : > { %v1942_v22 = vpop.f32.mrf.mxu1 }
  0xe0   : > { %v1930_v21 = vpop.f32.mrf.mxu0 }
  0xe1   : > { %v455_v39 = vpop.f32.mrf.mxu1 }
  0xe2   : > { %v431_v23 = vpop.f32.mrf.mxu0 }
  0xe3   : > { %v1945_v25 = vpop.f32.mrf.mxu1 }
  0xe4   : > { %v1933_v24 = vpop.f32.mrf.mxu0 }
  0xe5   : > { %v458_v26 = vpop.f32.mrf.mxu1 }
  0xe6   : > { %v434_v1 = vpop.f32.mrf.mxu0 }
  0xe7   : > { %v1946_v28 = vpop.f32.mrf.mxu1 }
  0xe8   : > { %v1934_v27 = vpop.f32.mrf.mxu0 }
  0xe9   : > { %v509_v30 = vpop.f32.mrf.mxu1 }
  0xea   : > { %v439_v29 = vpop.f32.mrf.mxu0  ;;  %v510_v32 = vadd.f32 %v509_v30, %v423_v16 }
  0xeb   : > { %v1951_v33 = vpop.f32.mrf.mxu1 }
  0xec   : > { %v1937_v31 = vpop.f32.mrf.mxu0 }
  0xed   : > { %v512_v35 = vpop.f32.mrf.mxu1 }
  0xee   : > { %v442_v34 = vpop.f32.mrf.mxu0  ;;  %v513_v37 = vadd.f32 %v512_v35, %v426_v19 }
  0xef   : > { %v1952_v38 = vpop.f32.mrf.mxu1 }
  0xf0   : > { %v1938_v36 = vpop.f32.mrf.mxu0 }
  0xf1   : > { %v517_v42 = vpop.f32.mrf.mxu1 }
  0xf2   : > { %v618_v40 = vpop.f32.mrf.mxu0  ;;  %v518_v45 = vadd.f32 %v517_v42, %v431_v23 }
  0xf3   : > { %v657_v41 = vadd.f32 %v618_v40, %v510_v32  ;;  %v1955_v47 = vpop.f32.mrf.mxu1 }
  0xf4   : > { %v1973_v43 = vpop.f32.mrf.mxu0 }
  0xf5   : > { %v520_v50 = vpop.f32.mrf.mxu1 }
  0xf6   : > { %v621_v48 = vpop.f32.mrf.mxu0  ;;  %v521_v52 = vadd.f32 %v520_v50, %v434_v1 }
  0xf7   : > { %v658_v49 = vadd.f32 %v621_v48, %v513_v37  ;;  %v1956_v53 = vpop.f32.mrf.mxu1 }
  0xf8   : > { %v1974_v51 = vpop.f32.mrf.mxu0 }
  0xf9   : > { %v525_v55 = vpop.f32.mrf.mxu1 }
  0xfa   : > { %v626_v44 = vpop.f32.mrf.mxu0  ;;  %v526_v57 = vadd.f32 %v525_v55, %v439_v29 }
  0xfb   : > { %v659_v54 = vadd.f32 %v626_v44, %v518_v45  ;;  %v1959_v58 = vpop.f32.mrf.mxu1 }
  0xfc   : > { %v1977_v56 = vpop.f32.mrf.mxu0 }
  0xfd   : > { %v528_v61 = vpop.f32.mrf.mxu1 }
  0xfe   : > { %v629_v59 = vpop.f32.mrf.mxu0  ;;  %v529_v63 = vadd.f32 %v528_v61, %v442_v34 }
  0xff   : > { %v660_v60 = vadd.f32 %v629_v59, %v521_v52  ;;  %v1960_v0 = vpop.f32.mrf.mxu1 }
 0x100   : > { %v1978_v62 = vpop.f32.mrf.mxu0 }
 0x101   : > { %v533_v4 = vpop.f32.mrf.mxu1 }
 0x102   : > { %v634_v46 = vpop.f32.mrf.mxu0  ;;  %v534_v5 = vadd.f32 %v533_v4, %v447_v17 }
 0x103   : > { %v661_v3 = vadd.f32 %v634_v46, %v526_v57  ;;  %v1963_v6 = vpop.f32.mrf.mxu1 }
 0x104   : > { %v1981_v2 = vpop.f32.mrf.mxu0 }
 0x105   : > { %v536_v9 = vpop.f32.mrf.mxu1 }
 0x106   : > { %v637_v7 = vpop.f32.mrf.mxu0  ;;  %v537_v12 = vadd.f32 %v536_v9, %v450_v20 }
 0x107   : > { %v662_v8 = vadd.f32 %v637_v7, %v529_v63  ;;  %v1964_v13 = vpop.f32.mrf.mxu1 }
 0x108   : > { %v1982_v10 = vpop.f32.mrf.mxu0 }
 0x109   : > { %v541_v16 = vpop.f32.mrf.mxu1 }
 0x10a   : > { %v642_v14 = vpop.f32.mrf.mxu0  ;;  %v542_v11 = vadd.f32 %v541_v16, %v455_v39 }
 0x10b   : > { %v663_v15 = vadd.f32 %v642_v14, %v534_v5  ;;  %v1967_v19 = vpop.f32.mrf.mxu1 }
 0x10c   : > { %v1985_v18 = vpop.f32.mrf.mxu0 }
 0x10d   : > { %v544_v23 = vpop.f32.mrf.mxu1 }
 0x10e   : > { %v645_v21 = vpop.f32.mrf.mxu0  ;;  %v545_v25 = vadd.f32 %v544_v23, %v458_v26 }
 0x10f   : > { %v664_v22 = vadd.f32 %v645_v21, %v537_v12  ;;  %v1968_v1 = vpop.f32.mrf.mxu1 }
 0x110   : > { %v1986_v24 = vpop.f32.mrf.mxu0 }
 0x111   : > { %v771_v28 = vpop.f32.mrf.mxu1 }
 0x112   : > { %v650_v17 = vpop.f32.mrf.mxu0  ;;  %v810_v30 = vadd.f32 %v771_v28, %v657_v41 }
 0x113   : > { %v665_v27 = vadd.f32 %v650_v17, %v542_v11  ;;  %v1995_v31 = vpop.f32.mrf.mxu1 }
 0x114   : > { %v1989_v29 = vpop.f32.mrf.mxu0 }
 0x115   : > { %v774_v33 = vpop.f32.mrf.mxu1 }
 0x116   : > { %v653_v20 = vpop.f32.mrf.mxu0  ;;  %v811_v35 = vadd.f32 %v774_v33, %v658_v49 }
 0x117   : > { %v666_v32 = vadd.f32 %v653_v20, %v545_v25  ;;  %v1996_v36 = vpop.f32.mrf.mxu1 }
 0x118   : > { %v1990_v34 = vpop.f32.mrf.mxu0 }
 0x119   : > { %v779_v38 = vpop.f32.mrf.mxu1 }
 0x11a   : > { %v932_v39 = vpop.f32.mrf.mxu0  ;;  %v812_v42 = vadd.f32 %v779_v38, %v659_v54 }
 0x11b   : > { %v2605_v37 = vadd.f32 %v932_v39, %v810_v30  ;;  %v1999_v26 = vpop.f32.mrf.mxu1 }
 0x11c   : > { %v2017_v40 = vpop.f32.mrf.mxu0 }
 0x11d   : > { %v782_v47 = vpop.f32.mrf.mxu1 }
 0x11e   : > { %v935_v43 = vpop.f32.mrf.mxu0  ;;  %v813_v41 = vadd.f32 %v782_v47, %v660_v60 }
 0x11f   : > { %v2607_v45 = vadd.f32 %v935_v43, %v811_v35  ;;  %v2000_v50 = vpop.f32.mrf.mxu1 }
 0x120   : > { %v2018_v48 = vpop.f32.mrf.mxu0 }
 0x121   : > { %v787_v53 = vpop.f32.mrf.mxu1 }
 0x122   : > { %v940_v51 = vpop.f32.mrf.mxu0  ;;  %v814_v44 = vadd.f32 %v787_v53, %v661_v3 }
 0x123   : > { %v2609_v52 = vadd.f32 %v940_v51, %v812_v42  ;;  %v2003_v55 = vpop.f32.mrf.mxu1 }
 0x124   : > { %v2021_v49 = vpop.f32.mrf.mxu0 }
 0x125   : > { %v790_v58 = vpop.f32.mrf.mxu1 }
 0x126   : > { %v943_v56 = vpop.f32.mrf.mxu0  ;;  %v815_v59 = vadd.f32 %v790_v58, %v662_v8 }
 0x127   : > { %v2611_v57 = vadd.f32 %v943_v56, %v813_v41  ;;  %v2004_v61 = vpop.f32.mrf.mxu1 }
 0x128   : > { %v2022_v54 = vpop.f32.mrf.mxu0 }
 0x129   : > { %v795_v0 = vpop.f32.mrf.mxu1 }
 0x12a   : > { %v948_v62 = vpop.f32.mrf.mxu0  ;;  %v816_v46 = vadd.f32 %v795_v0, %v663_v15 }
 0x12b   : > { %v2613_v63 = vadd.f32 %v948_v62, %v814_v44  ;;  %v2007_v4 = vpop.f32.mrf.mxu1 }
 0x12c   : > { %v2025_v60 = vpop.f32.mrf.mxu0 }
 0x12d   : > { %v798_v6 = vpop.f32.mrf.mxu1 }
 0x12e   : > { %v951_v2 = vpop.f32.mrf.mxu0  ;;  %v817_v7 = vadd.f32 %v798_v6, %v664_v22 }
 0x12f   : > { %v2615_v5 = vadd.f32 %v951_v2, %v815_v59  ;;  %v2008_v9 = vpop.f32.mrf.mxu1 }
 0x130   : > { %v2026_v3 = vpop.f32.mrf.mxu0 }
 0x131   : > { %v803_v13 = vpop.f32.mrf.mxu1 }
 0x132   : > { %v956_v10 = vpop.f32.mrf.mxu0  ;;  %v818_v14 = vadd.f32 %v803_v13, %v665_v27 }
 0x133   : > { %v2617_v12 = vadd.f32 %v956_v10, %v816_v46  ;;  %v2011_v16 = vpop.f32.mrf.mxu1 }
 0x134   : > { %v2029_v8 = vpop.f32.mrf.mxu0 }
 0x135   : > { %v806_v19 = vpop.f32.mrf.mxu1 }
 0x136   : > { %v959_v18 = vpop.f32.mrf.mxu0  ;;  %v819_v21 = vadd.f32 %v806_v19, %v666_v32 }
 0x137   : > { %v2619_v11 = vadd.f32 %v959_v18, %v817_v7  ;;  %v2012_v23 = vpop.f32.mrf.mxu1 }
 0x138   : > { %v2030_v15 = vpop.f32.mrf.mxu0  ;;  %v2654_v23 = vld [vmem:[%s2738_s2] ss:$0 sm:$0xff] }
 0x139   : > { %v1051_v1 = vpop.f32.mrf.mxu1 }
 0x13a   : > { %v964_v24 = vpop.f32.mrf.mxu0  ;;  %v1090_v9 = vadd.f32 %v1051_v1, %v2605_v37  ;;  %v2659_v1 = vld [vmem:[%s2739_s3] ss:$0 sm:$0xff] }
 0x13b   : > { %v2621_v25 = vadd.f32 %v964_v24, %v818_v14  ;;  %v2039_v17 = vpop.f32.mrf.mxu1 }
 0x13c   : > { %v2033_v22 = vpop.f32.mrf.mxu0 }
 0x13d   : > { %v1054_v30 = vpop.f32.mrf.mxu1 }
 0x13e   : > { %v967_v28 = vpop.f32.mrf.mxu0  ;;  %v1091_v18 = vadd.f32 %v1054_v30, %v2607_v45 }
 0x13f   : > { %v2623_v29 = vadd.f32 %v967_v28, %v819_v21  ;;  %v2040_v27 = vpop.f32.mrf.mxu1 }
 0x140   : > { %v2034_v31 = vpop.f32.mrf.mxu0 }
 0x141   : > { %v1059_v33 = vpop.f32.mrf.mxu1 }
 0x142   : > { %v1204_v20 = vpop.f32.mrf.mxu0  ;;  %v1092_v28 = vadd.f32 %v1059_v33, %v2609_v52 }
 0x143   : > { %v2043_v35 = vpop.f32.mrf.mxu1  ;;  %v1243_v8 = vadd.f32 %v1204_v20, %v1090_v9 }
 0x144   : > { %v2061_v34 = vpop.f32.mrf.mxu0 }
 0x145   : > { %v1062_v39 = vpop.f32.mrf.mxu1 }
 0x146   : > { %v1207_v36 = vpop.f32.mrf.mxu0 }
 0x147   : > { %v2044_v38 = vpop.f32.mrf.mxu1  ;;  %v1244_v24 = vadd.f32 %v1207_v36, %v1091_v18 }
 0x148   : > { %v2062_v32 = vpop.f32.mrf.mxu0  ;;  %v1093_v38 = vadd.f32 %v1062_v39, %v2611_v57 }
 0x149   : > { %v2625_v42 = vpop.f32.mrf.mxu1 }
 0x14a   : > { %v1212_v40 = vpop.f32.mrf.mxu0  ;;  %v1094_v39 = vadd.f32 %v2625_v42, %v2613_v63 }
 0x14b   : > { %v2047_v43 = vpop.f32.mrf.mxu1  ;;  %v1245_v20 = vadd.f32 %v1212_v40, %v1092_v28 }
 0x14c   : > { %v2065_v26 = vpop.f32.mrf.mxu0 }
 0x14d   : > { %v2627_v48 = vpop.f32.mrf.mxu1 }
 0x14e   : > { %v1215_v47 = vpop.f32.mrf.mxu0  ;;  %v1095_v63 = vadd.f32 %v2627_v48, %v2615_v5 }
 0x14f   : > { %v2048_v50 = vpop.f32.mrf.mxu1  ;;  %v1246_v40 = vadd.f32 %v1215_v47, %v1093_v38 }
 0x150   : > { %v2066_v41 = vpop.f32.mrf.mxu0 }
 0x151   : > { %v2631_v53 = vpop.f32.mrf.mxu1 }
 0x152   : > { %v2629_v51 = vpop.f32.mrf.mxu0  ;;  %v1096_v5 = vadd.f32 %v2631_v53, %v2617_v12 }
 0x153   : > { %v2051_v44 = vpop.f32.mrf.mxu1  ;;  %v1247_v47 = vadd.f32 %v2629_v51, %v1094_v39 }
 0x154   : > { %v2069_v49 = vpop.f32.mrf.mxu0 }
 0x155   : > { %v2635_v56 = vpop.f32.mrf.mxu1 }
 0x156   : > { %v2633_v55 = vpop.f32.mrf.mxu0  ;;  %v1097_v12 = vadd.f32 %v2635_v56, %v2619_v11 }
 0x157   : > { %v2052_v54 = vpop.f32.mrf.mxu1  ;;  %v1248_v51 = vadd.f32 %v2633_v55, %v1095_v63 }
 0x158   : > { %v2070_v58 = vpop.f32.mrf.mxu0 }
 0x159   : > { %v2639_v61 = vpop.f32.mrf.mxu1 }
 0x15a   : > { %v2637_v59 = vpop.f32.mrf.mxu0  ;;  %v1098_v11 = vadd.f32 %v2639_v61, %v2621_v25 }
 0x15b   : > { %v2055_v0 = vpop.f32.mrf.mxu1  ;;  %v1249_v55 = vadd.f32 %v2637_v59, %v1096_v5 }
 0x15c   : > { %v2073_v62 = vpop.f32.mrf.mxu0 }
 0x15d   : > { %v2643_v46 = vpop.f32.mrf.mxu1 }
 0x15e   : > { %v2641_v60 = vpop.f32.mrf.mxu0  ;;  %v1099_v25 = vadd.f32 %v2643_v46, %v2623_v29 }
 0x15f   : > { %v2056_v2 = vpop.f32.mrf.mxu1  ;;  %v1250_v59 = vadd.f32 %v2641_v60, %v1097_v12 }
 0x160   : > { %v2074_v4 = vpop.f32.mrf.mxu0 }
 0x161   : > { %v1365_v3 = vpop.f32.mrf.mxu1 }
 0x162   : > { %v2645_v6 = vpop.f32.mrf.mxu0  ;;  %v1404_v19 = vadd.f32 %v1365_v3, %v1243_v8 }
 0x163   : > { %v2083_v10 = vpop.f32.mrf.mxu1  ;;  %v1251_v60 = vadd.f32 %v2645_v6, %v1098_v11 }
 0x164   : > { %v2077_v7 = vpop.f32.mrf.mxu0 }
 0x165   : > { %v1368_v14 = vpop.f32.mrf.mxu1 }
 0x166   : > { %v2648_v13 = vpop.f32.mrf.mxu0  ;;  %v1405_v45 = vadd.f32 %v1368_v14, %v1244_v24 }
 0x167   : > { %v2084_v15 = vpop.f32.mrf.mxu1  ;;  %v1252_v6 = vadd.f32 %v2648_v13, %v1099_v25 }
 0x168   : > { %v2078_v16 = vpop.f32.mrf.mxu0 }
 0x169   : > { %v1373_v37 = vpop.f32.mrf.mxu1 }
 0x16a   : > { %v1484_v21 = vpop.f32.mrf.mxu0  ;;  %v1406_v26 = vadd.f32 %v1373_v37, %v1245_v20 }
 0x16b   : > { %v1523_v22 = vadd.f32 %v1484_v21, %v1404_v19  ;;  %v2087_v31 = vpop.f32.mrf.mxu1 }
 0x16c   : > { %v2105_v17 = vpop.f32.mrf.mxu0 }
 0x16d   : > { %v1540_v30 = vmul.f32 %v2654_v23, %v1523_v22  ;;  %v1376_v36 = vpop.f32.mrf.mxu1 }
 0x16e   : > { %v1487_v27 = vpop.f32.mrf.mxu0  ;;  %v1407_v54 = vadd.f32 %v1376_v36, %v1246_v40 }
 0x16f   : > { %v1557_v34 = vadd.f32 %v2659_v1, %v1540_v30  ;;  %v1524_v35 = vadd.f32 %v1487_v27, %v1405_v45  ;;  %v2088_v52 = vpop.f32.mrf.mxu1 }
 0x170   : > { %v2106_v32 = vpop.f32.mrf.mxu0 }
 0x171   : > { %v1567_v43 = vmax.f32 %v1557_v34, 0.0  ;;  %v1541_v41 = vmul.f32 %v2654_v23, %v1524_v35  ;;  %v1381_v58 = vpop.f32.mrf.mxu1 }
 0x172   : > { %v1492_v33 = vpop.f32.mrf.mxu0  ;;  %v1408_v42 = vadd.f32 %v1381_v58, %v1247_v47 }
 0x173   : > { %v1861_v50 = vpack.c.bf16 %v1567_v43, %v1567_v43  ;;  %v1558_v49 = vadd.f32 %v2659_v1, %v1541_v41  ;;  %v1525_v44 = vadd.f32 %v1492_v33, %v1406_v26  ;;  %v2091_v4 = vpop.f32.mrf.mxu1 }
 0x174   : > { %v2109_v57 = vpop.f32.mrf.mxu0 }
 0x175   : > { %1618 = vst.msk [vmem:[%s2670_s26] sm:$0xf] %vm1617_vm9, %v1861_v50  ;;  %v1568_v62 = vmax.f32 %v1558_v49, 0.0  ;;  %v1542_v0 = vmul.f32 %v2654_v23, %v1525_v44  ;;  %v1384_v10 = vpop.f32.mrf.mxu1 }
 0x176   : > { %v1495_v2 = vpop.f32.mrf.mxu0  ;;  %v1409_v48 = vadd.f32 %v1384_v10, %v1248_v51 }
 0x177   : > { %v1862_v3 = vpack.c.bf16 %v1568_v62, %v1568_v62  ;;  %v1559_v7 = vadd.f32 %v2659_v1, %v1542_v0  ;;  %v1526_v9 = vadd.f32 %v1495_v2, %v1407_v54  ;;  %v2092_v18 = vpop.f32.mrf.mxu1 }
 0x178   : > { %v2110_v8 = vpop.f32.mrf.mxu0 }
 0x179   : > { %1619 = vst.msk [vmem:[%s2670_s26 + $0x4] sm:$0xf] %vm1617_vm9, %v1862_v3  ;;  %v1569_v14 = vmax.f32 %v1559_v7, 0.0  ;;  %v1543_v16 = vmul.f32 %v2654_v23, %v1526_v9  ;;  %v1389_v22 = vpop.f32.mrf.mxu1 }
 0x17a   : > { %v1500_v19 = vpop.f32.mrf.mxu0  ;;  %v1410_v53 = vadd.f32 %v1389_v22, %v1249_v55 }
 0x17b   : > { %v1863_v15 = vpack.c.bf16 %v1569_v14, %v1569_v14  ;;  %v1560_v21 = vadd.f32 %v2659_v1, %v1543_v16  ;;  %v1527_v24 = vadd.f32 %v1500_v19, %v1408_v42  ;;  %v2095_v45 = vpop.f32.mrf.mxu1 }
 0x17c   : > { %v2113_v37 = vpop.f32.mrf.mxu0 }
 0x17d   : > { %1620 = vst.msk [vmem:[%s2670_s26 + $0x8] sm:$0xf] %vm1617_vm9, %v1863_v15  ;;  %v1570_v17 = vmax.f32 %v1560_v21, 0.0  ;;  %v1544_v28 = vmul.f32 %v2654_v23, %v1527_v24  ;;  %v1392_v34 = vpop.f32.mrf.mxu1 }
 0x17e   : > { %v1503_v30 = vpop.f32.mrf.mxu0  ;;  %v1411_v56 = vadd.f32 %v1392_v34, %v1250_v59 }
 0x17f   : > { %v1864_v31 = vpack.c.bf16 %v1570_v17, %v1570_v17  ;;  %v1561_v27 = vadd.f32 %v2659_v1, %v1544_v28  ;;  %v1528_v20 = vadd.f32 %v1503_v30, %v1409_v48  ;;  %v2096_v38 = vpop.f32.mrf.mxu1 }
 0x180   : > { %v2114_v35 = vpop.f32.mrf.mxu0 }
 0x181   : > { %1621 = vst.msk [vmem:[%s2670_s26 + $0xc] sm:$0xf] %vm1617_vm9, %v1864_v31  ;;  %v1571_v36 = vmax.f32 %v1561_v27, 0.0  ;;  %v1545_v32 = vmul.f32 %v2654_v23, %v1528_v20  ;;  %v1397_v33 = vpop.f32.mrf.mxu1 }
 0x182   : > { %v1508_v26 = vpop.f32.mrf.mxu0  ;;  %v1412_v61 = vadd.f32 %v1397_v33, %v1251_v60 }
 0x183   : > { %v1865_v43 = vpack.c.bf16 %v1571_v36, %v1571_v36  ;;  %v1562_v41 = vadd.f32 %v2659_v1, %v1545_v32  ;;  %v1529_v52 = vadd.f32 %v1508_v26, %v1410_v53  ;;  %v2099_v44 = vpop.f32.mrf.mxu1 }
 0x184   : > { %v2117_v40 = vpop.f32.mrf.mxu0 }
 0x185   : > { %1622 = vst.msk [vmem:[%s2670_s26 + $0x10] sm:$0xf] %vm1617_vm9, %v1865_v43  ;;  %v1572_v50 = vmax.f32 %v1562_v41, 0.0  ;;  %v1546_v49 = vmul.f32 %v2654_v23, %v1529_v52  ;;  %v1400_v62 = vpop.f32.mrf.mxu1 }
 0x186   : > { %v1511_v58 = vpop.f32.mrf.mxu0  ;;  %v1413_v29 = vadd.f32 %v1400_v62, %v1252_v6 }
 0x187   : > { %v1866_v57 = vpack.c.bf16 %v1572_v50, %v1572_v50  ;;  %v1563_v39 = vadd.f32 %v2659_v1, %v1546_v49  ;;  %v1530_v54 = vadd.f32 %v1511_v58, %v1411_v56  ;;  %v2100_v47 = vpop.f32.mrf.mxu1 }
 0x188   : > { %v2118_v0 = vpop.f32.mrf.mxu0 }
 0x189   : > { %1623 = vst.msk [vmem:[%s2670_s26 + $0x14] sm:$0xf] %vm1617_vm9, %v1866_v57  ;;  %v1573_v4 = vmax.f32 %v1563_v39, 0.0  ;;  %v1547_v2 = vmul.f32 %v2654_v23, %v1530_v54 }
 0x18a   : > { %v1516_v3 = vpop.f32.mrf.mxu0 }
 0x18b   : > { %v1867_v7 = vpack.c.bf16 %v1573_v4, %v1573_v4  ;;  %v1564_v9 = vadd.f32 %v2659_v1, %v1547_v2  ;;  %v1531_v10 = vadd.f32 %v1516_v3, %v1412_v61 }
 0x18c   : > { %v2121_v8 = vpop.f32.mrf.mxu0 }
 0x18d   : > { %1624 = vst.msk [vmem:[%s2670_s26 + $0x18] sm:$0xf] %vm1617_vm9, %v1867_v7  ;;  %v1574_v46 = vmax.f32 %v1564_v9, 0.0  ;;  %v1548_v63 = vmul.f32 %v2654_v23, %v1531_v10 }
 0x18e   : > { %v1519_v42 = vpop.f32.mrf.mxu0 }
 0x18f   : > { %v1868_v14 = vpack.c.bf16 %v1574_v46, %v1574_v46  ;;  %v1565_v16 = vadd.f32 %v2659_v1, %v1548_v63  ;;  %v1532_v18 = vadd.f32 %v1519_v42, %v1413_v29 }
 0x190   : > { %v2122_v19 = vpop.f32.mrf.mxu0 }
 0x191   : > { %1625 = vst.msk [vmem:[%s2670_s26 + $0x1c] sm:$0xf] %vm1617_vm9, %v1868_v14  ;;  %v1575_v13 = vmax.f32 %v1565_v16, 0.0  ;;  %v1549_v51 = vmul.f32 %v2654_v23, %v1532_v18 }
 0x193   : > { %v1869_v15 = vpack.c.bf16 %v1575_v13, %v1575_v13  ;;  %v1566_v21 = vadd.f32 %v2659_v1, %v1549_v51 }
 0x195   : > { %1626 = vst.msk [vmem:[%s2670_s26 + $0x20] sm:$0xf] %vm1617_vm9, %v1869_v15  ;;  %v1576_v24 = vmax.f32 %v1566_v21, 0.0 }
 0x197   : > { %v1870_v22 = vpack.c.bf16 %v1576_v24, %v1576_v24 }
 0x199   : > { %1627 = vst.msk [vmem:[%s2670_s26 + $0x24] sm:$0xf] %vm1617_vm9, %v1870_v22 }
 0x19a PF: > { %s14_s17 = sadd.s32 1, %s2198_s17   ;;  %s2741_s15 = smov %s2194_s16 }
 0x19b   : > { %p11_p5 = scmp.ge.s32.totalorder %s14_s17, 10   ;;  %s2742_s16 = smov %s2744_s18 }
 0x19d   :  { %13 = sbr.rel (!%p11_p5) target bundleno = 2 (0x2), region = 83 }

// kernel: _lambda_.20
= control target key start
LH: loop header
LB: loop body
LE: loop exit
PB: predicated region body
PF: predicated region fallthrough
CT: control target
= control target key end

     0   :  { %vm250_vm0 = vcmask 130048   ;;  %vm1034_vm1 = vcmask 257024   ;;  %s1982_s1 = inlined_call_operand.vmem [shape: bf16[1,16,32], index: 1, kind: input, shape index: {}]   ;;  %s1983_s0 = inlined_call_operand.vmem [shape: bf16[1,512,16], index: 0, kind: input, shape index: {}]   ;;  %s1984_s2 = inlined_call_operand.vmem [shape: f32[1,32], index: 2, kind: input, shape index: {}]   ;;  %s1985_s3 = inlined_call_operand.vmem [shape: f32[1,32], index: 3, kind: input, shape index: {}]   ;;  %s1986_s4 = inlined_call_operand.vmem [shape: bf16[1,512,32], index: 4, kind: output, shape index: {}]  }
   0x1   :  { %v1399_v0 = vld [vmem:[%s1982_s1] sm:$0xff]   ;;  %v1402_v3 = vld [vmem:[%s1983_s0 + $0x8] sm:$0xff]   ;;  %v1404_v5 = vld [vmem:[%s1983_s0 + $0x10] sm:$0xff]  }
   0x2   :  { %v1400_v1 = vld [vmem:[%s1983_s0] sm:$0xff]   ;;  %1331 = vmatprep.subr.bf16.mxu0 %v1399_v0  ;;  %1397 = vmatprep.subr.bf16.mxu1 %v1399_v0  ;;  %v1403_v4 = vld [vmem:[%s1983_s0 + $0x88] sm:$0xff]   ;;  %v1405_v6 = vld [vmem:[%s1983_s0 + $0x90] sm:$0xff]  }
   0x3   :  { %v1401_v2 = vld [vmem:[%s1983_s0 + $0x80] sm:$0xff]   ;;  %1332 = vmatpush3.bf16.msra.mxu0 %v1399_v0  ;;  %1398 = vmatpush3.bf16.msra.mxu1 %v1399_v0  ;;  %v1406_v7 = vld [vmem:[%s1983_s0 + $0x18] sm:$0xff]   ;;  %v1410_v11 = vld [vmem:[%s1983_s0 + $0x28] sm:$0xff]  }
   0x4   :  { %1333 = vmatprep.mubr.msk.bf16.mxu0 %vm250_vm0, %v1400_v1  ;;  %1365 = vmatprep.mubr.msk.bf16.mxu1 %vm250_vm0, %v1401_v2  ;;  %v1407_v8 = vld [vmem:[%s1983_s0 + $0x98] sm:$0xff]   ;;  %v1408_v9 = vld [vmem:[%s1983_s0 + $0x20] sm:$0xff]   ;;  %v1411_v12 = vld [vmem:[%s1983_s0 + $0xa8] sm:$0xff]  }
   0x5   :  { %v1409_v10 = vld [vmem:[%s1983_s0 + $0xa0] sm:$0xff]   ;;  %v1412_v13 = vld [vmem:[%s1983_s0 + $0x30] sm:$0xff]   ;;  %v1414_v15 = vld [vmem:[%s1983_s0 + $0x38] sm:$0xff]  }
   0x6   :  { %1334 = vmatmul.mubr.msk.bf16.vlgmr.msra.gmra.mxu0 %vm250_vm0, %v1402_v3  ;;  %1366 = vmatmul.mubr.msk.bf16.vlgmr.msra.gmra.mxu1 %vm250_vm0, %v1403_v4  ;;  %v1413_v14 = vld [vmem:[%s1983_s0 + $0xb0] sm:$0xff]   ;;  %v1415_v16 = vld [vmem:[%s1983_s0 + $0xb8] sm:$0xff]   ;;  %v1416_v17 = vld [vmem:[%s1983_s0 + $0x40] sm:$0xff]  }
   0x7   :  { %1337 = vmatprep.mubr.msk.bf16.mxu0 %vm250_vm0, %v1404_v5  ;;  %1369 = vmatprep.mubr.msk.bf16.mxu1 %vm250_vm0, %v1405_v6  ;;  %v1417_v18 = vld [vmem:[%s1983_s0 + $0xc0] sm:$0xff]   ;;  %v1418_v19 = vld [vmem:[%s1983_s0 + $0x48] sm:$0xff]   ;;  %v1420_v21 = vld [vmem:[%s1983_s0 + $0x50] sm:$0xff]  }
   0x8   :  { %v1419_v20 = vld [vmem:[%s1983_s0 + $0xc8] sm:$0xff]   ;;  %v1421_v22 = vld [vmem:[%s1983_s0 + $0xd0] sm:$0xff]   ;;  %v1422_v23 = vld [vmem:[%s1983_s0 + $0x58] sm:$0xff]  }
   0x9   :  { %v1423_v24 = vld [vmem:[%s1983_s0 + $0xd8] sm:$0xff]   ;;  %v1424_v25 = vld [vmem:[%s1983_s0 + $0x60] sm:$0xff]   ;;  %v1426_v27 = vld [vmem:[%s1983_s0 + $0x68] sm:$0xff]  }
   0xa   :  { %v1425_v26 = vld [vmem:[%s1983_s0 + $0xe0] sm:$0xff]   ;;  %v1427_v28 = vld [vmem:[%s1983_s0 + $0xe8] sm:$0xff]   ;;  %v1428_v29 = vld [vmem:[%s1983_s0 + $0x70] sm:$0xff]  }
   0xb   :  { %v1429_v30 = vld [vmem:[%s1983_s0 + $0xf0] sm:$0xff]   ;;  %v1430_v31 = vld [vmem:[%s1983_s0 + $0x78] sm:$0xff]   ;;  %v1591_v33 = vld [vmem:[%s1984_s2] ss:$0 sm:$0xff] }
   0xc   :  { %v1431_v32 = vld [vmem:[%s1983_s0 + $0xf8] sm:$0xff]   ;;  %v1596_v35 = vld [vmem:[%s1985_s3] ss:$0 sm:$0xff] }
   0xe   :  { %1338 = vmatmul.mubr.msk.bf16.gmra.mxu0 %vm250_vm0, %v1406_v7  ;;  %1370 = vmatmul.mubr.msk.bf16.gmra.mxu1 %vm250_vm0, %v1407_v8 }
   0xf   :  { %1341 = vmatprep.mubr.msk.bf16.mxu0 %vm250_vm0, %v1408_v9  ;;  %1373 = vmatprep.mubr.msk.bf16.mxu1 %vm250_vm0, %v1409_v10 }
  0x16   :  { %1342 = vmatmul.mubr.msk.bf16.gmra.mxu0 %vm250_vm0, %v1410_v11  ;;  %1374 = vmatmul.mubr.msk.bf16.gmra.mxu1 %vm250_vm0, %v1411_v12 }
  0x17   :  { %1345 = vmatprep.mubr.msk.bf16.mxu0 %vm250_vm0, %v1412_v13  ;;  %1377 = vmatprep.mubr.msk.bf16.mxu1 %vm250_vm0, %v1413_v14 }
  0x1e   :  { %1346 = vmatmul.mubr.msk.bf16.gmra.mxu0 %vm250_vm0, %v1414_v15  ;;  %1378 = vmatmul.mubr.msk.bf16.gmra.mxu1 %vm250_vm0, %v1415_v16 }
  0x1f   :  { %1349 = vmatprep.mubr.msk.bf16.mxu0 %vm250_vm0, %v1416_v17  ;;  %1381 = vmatprep.mubr.msk.bf16.mxu1 %vm250_vm0, %v1417_v18 }
  0x26   :  { %1350 = vmatmul.mubr.msk.bf16.gmra.mxu0 %vm250_vm0, %v1418_v19  ;;  %1382 = vmatmul.mubr.msk.bf16.gmra.mxu1 %vm250_vm0, %v1419_v20 }
  0x27   :  { %1353 = vmatprep.mubr.msk.bf16.mxu0 %vm250_vm0, %v1420_v21  ;;  %1385 = vmatprep.mubr.msk.bf16.mxu1 %vm250_vm0, %v1421_v22 }
  0x2e   :  { %1354 = vmatmul.mubr.msk.bf16.gmra.mxu0 %vm250_vm0, %v1422_v23  ;;  %1386 = vmatmul.mubr.msk.bf16.gmra.mxu1 %vm250_vm0, %v1423_v24 }
  0x2f   :  { %1357 = vmatprep.mubr.msk.bf16.mxu0 %vm250_vm0, %v1424_v25  ;;  %1389 = vmatprep.mubr.msk.bf16.mxu1 %vm250_vm0, %v1425_v26 }
  0x36   :  { %1358 = vmatmul.mubr.msk.bf16.gmra.mxu0 %vm250_vm0, %v1426_v27  ;;  %1390 = vmatmul.mubr.msk.bf16.gmra.mxu1 %vm250_vm0, %v1427_v28 }
  0x37   :  { %1361 = vmatprep.mubr.msk.bf16.mxu0 %vm250_vm0, %v1428_v29  ;;  %1393 = vmatprep.mubr.msk.bf16.mxu1 %vm250_vm0, %v1429_v30 }
  0x3e   :  { %1362 = vmatmul.mubr.msk.bf16.gmra.mxu0 %vm250_vm0, %v1430_v31  ;;  %1394 = vmatmul.mubr.msk.bf16.gmra.mxu1 %vm250_vm0, %v1431_v32 }
  0xc6   :  { %v1335_v34 = vpop.f32.mrf.mxu0  ;;  %v1367_v36 = vpop.f32.mrf.mxu1 }
  0xc7   :  { %v645_v37 = vmul.f32 %v1335_v34, %v1591_v33  ;;  %v677_v38 = vmul.f32 %v1367_v36, %v1591_v33 }
  0xc8   :  { %v381_v39 = vpop.f32.mrf.mxu0  ;;  %v509_v40 = vpop.f32.mrf.mxu1 }
  0xc9   :  { %v716_v41 = vadd.f32 %v1596_v35, %v645_v37  ;;  %v748_v42 = vadd.f32 %v1596_v35, %v677_v38  ;;  %v643_v43 = vmul.f32 %v1591_v33, %v381_v39  ;;  %v675_v44 = vmul.f32 %v1591_v33, %v509_v40 }
  0xca   :  { %v1336_v45 = vpop.f32.mrf.mxu0  ;;  %v1368_v46 = vpop.f32.mrf.mxu1 }
  0xcb   :  { %v1236_v47 = vpack.c.bf16 %v716_v41, %v716_v41  ;;  %v1268_v48 = vpack.c.bf16 %v748_v42, %v748_v42  ;;  %v714_v49 = vadd.f32 %v1596_v35, %v643_v43  ;;  %v746_v50 = vadd.f32 %v1596_v35, %v675_v44 }
  0xcc   :  { %v646_v51 = vmul.f32 %v1336_v45, %v1591_v33  ;;  %v678_v52 = vmul.f32 %v1368_v46, %v1591_v33  ;;  %v384_v53 = vpop.f32.mrf.mxu0  ;;  %v512_v54 = vpop.f32.mrf.mxu1 }
  0xcd   :  { %1037 = vst.msk [vmem:[%s1986_s4 + $0x8] sm:$0xf] %vm1034_vm1, %v1236_v47  ;;  %1069 = vst.msk [vmem:[%s1986_s4 + $0x88] sm:$0xf] %vm1034_vm1, %v1268_v48  ;;  %v1234_v55 = vpack.c.bf16 %v714_v49, %v714_v49  ;;  %v1266_v56 = vpack.c.bf16 %v746_v50, %v746_v50  ;;  %v644_v57 = vmul.f32 %v1591_v33, %v384_v53 }
  0xce   :  { %v676_v58 = vmul.f32 %v1591_v33, %v512_v54  ;;  %v717_v59 = vadd.f32 %v1596_v35, %v646_v51  ;;  %v749_v60 = vadd.f32 %v1596_v35, %v678_v52  ;;  %v1339_v61 = vpop.f32.mrf.mxu0  ;;  %v1371_v62 = vpop.f32.mrf.mxu1 }
  0xcf   :  { %1035 = vst.msk [vmem:[%s1986_s4] sm:$0xf] %vm1034_vm1, %v1234_v55  ;;  %1067 = vst.msk [vmem:[%s1986_s4 + $0x80] sm:$0xf] %vm1034_vm1, %v1266_v56  ;;  %v715_v63 = vadd.f32 %v1596_v35, %v644_v57  ;;  %v649_v1 = vmul.f32 %v1339_v61, %v1591_v33  ;;  %v681_v2 = vmul.f32 %v1371_v62, %v1591_v33 }
  0xd0   :  { %v747_v0 = vadd.f32 %v1596_v35, %v676_v58  ;;  %v1237_v3 = vpack.c.bf16 %v717_v59, %v717_v59  ;;  %v1269_v4 = vpack.c.bf16 %v749_v60, %v749_v60  ;;  %v397_v5 = vpop.f32.mrf.mxu0  ;;  %v525_v6 = vpop.f32.mrf.mxu1 }
  0xd1   :  { %v1235_v7 = vpack.c.bf16 %v715_v63, %v715_v63  ;;  %v720_v9 = vadd.f32 %v1596_v35, %v649_v1  ;;  %v752_v10 = vadd.f32 %v1596_v35, %v681_v2  ;;  %v647_v11 = vmul.f32 %v1591_v33, %v397_v5 }
  0xd2   :  { %v1267_v8 = vpack.c.bf16 %v747_v0, %v747_v0  ;;  %1038 = vst.msk [vmem:[%s1986_s4 + $0xc] sm:$0xf] %vm1034_vm1, %v1237_v3  ;;  %1070 = vst.msk [vmem:[%s1986_s4 + $0x8c] sm:$0xf] %vm1034_vm1, %v1269_v4  ;;  %v679_v12 = vmul.f32 %v1591_v33, %v525_v6  ;;  %v1340_v13 = vpop.f32.mrf.mxu0  ;;  %v1372_v14 = vpop.f32.mrf.mxu1 }
  0xd3   :  { %1036 = vst.msk [vmem:[%s1986_s4 + $0x4] sm:$0xf] %vm1034_vm1, %v1235_v7  ;;  %v1240_v15 = vpack.c.bf16 %v720_v9, %v720_v9  ;;  %v1272_v16 = vpack.c.bf16 %v752_v10, %v752_v10  ;;  %v650_v17 = vmul.f32 %v1340_v13, %v1591_v33  ;;  %v682_v18 = vmul.f32 %v1372_v14, %v1591_v33 }
  0xd4   :  { %1068 = vst.msk [vmem:[%s1986_s4 + $0x84] sm:$0xf] %vm1034_vm1, %v1267_v8  ;;  %v718_v19 = vadd.f32 %v1596_v35, %v647_v11  ;;  %v750_v20 = vadd.f32 %v1596_v35, %v679_v12  ;;  %v400_v21 = vpop.f32.mrf.mxu0  ;;  %v528_v22 = vpop.f32.mrf.mxu1 }
  0xd5   :  { %1041 = vst.msk [vmem:[%s1986_s4 + $0x18] sm:$0xf] %vm1034_vm1, %v1240_v15  ;;  %1073 = vst.msk [vmem:[%s1986_s4 + $0x98] sm:$0xf] %vm1034_vm1, %v1272_v16  ;;  %v721_v23 = vadd.f32 %v1596_v35, %v650_v17  ;;  %v753_v24 = vadd.f32 %v1596_v35, %v682_v18  ;;  %v648_v25 = vmul.f32 %v1591_v33, %v400_v21 }
  0xd6   :  { %v680_v26 = vmul.f32 %v1591_v33, %v528_v22  ;;  %v1238_v27 = vpack.c.bf16 %v718_v19, %v718_v19  ;;  %v1270_v28 = vpack.c.bf16 %v750_v20, %v750_v20  ;;  %v1343_v29 = vpop.f32.mrf.mxu0  ;;  %v1375_v30 = vpop.f32.mrf.mxu1 }
  0xd7   :  { %v1241_v31 = vpack.c.bf16 %v721_v23, %v721_v23  ;;  %v1273_v32 = vpack.c.bf16 %v753_v24, %v753_v24  ;;  %v719_v34 = vadd.f32 %v1596_v35, %v648_v25  ;;  %v653_v37 = vmul.f32 %v1343_v29, %v1591_v33 }
  0xd8   :  { %v751_v36 = vadd.f32 %v1596_v35, %v680_v26  ;;  %1039 = vst.msk [vmem:[%s1986_s4 + $0x10] sm:$0xf] %vm1034_vm1, %v1238_v27  ;;  %1071 = vst.msk [vmem:[%s1986_s4 + $0x90] sm:$0xf] %vm1034_vm1, %v1270_v28  ;;  %v685_v38 = vmul.f32 %v1375_v30, %v1591_v33  ;;  %v413_v39 = vpop.f32.mrf.mxu0  ;;  %v541_v40 = vpop.f32.mrf.mxu1 }
  0xd9   :  { %1042 = vst.msk [vmem:[%s1986_s4 + $0x1c] sm:$0xf] %vm1034_vm1, %v1241_v31  ;;  %1074 = vst.msk [vmem:[%s1986_s4 + $0x9c] sm:$0xf] %vm1034_vm1, %v1273_v32  ;;  %v1239_v41 = vpack.c.bf16 %v719_v34, %v719_v34  ;;  %v651_v43 = vmul.f32 %v1591_v33, %v413_v39  ;;  %v683_v44 = vmul.f32 %v1591_v33, %v541_v40 }
  0xda   :  { %v1271_v42 = vpack.c.bf16 %v751_v36, %v751_v36  ;;  %v724_v45 = vadd.f32 %v1596_v35, %v653_v37  ;;  %v756_v46 = vadd.f32 %v1596_v35, %v685_v38  ;;  %v1344_v47 = vpop.f32.mrf.mxu0  ;;  %v1376_v48 = vpop.f32.mrf.mxu1 }
  0xdb   :  { %1040 = vst.msk [vmem:[%s1986_s4 + $0x14] sm:$0xf] %vm1034_vm1, %v1239_v41  ;;  %v722_v49 = vadd.f32 %v1596_v35, %v651_v43  ;;  %v754_v50 = vadd.f32 %v1596_v35, %v683_v44  ;;  %v654_v51 = vmul.f32 %v1344_v47, %v1591_v33  ;;  %v686_v52 = vmul.f32 %v1376_v48, %v1591_v33 }
  0xdc   :  { %1072 = vst.msk [vmem:[%s1986_s4 + $0x94] sm:$0xf] %vm1034_vm1, %v1271_v42  ;;  %v1244_v53 = vpack.c.bf16 %v724_v45, %v724_v45  ;;  %v1276_v54 = vpack.c.bf16 %v756_v46, %v756_v46  ;;  %v416_v55 = vpop.f32.mrf.mxu0  ;;  %v544_v56 = vpop.f32.mrf.mxu1 }
  0xdd   :  { %v1242_v57 = vpack.c.bf16 %v722_v49, %v722_v49  ;;  %v1274_v58 = vpack.c.bf16 %v754_v50, %v754_v50  ;;  %v725_v59 = vadd.f32 %v1596_v35, %v654_v51  ;;  %v757_v60 = vadd.f32 %v1596_v35, %v686_v52 }
  0xde   :  { %1045 = vst.msk [vmem:[%s1986_s4 + $0x28] sm:$0xf] %vm1034_vm1, %v1244_v53  ;;  %1077 = vst.msk [vmem:[%s1986_s4 + $0xa8] sm:$0xf] %vm1034_vm1, %v1276_v54  ;;  %v652_v61 = vmul.f32 %v1591_v33, %v416_v55  ;;  %v684_v62 = vmul.f32 %v1591_v33, %v544_v56  ;;  %v1347_v63 = vpop.f32.mrf.mxu0  ;;  %v1379_v0 = vpop.f32.mrf.mxu1 }
  0xdf   :  { %1043 = vst.msk [vmem:[%s1986_s4 + $0x20] sm:$0xf] %vm1034_vm1, %v1242_v57  ;;  %1075 = vst.msk [vmem:[%s1986_s4 + $0xa0] sm:$0xf] %vm1034_vm1, %v1274_v58  ;;  %v1245_v1 = vpack.c.bf16 %v725_v59, %v725_v59  ;;  %v1277_v2 = vpack.c.bf16 %v757_v60, %v757_v60  ;;  %v657_v3 = vmul.f32 %v1347_v63, %v1591_v33 }
  0xe0   :  { %v689_v4 = vmul.f32 %v1379_v0, %v1591_v33  ;;  %v723_v5 = vadd.f32 %v1596_v35, %v652_v61  ;;  %v755_v6 = vadd.f32 %v1596_v35, %v684_v62  ;;  %v429_v7 = vpop.f32.mrf.mxu0  ;;  %v557_v8 = vpop.f32.mrf.mxu1 }
  0xe1   :  { %1046 = vst.msk [vmem:[%s1986_s4 + $0x2c] sm:$0xf] %vm1034_vm1, %v1245_v1  ;;  %1078 = vst.msk [vmem:[%s1986_s4 + $0xac] sm:$0xf] %vm1034_vm1, %v1277_v2  ;;  %v728_v9 = vadd.f32 %v1596_v35, %v657_v3  ;;  %v655_v11 = vmul.f32 %v1591_v33, %v429_v7  ;;  %v687_v12 = vmul.f32 %v1591_v33, %v557_v8 }
  0xe2   :  { %v760_v10 = vadd.f32 %v1596_v35, %v689_v4  ;;  %v1243_v13 = vpack.c.bf16 %v723_v5, %v723_v5  ;;  %v1275_v14 = vpack.c.bf16 %v755_v6, %v755_v6  ;;  %v1348_v15 = vpop.f32.mrf.mxu0  ;;  %v1380_v16 = vpop.f32.mrf.mxu1 }
  0xe3   :  { %v1248_v17 = vpack.c.bf16 %v728_v9, %v728_v9  ;;  %v726_v19 = vadd.f32 %v1596_v35, %v655_v11  ;;  %v758_v20 = vadd.f32 %v1596_v35, %v687_v12  ;;  %v658_v21 = vmul.f32 %v1348_v15, %v1591_v33 }
  0xe4   :  { %v1280_v18 = vpack.c.bf16 %v760_v10, %v760_v10  ;;  %1044 = vst.msk [vmem:[%s1986_s4 + $0x24] sm:$0xf] %vm1034_vm1, %v1243_v13  ;;  %1076 = vst.msk [vmem:[%s1986_s4 + $0xa4] sm:$0xf] %vm1034_vm1, %v1275_v14  ;;  %v690_v22 = vmul.f32 %v1380_v16, %v1591_v33  ;;  %v432_v23 = vpop.f32.mrf.mxu0  ;;  %v560_v24 = vpop.f32.mrf.mxu1 }
  0xe5   :  { %1049 = vst.msk [vmem:[%s1986_s4 + $0x38] sm:$0xf] %vm1034_vm1, %v1248_v17  ;;  %v1246_v25 = vpack.c.bf16 %v726_v19, %v726_v19  ;;  %v1278_v26 = vpack.c.bf16 %v758_v20, %v758_v20  ;;  %v656_v27 = vmul.f32 %v1591_v33, %v432_v23  ;;  %v688_v28 = vmul.f32 %v1591_v33, %v560_v24 }
  0xe6   :  { %1081 = vst.msk [vmem:[%s1986_s4 + $0xb8] sm:$0xf] %vm1034_vm1, %v1280_v18  ;;  %v729_v29 = vadd.f32 %v1596_v35, %v658_v21  ;;  %v761_v30 = vadd.f32 %v1596_v35, %v690_v22  ;;  %v1351_v31 = vpop.f32.mrf.mxu0  ;;  %v1383_v32 = vpop.f32.mrf.mxu1 }
  0xe7   :  { %1047 = vst.msk [vmem:[%s1986_s4 + $0x30] sm:$0xf] %vm1034_vm1, %v1246_v25  ;;  %1079 = vst.msk [vmem:[%s1986_s4 + $0xb0] sm:$0xf] %vm1034_vm1, %v1278_v26  ;;  %v727_v34 = vadd.f32 %v1596_v35, %v656_v27  ;;  %v759_v36 = vadd.f32 %v1596_v35, %v688_v28  ;;  %v661_v37 = vmul.f32 %v1351_v31, %v1591_v33 }
  0xe8   :  { %v693_v38 = vmul.f32 %v1383_v32, %v1591_v33  ;;  %v1249_v39 = vpack.c.bf16 %v729_v29, %v729_v29  ;;  %v1281_v40 = vpack.c.bf16 %v761_v30, %v761_v30  ;;  %v445_v41 = vpop.f32.mrf.mxu0  ;;  %v573_v42 = vpop.f32.mrf.mxu1 }
  0xe9   :  { %v1247_v43 = vpack.c.bf16 %v727_v34, %v727_v34  ;;  %v1279_v44 = vpack.c.bf16 %v759_v36, %v759_v36  ;;  %v732_v45 = vadd.f32 %v1596_v35, %v661_v37  ;;  %v659_v47 = vmul.f32 %v1591_v33, %v445_v41 }
  0xea   :  { %v764_v46 = vadd.f32 %v1596_v35, %v693_v38  ;;  %1050 = vst.msk [vmem:[%s1986_s4 + $0x3c] sm:$0xf] %vm1034_vm1, %v1249_v39  ;;  %1082 = vst.msk [vmem:[%s1986_s4 + $0xbc] sm:$0xf] %vm1034_vm1, %v1281_v40  ;;  %v691_v48 = vmul.f32 %v1591_v33, %v573_v42  ;;  %v1352_v49 = vpop.f32.mrf.mxu0  ;;  %v1384_v50 = vpop.f32.mrf.mxu1 }
  0xeb   :  { %1048 = vst.msk [vmem:[%s1986_s4 + $0x34] sm:$0xf] %vm1034_vm1, %v1247_v43  ;;  %1080 = vst.msk [vmem:[%s1986_s4 + $0xb4] sm:$0xf] %vm1034_vm1, %v1279_v44  ;;  %v1252_v51 = vpack.c.bf16 %v732_v45, %v732_v45  ;;  %v662_v53 = vmul.f32 %v1352_v49, %v1591_v33  ;;  %v694_v54 = vmul.f32 %v1384_v50, %v1591_v33 }
  0xec   :  { %v1284_v52 = vpack.c.bf16 %v764_v46, %v764_v46  ;;  %v730_v55 = vadd.f32 %v1596_v35, %v659_v47  ;;  %v762_v56 = vadd.f32 %v1596_v35, %v691_v48  ;;  %v448_v57 = vpop.f32.mrf.mxu0  ;;  %v576_v58 = vpop.f32.mrf.mxu1 }
  0xed   :  { %1053 = vst.msk [vmem:[%s1986_s4 + $0x48] sm:$0xf] %vm1034_vm1, %v1252_v51  ;;  %v733_v59 = vadd.f32 %v1596_v35, %v662_v53  ;;  %v765_v60 = vadd.f32 %v1596_v35, %v694_v54  ;;  %v660_v61 = vmul.f32 %v1591_v33, %v448_v57  ;;  %v692_v62 = vmul.f32 %v1591_v33, %v576_v58 }
  0xee   :  { %1085 = vst.msk [vmem:[%s1986_s4 + $0xc8] sm:$0xf] %vm1034_vm1, %v1284_v52  ;;  %v1250_v63 = vpack.c.bf16 %v730_v55, %v730_v55  ;;  %v1282_v0 = vpack.c.bf16 %v762_v56, %v762_v56  ;;  %v1355_v1 = vpop.f32.mrf.mxu0  ;;  %v1387_v2 = vpop.f32.mrf.mxu1 }
  0xef   :  { %v1253_v3 = vpack.c.bf16 %v733_v59, %v733_v59  ;;  %v1285_v4 = vpack.c.bf16 %v765_v60, %v765_v60  ;;  %v731_v5 = vadd.f32 %v1596_v35, %v660_v61  ;;  %v763_v6 = vadd.f32 %v1596_v35, %v692_v62 }
  0xf0   :  { %1051 = vst.msk [vmem:[%s1986_s4 + $0x40] sm:$0xf] %vm1034_vm1, %v1250_v63  ;;  %1083 = vst.msk [vmem:[%s1986_s4 + $0xc0] sm:$0xf] %vm1034_vm1, %v1282_v0  ;;  %v665_v7 = vmul.f32 %v1355_v1, %v1591_v33  ;;  %v697_v8 = vmul.f32 %v1387_v2, %v1591_v33  ;;  %v461_v9 = vpop.f32.mrf.mxu0  ;;  %v589_v10 = vpop.f32.mrf.mxu1 }
  0xf1   :  { %1054 = vst.msk [vmem:[%s1986_s4 + $0x4c] sm:$0xf] %vm1034_vm1, %v1253_v3  ;;  %1086 = vst.msk [vmem:[%s1986_s4 + $0xcc] sm:$0xf] %vm1034_vm1, %v1285_v4  ;;  %v1251_v11 = vpack.c.bf16 %v731_v5, %v731_v5  ;;  %v1283_v12 = vpack.c.bf16 %v763_v6, %v763_v6  ;;  %v663_v13 = vmul.f32 %v1591_v33, %v461_v9 }
  0xf2   :  { %v695_v14 = vmul.f32 %v1591_v33, %v589_v10  ;;  %v736_v15 = vadd.f32 %v1596_v35, %v665_v7  ;;  %v768_v16 = vadd.f32 %v1596_v35, %v697_v8  ;;  %v1356_v17 = vpop.f32.mrf.mxu0  ;;  %v1388_v18 = vpop.f32.mrf.mxu1 }
  0xf3   :  { %1052 = vst.msk [vmem:[%s1986_s4 + $0x44] sm:$0xf] %vm1034_vm1, %v1251_v11  ;;  %1084 = vst.msk [vmem:[%s1986_s4 + $0xc4] sm:$0xf] %vm1034_vm1, %v1283_v12  ;;  %v734_v19 = vadd.f32 %v1596_v35, %v663_v13  ;;  %v666_v21 = vmul.f32 %v1356_v17, %v1591_v33  ;;  %v698_v22 = vmul.f32 %v1388_v18, %v1591_v33 }
  0xf4   :  { %v766_v20 = vadd.f32 %v1596_v35, %v695_v14  ;;  %v1256_v23 = vpack.c.bf16 %v736_v15, %v736_v15  ;;  %v1288_v24 = vpack.c.bf16 %v768_v16, %v768_v16  ;;  %v464_v25 = vpop.f32.mrf.mxu0  ;;  %v592_v26 = vpop.f32.mrf.mxu1 }
  0xf5   :  { %v1254_v27 = vpack.c.bf16 %v734_v19, %v734_v19  ;;  %v737_v29 = vadd.f32 %v1596_v35, %v666_v21  ;;  %v769_v30 = vadd.f32 %v1596_v35, %v698_v22  ;;  %v664_v31 = vmul.f32 %v1591_v33, %v464_v25 }
  0xf6   :  { %v1286_v28 = vpack.c.bf16 %v766_v20, %v766_v20  ;;  %1057 = vst.msk [vmem:[%s1986_s4 + $0x58] sm:$0xf] %vm1034_vm1, %v1256_v23  ;;  %1089 = vst.msk [vmem:[%s1986_s4 + $0xd8] sm:$0xf] %vm1034_vm1, %v1288_v24  ;;  %v696_v32 = vmul.f32 %v1591_v33, %v592_v26  ;;  %v1359_v34 = vpop.f32.mrf.mxu0  ;;  %v1391_v36 = vpop.f32.mrf.mxu1 }
  0xf7   :  { %1055 = vst.msk [vmem:[%s1986_s4 + $0x50] sm:$0xf] %vm1034_vm1, %v1254_v27  ;;  %v1257_v37 = vpack.c.bf16 %v737_v29, %v737_v29  ;;  %v1289_v38 = vpack.c.bf16 %v769_v30, %v769_v30  ;;  %v669_v39 = vmul.f32 %v1359_v34, %v1591_v33  ;;  %v701_v40 = vmul.f32 %v1391_v36, %v1591_v33 }
  0xf8   :  { %1087 = vst.msk [vmem:[%s1986_s4 + $0xd0] sm:$0xf] %vm1034_vm1, %v1286_v28  ;;  %v735_v41 = vadd.f32 %v1596_v35, %v664_v31  ;;  %v767_v42 = vadd.f32 %v1596_v35, %v696_v32  ;;  %v477_v43 = vpop.f32.mrf.mxu0  ;;  %v605_v44 = vpop.f32.mrf.mxu1 }
  0xf9   :  { %1058 = vst.msk [vmem:[%s1986_s4 + $0x5c] sm:$0xf] %vm1034_vm1, %v1257_v37  ;;  %1090 = vst.msk [vmem:[%s1986_s4 + $0xdc] sm:$0xf] %vm1034_vm1, %v1289_v38  ;;  %v740_v45 = vadd.f32 %v1596_v35, %v669_v39  ;;  %v772_v46 = vadd.f32 %v1596_v35, %v701_v40  ;;  %v667_v47 = vmul.f32 %v1591_v33, %v477_v43 }
  0xfa   :  { %v699_v48 = vmul.f32 %v1591_v33, %v605_v44  ;;  %v1255_v49 = vpack.c.bf16 %v735_v41, %v735_v41  ;;  %v1287_v50 = vpack.c.bf16 %v767_v42, %v767_v42  ;;  %v1360_v51 = vpop.f32.mrf.mxu0  ;;  %v1392_v52 = vpop.f32.mrf.mxu1 }
  0xfb   :  { %v1260_v53 = vpack.c.bf16 %v740_v45, %v740_v45  ;;  %v1292_v54 = vpack.c.bf16 %v772_v46, %v772_v46  ;;  %v738_v55 = vadd.f32 %v1596_v35, %v667_v47  ;;  %v670_v57 = vmul.f32 %v1360_v51, %v1591_v33 }
  0xfc   :  { %v770_v56 = vadd.f32 %v1596_v35, %v699_v48  ;;  %1056 = vst.msk [vmem:[%s1986_s4 + $0x54] sm:$0xf] %vm1034_vm1, %v1255_v49  ;;  %1088 = vst.msk [vmem:[%s1986_s4 + $0xd4] sm:$0xf] %vm1034_vm1, %v1287_v50  ;;  %v702_v58 = vmul.f32 %v1392_v52, %v1591_v33  ;;  %v480_v59 = vpop.f32.mrf.mxu0  ;;  %v608_v60 = vpop.f32.mrf.mxu1 }
  0xfd   :  { %1061 = vst.msk [vmem:[%s1986_s4 + $0x68] sm:$0xf] %vm1034_vm1, %v1260_v53  ;;  %1093 = vst.msk [vmem:[%s1986_s4 + $0xe8] sm:$0xf] %vm1034_vm1, %v1292_v54  ;;  %v1258_v61 = vpack.c.bf16 %v738_v55, %v738_v55  ;;  %v668_v63 = vmul.f32 %v1591_v33, %v480_v59  ;;  %v700_v0 = vmul.f32 %v1591_v33, %v608_v60 }
  0xfe   :  { %v1290_v62 = vpack.c.bf16 %v770_v56, %v770_v56  ;;  %v741_v1 = vadd.f32 %v1596_v35, %v670_v57  ;;  %v773_v2 = vadd.f32 %v1596_v35, %v702_v58  ;;  %v1363_v3 = vpop.f32.mrf.mxu0  ;;  %v1395_v4 = vpop.f32.mrf.mxu1 }
  0xff   :  { %1059 = vst.msk [vmem:[%s1986_s4 + $0x60] sm:$0xf] %vm1034_vm1, %v1258_v61  ;;  %v739_v5 = vadd.f32 %v1596_v35, %v668_v63  ;;  %v771_v6 = vadd.f32 %v1596_v35, %v700_v0  ;;  %v673_v7 = vmul.f32 %v1363_v3, %v1591_v33  ;;  %v705_v8 = vmul.f32 %v1395_v4, %v1591_v33 }
 0x100   :  { %1091 = vst.msk [vmem:[%s1986_s4 + $0xe0] sm:$0xf] %vm1034_vm1, %v1290_v62  ;;  %v1261_v9 = vpack.c.bf16 %v741_v1, %v741_v1  ;;  %v1293_v10 = vpack.c.bf16 %v773_v2, %v773_v2  ;;  %v493_v11 = vpop.f32.mrf.mxu0  ;;  %v621_v12 = vpop.f32.mrf.mxu1 }
 0x101   :  { %v1259_v13 = vpack.c.bf16 %v739_v5, %v739_v5  ;;  %v1291_v14 = vpack.c.bf16 %v771_v6, %v771_v6  ;;  %v744_v15 = vadd.f32 %v1596_v35, %v673_v7  ;;  %v776_v16 = vadd.f32 %v1596_v35, %v705_v8 }
 0x102   :  { %1062 = vst.msk [vmem:[%s1986_s4 + $0x6c] sm:$0xf] %vm1034_vm1, %v1261_v9  ;;  %1094 = vst.msk [vmem:[%s1986_s4 + $0xec] sm:$0xf] %vm1034_vm1, %v1293_v10  ;;  %v671_v17 = vmul.f32 %v1591_v33, %v493_v11  ;;  %v703_v18 = vmul.f32 %v1591_v33, %v621_v12  ;;  %v1364_v19 = vpop.f32.mrf.mxu0  ;;  %v1396_v20 = vpop.f32.mrf.mxu1 }
 0x103   :  { %1060 = vst.msk [vmem:[%s1986_s4 + $0x64] sm:$0xf] %vm1034_vm1, %v1259_v13  ;;  %1092 = vst.msk [vmem:[%s1986_s4 + $0xe4] sm:$0xf] %vm1034_vm1, %v1291_v14  ;;  %v1264_v21 = vpack.c.bf16 %v744_v15, %v744_v15  ;;  %v1296_v22 = vpack.c.bf16 %v776_v16, %v776_v16  ;;  %v674_v23 = vmul.f32 %v1364_v19, %v1591_v33 }
 0x104   :  { %v706_v24 = vmul.f32 %v1396_v20, %v1591_v33  ;;  %v742_v25 = vadd.f32 %v1596_v35, %v671_v17  ;;  %v774_v26 = vadd.f32 %v1596_v35, %v703_v18  ;;  %v496_v27 = vpop.f32.mrf.mxu0  ;;  %v624_v28 = vpop.f32.mrf.mxu1 }
 0x105   :  { %1065 = vst.msk [vmem:[%s1986_s4 + $0x78] sm:$0xf] %vm1034_vm1, %v1264_v21  ;;  %1097 = vst.msk [vmem:[%s1986_s4 + $0xf8] sm:$0xf] %vm1034_vm1, %v1296_v22  ;;  %v745_v29 = vadd.f32 %v1596_v35, %v674_v23  ;;  %v672_v31 = vmul.f32 %v1591_v33, %v496_v27  ;;  %v704_v32 = vmul.f32 %v1591_v33, %v624_v28 }
 0x106   :  { %v777_v30 = vadd.f32 %v1596_v35, %v706_v24  ;;  %v1262_v34 = vpack.c.bf16 %v742_v25, %v742_v25  ;;  %v1294_v36 = vpack.c.bf16 %v774_v26, %v774_v26 }
 0x107   :  { %v1265_v37 = vpack.c.bf16 %v745_v29, %v745_v29  ;;  %v743_v39 = vadd.f32 %v1596_v35, %v672_v31  ;;  %v775_v40 = vadd.f32 %v1596_v35, %v704_v32 }
 0x108   :  { %v1297_v38 = vpack.c.bf16 %v777_v30, %v777_v30  ;;  %1063 = vst.msk [vmem:[%s1986_s4 + $0x70] sm:$0xf] %vm1034_vm1, %v1262_v34  ;;  %1095 = vst.msk [vmem:[%s1986_s4 + $0xf0] sm:$0xf] %vm1034_vm1, %v1294_v36 }
 0x109   :  { %1066 = vst.msk [vmem:[%s1986_s4 + $0x7c] sm:$0xf] %vm1034_vm1, %v1265_v37  ;;  %v1263_v33 = vpack.c.bf16 %v743_v39, %v743_v39  ;;  %v1295_v35 = vpack.c.bf16 %v775_v40, %v775_v40 }
 0x10a   :  { %1098 = vst.msk [vmem:[%s1986_s4 + $0xfc] sm:$0xf] %vm1034_vm1, %v1297_v38 }
 0x10b   :  { %1064 = vst.msk [vmem:[%s1986_s4 + $0x74] sm:$0xf] %vm1034_vm1, %v1263_v33  ;;  %1096 = vst.msk [vmem:[%s1986_s4 + $0xf4] sm:$0xf] %vm1034_vm1, %v1295_v35 }

// kernel: _lambda_.25
= control target key start
LH: loop header
LB: loop body
LE: loop exit
PB: predicated region body
PF: predicated region fallthrough
CT: control target
= control target key end

     0   :  { %vm258_vm0 = vcmask 261120   ;;  %vm1106_vm1 = vcmask 125952   ;;  %s2064_s1 = inlined_call_operand.vmem [shape: bf16[1,32,16], index: 1, kind: input, shape index: {}]   ;;  %s2065_s0 = inlined_call_operand.vmem [shape: bf16[1,512,32], index: 0, kind: input, shape index: {}]   ;;  %s2066_s2 = inlined_call_operand.vmem [shape: f32[1,16], index: 2, kind: input, shape index: {}]   ;;  %s2067_s3 = inlined_call_operand.vmem [shape: f32[1,16], index: 3, kind: input, shape index: {}]   ;;  %s2068_s4 = inlined_call_operand.vmem [shape: bf16[1,512,16], index: 4, kind: output, shape index: {}]  }
   0x1   :  { %v1477_v0 = vld [vmem:[%s2064_s1 + $0x8] sm:$0xff]   ;;  %v1478_v1 = vld [vmem:[%s2064_s1] sm:$0xff]   ;;  %v1483_v6 = vld [vmem:[%s2065_s0 + $0x10] sm:$0xff]  }
   0x2   :  { %1405 = vmatprep.subr.bf16.mxu0 %v1477_v0  ;;  %1473 = vmatprep.subr.bf16.mxu1 %v1477_v0  ;;  %v1479_v2 = vld [vmem:[%s2065_s0] sm:$0xff]   ;;  %v1481_v4 = vld [vmem:[%s2065_s0 + $0x8] sm:$0xff]   ;;  %v1484_v7 = vld [vmem:[%s2065_s0 + $0x90] sm:$0xff]  }
   0x3   :  { %1406 = vmatpush3.bf16.msra.mxu0 %v1477_v0  ;;  %1475 = vmatpush3.bf16.msra.mxu1 %v1477_v0  ;;  %v1480_v3 = vld [vmem:[%s2065_s0 + $0x80] sm:$0xff]   ;;  %v1482_v5 = vld [vmem:[%s2065_s0 + $0x88] sm:$0xff]   ;;  %v1485_v8 = vld [vmem:[%s2065_s0 + $0x18] sm:$0xff]  }
   0x4   :  { %1407 = vmatprep.subr.bf16.mxu0 %v1478_v1  ;;  %1474 = vmatprep.subr.bf16.mxu1 %v1478_v1  ;;  %v1486_v9 = vld [vmem:[%s2065_s0 + $0x98] sm:$0xff]   ;;  %v1487_v10 = vld [vmem:[%s2065_s0 + $0x20] sm:$0xff]   ;;  %v1489_v12 = vld [vmem:[%s2065_s0 + $0x28] sm:$0xff]  }
   0x5   :  { %1409 = vmatprep.mubr.msk.bf16.mxu0 %vm258_vm0, %v1479_v2  ;;  %1441 = vmatprep.mubr.msk.bf16.mxu1 %vm258_vm0, %v1480_v3  ;;  %v1488_v11 = vld [vmem:[%s2065_s0 + $0xa0] sm:$0xff]   ;;  %v1490_v13 = vld [vmem:[%s2065_s0 + $0xa8] sm:$0xff]   ;;  %v1491_v14 = vld [vmem:[%s2065_s0 + $0x30] sm:$0xff]  }
   0x6   :  { %v1492_v15 = vld [vmem:[%s2065_s0 + $0xb0] sm:$0xff]   ;;  %v1493_v16 = vld [vmem:[%s2065_s0 + $0x38] sm:$0xff]   ;;  %v1495_v18 = vld [vmem:[%s2065_s0 + $0x40] sm:$0xff]  }
   0x7   :  { %1408 = vmatpush3.bf16.msra.mxu0 %v1478_v1  ;;  %1476 = vmatpush3.bf16.msra.mxu1 %v1478_v1  ;;  %v1494_v17 = vld [vmem:[%s2065_s0 + $0xb8] sm:$0xff]   ;;  %v1496_v19 = vld [vmem:[%s2065_s0 + $0xc0] sm:$0xff]   ;;  %v1497_v20 = vld [vmem:[%s2065_s0 + $0x48] sm:$0xff]  }
   0x8   :  { %v1498_v21 = vld [vmem:[%s2065_s0 + $0xc8] sm:$0xff]   ;;  %v1499_v22 = vld [vmem:[%s2065_s0 + $0x50] sm:$0xff]   ;;  %v1501_v24 = vld [vmem:[%s2065_s0 + $0x58] sm:$0xff]  }
   0x9   :  { %v1500_v23 = vld [vmem:[%s2065_s0 + $0xd0] sm:$0xff]   ;;  %v1502_v25 = vld [vmem:[%s2065_s0 + $0xd8] sm:$0xff]   ;;  %v1503_v26 = vld [vmem:[%s2065_s0 + $0x60] sm:$0xff]  }
   0xa   :  { %1410 = vmatmul.mubr.msk.bf16.vlgmr.msra.gmra.mxu0 %vm258_vm0, %v1481_v4  ;;  %1442 = vmatmul.mubr.msk.bf16.vlgmr.msra.gmra.mxu1 %vm258_vm0, %v1482_v5  ;;  %v1504_v27 = vld [vmem:[%s2065_s0 + $0xe0] sm:$0xff]   ;;  %v1505_v28 = vld [vmem:[%s2065_s0 + $0x68] sm:$0xff]   ;;  %v1507_v30 = vld [vmem:[%s2065_s0 + $0x70] sm:$0xff]  }
   0xb   :  { %1413 = vmatprep.mubr.msk.bf16.mxu0 %vm258_vm0, %v1483_v6  ;;  %1445 = vmatprep.mubr.msk.bf16.mxu1 %vm258_vm0, %v1484_v7  ;;  %v1506_v29 = vld [vmem:[%s2065_s0 + $0xe8] sm:$0xff]   ;;  %v1508_v31 = vld [vmem:[%s2065_s0 + $0xf0] sm:$0xff]   ;;  %v1509_v32 = vld [vmem:[%s2065_s0 + $0x78] sm:$0xff]  }
   0xc   :  { %v1510_v33 = vld [vmem:[%s2065_s0 + $0xf8] sm:$0xff]   ;;  %v1673_v34 = vld [vmem:[%s2066_s2] ss:$0 sm:$0xff] }
   0xd   :  { %v1678_v36 = vld [vmem:[%s2067_s3] ss:$0 sm:$0xff] }
  0x12   :  { %1414 = vmatmul.mubr.msk.bf16.gmra.mxu0 %vm258_vm0, %v1485_v8  ;;  %1446 = vmatmul.mubr.msk.bf16.gmra.mxu1 %vm258_vm0, %v1486_v9 }
  0x13   :  { %1417 = vmatprep.mubr.msk.bf16.mxu0 %vm258_vm0, %v1487_v10  ;;  %1449 = vmatprep.mubr.msk.bf16.mxu1 %vm258_vm0, %v1488_v11 }
  0x1a   :  { %1418 = vmatmul.mubr.msk.bf16.gmra.mxu0 %vm258_vm0, %v1489_v12  ;;  %1450 = vmatmul.mubr.msk.bf16.gmra.mxu1 %vm258_vm0, %v1490_v13 }
  0x1b   :  { %1421 = vmatprep.mubr.msk.bf16.mxu0 %vm258_vm0, %v1491_v14  ;;  %1453 = vmatprep.mubr.msk.bf16.mxu1 %vm258_vm0, %v1492_v15 }
  0x22   :  { %1422 = vmatmul.mubr.msk.bf16.gmra.mxu0 %vm258_vm0, %v1493_v16  ;;  %1454 = vmatmul.mubr.msk.bf16.gmra.mxu1 %vm258_vm0, %v1494_v17 }
  0x23   :  { %1425 = vmatprep.mubr.msk.bf16.mxu0 %vm258_vm0, %v1495_v18  ;;  %1457 = vmatprep.mubr.msk.bf16.mxu1 %vm258_vm0, %v1496_v19 }
  0x2a   :  { %1426 = vmatmul.mubr.msk.bf16.gmra.mxu0 %vm258_vm0, %v1497_v20  ;;  %1458 = vmatmul.mubr.msk.bf16.gmra.mxu1 %vm258_vm0, %v1498_v21 }
  0x2b   :  { %1429 = vmatprep.mubr.msk.bf16.mxu0 %vm258_vm0, %v1499_v22  ;;  %1461 = vmatprep.mubr.msk.bf16.mxu1 %vm258_vm0, %v1500_v23 }
  0x32   :  { %1430 = vmatmul.mubr.msk.bf16.gmra.mxu0 %vm258_vm0, %v1501_v24  ;;  %1462 = vmatmul.mubr.msk.bf16.gmra.mxu1 %vm258_vm0, %v1502_v25 }
  0x33   :  { %1433 = vmatprep.mubr.msk.bf16.mxu0 %vm258_vm0, %v1503_v26  ;;  %1465 = vmatprep.mubr.msk.bf16.mxu1 %vm258_vm0, %v1504_v27 }
  0x3a   :  { %1434 = vmatmul.mubr.msk.bf16.gmra.mxu0 %vm258_vm0, %v1505_v28  ;;  %1466 = vmatmul.mubr.msk.bf16.gmra.mxu1 %vm258_vm0, %v1506_v29 }
  0x3b   :  { %1437 = vmatprep.mubr.msk.bf16.mxu0 %vm258_vm0, %v1507_v30  ;;  %1469 = vmatprep.mubr.msk.bf16.mxu1 %vm258_vm0, %v1508_v31 }
  0x42   :  { %1438 = vmatmul.mubr.msk.bf16.gmra.mxu0 %vm258_vm0, %v1509_v32  ;;  %1470 = vmatmul.mubr.msk.bf16.gmra.mxu1 %vm258_vm0, %v1510_v33 }
  0xca   :  { %v1411_v35 = vpop.f32.mrf.mxu0  ;;  %v1443_v37 = vpop.f32.mrf.mxu1 }
  0xcb   :  { %v653_v38 = vmul.f32 %v1411_v35, %v1673_v34  ;;  %v685_v39 = vmul.f32 %v1443_v37, %v1673_v34 }
  0xcc   :  { %v389_v40 = vpop.f32.mrf.mxu0  ;;  %v517_v41 = vpop.f32.mrf.mxu1 }
  0xcd   :  { %v724_v42 = vadd.f32 %v1678_v36, %v653_v38  ;;  %v756_v43 = vadd.f32 %v1678_v36, %v685_v39  ;;  %v651_v44 = vmul.f32 %v1673_v34, %v389_v40  ;;  %v683_v45 = vmul.f32 %v1673_v34, %v517_v41 }
  0xce   :  { %v1412_v46 = vpop.f32.mrf.mxu0  ;;  %v1444_v47 = vpop.f32.mrf.mxu1 }
  0xcf   :  { %v788_v48 = vmax.f32 %v724_v42, 0.0  ;;  %v820_v49 = vmax.f32 %v756_v43, 0.0  ;;  %v722_v50 = vadd.f32 %v1678_v36, %v651_v44  ;;  %v754_v51 = vadd.f32 %v1678_v36, %v683_v45 }
  0xd0   :  { %v654_v52 = vmul.f32 %v1412_v46, %v1673_v34  ;;  %v686_v53 = vmul.f32 %v1444_v47, %v1673_v34  ;;  %v392_v54 = vpop.f32.mrf.mxu0  ;;  %v520_v55 = vpop.f32.mrf.mxu1 }
  0xd1   :  { %v1309_v56 = vpack.c.bf16 %v788_v48, %v788_v48  ;;  %v1341_v57 = vpack.c.bf16 %v820_v49, %v820_v49  ;;  %v786_v58 = vmax.f32 %v722_v50, 0.0  ;;  %v818_v59 = vmax.f32 %v754_v51, 0.0 }
  0xd2   :  { %v725_v60 = vadd.f32 %v1678_v36, %v654_v52  ;;  %v757_v61 = vadd.f32 %v1678_v36, %v686_v53  ;;  %v652_v62 = vmul.f32 %v1673_v34, %v392_v54  ;;  %v684_v63 = vmul.f32 %v1673_v34, %v520_v55  ;;  %v1415_v0 = vpop.f32.mrf.mxu0  ;;  %v1447_v1 = vpop.f32.mrf.mxu1 }
  0xd3   :  { %1109 = vst.msk [vmem:[%s2068_s4 + $0x8] sm:$0xf] %vm1106_vm1, %v1309_v56  ;;  %1141 = vst.msk [vmem:[%s2068_s4 + $0x88] sm:$0xf] %vm1106_vm1, %v1341_v57  ;;  %v1307_v2 = vpack.c.bf16 %v786_v58, %v786_v58  ;;  %v1339_v3 = vpack.c.bf16 %v818_v59, %v818_v59  ;;  %v657_v4 = vmul.f32 %v1415_v0, %v1673_v34 }
  0xd4   :  { %v689_v5 = vmul.f32 %v1447_v1, %v1673_v34  ;;  %v789_v6 = vmax.f32 %v725_v60, 0.0  ;;  %v821_v7 = vmax.f32 %v757_v61, 0.0  ;;  %v723_v8 = vadd.f32 %v1678_v36, %v652_v62  ;;  %v405_v10 = vpop.f32.mrf.mxu0  ;;  %v533_v11 = vpop.f32.mrf.mxu1 }
  0xd5   :  { %v755_v9 = vadd.f32 %v1678_v36, %v684_v63  ;;  %1107 = vst.msk [vmem:[%s2068_s4] sm:$0xf] %vm1106_vm1, %v1307_v2  ;;  %1139 = vst.msk [vmem:[%s2068_s4 + $0x80] sm:$0xf] %vm1106_vm1, %v1339_v3  ;;  %v728_v12 = vadd.f32 %v1678_v36, %v657_v4  ;;  %v655_v14 = vmul.f32 %v1673_v34, %v405_v10 }
  0xd6   :  { %v760_v13 = vadd.f32 %v1678_v36, %v689_v5  ;;  %v687_v15 = vmul.f32 %v1673_v34, %v533_v11  ;;  %v1310_v16 = vpack.c.bf16 %v789_v6, %v789_v6  ;;  %v1342_v17 = vpack.c.bf16 %v821_v7, %v821_v7  ;;  %v1416_v20 = vpop.f32.mrf.mxu0  ;;  %v1448_v21 = vpop.f32.mrf.mxu1 }
  0xd7   :  { %v787_v18 = vmax.f32 %v723_v8, 0.0  ;;  %v819_v19 = vmax.f32 %v755_v9, 0.0  ;;  %v792_v22 = vmax.f32 %v728_v12, 0.0  ;;  %v726_v24 = vadd.f32 %v1678_v36, %v655_v14 }
  0xd8   :  { %v824_v23 = vmax.f32 %v760_v13, 0.0  ;;  %v758_v25 = vadd.f32 %v1678_v36, %v687_v15  ;;  %1110 = vst.msk [vmem:[%s2068_s4 + $0xc] sm:$0xf] %vm1106_vm1, %v1310_v16  ;;  %1142 = vst.msk [vmem:[%s2068_s4 + $0x8c] sm:$0xf] %vm1106_vm1, %v1342_v17  ;;  %v658_v28 = vmul.f32 %v1416_v20, %v1673_v34  ;;  %v690_v29 = vmul.f32 %v1448_v21, %v1673_v34  ;;  %v408_v30 = vpop.f32.mrf.mxu0  ;;  %v536_v31 = vpop.f32.mrf.mxu1 }
  0xd9   :  { %v1308_v26 = vpack.c.bf16 %v787_v18, %v787_v18  ;;  %v1340_v27 = vpack.c.bf16 %v819_v19, %v819_v19  ;;  %v1313_v32 = vpack.c.bf16 %v792_v22, %v792_v22  ;;  %v790_v35 = vmax.f32 %v726_v24, 0.0 }
  0xda   :  { %v1345_v33 = vpack.c.bf16 %v824_v23, %v824_v23  ;;  %v822_v37 = vmax.f32 %v758_v25, 0.0  ;;  %v729_v38 = vadd.f32 %v1678_v36, %v658_v28  ;;  %v761_v39 = vadd.f32 %v1678_v36, %v690_v29  ;;  %v1419_v42 = vpop.f32.mrf.mxu0  ;;  %v1451_v43 = vpop.f32.mrf.mxu1 }
  0xdb   :  { %1108 = vst.msk [vmem:[%s2068_s4 + $0x4] sm:$0xf] %vm1106_vm1, %v1308_v26  ;;  %1140 = vst.msk [vmem:[%s2068_s4 + $0x84] sm:$0xf] %vm1106_vm1, %v1340_v27  ;;  %v656_v40 = vmul.f32 %v1673_v34, %v408_v30  ;;  %v688_v41 = vmul.f32 %v1673_v34, %v536_v31  ;;  %v1311_v44 = vpack.c.bf16 %v790_v35, %v790_v35 }
  0xdc   :  { %1113 = vst.msk [vmem:[%s2068_s4 + $0x18] sm:$0xf] %vm1106_vm1, %v1313_v32  ;;  %1145 = vst.msk [vmem:[%s2068_s4 + $0x98] sm:$0xf] %vm1106_vm1, %v1345_v33  ;;  %v1343_v45 = vpack.c.bf16 %v822_v37, %v822_v37  ;;  %v661_v46 = vmul.f32 %v1419_v42, %v1673_v34  ;;  %v693_v47 = vmul.f32 %v1451_v43, %v1673_v34  ;;  %v793_v48 = vmax.f32 %v729_v38, 0.0  ;;  %v421_v52 = vpop.f32.mrf.mxu0  ;;  %v549_v53 = vpop.f32.mrf.mxu1 }
  0xdd   :  { %v825_v49 = vmax.f32 %v761_v39, 0.0  ;;  %v727_v50 = vadd.f32 %v1678_v36, %v656_v40  ;;  %v759_v51 = vadd.f32 %v1678_v36, %v688_v41  ;;  %1111 = vst.msk [vmem:[%s2068_s4 + $0x10] sm:$0xf] %vm1106_vm1, %v1311_v44  ;;  %v659_v56 = vmul.f32 %v1673_v34, %v421_v52 }
  0xde   :  { %1143 = vst.msk [vmem:[%s2068_s4 + $0x90] sm:$0xf] %vm1106_vm1, %v1343_v45  ;;  %v732_v54 = vadd.f32 %v1678_v36, %v661_v46  ;;  %v764_v55 = vadd.f32 %v1678_v36, %v693_v47  ;;  %v691_v57 = vmul.f32 %v1673_v34, %v549_v53  ;;  %v1314_v58 = vpack.c.bf16 %v793_v48, %v793_v48  ;;  %v1420_v62 = vpop.f32.mrf.mxu0  ;;  %v1452_v63 = vpop.f32.mrf.mxu1 }
  0xdf   :  { %v1346_v59 = vpack.c.bf16 %v825_v49, %v825_v49  ;;  %v791_v60 = vmax.f32 %v727_v50, 0.0  ;;  %v823_v61 = vmax.f32 %v759_v51, 0.0  ;;  %v730_v2 = vadd.f32 %v1678_v36, %v659_v56 }
  0xe0   :  { %v796_v0 = vmax.f32 %v732_v54, 0.0  ;;  %v828_v1 = vmax.f32 %v764_v55, 0.0  ;;  %v762_v3 = vadd.f32 %v1678_v36, %v691_v57  ;;  %1114 = vst.msk [vmem:[%s2068_s4 + $0x1c] sm:$0xf] %vm1106_vm1, %v1314_v58  ;;  %v662_v6 = vmul.f32 %v1420_v62, %v1673_v34  ;;  %v424_v8 = vpop.f32.mrf.mxu0  ;;  %v552_v9 = vpop.f32.mrf.mxu1 }
  0xe1   :  { %1146 = vst.msk [vmem:[%s2068_s4 + $0x9c] sm:$0xf] %vm1106_vm1, %v1346_v59  ;;  %v1312_v4 = vpack.c.bf16 %v791_v60, %v791_v60  ;;  %v1344_v5 = vpack.c.bf16 %v823_v61, %v823_v61  ;;  %v694_v7 = vmul.f32 %v1452_v63, %v1673_v34  ;;  %v794_v12 = vmax.f32 %v730_v2, 0.0 }
  0xe2   :  { %v1317_v10 = vpack.c.bf16 %v796_v0, %v796_v0  ;;  %v1349_v11 = vpack.c.bf16 %v828_v1, %v828_v1  ;;  %v826_v13 = vmax.f32 %v762_v3, 0.0  ;;  %v733_v14 = vadd.f32 %v1678_v36, %v662_v6  ;;  %v1423_v18 = vpop.f32.mrf.mxu0  ;;  %v1455_v19 = vpop.f32.mrf.mxu1 }
  0xe3   :  { %1112 = vst.msk [vmem:[%s2068_s4 + $0x14] sm:$0xf] %vm1106_vm1, %v1312_v4  ;;  %1144 = vst.msk [vmem:[%s2068_s4 + $0x94] sm:$0xf] %vm1106_vm1, %v1344_v5  ;;  %v765_v15 = vadd.f32 %v1678_v36, %v694_v7  ;;  %v660_v16 = vmul.f32 %v1673_v34, %v424_v8  ;;  %v692_v17 = vmul.f32 %v1673_v34, %v552_v9 }
  0xe4   :  { %1117 = vst.msk [vmem:[%s2068_s4 + $0x28] sm:$0xf] %vm1106_vm1, %v1317_v10  ;;  %1149 = vst.msk [vmem:[%s2068_s4 + $0xa8] sm:$0xf] %vm1106_vm1, %v1349_v11  ;;  %v1315_v20 = vpack.c.bf16 %v794_v12, %v794_v12  ;;  %v1347_v21 = vpack.c.bf16 %v826_v13, %v826_v13  ;;  %v665_v22 = vmul.f32 %v1423_v18, %v1673_v34  ;;  %v797_v24 = vmax.f32 %v733_v14, 0.0  ;;  %v437_v28 = vpop.f32.mrf.mxu0  ;;  %v565_v29 = vpop.f32.mrf.mxu1 }
  0xe5   :  { %v697_v23 = vmul.f32 %v1455_v19, %v1673_v34  ;;  %v829_v25 = vmax.f32 %v765_v15, 0.0  ;;  %v731_v26 = vadd.f32 %v1678_v36, %v660_v16  ;;  %v763_v27 = vadd.f32 %v1678_v36, %v692_v17 }
  0xe6   :  { %1115 = vst.msk [vmem:[%s2068_s4 + $0x20] sm:$0xf] %vm1106_vm1, %v1315_v20  ;;  %1147 = vst.msk [vmem:[%s2068_s4 + $0xa0] sm:$0xf] %vm1106_vm1, %v1347_v21  ;;  %v736_v30 = vadd.f32 %v1678_v36, %v665_v22  ;;  %v663_v32 = vmul.f32 %v1673_v34, %v437_v28  ;;  %v695_v33 = vmul.f32 %v1673_v34, %v565_v29  ;;  %v1424_v40 = vpop.f32.mrf.mxu0  ;;  %v1456_v41 = vpop.f32.mrf.mxu1 }
  0xe7   :  { %v768_v31 = vadd.f32 %v1678_v36, %v697_v23  ;;  %v1318_v35 = vpack.c.bf16 %v797_v24, %v797_v24  ;;  %v1350_v37 = vpack.c.bf16 %v829_v25, %v829_v25  ;;  %v795_v38 = vmax.f32 %v731_v26, 0.0 }
  0xe8   :  { %v827_v39 = vmax.f32 %v763_v27, 0.0  ;;  %v800_v42 = vmax.f32 %v736_v30, 0.0  ;;  %v734_v44 = vadd.f32 %v1678_v36, %v663_v32  ;;  %v766_v45 = vadd.f32 %v1678_v36, %v695_v33  ;;  %v440_v50 = vpop.f32.mrf.mxu0  ;;  %v568_v51 = vpop.f32.mrf.mxu1 }
  0xe9   :  { %v832_v43 = vmax.f32 %v768_v31, 0.0  ;;  %1118 = vst.msk [vmem:[%s2068_s4 + $0x2c] sm:$0xf] %vm1106_vm1, %v1318_v35  ;;  %1150 = vst.msk [vmem:[%s2068_s4 + $0xac] sm:$0xf] %vm1106_vm1, %v1350_v37  ;;  %v1316_v46 = vpack.c.bf16 %v795_v38, %v795_v38  ;;  %v666_v48 = vmul.f32 %v1424_v40, %v1673_v34  ;;  %v698_v49 = vmul.f32 %v1456_v41, %v1673_v34 }
  0xea   :  { %v1348_v47 = vpack.c.bf16 %v827_v39, %v827_v39  ;;  %v1321_v52 = vpack.c.bf16 %v800_v42, %v800_v42  ;;  %v798_v54 = vmax.f32 %v734_v44, 0.0  ;;  %v830_v55 = vmax.f32 %v766_v45, 0.0  ;;  %v1427_v60 = vpop.f32.mrf.mxu0  ;;  %v1459_v61 = vpop.f32.mrf.mxu1 }
  0xeb   :  { %v1353_v53 = vpack.c.bf16 %v832_v43, %v832_v43  ;;  %1116 = vst.msk [vmem:[%s2068_s4 + $0x24] sm:$0xf] %vm1106_vm1, %v1316_v46  ;;  %v737_v56 = vadd.f32 %v1678_v36, %v666_v48  ;;  %v769_v57 = vadd.f32 %v1678_v36, %v698_v49  ;;  %v664_v58 = vmul.f32 %v1673_v34, %v440_v50 }
  0xec   :  { %1148 = vst.msk [vmem:[%s2068_s4 + $0xa4] sm:$0xf] %vm1106_vm1, %v1348_v47  ;;  %v696_v59 = vmul.f32 %v1673_v34, %v568_v51  ;;  %1121 = vst.msk [vmem:[%s2068_s4 + $0x38] sm:$0xf] %vm1106_vm1, %v1321_v52  ;;  %v1319_v62 = vpack.c.bf16 %v798_v54, %v798_v54  ;;  %v1351_v63 = vpack.c.bf16 %v830_v55, %v830_v55  ;;  %v453_v6 = vpop.f32.mrf.mxu0  ;;  %v581_v7 = vpop.f32.mrf.mxu1 }
  0xed   :  { %1153 = vst.msk [vmem:[%s2068_s4 + $0xb8] sm:$0xf] %vm1106_vm1, %v1353_v53  ;;  %v669_v0 = vmul.f32 %v1427_v60, %v1673_v34  ;;  %v701_v1 = vmul.f32 %v1459_v61, %v1673_v34  ;;  %v801_v2 = vmax.f32 %v737_v56, 0.0  ;;  %v833_v3 = vmax.f32 %v769_v57, 0.0 }
  0xee   :  { %v735_v4 = vadd.f32 %v1678_v36, %v664_v58  ;;  %v767_v5 = vadd.f32 %v1678_v36, %v696_v59  ;;  %1119 = vst.msk [vmem:[%s2068_s4 + $0x30] sm:$0xf] %vm1106_vm1, %v1319_v62  ;;  %1151 = vst.msk [vmem:[%s2068_s4 + $0xb0] sm:$0xf] %vm1106_vm1, %v1351_v63  ;;  %v667_v10 = vmul.f32 %v1673_v34, %v453_v6  ;;  %v1428_v16 = vpop.f32.mrf.mxu0  ;;  %v1460_v17 = vpop.f32.mrf.mxu1 }
  0xef   :  { %v740_v8 = vadd.f32 %v1678_v36, %v669_v0  ;;  %v772_v9 = vadd.f32 %v1678_v36, %v701_v1  ;;  %v699_v11 = vmul.f32 %v1673_v34, %v581_v7  ;;  %v1322_v12 = vpack.c.bf16 %v801_v2, %v801_v2 }
  0xf0   :  { %v1354_v13 = vpack.c.bf16 %v833_v3, %v833_v3  ;;  %v799_v14 = vmax.f32 %v735_v4, 0.0  ;;  %v831_v15 = vmax.f32 %v767_v5, 0.0  ;;  %v738_v20 = vadd.f32 %v1678_v36, %v667_v10  ;;  %v456_v26 = vpop.f32.mrf.mxu0  ;;  %v584_v27 = vpop.f32.mrf.mxu1 }
  0xf1   :  { %v804_v18 = vmax.f32 %v740_v8, 0.0  ;;  %v836_v19 = vmax.f32 %v772_v9, 0.0  ;;  %v770_v21 = vadd.f32 %v1678_v36, %v699_v11  ;;  %1122 = vst.msk [vmem:[%s2068_s4 + $0x3c] sm:$0xf] %vm1106_vm1, %v1322_v12  ;;  %v670_v24 = vmul.f32 %v1428_v16, %v1673_v34 }
  0xf2   :  { %1154 = vst.msk [vmem:[%s2068_s4 + $0xbc] sm:$0xf] %vm1106_vm1, %v1354_v13  ;;  %v1320_v22 = vpack.c.bf16 %v799_v14, %v799_v14  ;;  %v1352_v23 = vpack.c.bf16 %v831_v15, %v831_v15  ;;  %v702_v25 = vmul.f32 %v1460_v17, %v1673_v34  ;;  %v802_v30 = vmax.f32 %v738_v20, 0.0  ;;  %v1431_v38 = vpop.f32.mrf.mxu0  ;;  %v1463_v39 = vpop.f32.mrf.mxu1 }
  0xf3   :  { %v1325_v28 = vpack.c.bf16 %v804_v18, %v804_v18  ;;  %v1357_v29 = vpack.c.bf16 %v836_v19, %v836_v19  ;;  %v834_v31 = vmax.f32 %v770_v21, 0.0  ;;  %v741_v32 = vadd.f32 %v1678_v36, %v670_v24 }
  0xf4   :  { %1120 = vst.msk [vmem:[%s2068_s4 + $0x34] sm:$0xf] %vm1106_vm1, %v1320_v22  ;;  %1152 = vst.msk [vmem:[%s2068_s4 + $0xb4] sm:$0xf] %vm1106_vm1, %v1352_v23  ;;  %v773_v33 = vadd.f32 %v1678_v36, %v702_v25  ;;  %v668_v35 = vmul.f32 %v1673_v34, %v456_v26  ;;  %v700_v37 = vmul.f32 %v1673_v34, %v584_v27  ;;  %v469_v48 = vpop.f32.mrf.mxu0  ;;  %v597_v49 = vpop.f32.mrf.mxu1 }
  0xf5   :  { %1125 = vst.msk [vmem:[%s2068_s4 + $0x48] sm:$0xf] %vm1106_vm1, %v1325_v28  ;;  %1157 = vst.msk [vmem:[%s2068_s4 + $0xc8] sm:$0xf] %vm1106_vm1, %v1357_v29  ;;  %v1323_v40 = vpack.c.bf16 %v802_v30, %v802_v30  ;;  %v1355_v41 = vpack.c.bf16 %v834_v31, %v834_v31  ;;  %v673_v42 = vmul.f32 %v1431_v38, %v1673_v34  ;;  %v805_v44 = vmax.f32 %v741_v32, 0.0 }
  0xf6   :  { %v705_v43 = vmul.f32 %v1463_v39, %v1673_v34  ;;  %v837_v45 = vmax.f32 %v773_v33, 0.0  ;;  %v739_v46 = vadd.f32 %v1678_v36, %v668_v35  ;;  %v771_v47 = vadd.f32 %v1678_v36, %v700_v37  ;;  %v1432_v58 = vpop.f32.mrf.mxu0  ;;  %v1464_v59 = vpop.f32.mrf.mxu1 }
  0xf7   :  { %1123 = vst.msk [vmem:[%s2068_s4 + $0x40] sm:$0xf] %vm1106_vm1, %v1323_v40  ;;  %1155 = vst.msk [vmem:[%s2068_s4 + $0xc0] sm:$0xf] %vm1106_vm1, %v1355_v41  ;;  %v744_v50 = vadd.f32 %v1678_v36, %v673_v42  ;;  %v671_v52 = vmul.f32 %v1673_v34, %v469_v48  ;;  %v703_v53 = vmul.f32 %v1673_v34, %v597_v49 }
  0xf8   :  { %v776_v51 = vadd.f32 %v1678_v36, %v705_v43  ;;  %v1326_v54 = vpack.c.bf16 %v805_v44, %v805_v44  ;;  %v1358_v55 = vpack.c.bf16 %v837_v45, %v837_v45  ;;  %v803_v56 = vmax.f32 %v739_v46, 0.0  ;;  %v472_v4 = vpop.f32.mrf.mxu0  ;;  %v600_v5 = vpop.f32.mrf.mxu1 }
  0xf9   :  { %v835_v57 = vmax.f32 %v771_v47, 0.0  ;;  %v808_v60 = vmax.f32 %v744_v50, 0.0  ;;  %v742_v62 = vadd.f32 %v1678_v36, %v671_v52  ;;  %v774_v63 = vadd.f32 %v1678_v36, %v703_v53 }
  0xfa   :  { %v840_v61 = vmax.f32 %v776_v51, 0.0  ;;  %1126 = vst.msk [vmem:[%s2068_s4 + $0x4c] sm:$0xf] %vm1106_vm1, %v1326_v54  ;;  %1158 = vst.msk [vmem:[%s2068_s4 + $0xcc] sm:$0xf] %vm1106_vm1, %v1358_v55  ;;  %v1324_v0 = vpack.c.bf16 %v803_v56, %v803_v56  ;;  %v674_v2 = vmul.f32 %v1432_v58, %v1673_v34  ;;  %v706_v3 = vmul.f32 %v1464_v59, %v1673_v34  ;;  %v1435_v14 = vpop.f32.mrf.mxu0  ;;  %v1467_v15 = vpop.f32.mrf.mxu1 }
  0xfb   :  { %v1356_v1 = vpack.c.bf16 %v835_v57, %v835_v57  ;;  %v1329_v6 = vpack.c.bf16 %v808_v60, %v808_v60  ;;  %v806_v8 = vmax.f32 %v742_v62, 0.0  ;;  %v838_v9 = vmax.f32 %v774_v63, 0.0 }
  0xfc   :  { %v1361_v7 = vpack.c.bf16 %v840_v61, %v840_v61  ;;  %1124 = vst.msk [vmem:[%s2068_s4 + $0x44] sm:$0xf] %vm1106_vm1, %v1324_v0  ;;  %v745_v10 = vadd.f32 %v1678_v36, %v674_v2  ;;  %v777_v11 = vadd.f32 %v1678_v36, %v706_v3  ;;  %v672_v12 = vmul.f32 %v1673_v34, %v472_v4  ;;  %v485_v24 = vpop.f32.mrf.mxu0  ;;  %v613_v25 = vpop.f32.mrf.mxu1 }
  0xfd   :  { %1156 = vst.msk [vmem:[%s2068_s4 + $0xc4] sm:$0xf] %vm1106_vm1, %v1356_v1  ;;  %v704_v13 = vmul.f32 %v1673_v34, %v600_v5  ;;  %1129 = vst.msk [vmem:[%s2068_s4 + $0x58] sm:$0xf] %vm1106_vm1, %v1329_v6  ;;  %v1327_v16 = vpack.c.bf16 %v806_v8, %v806_v8  ;;  %v1359_v17 = vpack.c.bf16 %v838_v9, %v838_v9 }
  0xfe   :  { %1161 = vst.msk [vmem:[%s2068_s4 + $0xd8] sm:$0xf] %vm1106_vm1, %v1361_v7  ;;  %v677_v18 = vmul.f32 %v1435_v14, %v1673_v34  ;;  %v709_v19 = vmul.f32 %v1467_v15, %v1673_v34  ;;  %v809_v20 = vmax.f32 %v745_v10, 0.0  ;;  %v841_v21 = vmax.f32 %v777_v11, 0.0  ;;  %v1436_v35 = vpop.f32.mrf.mxu0  ;;  %v1468_v37 = vpop.f32.mrf.mxu1 }
  0xff   :  { %v743_v22 = vadd.f32 %v1678_v36, %v672_v12  ;;  %v775_v23 = vadd.f32 %v1678_v36, %v704_v13  ;;  %1127 = vst.msk [vmem:[%s2068_s4 + $0x50] sm:$0xf] %vm1106_vm1, %v1327_v16  ;;  %1159 = vst.msk [vmem:[%s2068_s4 + $0xd0] sm:$0xf] %vm1106_vm1, %v1359_v17  ;;  %v675_v28 = vmul.f32 %v1673_v34, %v485_v24 }
 0x100   :  { %v748_v26 = vadd.f32 %v1678_v36, %v677_v18  ;;  %v780_v27 = vadd.f32 %v1678_v36, %v709_v19  ;;  %v707_v29 = vmul.f32 %v1673_v34, %v613_v25  ;;  %v1330_v30 = vpack.c.bf16 %v809_v20, %v809_v20  ;;  %v488_v46 = vpop.f32.mrf.mxu0  ;;  %v616_v47 = vpop.f32.mrf.mxu1 }
 0x101   :  { %v1362_v31 = vpack.c.bf16 %v841_v21, %v841_v21  ;;  %v807_v32 = vmax.f32 %v743_v22, 0.0  ;;  %v839_v33 = vmax.f32 %v775_v23, 0.0  ;;  %v746_v40 = vadd.f32 %v1678_v36, %v675_v28 }
 0x102   :  { %v812_v38 = vmax.f32 %v748_v26, 0.0  ;;  %v844_v39 = vmax.f32 %v780_v27, 0.0  ;;  %v778_v41 = vadd.f32 %v1678_v36, %v707_v29  ;;  %1130 = vst.msk [vmem:[%s2068_s4 + $0x5c] sm:$0xf] %vm1106_vm1, %v1330_v30  ;;  %v678_v44 = vmul.f32 %v1436_v35, %v1673_v34  ;;  %v1439_v56 = vpop.f32.mrf.mxu0  ;;  %v1471_v57 = vpop.f32.mrf.mxu1 }
 0x103   :  { %1162 = vst.msk [vmem:[%s2068_s4 + $0xdc] sm:$0xf] %vm1106_vm1, %v1362_v31  ;;  %v1328_v42 = vpack.c.bf16 %v807_v32, %v807_v32  ;;  %v1360_v43 = vpack.c.bf16 %v839_v33, %v839_v33  ;;  %v710_v45 = vmul.f32 %v1468_v37, %v1673_v34  ;;  %v810_v50 = vmax.f32 %v746_v40, 0.0 }
 0x104   :  { %v1333_v48 = vpack.c.bf16 %v812_v38, %v812_v38  ;;  %v1365_v49 = vpack.c.bf16 %v844_v39, %v844_v39  ;;  %v842_v51 = vmax.f32 %v778_v41, 0.0  ;;  %v749_v52 = vadd.f32 %v1678_v36, %v678_v44  ;;  %v501_v2 = vpop.f32.mrf.mxu0  ;;  %v629_v3 = vpop.f32.mrf.mxu1 }
 0x105   :  { %1128 = vst.msk [vmem:[%s2068_s4 + $0x54] sm:$0xf] %vm1106_vm1, %v1328_v42  ;;  %1160 = vst.msk [vmem:[%s2068_s4 + $0xd4] sm:$0xf] %vm1106_vm1, %v1360_v43  ;;  %v781_v53 = vadd.f32 %v1678_v36, %v710_v45  ;;  %v676_v54 = vmul.f32 %v1673_v34, %v488_v46  ;;  %v708_v55 = vmul.f32 %v1673_v34, %v616_v47 }
 0x106   :  { %1133 = vst.msk [vmem:[%s2068_s4 + $0x68] sm:$0xf] %vm1106_vm1, %v1333_v48  ;;  %1165 = vst.msk [vmem:[%s2068_s4 + $0xe8] sm:$0xf] %vm1106_vm1, %v1365_v49  ;;  %v1331_v58 = vpack.c.bf16 %v810_v50, %v810_v50  ;;  %v1363_v59 = vpack.c.bf16 %v842_v51, %v842_v51  ;;  %v681_v60 = vmul.f32 %v1439_v56, %v1673_v34  ;;  %v813_v62 = vmax.f32 %v749_v52, 0.0  ;;  %v1440_v12 = vpop.f32.mrf.mxu0  ;;  %v1472_v13 = vpop.f32.mrf.mxu1 }
 0x107   :  { %v713_v61 = vmul.f32 %v1471_v57, %v1673_v34  ;;  %v845_v63 = vmax.f32 %v781_v53, 0.0  ;;  %v747_v0 = vadd.f32 %v1678_v36, %v676_v54  ;;  %v779_v1 = vadd.f32 %v1678_v36, %v708_v55 }
 0x108   :  { %1131 = vst.msk [vmem:[%s2068_s4 + $0x60] sm:$0xf] %vm1106_vm1, %v1331_v58  ;;  %1163 = vst.msk [vmem:[%s2068_s4 + $0xe0] sm:$0xf] %vm1106_vm1, %v1363_v59  ;;  %v752_v4 = vadd.f32 %v1678_v36, %v681_v60  ;;  %v679_v6 = vmul.f32 %v1673_v34, %v501_v2  ;;  %v711_v7 = vmul.f32 %v1673_v34, %v629_v3  ;;  %v504_v22 = vpop.f32.mrf.mxu0  ;;  %v632_v23 = vpop.f32.mrf.mxu1 }
 0x109   :  { %v784_v5 = vadd.f32 %v1678_v36, %v713_v61  ;;  %v1334_v8 = vpack.c.bf16 %v813_v62, %v813_v62  ;;  %v1366_v9 = vpack.c.bf16 %v845_v63, %v845_v63  ;;  %v811_v10 = vmax.f32 %v747_v0, 0.0 }
 0x10a   :  { %v843_v11 = vmax.f32 %v779_v1, 0.0  ;;  %v816_v14 = vmax.f32 %v752_v4, 0.0  ;;  %v750_v16 = vadd.f32 %v1678_v36, %v679_v6  ;;  %v782_v17 = vadd.f32 %v1678_v36, %v711_v7 }
 0x10b   :  { %v848_v15 = vmax.f32 %v784_v5, 0.0  ;;  %1134 = vst.msk [vmem:[%s2068_s4 + $0x6c] sm:$0xf] %vm1106_vm1, %v1334_v8  ;;  %1166 = vst.msk [vmem:[%s2068_s4 + $0xec] sm:$0xf] %vm1106_vm1, %v1366_v9  ;;  %v1332_v18 = vpack.c.bf16 %v811_v10, %v811_v10  ;;  %v682_v20 = vmul.f32 %v1440_v12, %v1673_v34  ;;  %v714_v21 = vmul.f32 %v1472_v13, %v1673_v34 }
 0x10c   :  { %v1364_v19 = vpack.c.bf16 %v843_v11, %v843_v11  ;;  %v1337_v24 = vpack.c.bf16 %v816_v14, %v816_v14  ;;  %v814_v26 = vmax.f32 %v750_v16, 0.0  ;;  %v846_v27 = vmax.f32 %v782_v17, 0.0 }
 0x10d   :  { %v1369_v25 = vpack.c.bf16 %v848_v15, %v848_v15  ;;  %1132 = vst.msk [vmem:[%s2068_s4 + $0x64] sm:$0xf] %vm1106_vm1, %v1332_v18  ;;  %v753_v28 = vadd.f32 %v1678_v36, %v682_v20  ;;  %v785_v29 = vadd.f32 %v1678_v36, %v714_v21  ;;  %v680_v30 = vmul.f32 %v1673_v34, %v504_v22 }
 0x10e   :  { %1164 = vst.msk [vmem:[%s2068_s4 + $0xe4] sm:$0xf] %vm1106_vm1, %v1364_v19  ;;  %v712_v31 = vmul.f32 %v1673_v34, %v632_v23  ;;  %1137 = vst.msk [vmem:[%s2068_s4 + $0x78] sm:$0xf] %vm1106_vm1, %v1337_v24  ;;  %v1335_v32 = vpack.c.bf16 %v814_v26, %v814_v26  ;;  %v1367_v33 = vpack.c.bf16 %v846_v27, %v846_v27 }
 0x10f   :  { %1169 = vst.msk [vmem:[%s2068_s4 + $0xf8] sm:$0xf] %vm1106_vm1, %v1369_v25  ;;  %v817_v35 = vmax.f32 %v753_v28, 0.0  ;;  %v849_v37 = vmax.f32 %v785_v29, 0.0  ;;  %v751_v38 = vadd.f32 %v1678_v36, %v680_v30 }
 0x110   :  { %v783_v39 = vadd.f32 %v1678_v36, %v712_v31  ;;  %1135 = vst.msk [vmem:[%s2068_s4 + $0x70] sm:$0xf] %vm1106_vm1, %v1335_v32  ;;  %1167 = vst.msk [vmem:[%s2068_s4 + $0xf0] sm:$0xf] %vm1106_vm1, %v1367_v33 }
 0x111   :  { %v1338_v34 = vpack.c.bf16 %v817_v35, %v817_v35  ;;  %v1370_v40 = vpack.c.bf16 %v849_v37, %v849_v37  ;;  %v815_v41 = vmax.f32 %v751_v38, 0.0 }
 0x112   :  { %v847_v42 = vmax.f32 %v783_v39, 0.0 }
 0x113   :  { %1138 = vst.msk [vmem:[%s2068_s4 + $0x7c] sm:$0xf] %vm1106_vm1, %v1338_v34  ;;  %1170 = vst.msk [vmem:[%s2068_s4 + $0xfc] sm:$0xf] %vm1106_vm1, %v1370_v40  ;;  %v1336_v36 = vpack.c.bf16 %v815_v41, %v815_v41 }
 0x114   :  { %v1368_v43 = vpack.c.bf16 %v847_v42, %v847_v42 }
 0x115   :  { %1136 = vst.msk [vmem:[%s2068_s4 + $0x74] sm:$0xf] %vm1106_vm1, %v1336_v36 }
 0x116   :  { %1168 = vst.msk [vmem:[%s2068_s4 + $0xf4] sm:$0xf] %vm1106_vm1, %v1368_v43 }

// kernel: _lambda_.23
= control target key start
LH: loop header
LB: loop body
LE: loop exit
PB: predicated region body
PF: predicated region fallthrough
CT: control target
= control target key end

     0   :  { %vm343_vm0 = vcmask 1043456   ;;  %vm246_vm1 = vcmask 64512   ;;  %vm1290_vm2 = vcmask 257024   ;;  %s2772_s1 = inlined_call_operand.vmem [shape: bf16[1,8,32], index: 1, kind: input, shape index: {}]   ;;  %s2773_s0 = inlined_call_operand.vmem [shape: bf16[1,512,8], index: 0, kind: input, shape index: {}]   ;;  %s2774_s4 = inlined_call_operand.vmem [shape: bf16[1,512,32], index: 4, kind: input, shape index: {}]   ;;  %s2775_s2 = inlined_call_operand.vmem [shape: f32[1,32], index: 2, kind: input, shape index: {}]   ;;  %s2776_s3 = inlined_call_operand.vmem [shape: f32[1,32], index: 3, kind: input, shape index: {}]   ;;  %s2777_s5 = inlined_call_operand.vmem [shape: bf16[1,512,32], index: 5, kind: output, shape index: {}]  }
   0x1   :  { %v85_v0 = vld [vmem:[%s2772_s1] sm:$0xf]  ;;  %v1817_v4 = vld [vmem:[%s2773_s0 + $0x8] sm:$0xff]   ;;  %v1819_v6 = vld [vmem:[%s2773_s0 + $0x10] sm:$0xff]  }
   0x2   :  { %1813 = vmatprep.subr.msk.bf16.mxu0 %vm343_vm0, %v85_v0  ;;  %1814 = vmatprep.subr.msk.bf16.mxu1 %vm343_vm0, %v85_v0  ;;  %v345_v1 = vsel %vm343_vm0, %v85_v0, 0  ;;  %v1815_v2 = vld [vmem:[%s2773_s0] sm:$0xff]   ;;  %v1818_v5 = vld [vmem:[%s2773_s0 + $0x88] sm:$0xff]   ;;  %v1820_v7 = vld [vmem:[%s2773_s0 + $0x90] sm:$0xff]  }
   0x3   :  { %1746 = vmatpush3.bf16.msra.mxu0 %v345_v1  ;;  %1812 = vmatpush3.bf16.msra.mxu1 %v345_v1  ;;  %v1816_v3 = vld [vmem:[%s2773_s0 + $0x80] sm:$0xff]   ;;  %v1821_v8 = vld [vmem:[%s2773_s0 + $0x18] sm:$0xff]   ;;  %v1825_v12 = vld [vmem:[%s2773_s0 + $0x28] sm:$0xff]  }
   0x4   :  { %1747 = vmatprep.mubr.msk.bf16.mxu0 %vm246_vm1, %v1815_v2  ;;  %1779 = vmatprep.mubr.msk.bf16.mxu1 %vm246_vm1, %v1816_v3  ;;  %v1822_v9 = vld [vmem:[%s2773_s0 + $0x98] sm:$0xff]   ;;  %v1823_v10 = vld [vmem:[%s2773_s0 + $0x20] sm:$0xff]   ;;  %v1826_v13 = vld [vmem:[%s2773_s0 + $0xa8] sm:$0xff]  }
   0x5   :  { %v1824_v11 = vld [vmem:[%s2773_s0 + $0xa0] sm:$0xff]   ;;  %v1827_v14 = vld [vmem:[%s2773_s0 + $0x30] sm:$0xff]   ;;  %v1829_v16 = vld [vmem:[%s2773_s0 + $0x38] sm:$0xff]  }
   0x6   :  { %1748 = vmatmul.mubr.msk.bf16.vlgmr.msra.gmra.mxu0 %vm246_vm1, %v1817_v4  ;;  %1780 = vmatmul.mubr.msk.bf16.vlgmr.msra.gmra.mxu1 %vm246_vm1, %v1818_v5  ;;  %v1828_v15 = vld [vmem:[%s2773_s0 + $0xb0] sm:$0xff]   ;;  %v1830_v17 = vld [vmem:[%s2773_s0 + $0xb8] sm:$0xff]   ;;  %v1831_v18 = vld [vmem:[%s2773_s0 + $0x40] sm:$0xff]  }
   0x7   :  { %1751 = vmatprep.mubr.msk.bf16.mxu0 %vm246_vm1, %v1819_v6  ;;  %1783 = vmatprep.mubr.msk.bf16.mxu1 %vm246_vm1, %v1820_v7  ;;  %v1832_v19 = vld [vmem:[%s2773_s0 + $0xc0] sm:$0xff]   ;;  %v1833_v20 = vld [vmem:[%s2773_s0 + $0x48] sm:$0xff]   ;;  %v1835_v22 = vld [vmem:[%s2773_s0 + $0x50] sm:$0xff]  }
   0x8   :  { %v1834_v21 = vld [vmem:[%s2773_s0 + $0xc8] sm:$0xff]   ;;  %v1836_v23 = vld [vmem:[%s2773_s0 + $0xd0] sm:$0xff]   ;;  %v1837_v24 = vld [vmem:[%s2773_s0 + $0x58] sm:$0xff]  }
   0x9   :  { %v1838_v25 = vld [vmem:[%s2773_s0 + $0xd8] sm:$0xff]   ;;  %v1839_v26 = vld [vmem:[%s2773_s0 + $0x60] sm:$0xff]   ;;  %v1841_v28 = vld [vmem:[%s2773_s0 + $0x68] sm:$0xff]  }
   0xa   :  { %v1840_v27 = vld [vmem:[%s2773_s0 + $0xe0] sm:$0xff]   ;;  %v1842_v29 = vld [vmem:[%s2773_s0 + $0xe8] sm:$0xff]   ;;  %v1843_v30 = vld [vmem:[%s2773_s0 + $0x70] sm:$0xff]  }
   0xb   :  { %v1844_v31 = vld [vmem:[%s2773_s0 + $0xf0] sm:$0xff]   ;;  %v1845_v32 = vld [vmem:[%s2773_s0 + $0x78] sm:$0xff]   ;;  %v2011_v34 = vld [vmem:[%s2774_s4 + $0x8] sm:$0xff]  }
   0xc   :  { %v1846_v33 = vld [vmem:[%s2773_s0 + $0xf8] sm:$0xff]   ;;  %v2016_v35 = vld [vmem:[%s2774_s4 + $0x88] sm:$0xff]   ;;  %v2021_v36 = vld [vmem:[%s2774_s4] sm:$0xff]   ;;  %v1559_v42 = vunpack.c.l.bf16 %v2011_v34  ;;  %v1560_v47 = vunpack.c.h.bf16 %v2011_v34 }
   0xd   :  { %v2026_v37 = vld [vmem:[%s2774_s4 + $0x80] sm:$0xff]   ;;  %v2031_v38 = vld [vmem:[%s2774_s4 + $0x18] sm:$0xff]   ;;  %v2041_v40 = vld [vmem:[%s2774_s4 + $0x10] sm:$0xff]   ;;  %v1623_v43 = vunpack.c.l.bf16 %v2016_v35  ;;  %v1555_v44 = vunpack.c.l.bf16 %v2021_v36  ;;  %v1624_v48 = vunpack.c.h.bf16 %v2016_v35  ;;  %v1556_v49 = vunpack.c.h.bf16 %v2021_v36 }
   0xe   :  { %1752 = vmatmul.mubr.msk.bf16.gmra.mxu0 %vm246_vm1, %v1821_v8  ;;  %1784 = vmatmul.mubr.msk.bf16.gmra.mxu1 %vm246_vm1, %v1822_v9  ;;  %v2036_v39 = vld [vmem:[%s2774_s4 + $0x98] sm:$0xff]   ;;  %v2046_v41 = vld [vmem:[%s2774_s4 + $0x90] sm:$0xff]   ;;  %v1619_v45 = vunpack.c.l.bf16 %v2026_v37  ;;  %v2055_v46 = vld [vmem:[%s2774_s4 + $0x28] sm:$0xff]   ;;  %v1620_v50 = vunpack.c.h.bf16 %v2026_v37  ;;  %v1567_v54 = vunpack.c.l.bf16 %v2031_v38  ;;  %v1563_v56 = vunpack.c.l.bf16 %v2041_v40 }
   0xf   :  { %1755 = vmatprep.mubr.msk.bf16.mxu0 %vm246_vm1, %v1823_v10  ;;  %1787 = vmatprep.mubr.msk.bf16.mxu1 %vm246_vm1, %v1824_v11  ;;  %v2064_v51 = vld [vmem:[%s2774_s4 + $0xa8] sm:$0xff]   ;;  %v2069_v52 = vld [vmem:[%s2774_s4 + $0x20] sm:$0xff]   ;;  %v1631_v55 = vunpack.c.l.bf16 %v2036_v39  ;;  %v1627_v57 = vunpack.c.l.bf16 %v2046_v41  ;;  %v2083_v58 = vld [vmem:[%s2774_s4 + $0x38] sm:$0xff]   ;;  %v1568_v59 = vunpack.c.h.bf16 %v2031_v38  ;;  %v2779_v38 = vunpack.c.h.bf16 %v2041_v40 }
  0x10   :  { %v2074_v53 = vld [vmem:[%s2774_s4 + $0xa0] sm:$0xff]   ;;  %v2092_v63 = vld [vmem:[%s2774_s4 + $0xb8] sm:$0xff]   ;;  %v2097_v0 = vld [vmem:[%s2774_s4 + $0x30] sm:$0xff]  }
  0x11   :  { %v2102_v1 = vld [vmem:[%s2774_s4 + $0xb0] sm:$0xff]   ;;  %v2111_v6 = vld [vmem:[%s2774_s4 + $0x48] sm:$0xff]  }
  0x12   :  { %v2120_v11 = vld [vmem:[%s2774_s4 + $0xc8] sm:$0xff]  }
  0x16   :  { %1756 = vmatmul.mubr.msk.bf16.gmra.mxu0 %vm246_vm1, %v1825_v12  ;;  %1788 = vmatmul.mubr.msk.bf16.gmra.mxu1 %vm246_vm1, %v1826_v13  ;;  %v2125_v12 = vld [vmem:[%s2774_s4 + $0x40] sm:$0xff]  }
  0x17   :  { %1759 = vmatprep.mubr.msk.bf16.mxu0 %vm246_vm1, %v1827_v14  ;;  %1791 = vmatprep.mubr.msk.bf16.mxu1 %vm246_vm1, %v1828_v15  ;;  %v2130_v13 = vld [vmem:[%s2774_s4 + $0xc0] sm:$0xff]   ;;  %v2228_v15 = vld [vmem:[%s2774_s4 + $0xf0] sm:$0xff]  }
  0x1e   :  { %1760 = vmatmul.mubr.msk.bf16.gmra.mxu0 %vm246_vm1, %v1829_v16  ;;  %1792 = vmatmul.mubr.msk.bf16.gmra.mxu1 %vm246_vm1, %v1830_v17  ;;  %v2204_v16 = vld [vmem:[%s2774_s4 + $0x78] sm:$0xff]  }
  0x1f   :  { %1763 = vmatprep.mubr.msk.bf16.mxu0 %vm246_vm1, %v1831_v18  ;;  %1795 = vmatprep.mubr.msk.bf16.mxu1 %vm246_vm1, %v1832_v19  ;;  %v2139_v18 = vld [vmem:[%s2774_s4 + $0x58] sm:$0xff]  }
  0x26   :  { %1764 = vmatmul.mubr.msk.bf16.gmra.mxu0 %vm246_vm1, %v1833_v20  ;;  %1796 = vmatmul.mubr.msk.bf16.gmra.mxu1 %vm246_vm1, %v1834_v21  ;;  %v2214_v21 = vld [vmem:[%s2776_s3] ss:$0 sm:$0xff] }
  0x27   :  { %1767 = vmatprep.mubr.msk.bf16.mxu0 %vm246_vm1, %v1835_v22  ;;  %1799 = vmatprep.mubr.msk.bf16.mxu1 %vm246_vm1, %v1836_v23  ;;  %v2148_v23 = vld [vmem:[%s2774_s4 + $0xd8] sm:$0xff]   ;;  %v2223_v22 = vld [vmem:[%s2774_s4 + $0x70] sm:$0xff]  }
  0x2e   :  { %1768 = vmatmul.mubr.msk.bf16.gmra.mxu0 %vm246_vm1, %v1837_v24  ;;  %1800 = vmatmul.mubr.msk.bf16.gmra.mxu1 %vm246_vm1, %v1838_v25  ;;  %v2153_v24 = vld [vmem:[%s2774_s4 + $0x50] sm:$0xff]  }
  0x2f   :  { %1771 = vmatprep.mubr.msk.bf16.mxu0 %vm246_vm1, %v1839_v26  ;;  %1803 = vmatprep.mubr.msk.bf16.mxu1 %vm246_vm1, %v1840_v27  ;;  %v2158_v25 = vld [vmem:[%s2774_s4 + $0xd0] sm:$0xff]   ;;  %v2176_v27 = vld [vmem:[%s2774_s4 + $0xe8] sm:$0xff]  }
  0x36   :  { %1772 = vmatmul.mubr.msk.bf16.gmra.mxu0 %vm246_vm1, %v1841_v28  ;;  %1804 = vmatmul.mubr.msk.bf16.gmra.mxu1 %vm246_vm1, %v1842_v29  ;;  %v2181_v29 = vld [vmem:[%s2774_s4 + $0x60] sm:$0xff]  }
  0x37   :  { %1775 = vmatprep.mubr.msk.bf16.mxu0 %vm246_vm1, %v1843_v30  ;;  %1807 = vmatprep.mubr.msk.bf16.mxu1 %vm246_vm1, %v1844_v31  ;;  %v2167_v30 = vld [vmem:[%s2774_s4 + $0x68] sm:$0xff]   ;;  %v2186_v31 = vld [vmem:[%s2774_s4 + $0xe0] sm:$0xff]  }
  0x3e   :  { %1776 = vmatmul.mubr.msk.bf16.gmra.mxu0 %vm246_vm1, %v1845_v32  ;;  %1808 = vmatmul.mubr.msk.bf16.gmra.mxu1 %vm246_vm1, %v1846_v33  ;;  %v2191_v33 = vld [vmem:[%s2775_s2] ss:$0 sm:$0xff]  ;;  %v2209_v32 = vld [vmem:[%s2774_s4 + $0xf8] sm:$0xff]  }
  0xc6   :  { %v1749_v28 = vpop.f32.mrf.mxu0  ;;  %v1781_v10 = vpop.f32.mrf.mxu1 }
  0xc7   :  { %v645_v14 = vmul.f32 %v1749_v28, %v2191_v33  ;;  %v677_v26 = vmul.f32 %v1781_v10, %v2191_v33 }
  0xc8   :  { %v381_v9 = vpop.f32.mrf.mxu0  ;;  %v509_v3 = vpop.f32.mrf.mxu1 }
  0xc9   :  { %v716_v4 = vadd.f32 %v2214_v21, %v645_v14  ;;  %v643_v28 = vmul.f32 %v2191_v33, %v381_v9  ;;  %v748_v20 = vadd.f32 %v2214_v21, %v677_v26  ;;  %v675_v10 = vmul.f32 %v2191_v33, %v509_v3 }
  0xca   :  { %v1750_v2 = vpop.f32.mrf.mxu0  ;;  %v1782_v62 = vpop.f32.mrf.mxu1 }
  0xcb   :  { %v908_v5 = vadd.f32 %v1559_v42, %v716_v4  ;;  %v714_v14 = vadd.f32 %v2214_v21, %v643_v28  ;;  %v646_v9 = vmul.f32 %v1750_v2, %v2191_v33  ;;  %v940_v26 = vadd.f32 %v1623_v43, %v748_v20 }
  0xcc   :  { %v746_v3 = vadd.f32 %v2214_v21, %v675_v10  ;;  %v678_v17 = vmul.f32 %v1782_v62, %v2191_v33  ;;  %v384_v8 = vpop.f32.mrf.mxu0  ;;  %v512_v28 = vpop.f32.mrf.mxu1 }
  0xcd   :  { %v972_v61 = vmax.f32 %v908_v5, 0.0  ;;  %v906_v42 = vadd.f32 %v1555_v44, %v714_v14  ;;  %v717_v4 = vadd.f32 %v2214_v21, %v646_v9  ;;  %v644_v2 = vmul.f32 %v2191_v33, %v384_v8 }
  0xce   :  { %v1004_v19 = vmax.f32 %v940_v26, 0.0  ;;  %v938_v43 = vadd.f32 %v1619_v45, %v746_v3  ;;  %v749_v20 = vadd.f32 %v2214_v21, %v678_v17  ;;  %v676_v62 = vmul.f32 %v2191_v33, %v512_v28  ;;  %v1753_v10 = vpop.f32.mrf.mxu0  ;;  %v1785_v14 = vpop.f32.mrf.mxu1 }
  0xcf   :  { %v1491_v60 = vpack.c.bf16 %v972_v61, %v972_v61  ;;  %v970_v7 = vmax.f32 %v906_v42, 0.0  ;;  %v909_v5 = vadd.f32 %v1560_v47, %v717_v4  ;;  %v715_v44 = vadd.f32 %v2214_v21, %v644_v2 }
  0xd0   :  { %v1523_v9 = vpack.c.bf16 %v1004_v19, %v1004_v19  ;;  %v1002_v8 = vmax.f32 %v938_v43, 0.0  ;;  %v941_v26 = vadd.f32 %v1624_v48, %v749_v20  ;;  %v747_v45 = vadd.f32 %v2214_v21, %v676_v62  ;;  %v397_v3 = vpop.f32.mrf.mxu0  ;;  %v525_v19 = vpop.f32.mrf.mxu1 }
  0xd1   :  { %1293 = vst.msk [vmem:[%s2777_s5 + $0x8] sm:$0xf] %vm1290_vm2, %v1491_v60  ;;  %v1489_v61 = vpack.c.bf16 %v970_v7, %v970_v7  ;;  %v973_v17 = vmax.f32 %v909_v5, 0.0  ;;  %v907_v34 = vadd.f32 %v1556_v49, %v715_v44  ;;  %v649_v47 = vmul.f32 %v1753_v10, %v2191_v33 }
  0xd2   :  { %1325 = vst.msk [vmem:[%s2777_s5 + $0x88] sm:$0xf] %vm1290_vm2, %v1523_v9  ;;  %v1521_v35 = vpack.c.bf16 %v1002_v8, %v1002_v8  ;;  %v1005_v48 = vmax.f32 %v941_v26, 0.0  ;;  %v939_v42 = vadd.f32 %v1620_v50, %v747_v45  ;;  %v681_v60 = vmul.f32 %v1785_v14, %v2191_v33  ;;  %v1754_v7 = vpop.f32.mrf.mxu0  ;;  %v1786_v28 = vpop.f32.mrf.mxu1 }
  0xd3   :  { %1291 = vst.msk [vmem:[%s2777_s5] sm:$0xf] %vm1290_vm2, %v1489_v61  ;;  %v1492_v36 = vpack.c.bf16 %v973_v17, %v973_v17  ;;  %v971_v49 = vmax.f32 %v907_v34, 0.0  ;;  %v720_v4 = vadd.f32 %v2214_v21, %v649_v47  ;;  %v647_v2 = vmul.f32 %v2191_v33, %v397_v3 }
  0xd4   :  { %1323 = vst.msk [vmem:[%s2777_s5 + $0x80] sm:$0xf] %vm1290_vm2, %v1521_v35  ;;  %v1524_v37 = vpack.c.bf16 %v1005_v48, %v1005_v48  ;;  %v1003_v50 = vmax.f32 %v939_v42, 0.0  ;;  %v752_v43 = vadd.f32 %v2214_v21, %v681_v60  ;;  %v679_v20 = vmul.f32 %v2191_v33, %v525_v19  ;;  %v400_v62 = vpop.f32.mrf.mxu0  ;;  %v528_v9 = vpop.f32.mrf.mxu1 }
  0xd5   :  { %1294 = vst.msk [vmem:[%s2777_s5 + $0xc] sm:$0xf] %vm1290_vm2, %v1492_v36  ;;  %v1490_v10 = vpack.c.bf16 %v971_v49, %v971_v49  ;;  %v912_v5 = vadd.f32 %v1567_v54, %v720_v4  ;;  %v718_v44 = vadd.f32 %v2214_v21, %v647_v2  ;;  %v650_v14 = vmul.f32 %v1754_v7, %v2191_v33 }
  0xd6   :  { %1326 = vst.msk [vmem:[%s2777_s5 + $0x8c] sm:$0xf] %vm1290_vm2, %v1524_v37  ;;  %v1522_v8 = vpack.c.bf16 %v1003_v50, %v1003_v50  ;;  %v944_v26 = vadd.f32 %v1631_v55, %v752_v43  ;;  %v750_v45 = vadd.f32 %v2214_v21, %v679_v20  ;;  %v682_v3 = vmul.f32 %v1786_v28, %v2191_v33  ;;  %v1757_v61 = vpop.f32.mrf.mxu0  ;;  %v1789_v19 = vpop.f32.mrf.mxu1 }
  0xd7   :  { %1292 = vst.msk [vmem:[%s2777_s5 + $0x4] sm:$0xf] %vm1290_vm2, %v1490_v10  ;;  %v976_v54 = vmax.f32 %v912_v5, 0.0  ;;  %v910_v17 = vadd.f32 %v1563_v56, %v718_v44  ;;  %v721_v34 = vadd.f32 %v2214_v21, %v650_v14  ;;  %v648_v47 = vmul.f32 %v2191_v33, %v400_v62 }
  0xd8   :  { %1324 = vst.msk [vmem:[%s2777_s5 + $0x84] sm:$0xf] %vm1290_vm2, %v1522_v8  ;;  %v1008_v55 = vmax.f32 %v944_v26, 0.0  ;;  %v942_v35 = vadd.f32 %v1627_v57, %v750_v45  ;;  %v753_v48 = vadd.f32 %v2214_v21, %v682_v3  ;;  %v680_v42 = vmul.f32 %v2191_v33, %v528_v9  ;;  %v413_v60 = vpop.f32.mrf.mxu0  ;;  %v541_v4 = vpop.f32.mrf.mxu1 }
  0xd9   :  { %v1495_v56 = vpack.c.bf16 %v976_v54, %v976_v54  ;;  %v974_v7 = vmax.f32 %v910_v17, 0.0  ;;  %v913_v36 = vadd.f32 %v1568_v59, %v721_v34  ;;  %v719_v49 = vadd.f32 %v2214_v21, %v648_v47 }
  0xda   :  { %v1527_v2 = vpack.c.bf16 %v1008_v55, %v1008_v55  ;;  %v1006_v28 = vmax.f32 %v942_v35, 0.0  ;;  %v2778_v37 = vunpack.c.h.bf16 %v2036_v39  ;;  %v751_v57 = vadd.f32 %v2214_v21, %v680_v42  ;;  %v1758_v43 = vpop.f32.mrf.mxu0  ;;  %v1790_v5 = vpop.f32.mrf.mxu1 }
  0xdb   :  { %1297 = vst.msk [vmem:[%s2777_s5 + $0x18] sm:$0xf] %vm1290_vm2, %v1495_v56  ;;  %v1493_v20 = vpack.c.bf16 %v974_v7, %v974_v7  ;;  %v977_v62 = vmax.f32 %v913_v36, 0.0  ;;  %v911_v59 = vadd.f32 %v2779_v38, %v719_v49  ;;  %v653_v10 = vmul.f32 %v1757_v61, %v2191_v33 }
  0xdc   :  { %v945_v50 = vadd.f32 %v2778_v37, %v753_v48  ;;  %1329 = vst.msk [vmem:[%s2777_s5 + $0x98] sm:$0xf] %vm1290_vm2, %v1527_v2  ;;  %v1525_v39 = vpack.c.bf16 %v1006_v28, %v1006_v28  ;;  %v2780_v14 = vunpack.c.h.bf16 %v2046_v41  ;;  %v685_v8 = vmul.f32 %v1789_v19, %v2191_v33  ;;  %v416_v26 = vpop.f32.mrf.mxu0  ;;  %v544_v54 = vpop.f32.mrf.mxu1 }
  0xdd   :  { %1295 = vst.msk [vmem:[%s2777_s5 + $0x10] sm:$0xf] %vm1290_vm2, %v1493_v20  ;;  %v1496_v40 = vpack.c.bf16 %v977_v62, %v977_v62  ;;  %v975_v45 = vmax.f32 %v911_v59, 0.0  ;;  %v724_v3 = vadd.f32 %v2214_v21, %v653_v10  ;;  %v651_v61 = vmul.f32 %v2191_v33, %v413_v60 }
  0xde   :  { %v1009_v44 = vmax.f32 %v945_v50, 0.0  ;;  %v943_v9 = vadd.f32 %v2780_v14, %v751_v57  ;;  %1327 = vst.msk [vmem:[%s2777_s5 + $0x90] sm:$0xf] %vm1290_vm2, %v1525_v39  ;;  %v756_v34 = vadd.f32 %v2214_v21, %v685_v8  ;;  %v683_v47 = vmul.f32 %v2191_v33, %v541_v4  ;;  %v1761_v19 = vpop.f32.mrf.mxu0  ;;  %v1793_v56 = vpop.f32.mrf.mxu1 }
  0xdf   :  { %1298 = vst.msk [vmem:[%s2777_s5 + $0x1c] sm:$0xf] %vm1290_vm2, %v1496_v40  ;;  %v1494_v55 = vpack.c.bf16 %v975_v45, %v975_v45  ;;  %v2781_v35 = vunpack.c.l.bf16 %v2055_v46  ;;  %v722_v42 = vadd.f32 %v2214_v21, %v651_v61  ;;  %v654_v60 = vmul.f32 %v1758_v43, %v2191_v33 }
  0xe0   :  { %v1528_v41 = vpack.c.bf16 %v1009_v44, %v1009_v44  ;;  %v1007_v17 = vmax.f32 %v943_v9, 0.0  ;;  %v2782_v36 = vunpack.c.l.bf16 %v2064_v51  ;;  %v754_v4 = vadd.f32 %v2214_v21, %v683_v47  ;;  %v429_v28 = vpop.f32.mrf.mxu0  ;;  %v557_v62 = vpop.f32.mrf.mxu1 }
  0xe1   :  { %v916_v48 = vadd.f32 %v2781_v35, %v724_v3  ;;  %v686_v2 = vmul.f32 %v1790_v5, %v2191_v33  ;;  %1296 = vst.msk [vmem:[%s2777_s5 + $0x14] sm:$0xf] %vm1290_vm2, %v1494_v55  ;;  %v2783_v50 = vunpack.c.l.bf16 %v2069_v52  ;;  %v725_v43 = vadd.f32 %v2214_v21, %v654_v60 }
  0xe2   :  { %1330 = vst.msk [vmem:[%s2777_s5 + $0x9c] sm:$0xf] %vm1290_vm2, %v1528_v41  ;;  %v1526_v7 = vpack.c.bf16 %v1007_v17, %v1007_v17  ;;  %v948_v49 = vadd.f32 %v2782_v36, %v756_v34  ;;  %v652_v20 = vmul.f32 %v2191_v33, %v416_v26  ;;  %v2784_v59 = vunpack.c.l.bf16 %v2074_v53  ;;  %v1762_v44 = vpop.f32.mrf.mxu0  ;;  %v1794_v45 = vpop.f32.mrf.mxu1 }
  0xe3   :  { %v980_v37 = vmax.f32 %v916_v48, 0.0  ;;  %v914_v57 = vadd.f32 %v2783_v50, %v722_v42  ;;  %v757_v5 = vadd.f32 %v2214_v21, %v686_v2  ;;  %v684_v39 = vmul.f32 %v2191_v33, %v544_v54 }
  0xe4   :  { %1328 = vst.msk [vmem:[%s2777_s5 + $0x94] sm:$0xf] %vm1290_vm2, %v1526_v7  ;;  %v1012_v38 = vmax.f32 %v948_v49, 0.0  ;;  %v946_v10 = vadd.f32 %v2784_v59, %v754_v4  ;;  %v2785_v8 = vunpack.c.h.bf16 %v2055_v46  ;;  %v723_v40 = vadd.f32 %v2214_v21, %v652_v20  ;;  %v432_v47 = vpop.f32.mrf.mxu0  ;;  %v560_v42 = vpop.f32.mrf.mxu1 }
  0xe5   :  { %v1499_v14 = vpack.c.bf16 %v980_v37, %v980_v37  ;;  %v978_v9 = vmax.f32 %v914_v57, 0.0  ;;  %v2786_v41 = vunpack.c.h.bf16 %v2064_v51  ;;  %v755_v34 = vadd.f32 %v2214_v21, %v684_v39 }
  0xe6   :  { %v917_v26 = vadd.f32 %v2785_v8, %v725_v43  ;;  %v1531_v3 = vpack.c.bf16 %v1012_v38, %v1012_v38  ;;  %v1010_v61 = vmax.f32 %v946_v10, 0.0  ;;  %v2787_v46 = vunpack.c.h.bf16 %v2069_v52  ;;  %v1765_v4 = vpop.f32.mrf.mxu0  ;;  %v1797_v50 = vpop.f32.mrf.mxu1 }
  0xe7   :  { %v949_v17 = vadd.f32 %v2786_v41, %v757_v5  ;;  %1301 = vst.msk [vmem:[%s2777_s5 + $0x28] sm:$0xf] %vm1290_vm2, %v1499_v14  ;;  %v1497_v54 = vpack.c.bf16 %v978_v9, %v978_v9  ;;  %v657_v48 = vmul.f32 %v1761_v19, %v2191_v33  ;;  %v2788_v7 = vunpack.c.h.bf16 %v2074_v53 }
  0xe8   :  { %v981_v55 = vmax.f32 %v917_v26, 0.0  ;;  %v915_v35 = vadd.f32 %v2787_v46, %v723_v40  ;;  %1333 = vst.msk [vmem:[%s2777_s5 + $0xa8] sm:$0xf] %vm1290_vm2, %v1531_v3  ;;  %v1529_v51 = vpack.c.bf16 %v1010_v61, %v1010_v61  ;;  %v689_v49 = vmul.f32 %v1793_v56, %v2191_v33  ;;  %v445_v20 = vpop.f32.mrf.mxu0  ;;  %v573_v39 = vpop.f32.mrf.mxu1 }
  0xe9   :  { %v1013_v60 = vmax.f32 %v949_v17, 0.0  ;;  %v947_v36 = vadd.f32 %v2788_v7, %v755_v34  ;;  %1299 = vst.msk [vmem:[%s2777_s5 + $0x20] sm:$0xf] %vm1290_vm2, %v1497_v54  ;;  %v728_v2 = vadd.f32 %v2214_v21, %v657_v48  ;;  %v655_v37 = vmul.f32 %v2191_v33, %v429_v28 }
  0xea   :  { %v1500_v52 = vpack.c.bf16 %v981_v55, %v981_v55  ;;  %v979_v19 = vmax.f32 %v915_v35, 0.0  ;;  %1331 = vst.msk [vmem:[%s2777_s5 + $0xa0] sm:$0xf] %vm1290_vm2, %v1529_v51  ;;  %v760_v57 = vadd.f32 %v2214_v21, %v689_v49  ;;  %v687_v43 = vmul.f32 %v2191_v33, %v557_v62  ;;  %v1766_v40 = vpop.f32.mrf.mxu0  ;;  %v1798_v34 = vpop.f32.mrf.mxu1 }
  0xeb   :  { %v1532_v53 = vpack.c.bf16 %v1013_v60, %v1013_v60  ;;  %v1011_v56 = vmax.f32 %v947_v36, 0.0  ;;  %v2789_v28 = vunpack.c.l.bf16 %v2083_v58  ;;  %v726_v10 = vadd.f32 %v2214_v21, %v655_v37 }
  0xec   :  { %1302 = vst.msk [vmem:[%s2777_s5 + $0x2c] sm:$0xf] %vm1290_vm2, %v1500_v52  ;;  %v1498_v38 = vpack.c.bf16 %v979_v19, %v979_v19  ;;  %v658_v5 = vmul.f32 %v1762_v44, %v2191_v33  ;;  %v2790_v14 = vunpack.c.l.bf16 %v2092_v63  ;;  %v758_v8 = vadd.f32 %v2214_v21, %v687_v43  ;;  %v448_v48 = vpop.f32.mrf.mxu0  ;;  %v576_v49 = vpop.f32.mrf.mxu1 }
  0xed   :  { %v920_v59 = vadd.f32 %v2789_v28, %v728_v2  ;;  %1334 = vst.msk [vmem:[%s2777_s5 + $0xac] sm:$0xf] %vm1290_vm2, %v1532_v53  ;;  %v1530_v62 = vpack.c.bf16 %v1011_v56, %v1011_v56  ;;  %v690_v26 = vmul.f32 %v1794_v45, %v2191_v33  ;;  %v2791_v3 = vunpack.c.l.bf16 %v2097_v0 }
  0xee   :  { %v952_v9 = vadd.f32 %v2790_v14, %v760_v57  ;;  %1300 = vst.msk [vmem:[%s2777_s5 + $0x24] sm:$0xf] %vm1290_vm2, %v1498_v38  ;;  %v729_v41 = vadd.f32 %v2214_v21, %v658_v5  ;;  %v656_v17 = vmul.f32 %v2191_v33, %v432_v47  ;;  %v2792_v54 = vunpack.c.l.bf16 %v2102_v1  ;;  %v2462_v56 = vpop.f32.mrf.mxu0  ;;  %v2471_v28 = vpop.f32.mrf.mxu1 }
  0xef   :  { %v984_v44 = vmax.f32 %v920_v59, 0.0  ;;  %v918_v61 = vadd.f32 %v2791_v3, %v726_v10  ;;  %1332 = vst.msk [vmem:[%s2777_s5 + $0xa4] sm:$0xf] %vm1290_vm2, %v1530_v62  ;;  %v761_v46 = vadd.f32 %v2214_v21, %v690_v26  ;;  %v688_v35 = vmul.f32 %v2191_v33, %v560_v42 }
  0xf0   :  { %v1016_v45 = vmax.f32 %v952_v9, 0.0  ;;  %v950_v55 = vadd.f32 %v2792_v54, %v758_v8  ;;  %v2793_v7 = vunpack.c.h.bf16 %v2083_v58  ;;  %v727_v36 = vadd.f32 %v2214_v21, %v656_v17  ;;  %v461_v14 = vpop.f32.mrf.mxu0  ;;  %v589_v26 = vpop.f32.mrf.mxu1 }
  0xf1   :  { %v1503_v51 = vpack.c.bf16 %v984_v44, %v984_v44  ;;  %v982_v60 = vmax.f32 %v918_v61, 0.0  ;;  %v2794_v2 = vunpack.c.h.bf16 %v2092_v63  ;;  %v759_v53 = vadd.f32 %v2214_v21, %v688_v35 }
  0xf2   :  { %v921_v47 = vadd.f32 %v2793_v7, %v729_v41  ;;  %v1535_v52 = vpack.c.bf16 %v1016_v45, %v1016_v45  ;;  %v1014_v19 = vmax.f32 %v950_v55, 0.0  ;;  %v2795_v57 = vunpack.c.h.bf16 %v2097_v0  ;;  %v1770_v61 = vpop.f32.mrf.mxu0  ;;  %v1802_v55 = vpop.f32.mrf.mxu1 }
  0xf3   :  { %v953_v37 = vadd.f32 %v2794_v2, %v761_v46  ;;  %1305 = vst.msk [vmem:[%s2777_s5 + $0x38] sm:$0xf] %vm1290_vm2, %v1503_v51  ;;  %v1501_v42 = vpack.c.bf16 %v982_v60, %v982_v60  ;;  %v661_v38 = vmul.f32 %v1765_v4, %v2191_v33  ;;  %v2796_v10 = vunpack.c.h.bf16 %v2102_v1 }
  0xf4   :  { %v985_v58 = vmax.f32 %v921_v47, 0.0  ;;  %v919_v43 = vadd.f32 %v2795_v57, %v727_v36  ;;  %1337 = vst.msk [vmem:[%s2777_s5 + $0xb8] sm:$0xf] %vm1290_vm2, %v1535_v52  ;;  %v1533_v63 = vpack.c.bf16 %v1014_v19, %v1014_v19  ;;  %v693_v62 = vmul.f32 %v1797_v50, %v2191_v33  ;;  %v464_v7 = vpop.f32.mrf.mxu0  ;;  %v592_v2 = vpop.f32.mrf.mxu1 }
  0xf5   :  { %v1017_v59 = vmax.f32 %v953_v37, 0.0  ;;  %v951_v5 = vadd.f32 %v2796_v10, %v759_v53  ;;  %1303 = vst.msk [vmem:[%s2777_s5 + $0x30] sm:$0xf] %vm1290_vm2, %v1501_v42  ;;  %v732_v9 = vadd.f32 %v2214_v21, %v661_v38  ;;  %v659_v8 = vmul.f32 %v2191_v33, %v445_v20 }
  0xf6   :  { %v1504_v0 = vpack.c.bf16 %v985_v58, %v985_v58  ;;  %v983_v4 = vmax.f32 %v919_v43, 0.0  ;;  %1335 = vst.msk [vmem:[%s2777_s5 + $0xb0] sm:$0xf] %vm1290_vm2, %v1533_v63  ;;  %v764_v44 = vadd.f32 %v2214_v21, %v693_v62  ;;  %v691_v3 = vmul.f32 %v2191_v33, %v573_v39  ;;  %v2524_v57 = vpop.f32.mrf.mxu0  ;;  %v2529_v10 = vpop.f32.mrf.mxu1 }
  0xf7   :  { %v1536_v1 = vpack.c.bf16 %v1017_v59, %v1017_v59  ;;  %v1015_v50 = vmax.f32 %v951_v5, 0.0  ;;  %v2797_v20 = vunpack.c.l.bf16 %v2111_v6  ;;  %v730_v45 = vadd.f32 %v2214_v21, %v659_v8 }
  0xf8   :  { %1306 = vst.msk [vmem:[%s2777_s5 + $0x3c] sm:$0xf] %vm1290_vm2, %v1504_v0  ;;  %v1502_v41 = vpack.c.bf16 %v983_v4, %v983_v4  ;;  %v662_v54 = vmul.f32 %v1766_v40, %v2191_v33  ;;  %v2798_v46 = vunpack.c.l.bf16 %v2120_v11  ;;  %v762_v51 = vadd.f32 %v2214_v21, %v691_v3  ;;  %v2534_v8 = vpop.f32.mrf.mxu0  ;;  %v2544_v3 = vpop.f32.mrf.mxu1 }
  0xf9   :  { %v924_v17 = vadd.f32 %v2797_v20, %v732_v9  ;;  %1338 = vst.msk [vmem:[%s2777_s5 + $0xbc] sm:$0xf] %vm1290_vm2, %v1536_v1  ;;  %v1534_v39 = vpack.c.bf16 %v1015_v50, %v1015_v50  ;;  %v694_v60 = vmul.f32 %v1798_v34, %v2191_v33  ;;  %v2799_v47 = vunpack.c.l.bf16 %v2125_v12 }
  0xfa   :  { %v956_v35 = vadd.f32 %v2798_v46, %v764_v44  ;;  %1304 = vst.msk [vmem:[%s2777_s5 + $0x34] sm:$0xf] %vm1290_vm2, %v1502_v41  ;;  %v733_v52 = vadd.f32 %v2214_v21, %v662_v54  ;;  %v660_v19 = vmul.f32 %v2191_v33, %v448_v48  ;;  %v2800_v37 = vunpack.c.l.bf16 %v2130_v13 }
  0xfb   :  { %v988_v40 = vmax.f32 %v924_v17, 0.0  ;;  %v922_v36 = vadd.f32 %v2799_v47, %v730_v45  ;;  %1336 = vst.msk [vmem:[%s2777_s5 + $0xb4] sm:$0xf] %vm1290_vm2, %v1534_v39  ;;  %v765_v42 = vadd.f32 %v2214_v21, %v694_v60  ;;  %v692_v58 = vmul.f32 %v2191_v33, %v576_v49 }
  0xfc   :  { %v1020_v34 = vmax.f32 %v956_v35, 0.0  ;;  %v954_v53 = vadd.f32 %v2800_v37, %v762_v51  ;;  %v2801_v48 = vunpack.c.h.bf16 %v2111_v6  ;;  %v731_v59 = vadd.f32 %v2214_v21, %v660_v19  ;;  %v1774_v51 = vpop.f32.mrf.mxu0 }
  0xfd   :  { %v1507_v43 = vpack.c.bf16 %v988_v40, %v988_v40  ;;  %v986_v38 = vmax.f32 %v922_v36, 0.0  ;;  %v2802_v0 = vunpack.c.h.bf16 %v2120_v11  ;;  %v763_v9 = vadd.f32 %v2214_v21, %v692_v58 }
  0xfe   :  { %v925_v63 = vadd.f32 %v2801_v48, %v733_v52  ;;  %v1539_v5 = vpack.c.bf16 %v1020_v34, %v1020_v34  ;;  %v1018_v62 = vmax.f32 %v954_v53, 0.0  ;;  %v2803_v1 = vunpack.c.h.bf16 %v2125_v12  ;;  %v1806_v52 = vpop.f32.mrf.mxu1 }
  0xff   :  { %v957_v4 = vadd.f32 %v2802_v0, %v765_v42  ;;  %1309 = vst.msk [vmem:[%s2777_s5 + $0x48] sm:$0xf] %vm1290_vm2, %v1507_v43  ;;  %v1505_v6 = vpack.c.bf16 %v986_v38, %v986_v38  ;;  %v665_v44 = vmul.f32 %v2462_v56, %v2191_v33  ;;  %v2804_v20 = vunpack.c.h.bf16 %v2130_v13 }
 0x100   :  { %v989_v49 = vmax.f32 %v925_v63, 0.0  ;;  %v923_v50 = vadd.f32 %v2803_v1, %v731_v59  ;;  %1341 = vst.msk [vmem:[%s2777_s5 + $0xc8] sm:$0xf] %vm1290_vm2, %v1539_v5  ;;  %v1537_v11 = vpack.c.bf16 %v1018_v62, %v1018_v62  ;;  %v697_v45 = vmul.f32 %v2471_v28, %v2191_v33  ;;  %v480_v62 = vpop.f32.mrf.mxu0 }
 0x101   :  { %v1021_v41 = vmax.f32 %v957_v4, 0.0  ;;  %v955_v17 = vadd.f32 %v2804_v20, %v763_v9  ;;  %1307 = vst.msk [vmem:[%s2777_s5 + $0x40] sm:$0xf] %vm1290_vm2, %v1505_v6  ;;  %v736_v54 = vadd.f32 %v2214_v21, %v665_v44  ;;  %v663_v39 = vmul.f32 %v2191_v33, %v461_v14 }
 0x102   :  { %v1508_v12 = vpack.c.bf16 %v989_v49, %v989_v49  ;;  %v987_v56 = vmax.f32 %v923_v50, 0.0  ;;  %1339 = vst.msk [vmem:[%s2777_s5 + $0xc0] sm:$0xf] %vm1290_vm2, %v1537_v11  ;;  %v768_v28 = vadd.f32 %v2214_v21, %v697_v45  ;;  %v695_v35 = vmul.f32 %v2191_v33, %v589_v26  ;;  %v608_v49 = vpop.f32.mrf.mxu1 }
 0x103   :  { %v1540_v13 = vpack.c.bf16 %v1021_v41, %v1021_v41  ;;  %v1019_v46 = vmax.f32 %v955_v17, 0.0  ;;  %v2805_v14 = vunpack.c.l.bf16 %v2139_v18  ;;  %v734_v47 = vadd.f32 %v2214_v21, %v663_v39 }
 0x104   :  { %1310 = vst.msk [vmem:[%s2777_s5 + $0x4c] sm:$0xf] %vm1290_vm2, %v1508_v12  ;;  %v1506_v60 = vpack.c.bf16 %v987_v56, %v987_v56  ;;  %v666_v36 = vmul.f32 %v1770_v61, %v2191_v33  ;;  %v2806_v19 = vunpack.c.l.bf16 %v2148_v23  ;;  %v766_v37 = vadd.f32 %v2214_v21, %v695_v35  ;;  %v1809_v35 = vpop.f32.mrf.mxu1 }
 0x105   :  { %v928_v40 = vadd.f32 %v2805_v14, %v736_v54  ;;  %1342 = vst.msk [vmem:[%s2777_s5 + $0xcc] sm:$0xf] %vm1290_vm2, %v1540_v13  ;;  %v1538_v26 = vpack.c.bf16 %v1019_v46, %v1019_v46  ;;  %v698_v53 = vmul.f32 %v1802_v55, %v2191_v33  ;;  %v2807_v42 = vunpack.c.l.bf16 %v2153_v24  ;;  %v1777_v13 = vpop.f32.mrf.mxu0 }
 0x106   :  { %v960_v34 = vadd.f32 %v2806_v19, %v768_v28  ;;  %1308 = vst.msk [vmem:[%s2777_s5 + $0x44] sm:$0xf] %vm1290_vm2, %v1506_v60  ;;  %v737_v43 = vadd.f32 %v2214_v21, %v666_v36  ;;  %v664_v38 = vmul.f32 %v2191_v33, %v464_v7  ;;  %v2808_v55 = vunpack.c.l.bf16 %v2158_v25 }
 0x107   :  { %v992_v61 = vmax.f32 %v928_v40, 0.0  ;;  %v926_v58 = vadd.f32 %v2807_v42, %v734_v47  ;;  %1340 = vst.msk [vmem:[%s2777_s5 + $0xc4] sm:$0xf] %vm1290_vm2, %v1538_v26  ;;  %v769_v59 = vadd.f32 %v2214_v21, %v698_v53  ;;  %v696_v5 = vmul.f32 %v2191_v33, %v592_v2 }
 0x108   :  { %v1024_v48 = vmax.f32 %v960_v34, 0.0  ;;  %v958_v63 = vadd.f32 %v2808_v55, %v766_v37  ;;  %v2809_v9 = vunpack.c.h.bf16 %v2139_v18  ;;  %v735_v7 = vadd.f32 %v2214_v21, %v664_v38 }
 0x109   :  { %v1511_v0 = vpack.c.bf16 %v992_v61, %v992_v61  ;;  %v990_v4 = vmax.f32 %v926_v58, 0.0  ;;  %v2810_v44 = vunpack.c.h.bf16 %v2148_v23  ;;  %v767_v41 = vadd.f32 %v2214_v21, %v696_v5  ;;  %v493_v61 = vpop.f32.mrf.mxu0 }
 0x10a   :  { %v929_v6 = vadd.f32 %v2809_v9, %v737_v43  ;;  %v1543_v1 = vpack.c.bf16 %v1024_v48, %v1024_v48  ;;  %v1022_v50 = vmax.f32 %v958_v63, 0.0  ;;  %v2811_v18 = vunpack.c.h.bf16 %v2153_v24  ;;  %v621_v48 = vpop.f32.mrf.mxu1 }
 0x10b   :  { %v961_v11 = vadd.f32 %v2810_v44, %v769_v59  ;;  %1313 = vst.msk [vmem:[%s2777_s5 + $0x58] sm:$0xf] %vm1290_vm2, %v1511_v0  ;;  %v1509_v2 = vpack.c.bf16 %v990_v4, %v990_v4  ;;  %v669_v45 = vmul.f32 %v2524_v57, %v2191_v33  ;;  %v2812_v56 = vunpack.c.h.bf16 %v2158_v25 }
 0x10c   :  { %v993_v20 = vmax.f32 %v929_v6, 0.0  ;;  %v927_v17 = vadd.f32 %v2811_v18, %v735_v7  ;;  %1345 = vst.msk [vmem:[%s2777_s5 + $0xd8] sm:$0xf] %vm1290_vm2, %v1543_v1  ;;  %v1541_v23 = vpack.c.bf16 %v1022_v50, %v1022_v50  ;;  %v701_v39 = vmul.f32 %v2529_v10, %v2191_v33 }
 0x10d   :  { %v1025_v12 = vmax.f32 %v961_v11, 0.0  ;;  %v959_v54 = vadd.f32 %v2812_v56, %v767_v41  ;;  %1311 = vst.msk [vmem:[%s2777_s5 + $0x50] sm:$0xf] %vm1290_vm2, %v1509_v2  ;;  %v740_v46 = vadd.f32 %v2214_v21, %v669_v45  ;;  %v667_v28 = vmul.f32 %v2191_v33, %v2534_v8  ;;  %v1778_v41 = vpop.f32.mrf.mxu0 }
 0x10e   :  { %v1512_v24 = vpack.c.bf16 %v993_v20, %v993_v20  ;;  %v991_v57 = vmax.f32 %v927_v17, 0.0  ;;  %1343 = vst.msk [vmem:[%s2777_s5 + $0xd0] sm:$0xf] %vm1290_vm2, %v1541_v23  ;;  %v772_v60 = vadd.f32 %v2214_v21, %v701_v39  ;;  %v699_v14 = vmul.f32 %v2191_v33, %v2544_v3  ;;  %v1810_v17 = vpop.f32.mrf.mxu1 }
 0x10f   :  { %v1544_v25 = vpack.c.bf16 %v1025_v12, %v1025_v12  ;;  %v1023_v10 = vmax.f32 %v959_v54, 0.0  ;;  %v2813_v8 = vunpack.c.l.bf16 %v2167_v30  ;;  %v738_v36 = vadd.f32 %v2214_v21, %v667_v28  ;;  %v496_v28 = vpop.f32.mrf.mxu0 }
 0x110   :  { %1314 = vst.msk [vmem:[%s2777_s5 + $0x5c] sm:$0xf] %vm1290_vm2, %v1512_v24  ;;  %v1510_v40 = vpack.c.bf16 %v991_v57, %v991_v57  ;;  %v670_v26 = vmul.f32 %v1774_v51, %v2191_v33  ;;  %v2814_v3 = vunpack.c.l.bf16 %v2176_v27  ;;  %v770_v37 = vadd.f32 %v2214_v21, %v699_v14 }
 0x111   :  { %v932_v47 = vadd.f32 %v2813_v8, %v740_v46  ;;  %1346 = vst.msk [vmem:[%s2777_s5 + $0xdc] sm:$0xf] %vm1290_vm2, %v1544_v25  ;;  %v1542_v19 = vpack.c.bf16 %v1023_v10, %v1023_v10  ;;  %v702_v53 = vmul.f32 %v1806_v52, %v2191_v33  ;;  %v2815_v42 = vunpack.c.l.bf16 %v2181_v29 }
 0x112   :  { %v964_v34 = vadd.f32 %v2814_v3, %v772_v60  ;;  %1312 = vst.msk [vmem:[%s2777_s5 + $0x54] sm:$0xf] %vm1290_vm2, %v1510_v40  ;;  %v741_v43 = vadd.f32 %v2214_v21, %v670_v26  ;;  %v668_v38 = vmul.f32 %v2191_v33, %v480_v62  ;;  %v2816_v55 = vunpack.c.l.bf16 %v2186_v31  ;;  %v624_v40 = vpop.f32.mrf.mxu1 }
 0x113   :  { %v996_v51 = vmax.f32 %v932_v47, 0.0  ;;  %v930_v58 = vadd.f32 %v2815_v42, %v738_v36  ;;  %1344 = vst.msk [vmem:[%s2777_s5 + $0xd4] sm:$0xf] %vm1290_vm2, %v1542_v19  ;;  %v773_v59 = vadd.f32 %v2214_v21, %v702_v53  ;;  %v700_v5 = vmul.f32 %v2191_v33, %v608_v49 }
 0x114   :  { %v1028_v52 = vmax.f32 %v964_v34, 0.0  ;;  %v962_v63 = vadd.f32 %v2816_v55, %v770_v37  ;;  %v2817_v9 = vunpack.c.h.bf16 %v2167_v30  ;;  %v739_v62 = vadd.f32 %v2214_v21, %v668_v38 }
 0x115   :  { %v1515_v0 = vpack.c.bf16 %v996_v51, %v996_v51  ;;  %v994_v4 = vmax.f32 %v930_v58, 0.0  ;;  %v2818_v50 = vunpack.c.h.bf16 %v2176_v27  ;;  %v771_v11 = vadd.f32 %v2214_v21, %v700_v5 }
 0x116   :  { %v933_v6 = vadd.f32 %v2817_v9, %v741_v43  ;;  %v1547_v7 = vpack.c.bf16 %v1028_v52, %v1028_v52  ;;  %v1026_v1 = vmax.f32 %v962_v63, 0.0  ;;  %v2819_v30 = vunpack.c.h.bf16 %v2181_v29 }
 0x117   :  { %v965_v44 = vadd.f32 %v2818_v50, %v773_v59  ;;  %1317 = vst.msk [vmem:[%s2777_s5 + $0x68] sm:$0xf] %vm1290_vm2, %v1515_v0  ;;  %v1513_v49 = vpack.c.bf16 %v994_v4, %v994_v4  ;;  %v673_v18 = vmul.f32 %v1777_v13, %v2191_v33  ;;  %v2820_v23 = vunpack.c.h.bf16 %v2186_v31 }
 0x118   :  { %v997_v2 = vmax.f32 %v933_v6, 0.0  ;;  %v931_v20 = vadd.f32 %v2819_v30, %v739_v62  ;;  %1349 = vst.msk [vmem:[%s2777_s5 + $0xe8] sm:$0xf] %vm1290_vm2, %v1547_v7  ;;  %v1545_v27 = vpack.c.bf16 %v1026_v1, %v1026_v1  ;;  %v705_v56 = vmul.f32 %v1809_v35, %v2191_v33 }
 0x119   :  { %v1029_v45 = vmax.f32 %v965_v44, 0.0  ;;  %v963_v12 = vadd.f32 %v2820_v23, %v771_v11  ;;  %1315 = vst.msk [vmem:[%s2777_s5 + $0x60] sm:$0xf] %vm1290_vm2, %v1513_v49  ;;  %v744_v39 = vadd.f32 %v2214_v21, %v673_v18  ;;  %v671_v13 = vmul.f32 %v2191_v33, %v493_v61 }
 0x11a   :  { %v1516_v29 = vpack.c.bf16 %v997_v2, %v997_v2  ;;  %v995_v54 = vmax.f32 %v931_v20, 0.0  ;;  %1347 = vst.msk [vmem:[%s2777_s5 + $0xe0] sm:$0xf] %vm1290_vm2, %v1545_v27  ;;  %v776_v57 = vadd.f32 %v2214_v21, %v705_v56  ;;  %v703_v46 = vmul.f32 %v2191_v33, %v621_v48 }
 0x11b   :  { %v1548_v31 = vpack.c.bf16 %v1029_v45, %v1029_v45  ;;  %v1027_v24 = vmax.f32 %v963_v12, 0.0  ;;  %v2821_v25 = vunpack.c.l.bf16 %v2204_v16  ;;  %v742_v60 = vadd.f32 %v2214_v21, %v671_v13 }
 0x11c   :  { %1318 = vst.msk [vmem:[%s2777_s5 + $0x6c] sm:$0xf] %vm1290_vm2, %v1516_v29  ;;  %v1514_v35 = vpack.c.bf16 %v995_v54, %v995_v54  ;;  %v674_v14 = vmul.f32 %v1778_v41, %v2191_v33  ;;  %v2822_v47 = vunpack.c.l.bf16 %v2209_v32  ;;  %v774_v26 = vadd.f32 %v2214_v21, %v703_v46 }
 0x11d   :  { %v936_v10 = vadd.f32 %v2821_v25, %v744_v39  ;;  %1350 = vst.msk [vmem:[%s2777_s5 + $0xec] sm:$0xf] %vm1290_vm2, %v1548_v31  ;;  %v1546_v8 = vpack.c.bf16 %v1027_v24, %v1027_v24  ;;  %v706_v19 = vmul.f32 %v1810_v17, %v2191_v33  ;;  %v2823_v34 = vunpack.c.l.bf16 %v2223_v22 }
 0x11e   :  { %v968_v36 = vadd.f32 %v2822_v47, %v776_v57  ;;  %1316 = vst.msk [vmem:[%s2777_s5 + $0x64] sm:$0xf] %vm1290_vm2, %v1514_v35  ;;  %v745_v53 = vadd.f32 %v2214_v21, %v674_v14  ;;  %v672_v61 = vmul.f32 %v2191_v33, %v496_v28  ;;  %v2824_v42 = vunpack.c.l.bf16 %v2228_v15 }
 0x11f   :  { %v1000_v3 = vmax.f32 %v936_v10, 0.0  ;;  %v934_v37 = vadd.f32 %v2823_v34, %v742_v60  ;;  %1348 = vst.msk [vmem:[%s2777_s5 + $0xe4] sm:$0xf] %vm1290_vm2, %v1546_v8  ;;  %v777_v43 = vadd.f32 %v2214_v21, %v706_v19  ;;  %v704_v38 = vmul.f32 %v2191_v33, %v624_v40 }
 0x120   :  { %v1032_v51 = vmax.f32 %v968_v36, 0.0  ;;  %v966_v58 = vadd.f32 %v2824_v42, %v774_v26  ;;  %v2825_v55 = vunpack.c.h.bf16 %v2204_v16  ;;  %v743_v59 = vadd.f32 %v2214_v21, %v672_v61 }
 0x121   :  { %v1519_v48 = vpack.c.bf16 %v1000_v3, %v1000_v3  ;;  %v998_v52 = vmax.f32 %v934_v37, 0.0  ;;  %v2826_v4 = vunpack.c.h.bf16 %v2209_v32  ;;  %v775_v6 = vadd.f32 %v2214_v21, %v704_v38 }
 0x122   :  { %v937_v63 = vadd.f32 %v2825_v55, %v745_v53  ;;  %v1551_v5 = vpack.c.bf16 %v1032_v51, %v1032_v51  ;;  %v1030_v0 = vmax.f32 %v966_v58, 0.0  ;;  %v2827_v7 = vunpack.c.h.bf16 %v2223_v22 }
 0x123   :  { %v969_v9 = vadd.f32 %v2826_v4, %v777_v43  ;;  %1321 = vst.msk [vmem:[%s2777_s5 + $0x78] sm:$0xf] %vm1290_vm2, %v1519_v48  ;;  %v1517_v33 = vpack.c.bf16 %v998_v52, %v998_v52  ;;  %v2828_v50 = vunpack.c.h.bf16 %v2228_v15 }
 0x124   :  { %v1001_v62 = vmax.f32 %v937_v63, 0.0  ;;  %v935_v16 = vadd.f32 %v2827_v7, %v743_v59  ;;  %1353 = vst.msk [vmem:[%s2777_s5 + $0xf8] sm:$0xf] %vm1290_vm2, %v1551_v5  ;;  %v1549_v1 = vpack.c.bf16 %v1030_v0, %v1030_v0 }
 0x125   :  { %v1033_v32 = vmax.f32 %v969_v9, 0.0  ;;  %v967_v21 = vadd.f32 %v2828_v50, %v775_v6  ;;  %1319 = vst.msk [vmem:[%s2777_s5 + $0x70] sm:$0xf] %vm1290_vm2, %v1517_v33 }
 0x126   :  { %v1520_v44 = vpack.c.bf16 %v1001_v62, %v1001_v62  ;;  %v999_v11 = vmax.f32 %v935_v16, 0.0  ;;  %1351 = vst.msk [vmem:[%s2777_s5 + $0xf0] sm:$0xf] %vm1290_vm2, %v1549_v1 }
 0x127   :  { %v1552_v22 = vpack.c.bf16 %v1033_v32, %v1033_v32  ;;  %v1031_v41 = vmax.f32 %v967_v21, 0.0 }
 0x128   :  { %1322 = vst.msk [vmem:[%s2777_s5 + $0x7c] sm:$0xf] %vm1290_vm2, %v1520_v44  ;;  %v1518_v15 = vpack.c.bf16 %v999_v11, %v999_v11 }
 0x129   :  { %1354 = vst.msk [vmem:[%s2777_s5 + $0xfc] sm:$0xf] %vm1290_vm2, %v1552_v22  ;;  %v1550_v49 = vpack.c.bf16 %v1031_v41, %v1031_v41 }
 0x12a   :  { %1320 = vst.msk [vmem:[%s2777_s5 + $0x74] sm:$0xf] %vm1290_vm2, %v1518_v15 }
 0x12b   :  { %1352 = vst.msk [vmem:[%s2777_s5 + $0xf4] sm:$0xf] %vm1290_vm2, %v1550_v49 }

// kernel: _lambda_.26
= control target key start
LH: loop header
LB: loop body
LE: loop exit
PB: predicated region body
PF: predicated region fallthrough
CT: control target
= control target key end

     0   :  { %s1480_s15 = smov 0   ;;  %s1482_s16 = smov 0   ;;  %s1593_s0 = inlined_call_operand.vmem [shape: bf16[8,100,16], index: 0, kind: input, shape index: {}]   ;;  %s1594_s1 = inlined_call_operand.vmem [shape: bf16[9,16,16], index: 1, kind: input, shape index: {}]   ;;  %s1595_s2 = inlined_call_operand.vmem [shape: f32[1,16], index: 2, kind: input, shape index: {}]   ;;  %s1596_s3 = inlined_call_operand.vmem [shape: f32[1,16], index: 3, kind: input, shape index: {}]   ;;  %s1597_s4 = inlined_call_operand.vmem [shape: bf16[8,20,16], index: 4, kind: output, shape index: {}]  }
   0x1   :  { %s1484_s17 = smov 0  }
   0x2 LB: > { %s33_s18 = sadd.s32 1, %s1449_s16  ;;  %p1229_p0 = scmp.ge.s32.totalorder %s1453_s17, 1  ;;  %s1453_s17 = sphi %s1484_s17, %s14_s17   ;;  %s1449_s16 = sphi %s1482_s16, %s1599_s16   ;;  %s1445_s15 = sphi %s1480_s15, %s1598_s15  }
   0x3   : > { %p35_p1 = scmp.ge.s32.totalorder %s33_s18, 8  ;;  %p210_p2 = scmp.lt.s32.totalorder %s1453_s17, 9 }
   0x5   : > { %s1601_s18 = smov (%p35_p1, %s33_s18), 0  ;;  %p211_p3 = pnand %p1229_p0, %p210_p2 }
   0x6   : > { %p253_p4 = scmp.lt.s32.totalorder (!%p211_p3), %s1445_s15, 7 }
   0x7   : > { %214 = sbr.rel (%p211_p3) target bundleno = 267 (0x10b), region = 36 }
   0xc   : > { %v1407_v0 = vld [vmem:[%s1594_s1 + $0x8] sm:$0xff]   ;;  %v1408_v1 = vld [vmem:[%s1594_s1] sm:$0xff]   ;;  %s1603_s15 = smov (!%p253_p4, %s1445_s15), 7  ;;  %v1412_v2 = vld [vmem:[%s1594_s1 + $0x10] sm:$0xff]   ;;  %vm301_vm0 = vsmask.f32 7424 }
   0xd   : > { %1327 = vmatprep.subr.bf16.mxu0 %v1407_v0  ;;  %1333 = vmatprep.subr.bf16.mxu1 %v1408_v1  ;;  %s1381_s25 = smul.u32 52, %s1603_s15  ;;  %v1414_v3 = vld [vmem:[%s1594_s1 + $0x18] sm:$0xff]   ;;  %vm323_vm1 = vcmask 130048   ;;  %v1419_v14 = vld [vmem:[%s1594_s1 + $0x28] sm:$0xff]   ;;  %vm544_vm2 = vcmask 1046528   ;;  %v1418_v25 = vld [vmem:[%s1594_s1 + $0x20] sm:$0xff]  }
   0xe   : > { %1328 = vmatpush3.bf16.msra.mxu0 %v1407_v0  ;;  %1334 = vmatpush3.bf16.msra.mxu1 %v1408_v1  ;;  %vm625_vm3 = vsmask.f32 6400  ;;  %v1424_v41 = vld [vmem:[%s1594_s1 + $0x38] sm:$0xff]   ;;  %v1423_v60 = vld [vmem:[%s1594_s1 + $0x30] sm:$0xff]   ;;  %vm908_vm4 = vcmask 1044480   ;;  %s1382_s23 = smul.u32 12, %s1603_s15 }
   0xf   : > { %1339 = vmatprep.subr.bf16.mxu0 %v1412_v2  ;;  %s1516_s30 = scalar_lea.vmem %s1593_s0, %s1381_s25  ;;  %1345 = vmatprep.subr.bf16.mxu1 %v1414_v3  ;;  %vm810_vm5 = vsmask.f32 5376  ;;  %vm1087_vm6 = vcmask 123904   ;;  %vm1084_vm7 = vcmask 125952  }
  0x10   : > { %v1409_v4 = vld [vmem:[%s1516_s30 + $0xc] sm:$0xff]   ;;  %v1410_v5 = vld [vmem:[%s1516_s30 + $0x14] ss:$0 sps:$4 sm:$0x77]   ;;  %v1411_v6 = vld [vmem:[%s1516_s30] sm:$0xff]   ;;  %s279_s26 = scalar_lea.vmem %s1597_s4, %s1382_s23 }
  0x11   : > { %v303_v7 = vshrl.u32 %v1409_v4, 16  ;;  %v305_v8 = vshll.u32 %v1409_v4, 16  ;;  %v310_v9 = vshll.u32 %v1410_v5, 16  ;;  %v314_v10 = vshrl.u32 %v1410_v5, 16  ;;  %1335 = vmatprep.mubr.msk.bf16.mxu1 %vm323_vm1, %v1411_v6  ;;  %v1416_v22 = vld [vmem:[%s1516_s30 + $0x18] sm:$0xfe]  }
  0x12   : > { %v453_v11 = vshrl.u32 %v1411_v6, 16  ;;  %v455_v12 = vshll.u32 %v1411_v6, 16  ;;  %v1413_v13 = vld [vmem:[%s1516_s30 + $0x8] ss:$0 sps:$4 sm:$0x33]   ;;  %v545_v28 = vrot.slane %v1416_v22, 1 }
  0x13   : > { %v307_v15 = vrot.slane %v305_v8, 1  ;;  %v312_v16 = vrot.slane %v310_v9, 1  ;;  %v1415_v17 = vld [vmem:[%s1516_s30 + $0x8] ss:$0 sps:$4 sm:$0x77]   ;;  %1336 = vmatmul.mubr.msk.bf16.vlgmr.msra.gmra.mxu1 %vm323_vm1, %v1413_v13  ;;  %v714_v32 = vshrl.u32 %v1416_v22, 16 }
  0x14   : > { %v457_v18 = vrot.slane %v455_v12, 1  ;;  %1346 = vmatpush3.bf16.msra.mxu1 %v1414_v3  ;;  %v460_v21 = vshll.u32 %v1415_v17, 16  ;;  %v1417_v24 = vld [vmem:[%s1516_s30 + $0x20] ss:$0 sps:$4 sm:$0x77]   ;;  %v464_v34 = vshrl.u32 %v1415_v17, 16 }
  0x15   : > { %v308_v19 = vor.u32 %v307_v15, %v303_v7  ;;  %v316_v20 = vor.u32 %v314_v10, %v312_v16  ;;  %1357 = vmatprep.subr.bf16.mxu1 %v1419_v14  ;;  %v546_v29 = vrot.slane %v1417_v24, 1  ;;  %v1420_v30 = vld [vmem:[%s1516_s30 + $0x24] sm:$0xfe]   ;;  %v1421_v31 = vld [vmem:[%s1516_s30 + $0x2c] ss:$0 sps:$4 sm:$0xff]   ;;  %v717_v36 = vshll.u32 %v1416_v22, 16 }
  0x16   : > { %v458_v23 = vor.u32 %v457_v18, %v453_v11  ;;  %v462_v27 = vrot.slane %v460_v21, 1  ;;  %v1422_v35 = vld [vmem:[%s1516_s30 + $0x20] ss:$0 sps:$4 sm:$0xff]   ;;  %v627_v38 = vshrl.u32 %v1420_v30, 16  ;;  %v630_v39 = vshll.u32 %v1420_v30, 16 }
  0x17   : > { %v313_v26 = vsel %vm301_vm0, %v308_v19, %v312_v16  ;;  %v547_v37 = vsel %vm544_vm2, %v545_v28, %v546_v29  ;;  %v635_v40 = vshrl.u32 %v1421_v31, 16  ;;  %v638_v42 = vshll.u32 %v1421_v31, 16  ;;  %v793_v53 = vld [vmem:[%s1516_s30] sm:$0xc]  ;;  %v794_v54 = vld [vmem:[%s1516_s30 + $0x4] sm:$0xf] }
  0x18   : > { %1329 = vmatprep.mubr.msk.bf16.mxu0 %vm323_vm1, %v313_v26  ;;  %v463_v33 = vsel %vm301_vm0, %v458_v23, %v462_v27  ;;  %1347 = vmatprep.mubr.msk.bf16.mxu1 %vm323_vm1, %v547_v37  ;;  %v716_v43 = vrot.slane %v714_v32, 1  ;;  %v719_v44 = vrot.slane %v717_v36, 2  ;;  %v722_v45 = vshrl.u32 %v1422_v35, 16  ;;  %v1426_v61 = vld [vmem:[%s1516_s30 + $0x8] sm:$0x1f]   ;;  %v1429_v18 = vld [vmem:[%s1594_s1 + $0x40] sm:$0xff]  }
  0x19   : > { %1330 = vmatmul.mubr.msk.bf16.vlgmr.msra.gmra.mxu0 %vm323_vm1, %v316_v20  ;;  %v629_v46 = vrot.slane %v627_v38, 1  ;;  %v632_v47 = vrot.slane %v630_v39, 2  ;;  %v637_v48 = vrot.slane %v635_v40, 1  ;;  %v725_v49 = vshll.u32 %v1422_v35, 16  ;;  %v1427_v4 = vld [vmem:[%s1516_s30 + $0xc] sm:$0xf8]  }
  0x1a   : > { %1340 = vmatpush3.bf16.msra.mxu0 %v1412_v2  ;;  %1341 = vmatprep.mubr.msk.bf16.mxu0 %vm323_vm1, %v463_v33  ;;  %v466_v50 = vor.u32 %v464_v34, %v462_v27  ;;  %v640_v51 = vrot.slane %v638_v42, 2  ;;  %v724_v52 = vrot.slane %v722_v45, 1  ;;  %v720_v56 = vor.u32 %v719_v44, %v716_v43  ;;  %v1428_v8 = vld [vmem:[%s1516_s30 + $0x14] sm:$0x1f]  }
  0x1b   : > { %1351 = vmatprep.subr.bf16.mxu0 %v1418_v25  ;;  %1348 = vmatmul.mubr.msk.bf16.vlgmr.msra.gmra.mxu1 %vm323_vm1, %v546_v29  ;;  %v633_v55 = vor.u32 %v632_v47, %v629_v46  ;;  %v727_v57 = vrot.slane %v725_v49, 2  ;;  %v1272_v58 = vcombine.low %v793_v53, %v794_v54  ;;  %v820_v2 = vshrl.u32 %v1426_v61, 16 }
  0x1c   : > { %1358 = vmatpush3.bf16.msra.mxu1 %v1419_v14  ;;  %v641_v59 = vor.u32 %v640_v51, %v637_v48  ;;  %v823_v3 = vshll.u32 %v1426_v61, 16  ;;  %v909_v11 = vrot.slane %v1427_v4, 3  ;;  %v910_v13 = vrot.slane %v1428_v8, 3  ;;  %v975_v14 = vld [vmem:[%s1516_s30] sm:$0x8] }
  0x1d   : > { %1369 = vmatprep.subr.bf16.mxu1 %v1424_v41  ;;  %v728_v62 = vor.u32 %v727_v57, %v724_v52  ;;  %v812_v63 = vshrl.u32 %v1272_v58, 16  ;;  %v815_v0 = vshll.u32 %v1272_v58, 16  ;;  %v822_v9 = vrot.slane %v820_v2, 2 }
  0x1e   : > { %v642_v1 = vsel %vm625_vm3, %v633_v55, %v641_v59  ;;  %v825_v10 = vrot.slane %v823_v3, 3  ;;  %v911_v16 = vsel %vm908_vm4, %v909_v11, %v910_v13  ;;  %v1286_v19 = vcombine.low %v975_v14, %v794_v54 }
  0x1f   : > { %v729_v5 = vsel %vm625_vm3, %v720_v56, %v728_v62  ;;  %v814_v6 = vrot.slane %v812_v63, 2  ;;  %v817_v7 = vrot.slane %v815_v0, 3  ;;  %v983_v21 = vrot.slane %v1426_v61, 3 }
  0x20   : > { %1359 = vmatprep.mubr.msk.bf16.mxu1 %vm323_vm1, %v729_v5  ;;  %v826_v15 = vor.u32 %v825_v10, %v822_v9  ;;  %v982_v20 = vrot.slane %v1286_v19, 3  ;;  %v1290_v9 = vld [vmem:[%s1595_s2] ss:$0 sm:$0xff] }
  0x21   : > { %1342 = vmatmul.mubr.msk.bf16.vlgmr.msra.gmra.mxu0 %vm323_vm1, %v466_v50  ;;  %v818_v12 = vor.u32 %v817_v7, %v814_v6 }
  0x22   : > { %1352 = vmatpush3.bf16.msra.mxu0 %v1418_v25  ;;  %1353 = vmatprep.mubr.msk.bf16.mxu0 %vm323_vm1, %v642_v1  ;;  %v984_v22 = vsel %vm908_vm4, %v982_v20, %v983_v21 }
  0x23   : > { %1363 = vmatprep.subr.bf16.mxu0 %v1423_v60  ;;  %1360 = vmatmul.mubr.msk.bf16.vlgmr.msra.gmra.mxu1 %vm323_vm1, %v728_v62  ;;  %v827_v17 = vsel %vm810_vm5, %v818_v12, %v826_v15 }
  0x24   : > { %1370 = vmatpush3.bf16.msra.mxu1 %v1424_v41  ;;  %1371 = vmatprep.mubr.msk.bf16.mxu1 %vm323_vm1, %v911_v16 }
  0x29   : > { %1354 = vmatmul.mubr.msk.bf16.vlgmr.msra.gmra.mxu0 %vm323_vm1, %v641_v59 }
  0x2a   : > { %1364 = vmatpush3.bf16.msra.mxu0 %v1423_v60  ;;  %1365 = vmatprep.mubr.msk.bf16.mxu0 %vm323_vm1, %v827_v17 }
  0x2b   : > { %1375 = vmatprep.subr.bf16.mxu0 %v1429_v18  ;;  %1372 = vmatmul.mubr.msk.bf16.vlgmr.msra.gmra.mxu1 %vm323_vm1, %v910_v13  ;;  %v1291_v13 = vld [vmem:[%s1596_s3] ss:$0 sm:$0xff] }
  0x31   : > { %1366 = vmatmul.mubr.msk.bf16.vlgmr.msra.gmra.mxu0 %vm323_vm1, %v826_v15 }
  0x32   : > { %1376 = vmatpush3.bf16.msra.mxu0 %v1429_v18  ;;  %1377 = vmatprep.mubr.msk.bf16.mxu0 %vm323_vm1, %v984_v22 }
  0x39   : > { %1378 = vmatmul.mubr.msk.bf16.vlgmr.msra.gmra.mxu0 %vm323_vm1, %v983_v21 }
  0xd3   : > { %v1337_v23 = vpop.f32.mrf.mxu1 }
  0xd5   : > { %v432_v24 = vpop.f32.mrf.mxu1 }
  0xd7   : > { %v1338_v25 = vpop.f32.mrf.mxu1 }
  0xd9   : > { %v1331_v26 = vpop.f32.mrf.mxu0  ;;  %v435_v27 = vpop.f32.mrf.mxu1 }
  0xda   : > { %v441_v39 = vadd.f32 %v1337_v23, %v1331_v26 }
  0xdb   : > { %v364_v28 = vpop.f32.mrf.mxu0  ;;  %v1349_v29 = vpop.f32.mrf.mxu1 }
  0xdc   : > { %v433_v42 = vadd.f32 %v432_v24, %v364_v28 }
  0xdd   : > { %v1332_v30 = vpop.f32.mrf.mxu0  ;;  %v594_v31 = vpop.f32.mrf.mxu1 }
  0xdf   : > { %v367_v32 = vpop.f32.mrf.mxu0  ;;  %v1350_v33 = vpop.f32.mrf.mxu1 }
  0xe0   : > { %v436_v49 = vadd.f32 %v435_v27, %v367_v32 }
  0xe1   : > { %v1343_v34 = vpop.f32.mrf.mxu0  ;;  %v597_v35 = vpop.f32.mrf.mxu1 }
  0xe2   : > { %v529_v43 = vadd.f32 %v1343_v34, %v441_v39 }
  0xe3   : > { %v513_v36 = vpop.f32.mrf.mxu0  ;;  %v1361_v37 = vpop.f32.mrf.mxu1 }
  0xe4   : > { %v527_v46 = vadd.f32 %v513_v36, %v433_v42  ;;  %v610_v50 = vadd.f32 %v1349_v29, %v529_v43 }
  0xe5   : > { %v1344_v38 = vpop.f32.mrf.mxu0  ;;  %v776_v40 = vpop.f32.mrf.mxu1 }
  0xe6   : > { %v608_v53 = vadd.f32 %v594_v31, %v527_v46 }
  0xe7   : > { %v516_v41 = vpop.f32.mrf.mxu0  ;;  %v1362_v44 = vpop.f32.mrf.mxu1 }
  0xe8   : > { %v528_v54 = vadd.f32 %v516_v41, %v436_v49 }
  0xe9   : > { %v1355_v45 = vpop.f32.mrf.mxu0  ;;  %v779_v47 = vpop.f32.mrf.mxu1 }
  0xea   : > { %v705_v55 = vadd.f32 %v1355_v45, %v610_v50  ;;  %v609_v61 = vadd.f32 %v597_v35, %v528_v54 }
  0xeb   : > { %v689_v48 = vpop.f32.mrf.mxu0  ;;  %v1373_v51 = vpop.f32.mrf.mxu1 }
  0xec   : > { %v703_v58 = vadd.f32 %v689_v48, %v608_v53  ;;  %v792_v62 = vadd.f32 %v1361_v37, %v705_v55 }
  0xed   : > { %v1356_v52 = vpop.f32.mrf.mxu0  ;;  %v958_v56 = vpop.f32.mrf.mxu1 }
  0xee   : > { %v790_v0 = vadd.f32 %v776_v40, %v703_v58 }
  0xef   : > { %v692_v57 = vpop.f32.mrf.mxu0  ;;  %v1374_v59 = vpop.f32.mrf.mxu1 }
  0xf0   : > { %v704_v1 = vadd.f32 %v692_v57, %v609_v61 }
  0xf1   : > { %v1367_v60 = vpop.f32.mrf.mxu0  ;;  %v961_v17 = vpop.f32.mrf.mxu1 }
  0xf2   : > { %v890_v2 = vadd.f32 %v1367_v60, %v792_v62  ;;  %v791_v6 = vadd.f32 %v779_v47, %v704_v1 }
  0xf3   : > { %v874_v63 = vpop.f32.mrf.mxu0 }
  0xf4   : > { %v888_v4 = vadd.f32 %v874_v63, %v790_v0  ;;  %v974_v7 = vadd.f32 %v1373_v51, %v890_v2 }
  0xf5   : > { %v1368_v3 = vpop.f32.mrf.mxu0 }
  0xf6   : > { %v972_v10 = vadd.f32 %v958_v56, %v888_v4 }
  0xf7   : > { %v877_v5 = vpop.f32.mrf.mxu0 }
  0xf8   : > { %v889_v11 = vadd.f32 %v877_v5, %v791_v6 }
  0xf9   : > { %v1379_v8 = vpop.f32.mrf.mxu0 }
  0xfa   : > { %v1047_v12 = vadd.f32 %v1379_v8, %v974_v7  ;;  %v973_v19 = vadd.f32 %v961_v17, %v889_v11 }
  0xfb   : > { %v1031_v14 = vpop.f32.mrf.mxu0 }
  0xfc   : > { %v1057_v15 = vmul.f32 %v1290_v9, %v1047_v12  ;;  %v1045_v16 = vadd.f32 %v1031_v14, %v972_v10 }
  0xfd   : > { %v1380_v18 = vpop.f32.mrf.mxu0 }
  0xfe   : > { %v1067_v20 = vadd.f32 %v1291_v13, %v1057_v15  ;;  %v1055_v21 = vmul.f32 %v1290_v9, %v1045_v16 }
  0xff   : > { %v1034_v22 = vpop.f32.mrf.mxu0 }
 0x100   : > { %v1070_v23 = vmax.f32 %v1067_v20, 0.0  ;;  %v1065_v24 = vadd.f32 %v1291_v13, %v1055_v21  ;;  %v1046_v25 = vadd.f32 %v1034_v22, %v973_v19 }
 0x102   : > { %v1299_v26 = vpack.c.bf16 %v1070_v23, %v1070_v23  ;;  %v1068_v27 = vmax.f32 %v1065_v24, 0.0  ;;  %v1056_v28 = vmul.f32 %v1290_v9, %v1046_v25 }
 0x104   : > { %1088 = vst.msk [vmem:[%s279_s26 + $0x8] sm:$0x3] %vm1087_vm6, %v1299_v26  ;;  %v1297_v29 = vpack.c.bf16 %v1068_v27, %v1068_v27  ;;  %v1066_v30 = vadd.f32 %v1291_v13, %v1056_v28 }
 0x106   : > { %1085 = vst.msk [vmem:[%s279_s26] sm:$0xf] %vm1084_vm7, %v1297_v29  ;;  %v1069_v31 = vmax.f32 %v1066_v30, 0.0 }
 0x108   : > { %v1298_v32 = vpack.c.bf16 %v1069_v31, %v1069_v31 }
 0x10a   : > { %1086 = vst.msk [vmem:[%s279_s26 + $0x4] sm:$0xf] %vm1084_vm7, %v1298_v32 }
 0x10b PF: > { %s14_s17 = sadd.s32 1, %s1453_s17   ;;  %s1598_s15 = smov %s1449_s16 }
 0x10c   : > { %p11_p5 = scmp.ge.s32.totalorder %s14_s17, 10   ;;  %s1599_s16 = smov %s1601_s18 }
 0x10e   :  { %13 = sbr.rel (!%p11_p5) target bundleno = 2 (0x2), region = 83 }

// kernel: _lambda_.24
= control target key start
LH: loop header
LB: loop body
LE: loop exit
PB: predicated region body
PF: predicated region fallthrough
CT: control target
= control target key end

     0   :  { %vm90_vm0 = vcmask 261120   ;;  %vm322_vm1 = vcmask 519168   ;;  %s608_s1 = inlined_call_operand.vmem [shape: bf16[1,32,64], index: 1, kind: input, shape index: {}]   ;;  %s609_s0 = inlined_call_operand.vmem [shape: bf16[1,128,32], index: 0, kind: input, shape index: {}]   ;;  %s610_s2 = inlined_call_operand.vmem [shape: f32[1,64], index: 2, kind: input, shape index: {}]   ;;  %s611_s3 = inlined_call_operand.vmem [shape: f32[1,64], index: 3, kind: input, shape index: {}]   ;;  %s612_s4 = inlined_call_operand.vmem [shape: bf16[1,128,64], index: 4, kind: output, shape index: {}]  }
   0x1   :  { %v429_v0 = vld [vmem:[%s608_s1 + $0x8] sm:$0xff]   ;;  %v430_v1 = vld [vmem:[%s608_s1] sm:$0xff]   ;;  %v435_v6 = vld [vmem:[%s609_s0 + $0x10] sm:$0xff]  }
   0x2   :  { %405 = vmatprep.subr.bf16.mxu0 %v429_v0  ;;  %425 = vmatprep.subr.bf16.mxu1 %v429_v0  ;;  %v431_v2 = vld [vmem:[%s609_s0] sm:$0xff]   ;;  %v433_v4 = vld [vmem:[%s609_s0 + $0x8] sm:$0xff]   ;;  %v436_v7 = vld [vmem:[%s609_s0 + $0x30] sm:$0xff]  }
   0x3   :  { %406 = vmatpush3.bf16.msra.mxu0 %v429_v0  ;;  %427 = vmatpush3.bf16.msra.mxu1 %v429_v0  ;;  %v432_v3 = vld [vmem:[%s609_s0 + $0x20] sm:$0xff]   ;;  %v434_v5 = vld [vmem:[%s609_s0 + $0x28] sm:$0xff]   ;;  %v437_v8 = vld [vmem:[%s609_s0 + $0x18] sm:$0xff]  }
   0x4   :  { %407 = vmatprep.subr.bf16.mxu0 %v430_v1  ;;  %426 = vmatprep.subr.bf16.mxu1 %v430_v1  ;;  %v438_v9 = vld [vmem:[%s609_s0 + $0x38] sm:$0xff]   ;;  %v505_v10 = vld [vmem:[%s610_s2] ss:$0 sm:$0xff] }
   0x5   :  { %409 = vmatprep.mubr.msk.bf16.mxu0 %vm90_vm0, %v431_v2  ;;  %417 = vmatprep.mubr.msk.bf16.mxu1 %vm90_vm0, %v432_v3  ;;  %v510_v12 = vld [vmem:[%s611_s3] ss:$0 sm:$0xff] }
   0x7   :  { %408 = vmatpush3.bf16.msra.mxu0 %v430_v1  ;;  %428 = vmatpush3.bf16.msra.mxu1 %v430_v1 }
   0xa   :  { %410 = vmatmul.mubr.msk.bf16.vlgmr.msra.gmra.mxu0 %vm90_vm0, %v433_v4  ;;  %418 = vmatmul.mubr.msk.bf16.vlgmr.msra.gmra.mxu1 %vm90_vm0, %v434_v5 }
   0xb   :  { %413 = vmatprep.mubr.msk.bf16.mxu0 %vm90_vm0, %v435_v6  ;;  %421 = vmatprep.mubr.msk.bf16.mxu1 %vm90_vm0, %v436_v7 }
  0x12   :  { %414 = vmatmul.mubr.msk.bf16.gmra.mxu0 %vm90_vm0, %v437_v8  ;;  %422 = vmatmul.mubr.msk.bf16.gmra.mxu1 %vm90_vm0, %v438_v9 }
  0xca   :  { %v411_v11 = vpop.f32.mrf.mxu0  ;;  %v419_v13 = vpop.f32.mrf.mxu1 }
  0xcb   :  { %v221_v14 = vmul.f32 %v411_v11, %v505_v10  ;;  %v229_v15 = vmul.f32 %v419_v13, %v505_v10 }
  0xcc   :  { %v149_v16 = vpop.f32.mrf.mxu0  ;;  %v181_v17 = vpop.f32.mrf.mxu1 }
  0xcd   :  { %v244_v18 = vadd.f32 %v510_v12, %v221_v14  ;;  %v252_v19 = vadd.f32 %v510_v12, %v229_v15  ;;  %v219_v20 = vmul.f32 %v505_v10, %v149_v16  ;;  %v227_v21 = vmul.f32 %v505_v10, %v181_v17 }
  0xce   :  { %v412_v22 = vpop.f32.mrf.mxu0  ;;  %v420_v23 = vpop.f32.mrf.mxu1 }
  0xcf   :  { %v381_v24 = vpack.c.bf16 %v244_v18, %v244_v18  ;;  %v389_v25 = vpack.c.bf16 %v252_v19, %v252_v19  ;;  %v242_v26 = vadd.f32 %v510_v12, %v219_v20  ;;  %v250_v27 = vadd.f32 %v510_v12, %v227_v21 }
  0xd0   :  { %v222_v28 = vmul.f32 %v412_v22, %v505_v10  ;;  %v230_v29 = vmul.f32 %v420_v23, %v505_v10  ;;  %v152_v30 = vpop.f32.mrf.mxu0  ;;  %v184_v31 = vpop.f32.mrf.mxu1 }
  0xd1   :  { %325 = vst.msk [vmem:[%s612_s4 + $0x8] sm:$0xf] %vm322_vm1, %v381_v24  ;;  %333 = vst.msk [vmem:[%s612_s4 + $0x28] sm:$0xf] %vm322_vm1, %v389_v25  ;;  %v379_v32 = vpack.c.bf16 %v242_v26, %v242_v26  ;;  %v387_v33 = vpack.c.bf16 %v250_v27, %v250_v27  ;;  %v220_v34 = vmul.f32 %v505_v10, %v152_v30 }
  0xd2   :  { %v228_v35 = vmul.f32 %v505_v10, %v184_v31  ;;  %v245_v36 = vadd.f32 %v510_v12, %v222_v28  ;;  %v253_v37 = vadd.f32 %v510_v12, %v230_v29  ;;  %v415_v38 = vpop.f32.mrf.mxu0  ;;  %v423_v39 = vpop.f32.mrf.mxu1 }
  0xd3   :  { %323 = vst.msk [vmem:[%s612_s4] sm:$0xf] %vm322_vm1, %v379_v32  ;;  %331 = vst.msk [vmem:[%s612_s4 + $0x20] sm:$0xf] %vm322_vm1, %v387_v33  ;;  %v243_v40 = vadd.f32 %v510_v12, %v220_v34  ;;  %v225_v42 = vmul.f32 %v415_v38, %v505_v10  ;;  %v233_v43 = vmul.f32 %v423_v39, %v505_v10 }
  0xd4   :  { %v251_v41 = vadd.f32 %v510_v12, %v228_v35  ;;  %v382_v44 = vpack.c.bf16 %v245_v36, %v245_v36  ;;  %v390_v45 = vpack.c.bf16 %v253_v37, %v253_v37  ;;  %v165_v46 = vpop.f32.mrf.mxu0  ;;  %v197_v47 = vpop.f32.mrf.mxu1 }
  0xd5   :  { %v380_v48 = vpack.c.bf16 %v243_v40, %v243_v40  ;;  %v248_v50 = vadd.f32 %v510_v12, %v225_v42  ;;  %v256_v51 = vadd.f32 %v510_v12, %v233_v43  ;;  %v223_v52 = vmul.f32 %v505_v10, %v165_v46 }
  0xd6   :  { %v388_v49 = vpack.c.bf16 %v251_v41, %v251_v41  ;;  %326 = vst.msk [vmem:[%s612_s4 + $0xc] sm:$0xf] %vm322_vm1, %v382_v44  ;;  %334 = vst.msk [vmem:[%s612_s4 + $0x2c] sm:$0xf] %vm322_vm1, %v390_v45  ;;  %v231_v53 = vmul.f32 %v505_v10, %v197_v47  ;;  %v416_v54 = vpop.f32.mrf.mxu0  ;;  %v424_v55 = vpop.f32.mrf.mxu1 }
  0xd7   :  { %324 = vst.msk [vmem:[%s612_s4 + $0x4] sm:$0xf] %vm322_vm1, %v380_v48  ;;  %v385_v56 = vpack.c.bf16 %v248_v50, %v248_v50  ;;  %v393_v57 = vpack.c.bf16 %v256_v51, %v256_v51  ;;  %v226_v58 = vmul.f32 %v416_v54, %v505_v10  ;;  %v234_v59 = vmul.f32 %v424_v55, %v505_v10 }
  0xd8   :  { %332 = vst.msk [vmem:[%s612_s4 + $0x24] sm:$0xf] %vm322_vm1, %v388_v49  ;;  %v246_v60 = vadd.f32 %v510_v12, %v223_v52  ;;  %v254_v61 = vadd.f32 %v510_v12, %v231_v53  ;;  %v168_v62 = vpop.f32.mrf.mxu0  ;;  %v200_v63 = vpop.f32.mrf.mxu1 }
  0xd9   :  { %329 = vst.msk [vmem:[%s612_s4 + $0x18] sm:$0xf] %vm322_vm1, %v385_v56  ;;  %337 = vst.msk [vmem:[%s612_s4 + $0x38] sm:$0xf] %vm322_vm1, %v393_v57  ;;  %v249_v0 = vadd.f32 %v510_v12, %v226_v58  ;;  %v257_v1 = vadd.f32 %v510_v12, %v234_v59  ;;  %v224_v2 = vmul.f32 %v505_v10, %v168_v62 }
  0xda   :  { %v232_v3 = vmul.f32 %v505_v10, %v200_v63  ;;  %v383_v4 = vpack.c.bf16 %v246_v60, %v246_v60  ;;  %v391_v5 = vpack.c.bf16 %v254_v61, %v254_v61 }
  0xdb   :  { %v386_v6 = vpack.c.bf16 %v249_v0, %v249_v0  ;;  %v394_v7 = vpack.c.bf16 %v257_v1, %v257_v1  ;;  %v247_v8 = vadd.f32 %v510_v12, %v224_v2 }
  0xdc   :  { %v255_v9 = vadd.f32 %v510_v12, %v232_v3  ;;  %327 = vst.msk [vmem:[%s612_s4 + $0x10] sm:$0xf] %vm322_vm1, %v383_v4  ;;  %335 = vst.msk [vmem:[%s612_s4 + $0x30] sm:$0xf] %vm322_vm1, %v391_v5 }
  0xdd   :  { %330 = vst.msk [vmem:[%s612_s4 + $0x1c] sm:$0xf] %vm322_vm1, %v386_v6  ;;  %338 = vst.msk [vmem:[%s612_s4 + $0x3c] sm:$0xf] %vm322_vm1, %v394_v7  ;;  %v384_v10 = vpack.c.bf16 %v247_v8, %v247_v8 }
  0xde   :  { %v392_v11 = vpack.c.bf16 %v255_v9, %v255_v9 }
  0xdf   :  { %328 = vst.msk [vmem:[%s612_s4 + $0x14] sm:$0xf] %vm322_vm1, %v384_v10 }
  0xe0   :  { %336 = vst.msk [vmem:[%s612_s4 + $0x34] sm:$0xf] %vm322_vm1, %v392_v11 }

// kernel: _lambda_.27
= control target key start
LH: loop header
LB: loop body
LE: loop exit
PB: predicated region body
PF: predicated region fallthrough
CT: control target
= control target key end

     0   :  { %vm85_vm0 = vcmask 130048   ;;  %vm381_vm1 = vcmask 519168   ;;  %s773_s1 = inlined_call_operand.vmem [shape: bf16[1,16,64], index: 1, kind: input, shape index: {}]   ;;  %s774_s0 = inlined_call_operand.vmem [shape: bf16[1,128,16], index: 0, kind: input, shape index: {}]   ;;  %s775_s4 = inlined_call_operand.vmem [shape: bf16[1,128,64], index: 4, kind: input, shape index: {}]   ;;  %s776_s2 = inlined_call_operand.vmem [shape: f32[1,64], index: 2, kind: input, shape index: {}]   ;;  %s777_s3 = inlined_call_operand.vmem [shape: f32[1,64], index: 3, kind: input, shape index: {}]   ;;  %s778_s5 = inlined_call_operand.vmem [shape: bf16[1,128,64], index: 5, kind: output, shape index: {}]  }
   0x1   :  { %v521_v0 = vld [vmem:[%s773_s1] sm:$0xff]   ;;  %v524_v3 = vld [vmem:[%s774_s0 + $0x8] sm:$0xff]   ;;  %v526_v5 = vld [vmem:[%s774_s0 + $0x10] sm:$0xff]  }
   0x2   :  { %v522_v1 = vld [vmem:[%s774_s0] sm:$0xff]   ;;  %501 = vmatprep.subr.bf16.mxu0 %v521_v0  ;;  %519 = vmatprep.subr.bf16.mxu1 %v521_v0  ;;  %v525_v4 = vld [vmem:[%s774_s0 + $0x28] sm:$0xff]   ;;  %v527_v6 = vld [vmem:[%s774_s0 + $0x30] sm:$0xff]  }
   0x3   :  { %v523_v2 = vld [vmem:[%s774_s0 + $0x20] sm:$0xff]   ;;  %502 = vmatpush3.bf16.msra.mxu0 %v521_v0  ;;  %520 = vmatpush3.bf16.msra.mxu1 %v521_v0  ;;  %v528_v7 = vld [vmem:[%s774_s0 + $0x18] sm:$0xff]   ;;  %v598_v9 = vld [vmem:[%s775_s4 + $0x8] sm:$0xff]  }
   0x4   :  { %503 = vmatprep.mubr.msk.bf16.mxu0 %vm85_vm0, %v522_v1  ;;  %511 = vmatprep.mubr.msk.bf16.mxu1 %vm85_vm0, %v523_v2  ;;  %v529_v8 = vld [vmem:[%s774_s0 + $0x38] sm:$0xff]   ;;  %v603_v10 = vld [vmem:[%s775_s4 + $0x28] sm:$0xff]   ;;  %v608_v11 = vld [vmem:[%s775_s4] sm:$0xff]   ;;  %v459_v14 = vunpack.c.l.bf16 %v598_v9  ;;  %v460_v23 = vunpack.c.h.bf16 %v598_v9 }
   0x5   :  { %v613_v12 = vld [vmem:[%s775_s4 + $0x20] sm:$0xff]   ;;  %v624_v15 = vld [vmem:[%s775_s4 + $0x18] sm:$0xff]   ;;  %v475_v20 = vunpack.c.l.bf16 %v603_v10  ;;  %v455_v21 = vunpack.c.l.bf16 %v608_v11  ;;  %v476_v26 = vunpack.c.h.bf16 %v603_v10  ;;  %v646_v27 = vld [vmem:[%s775_s4 + $0x10] sm:$0xff]   ;;  %v456_v31 = vunpack.c.h.bf16 %v608_v11 }
   0x6   :  { %504 = vmatmul.mubr.msk.bf16.vlgmr.msra.gmra.mxu0 %vm85_vm0, %v524_v3  ;;  %512 = vmatmul.mubr.msk.bf16.vlgmr.msra.gmra.mxu1 %vm85_vm0, %v525_v4  ;;  %v618_v13 = vld [vmem:[%s776_s2] ss:$0 sm:$0xff]  ;;  %v629_v16 = vld [vmem:[%s775_s4 + $0x38] sm:$0xff]   ;;  %v471_v22 = vunpack.c.l.bf16 %v613_v12  ;;  %v651_v28 = vld [vmem:[%s775_s4 + $0x30] sm:$0xff]   ;;  %v472_v32 = vunpack.c.h.bf16 %v613_v12  ;;  %v467_v33 = vunpack.c.l.bf16 %v624_v15  ;;  %v463_v41 = vunpack.c.l.bf16 %v646_v27 }
   0x7   :  { %507 = vmatprep.mubr.msk.bf16.mxu0 %vm85_vm0, %v526_v5  ;;  %515 = vmatprep.mubr.msk.bf16.mxu1 %vm85_vm0, %v527_v6  ;;  %v634_v18 = vld [vmem:[%s777_s3] ss:$0 sm:$0xff]  ;;  %v483_v34 = vunpack.c.l.bf16 %v629_v16  ;;  %v479_v42 = vunpack.c.l.bf16 %v651_v28  ;;  %v468_v43 = vunpack.c.h.bf16 %v624_v15  ;;  %v484_v44 = vunpack.c.h.bf16 %v629_v16 }
   0x8   :  { %v464_v53 = vunpack.c.h.bf16 %v646_v27  ;;  %v480_v54 = vunpack.c.h.bf16 %v651_v28 }
   0xe   :  { %508 = vmatmul.mubr.msk.bf16.gmra.mxu0 %vm85_vm0, %v528_v7  ;;  %516 = vmatmul.mubr.msk.bf16.gmra.mxu1 %vm85_vm0, %v529_v8 }
  0xc6   :  { %v505_v17 = vpop.f32.mrf.mxu0  ;;  %v513_v19 = vpop.f32.mrf.mxu1 }
  0xc7   :  { %v216_v24 = vmul.f32 %v505_v17, %v618_v13  ;;  %v224_v25 = vmul.f32 %v513_v19, %v618_v13 }
  0xc8   :  { %v144_v29 = vpop.f32.mrf.mxu0  ;;  %v176_v30 = vpop.f32.mrf.mxu1 }
  0xc9   :  { %v239_v35 = vadd.f32 %v634_v18, %v216_v24  ;;  %v247_v36 = vadd.f32 %v634_v18, %v224_v25  ;;  %v214_v37 = vmul.f32 %v618_v13, %v144_v29  ;;  %v222_v38 = vmul.f32 %v618_v13, %v176_v30 }
  0xca   :  { %v506_v39 = vpop.f32.mrf.mxu0  ;;  %v514_v40 = vpop.f32.mrf.mxu1 }
  0xcb   :  { %v287_v45 = vadd.f32 %v459_v14, %v239_v35  ;;  %v295_v46 = vadd.f32 %v475_v20, %v247_v36  ;;  %v237_v47 = vadd.f32 %v634_v18, %v214_v37  ;;  %v245_v48 = vadd.f32 %v634_v18, %v222_v38 }
  0xcc   :  { %v217_v49 = vmul.f32 %v506_v39, %v618_v13  ;;  %v225_v50 = vmul.f32 %v514_v40, %v618_v13  ;;  %v147_v51 = vpop.f32.mrf.mxu0  ;;  %v179_v52 = vpop.f32.mrf.mxu1 }
  0xcd   :  { %v303_v55 = vmax.f32 %v287_v45, 0.0  ;;  %v311_v56 = vmax.f32 %v295_v46, 0.0  ;;  %v285_v57 = vadd.f32 %v455_v21, %v237_v47  ;;  %v293_v58 = vadd.f32 %v471_v22, %v245_v48 }
  0xce   :  { %v240_v59 = vadd.f32 %v634_v18, %v217_v49  ;;  %v248_v60 = vadd.f32 %v634_v18, %v225_v50  ;;  %v215_v61 = vmul.f32 %v618_v13, %v147_v51  ;;  %v223_v62 = vmul.f32 %v618_v13, %v179_v52  ;;  %v509_v63 = vpop.f32.mrf.mxu0  ;;  %v517_v0 = vpop.f32.mrf.mxu1 }
  0xcf   :  { %v439_v1 = vpack.c.bf16 %v303_v55, %v303_v55  ;;  %v447_v2 = vpack.c.bf16 %v311_v56, %v311_v56  ;;  %v301_v3 = vmax.f32 %v285_v57, 0.0  ;;  %v309_v4 = vmax.f32 %v293_v58, 0.0 }
  0xd0   :  { %v288_v5 = vadd.f32 %v460_v23, %v240_v59  ;;  %v296_v6 = vadd.f32 %v476_v26, %v248_v60  ;;  %v238_v7 = vadd.f32 %v634_v18, %v215_v61  ;;  %v246_v8 = vadd.f32 %v634_v18, %v223_v62  ;;  %v160_v9 = vpop.f32.mrf.mxu0  ;;  %v192_v10 = vpop.f32.mrf.mxu1 }
  0xd1   :  { %384 = vst.msk [vmem:[%s778_s5 + $0x8] sm:$0xf] %vm381_vm1, %v439_v1  ;;  %392 = vst.msk [vmem:[%s778_s5 + $0x28] sm:$0xf] %vm381_vm1, %v447_v2  ;;  %v437_v11 = vpack.c.bf16 %v301_v3, %v301_v3  ;;  %v445_v12 = vpack.c.bf16 %v309_v4, %v309_v4  ;;  %v220_v14 = vmul.f32 %v509_v63, %v618_v13 }
  0xd2   :  { %v228_v17 = vmul.f32 %v517_v0, %v618_v13  ;;  %v304_v19 = vmax.f32 %v288_v5, 0.0  ;;  %v312_v20 = vmax.f32 %v296_v6, 0.0  ;;  %v286_v21 = vadd.f32 %v456_v31, %v238_v7  ;;  %v510_v23 = vpop.f32.mrf.mxu0  ;;  %v518_v24 = vpop.f32.mrf.mxu1 }
  0xd3   :  { %v294_v22 = vadd.f32 %v472_v32, %v246_v8  ;;  %382 = vst.msk [vmem:[%s778_s5] sm:$0xf] %vm381_vm1, %v437_v11  ;;  %390 = vst.msk [vmem:[%s778_s5 + $0x20] sm:$0xf] %vm381_vm1, %v445_v12  ;;  %v243_v25 = vadd.f32 %v634_v18, %v220_v14  ;;  %v218_v29 = vmul.f32 %v618_v13, %v160_v9 }
  0xd4   :  { %v251_v26 = vadd.f32 %v634_v18, %v228_v17  ;;  %v226_v30 = vmul.f32 %v618_v13, %v192_v10  ;;  %v440_v31 = vpack.c.bf16 %v304_v19, %v304_v19  ;;  %v448_v32 = vpack.c.bf16 %v312_v20, %v312_v20  ;;  %v163_v45 = vpop.f32.mrf.mxu0  ;;  %v195_v46 = vpop.f32.mrf.mxu1 }
  0xd5   :  { %v302_v35 = vmax.f32 %v286_v21, 0.0  ;;  %v310_v36 = vmax.f32 %v294_v22, 0.0  ;;  %v291_v37 = vadd.f32 %v467_v33, %v243_v25  ;;  %v241_v39 = vadd.f32 %v634_v18, %v218_v29 }
  0xd6   :  { %v299_v38 = vadd.f32 %v483_v34, %v251_v26  ;;  %v249_v40 = vadd.f32 %v634_v18, %v226_v30  ;;  %385 = vst.msk [vmem:[%s778_s5 + $0xc] sm:$0xf] %vm381_vm1, %v440_v31  ;;  %393 = vst.msk [vmem:[%s778_s5 + $0x2c] sm:$0xf] %vm381_vm1, %v448_v32  ;;  %v221_v34 = vmul.f32 %v510_v23, %v618_v13 }
  0xd7   :  { %v438_v33 = vpack.c.bf16 %v302_v35, %v302_v35  ;;  %v446_v47 = vpack.c.bf16 %v310_v36, %v310_v36  ;;  %v229_v48 = vmul.f32 %v518_v24, %v618_v13  ;;  %v307_v49 = vmax.f32 %v291_v37, 0.0 }
  0xd8   :  { %v315_v50 = vmax.f32 %v299_v38, 0.0  ;;  %v289_v51 = vadd.f32 %v463_v41, %v241_v39  ;;  %v297_v52 = vadd.f32 %v479_v42, %v249_v40  ;;  %v244_v55 = vadd.f32 %v634_v18, %v221_v34 }
  0xd9   :  { %383 = vst.msk [vmem:[%s778_s5 + $0x4] sm:$0xf] %vm381_vm1, %v438_v33  ;;  %391 = vst.msk [vmem:[%s778_s5 + $0x24] sm:$0xf] %vm381_vm1, %v446_v47  ;;  %v252_v56 = vadd.f32 %v634_v18, %v229_v48  ;;  %v219_v57 = vmul.f32 %v618_v13, %v163_v45  ;;  %v227_v41 = vmul.f32 %v618_v13, %v195_v46 }
  0xda   :  { %v443_v58 = vpack.c.bf16 %v307_v49, %v307_v49  ;;  %v451_v42 = vpack.c.bf16 %v315_v50, %v315_v50  ;;  %v305_v59 = vmax.f32 %v289_v51, 0.0  ;;  %v313_v60 = vmax.f32 %v297_v52, 0.0 }
  0xdb   :  { %v292_v61 = vadd.f32 %v468_v43, %v244_v55  ;;  %v300_v62 = vadd.f32 %v484_v44, %v252_v56  ;;  %v242_v63 = vadd.f32 %v634_v18, %v219_v57  ;;  %v250_v0 = vadd.f32 %v634_v18, %v227_v41 }
  0xdc   :  { %388 = vst.msk [vmem:[%s778_s5 + $0x18] sm:$0xf] %vm381_vm1, %v443_v58  ;;  %396 = vst.msk [vmem:[%s778_s5 + $0x38] sm:$0xf] %vm381_vm1, %v451_v42  ;;  %v441_v13 = vpack.c.bf16 %v305_v59, %v305_v59  ;;  %v449_v15 = vpack.c.bf16 %v313_v60, %v313_v60 }
  0xdd   :  { %v308_v43 = vmax.f32 %v292_v61, 0.0  ;;  %v316_v1 = vmax.f32 %v300_v62, 0.0  ;;  %v290_v16 = vadd.f32 %v464_v53, %v242_v63  ;;  %v298_v18 = vadd.f32 %v480_v54, %v250_v0 }
  0xde   :  { %386 = vst.msk [vmem:[%s778_s5 + $0x10] sm:$0xf] %vm381_vm1, %v441_v13  ;;  %394 = vst.msk [vmem:[%s778_s5 + $0x30] sm:$0xf] %vm381_vm1, %v449_v15 }
  0xdf   :  { %v444_v44 = vpack.c.bf16 %v308_v43, %v308_v43  ;;  %v452_v2 = vpack.c.bf16 %v316_v1, %v316_v1  ;;  %v306_v3 = vmax.f32 %v290_v16, 0.0  ;;  %v314_v4 = vmax.f32 %v298_v18, 0.0 }
  0xe1   :  { %389 = vst.msk [vmem:[%s778_s5 + $0x1c] sm:$0xf] %vm381_vm1, %v444_v44  ;;  %397 = vst.msk [vmem:[%s778_s5 + $0x3c] sm:$0xf] %vm381_vm1, %v452_v2  ;;  %v442_v27 = vpack.c.bf16 %v306_v3, %v306_v3  ;;  %v450_v28 = vpack.c.bf16 %v314_v4, %v314_v4 }
  0xe3   :  { %387 = vst.msk [vmem:[%s778_s5 + $0x14] sm:$0xf] %vm381_vm1, %v442_v27  ;;  %395 = vst.msk [vmem:[%s778_s5 + $0x34] sm:$0xf] %vm381_vm1, %v450_v28 }

// kernel: _lambda_.29
= control target key start
LH: loop header
LB: loop body
LE: loop exit
PB: predicated region body
PF: predicated region fallthrough
CT: control target
= control target key end

     0   :  { %s1142_s15 = smov 0   ;;  %s1144_s16 = smov 0   ;;  %s1262_s0 = inlined_call_operand.vmem [shape: bf16[2,96,64], index: 0, kind: input, shape index: {}]   ;;  %s1263_s1 = inlined_call_operand.vmem [shape: bf16[3,64,32], index: 1, kind: input, shape index: {}]   ;;  %s1264_s2 = inlined_call_operand.vmem [shape: f32[1,32], index: 2, kind: input, shape index: {}]   ;;  %s1265_s3 = inlined_call_operand.vmem [shape: f32[1,32], index: 3, kind: input, shape index: {}]   ;;  %s1266_s4 = inlined_call_operand.vmem [shape: bf16[2,64,32], index: 4, kind: output, shape index: {}]  }
   0x1   :  { %s1146_s17 = smov 0  }
   0x2 LB: > { %s33_s18 = sadd.s32 1, %s1111_s16  ;;  %p893_p0 = scmp.ge.s32.totalorder %s1115_s17, 1  ;;  %s1115_s17 = sphi %s1146_s17, %s14_s17   ;;  %s1111_s16 = sphi %s1144_s16, %s1268_s16   ;;  %s1107_s15 = sphi %s1142_s15, %s1267_s15  }
   0x3   : > { %p35_p1 = scmp.ge.s32.totalorder %s33_s18, 2  ;;  %p210_p2 = scmp.lt.s32.totalorder %s1115_s17, 3 }
   0x5   : > { %s1270_s18 = smov (%p35_p1, %s33_s18), 0  ;;  %p211_p3 = pnand %p893_p0, %p210_p2 }
   0x6   : > { %p253_p4 = scmp.lt.s32.totalorder (!%p211_p3), %s1107_s15, 1 }
   0x7   : > { %214 = sbr.rel (%p211_p3) target bundleno = 256 (0x100), region = 36 }
   0xc   : > { %v1072_v0 = vld [vmem:[%s1263_s1 + $0x38] sm:$0xff]   ;;  %v1074_v2 = vld [vmem:[%s1263_s1 + $0x30] sm:$0xff]   ;;  %s1272_s15 = smov (!%p253_p4, %s1107_s15), 1  ;;  %v1076_v4 = vld [vmem:[%s1263_s1 + $0x28] sm:$0xff]   ;;  %vm353_vm0 = vcmask 523264   ;;  %vm744_vm1 = vcmask 257024  }
   0xd   : > { %v1073_v1 = vld [vmem:[%s1263_s1 + $0x18] sm:$0xff]   ;;  %991 = vmatprep.subr.bf16.mxu0 %v1072_v0  ;;  %v1075_v3 = vld [vmem:[%s1263_s1 + $0x10] sm:$0xff]   ;;  %s1047_s29 = smul.u32 48, %s1272_s15  ;;  %v1077_v5 = vld [vmem:[%s1263_s1 + $0x8] sm:$0xff]  }
   0xe   : > { %1007 = vmatprep.subr.bf16.mxu1 %v1073_v1  ;;  %992 = vmatpush3.bf16.msra.mxu0 %v1072_v0  ;;  %v1078_v6 = vld [vmem:[%s1263_s1 + $0x20] sm:$0xff]   ;;  %v1083_v10 = vld [vmem:[%s1263_s1 + $0x58] sm:$0xff]   ;;  %v1084_v12 = vld [vmem:[%s1263_s1 + $0x50] sm:$0xff]  }
   0xf   : > { %1008 = vmatpush3.bf16.msra.mxu1 %v1073_v1  ;;  %993 = vmatprep.subr.bf16.mxu0 %v1074_v2  ;;  %s1187_s10 = scalar_lea.vmem %s1262_s0, %s1047_s29  ;;  %v1079_v7 = vld [vmem:[%s1263_s1] sm:$0xff]   ;;  %v1087_v14 = vld [vmem:[%s1263_s1 + $0x48] sm:$0xff]   ;;  %s958_s29 = sshll.u32 %s1272_s15, 5 }
  0x10   : > { %1009 = vmatprep.subr.bf16.mxu1 %v1075_v3  ;;  %v1080_v8 = vld [vmem:[%s1187_s10 + $0x8] sm:$0xff]   ;;  %v1081_v9 = vld [vmem:[%s1187_s10] sm:$0xff]   ;;  %v1082_v11 = vld [vmem:[%s1187_s10 + $0x10] sm:$0xff]   ;;  %s1235_s6 = scalar_lea.vmem %s1266_s4, %s958_s29 }
  0x11   : > { %999 = vmatprep.mubr.msk.bf16.mxu0 %vm353_vm0, %v1080_v8  ;;  %1015 = vmatprep.mubr.msk.bf16.mxu1 %vm353_vm0, %v1081_v9  ;;  %v1085_v13 = vld [vmem:[%s1187_s10 + $0x18] sm:$0xff]   ;;  %v1086_v15 = vld [vmem:[%s1187_s10 + $0x20] sm:$0xff]   ;;  %v1089_v17 = vld [vmem:[%s1187_s10 + $0x10] sm:$0xff]  }
  0x12   : > { %994 = vmatpush3.bf16.msra.mxu0 %v1074_v2  ;;  %v1088_v16 = vld [vmem:[%s1263_s1 + $0x40] sm:$0xff]   ;;  %v1091_v19 = vld [vmem:[%s1187_s10 + $0x18] sm:$0xff]   ;;  %v1092_v20 = vld [vmem:[%s1187_s10 + $0x28] sm:$0xff]  }
  0x13   : > { %1010 = vmatpush3.bf16.msra.mxu1 %v1075_v3  ;;  %995 = vmatprep.subr.bf16.mxu0 %v1076_v4  ;;  %v1090_v18 = vld [vmem:[%s1187_s10 + $0x20] sm:$0xff]  }
  0x14   : > { %1011 = vmatprep.subr.bf16.mxu1 %v1077_v5  ;;  %v946_v40 = vld [vmem:[%s1264_s2] ss:$0 sm:$0xff] }
  0x15   : > { %v947_v45 = vld [vmem:[%s1265_s3] ss:$0 sm:$0xff] }
  0x16   : > { %996 = vmatpush3.bf16.msra.mxu0 %v1076_v4 }
  0x17   : > { %1012 = vmatpush3.bf16.msra.mxu1 %v1077_v5  ;;  %997 = vmatprep.subr.bf16.mxu0 %v1078_v6 }
  0x18   : > { %1013 = vmatprep.subr.bf16.mxu1 %v1079_v7 }
  0x1a   : > { %998 = vmatpush3.bf16.msra.mxu0 %v1078_v6 }
  0x1b   : > { %1014 = vmatpush3.bf16.msra.mxu1 %v1079_v7  ;;  %1023 = vmatprep.subr.bf16.mxu0 %v1083_v10 }
  0x1c   : > { %1039 = vmatprep.subr.bf16.mxu1 %v1083_v10 }
  0x1d   : > { %1000 = vmatmul.mubr.msk.bf16.vlgmr.msra.gmra.mxu0 %vm353_vm0, %v1082_v11 }
  0x1e   : > { %1016 = vmatmul.mubr.msk.bf16.vlgmr.msra.gmra.mxu1 %vm353_vm0, %v1080_v8  ;;  %1024 = vmatpush3.bf16.msra.mxu0 %v1083_v10 }
  0x1f   : > { %1043 = vmatpush3.bf16.msra.mxu1 %v1083_v10  ;;  %1025 = vmatprep.subr.bf16.mxu0 %v1084_v12 }
  0x20   : > { %1040 = vmatprep.subr.bf16.mxu1 %v1084_v12  ;;  %1003 = vmatprep.mubr.msk.bf16.mxu0 %vm353_vm0, %v1085_v13 }
  0x21   : > { %1019 = vmatprep.mubr.msk.bf16.mxu1 %vm353_vm0, %v1082_v11 }
  0x22   : > { %1026 = vmatpush3.bf16.msra.mxu0 %v1084_v12 }
  0x23   : > { %1044 = vmatpush3.bf16.msra.mxu1 %v1084_v12  ;;  %1027 = vmatprep.subr.bf16.mxu0 %v1087_v14 }
  0x24   : > { %1041 = vmatprep.subr.bf16.mxu1 %v1087_v14 }
  0x25   : > { %1004 = vmatmul.mubr.msk.bf16.gmra.mxu0 %vm353_vm0, %v1086_v15 }
  0x26   : > { %1020 = vmatmul.mubr.msk.bf16.gmra.mxu1 %vm353_vm0, %v1085_v13  ;;  %1028 = vmatpush3.bf16.msra.mxu0 %v1087_v14 }
  0x27   : > { %1045 = vmatpush3.bf16.msra.mxu1 %v1087_v14  ;;  %1029 = vmatprep.subr.bf16.mxu0 %v1088_v16 }
  0x28   : > { %1042 = vmatprep.subr.bf16.mxu1 %v1088_v16  ;;  %1031 = vmatprep.mubr.msk.bf16.mxu0 %vm353_vm0, %v1089_v17 }
  0x29   : > { %1035 = vmatprep.mubr.msk.bf16.mxu1 %vm353_vm0, %v1090_v18 }
  0x2a   : > { %1030 = vmatpush3.bf16.msra.mxu0 %v1088_v16 }
  0x2b   : > { %1046 = vmatpush3.bf16.msra.mxu1 %v1088_v16 }
  0x2d   : > { %1032 = vmatmul.mubr.msk.bf16.vlgmr.msra.gmra.mxu0 %vm353_vm0, %v1091_v19 }
  0x2e   : > { %1036 = vmatmul.mubr.msk.bf16.vlgmr.msra.gmra.mxu1 %vm353_vm0, %v1092_v20 }
  0xdd   : > { %v1001_v21 = vpop.f32.mrf.mxu0 }
  0xde   : > { %v1017_v22 = vpop.f32.mrf.mxu1 }
  0xdf   : > { %v400_v23 = vpop.f32.mrf.mxu0  ;;  %v506_v36 = vadd.f32 %v1017_v22, %v1001_v21 }
  0xe0   : > { %v497_v24 = vpop.f32.mrf.mxu1 }
  0xe1   : > { %v1002_v25 = vpop.f32.mrf.mxu0  ;;  %v498_v41 = vadd.f32 %v497_v24, %v400_v23 }
  0xe2   : > { %v1018_v26 = vpop.f32.mrf.mxu1 }
  0xe3   : > { %v403_v27 = vpop.f32.mrf.mxu0  ;;  %v509_v48 = vadd.f32 %v1018_v26, %v1002_v25 }
  0xe4   : > { %v500_v28 = vpop.f32.mrf.mxu1 }
  0xe5   : > { %v1005_v29 = vpop.f32.mrf.mxu0  ;;  %v501_v56 = vadd.f32 %v500_v28, %v403_v27 }
  0xe6   : > { %v1021_v30 = vpop.f32.mrf.mxu1 }
  0xe7   : > { %v416_v31 = vpop.f32.mrf.mxu0  ;;  %v522_v38 = vadd.f32 %v1021_v30, %v1005_v29 }
  0xe8   : > { %v513_v32 = vpop.f32.mrf.mxu1 }
  0xe9   : > { %v1006_v33 = vpop.f32.mrf.mxu0  ;;  %v514_v44 = vadd.f32 %v513_v32, %v416_v31 }
  0xea   : > { %v1022_v34 = vpop.f32.mrf.mxu1 }
  0xeb   : > { %v419_v35 = vpop.f32.mrf.mxu0  ;;  %v525_v52 = vadd.f32 %v1022_v34, %v1006_v33 }
  0xec   : > { %v516_v37 = vpop.f32.mrf.mxu1 }
  0xed   : > { %v1033_v39 = vpop.f32.mrf.mxu0  ;;  %v517_v61 = vadd.f32 %v516_v37, %v419_v35 }
  0xee   : > { %v668_v42 = vadd.f32 %v1033_v39, %v506_v36  ;;  %v1037_v43 = vpop.f32.mrf.mxu1 }
  0xef   : > { %v672_v46 = vadd.f32 %v1037_v43, %v522_v38  ;;  %v635_v47 = vpop.f32.mrf.mxu0 }
  0xf0   : > { %v683_v49 = vmul.f32 %v946_v40, %v668_v42  ;;  %v666_v50 = vadd.f32 %v635_v47, %v498_v41  ;;  %v651_v51 = vpop.f32.mrf.mxu1 }
  0xf1   : > { %v687_v53 = vmul.f32 %v946_v40, %v672_v46  ;;  %v670_v54 = vadd.f32 %v651_v51, %v514_v44  ;;  %v1034_v55 = vpop.f32.mrf.mxu0 }
  0xf2   : > { %v698_v57 = vadd.f32 %v947_v45, %v683_v49  ;;  %v681_v58 = vmul.f32 %v946_v40, %v666_v50  ;;  %v669_v59 = vadd.f32 %v1034_v55, %v509_v48  ;;  %v1038_v60 = vpop.f32.mrf.mxu1 }
  0xf3   : > { %v702_v62 = vadd.f32 %v947_v45, %v687_v53  ;;  %v685_v63 = vmul.f32 %v946_v40, %v670_v54  ;;  %v673_v0 = vadd.f32 %v1038_v60, %v525_v52  ;;  %v638_v1 = vpop.f32.mrf.mxu0 }
  0xf4   : > { %v706_v2 = vmax.f32 %v698_v57, 0.0  ;;  %v696_v3 = vadd.f32 %v947_v45, %v681_v58  ;;  %v684_v4 = vmul.f32 %v946_v40, %v669_v59  ;;  %v667_v5 = vadd.f32 %v638_v1, %v501_v56  ;;  %v654_v6 = vpop.f32.mrf.mxu1 }
  0xf5   : > { %v710_v7 = vmax.f32 %v702_v62, 0.0  ;;  %v700_v8 = vadd.f32 %v947_v45, %v685_v63  ;;  %v688_v9 = vmul.f32 %v946_v40, %v673_v0  ;;  %v671_v10 = vadd.f32 %v654_v6, %v517_v61 }
  0xf6   : > { %v961_v11 = vpack.c.bf16 %v706_v2, %v706_v2  ;;  %v704_v12 = vmax.f32 %v696_v3, 0.0  ;;  %v699_v13 = vadd.f32 %v947_v45, %v684_v4  ;;  %v682_v14 = vmul.f32 %v946_v40, %v667_v5 }
  0xf7   : > { %v965_v15 = vpack.c.bf16 %v710_v7, %v710_v7  ;;  %v708_v16 = vmax.f32 %v700_v8, 0.0  ;;  %v703_v17 = vadd.f32 %v947_v45, %v688_v9  ;;  %v686_v18 = vmul.f32 %v946_v40, %v671_v10 }
  0xf8   : > { %747 = vst.msk [vmem:[%s1235_s6 + $0x8] sm:$0xf] %vm744_vm1, %v961_v11  ;;  %v959_v19 = vpack.c.bf16 %v704_v12, %v704_v12  ;;  %v707_v20 = vmax.f32 %v699_v13, 0.0  ;;  %v697_v21 = vadd.f32 %v947_v45, %v682_v14 }
  0xf9   : > { %751 = vst.msk [vmem:[%s1235_s6 + $0x18] sm:$0xf] %vm744_vm1, %v965_v15  ;;  %v963_v22 = vpack.c.bf16 %v708_v16, %v708_v16  ;;  %v711_v23 = vmax.f32 %v703_v17, 0.0  ;;  %v701_v24 = vadd.f32 %v947_v45, %v686_v18 }
  0xfa   : > { %745 = vst.msk [vmem:[%s1235_s6] sm:$0xf] %vm744_vm1, %v959_v19  ;;  %v962_v25 = vpack.c.bf16 %v707_v20, %v707_v20  ;;  %v705_v26 = vmax.f32 %v697_v21, 0.0 }
  0xfb   : > { %749 = vst.msk [vmem:[%s1235_s6 + $0x10] sm:$0xf] %vm744_vm1, %v963_v22  ;;  %v966_v27 = vpack.c.bf16 %v711_v23, %v711_v23  ;;  %v709_v28 = vmax.f32 %v701_v24, 0.0 }
  0xfc   : > { %748 = vst.msk [vmem:[%s1235_s6 + $0xc] sm:$0xf] %vm744_vm1, %v962_v25  ;;  %v960_v29 = vpack.c.bf16 %v705_v26, %v705_v26 }
  0xfd   : > { %752 = vst.msk [vmem:[%s1235_s6 + $0x1c] sm:$0xf] %vm744_vm1, %v966_v27  ;;  %v964_v30 = vpack.c.bf16 %v709_v28, %v709_v28 }
  0xfe   : > { %746 = vst.msk [vmem:[%s1235_s6 + $0x4] sm:$0xf] %vm744_vm1, %v960_v29 }
  0xff   : > { %750 = vst.msk [vmem:[%s1235_s6 + $0x14] sm:$0xf] %vm744_vm1, %v964_v30 }
 0x100 PF: > { %s14_s17 = sadd.s32 1, %s1115_s17   ;;  %s1267_s15 = smov %s1111_s16 }
 0x101   : > { %p11_p5 = scmp.ge.s32.totalorder %s14_s17, 4   ;;  %s1268_s16 = smov %s1270_s18 }
 0x103   :  { %13 = sbr.rel (!%p11_p5) target bundleno = 2 (0x2), region = 77 }

// kernel: _lambda_.30
= control target key start
LH: loop header
LB: loop body
LE: loop exit
PB: predicated region body
PF: predicated region fallthrough
CT: control target
= control target key end

     0   :  { %s1338_s15 = smov 0   ;;  %s1340_s16 = smov 0   ;;  %s1492_s0 = inlined_call_operand.vmem [shape: bf16[8,36,32], index: 0, kind: input, shape index: {}]   ;;  %s1493_s1 = inlined_call_operand.vmem [shape: bf16[9,32,32], index: 1, kind: input, shape index: {}]   ;;  %s1494_s2 = inlined_call_operand.vmem [shape: f32[1,32], index: 2, kind: input, shape index: {}]   ;;  %s1495_s3 = inlined_call_operand.vmem [shape: f32[1,32], index: 3, kind: input, shape index: {}]   ;;  %s1496_s4 = inlined_call_operand.vmem [shape: bf16[8,6,32], index: 4, kind: output, shape index: {}]  }
   0x1   :  { %s1342_s17 = smov 0  }
   0x2 LB: > { %s33_s18 = sadd.s32 1, %s1305_s16  ;;  %p1061_p0 = scmp.ge.s32.totalorder %s1309_s17, 1  ;;  %s1309_s17 = sphi %s1342_s17, %s14_s17   ;;  %s1305_s16 = sphi %s1340_s16, %s1498_s16   ;;  %s1301_s15 = sphi %s1338_s15, %s1497_s15  }
   0x3   : > { %p35_p1 = scmp.ge.s32.totalorder %s33_s18, 8  ;;  %p210_p2 = scmp.lt.s32.totalorder %s1309_s17, 9 }
   0x5   : > { %s1500_s18 = smov (%p35_p1, %s33_s18), 0  ;;  %p211_p3 = pnand %p1061_p0, %p210_p2 }
   0x6   : > { %p251_p4 = scmp.lt.s32.totalorder (!%p211_p3), %s1301_s15, 7 }
   0x7   : > { %214 = sbr.rel (%p211_p3) target bundleno = 260 (0x104), region = 36 }
   0xc   : > { %v1261_v0 = vld [vmem:[%s1493_s1 + $0x18] sm:$0xff]   ;;  %v1311_v1 = vmov 0.0   ;;  %v1262_v2 = vld [vmem:[%s1493_s1 + $0x8] sm:$0xff]   ;;  %v1263_v3 = vld [vmem:[%s1493_s1 + $0x10] sm:$0xff]   ;;  %vm1312_vm0 = vmmov 0   ;;  %s1502_s15 = smov (!%p251_p4, %s1301_s15), 7 }
   0xd   : > { %1162 = vmatprep.subr.bf16.mxu0 %v1311_v1  ;;  %1170 = vmatprep.subr.bf16.mxu1 %v1311_v1  ;;  %v1264_v4 = vld [vmem:[%s1493_s1] sm:$0xff]   ;;  %s1234_s27 = smul.u32 20, %s1502_s15  ;;  %vm310_vm1 = vcmask 261120   ;;  %v1267_v5 = vld [vmem:[%s1493_s1 + $0x38] sm:$0xff]   ;;  %v1269_v11 = vld [vmem:[%s1493_s1 + $0x30] sm:$0xff]   ;;  %s1063_s19 = sshll.u32 %s1502_s15, 2 }
   0xe   : > { %1163 = vmatpush3.bf16.msra.mxu0 %v1261_v0  ;;  %1166 = vmatprep.mubr.msk.bf16.mxu0 %vm1312_vm0, %v1311_v1  ;;  %v1266_v15 = vld [vmem:[%s1493_s1 + $0x28] sm:$0xff]   ;;  %v1273_v17 = vld [vmem:[%s1493_s1 + $0x58] sm:$0xff]   ;;  %v1268_v23 = vld [vmem:[%s1493_s1 + $0x20] sm:$0xff]   ;;  %s275_s22 = scalar_lea.vmem %s1496_s4, %s1063_s19  ;;  %vm928_vm2 = vcmask 256000  }
   0xf   : > { %1171 = vmatpush3.bf16.msra.mxu1 %v1262_v2  ;;  %1164 = vmatprep.subr.bf16.mxu0 %v1311_v1  ;;  %s1386_s6 = scalar_lea.vmem %s1492_s0, %s1234_s27  ;;  %v1272_v26 = vld [vmem:[%s1493_s1 + $0x48] sm:$0xff]   ;;  %v1275_v27 = vld [vmem:[%s1493_s1 + $0x50] sm:$0xff]   ;;  %v1279_v36 = vld [vmem:[%s1493_s1 + $0x78] sm:$0xff]  }
  0x10   : > { %1172 = vmatprep.subr.bf16.mxu1 %v1311_v1  ;;  %1174 = vmatprep.mubr.msk.bf16.mxu1 %vm1312_vm0, %v1311_v1  ;;  %v1265_v6 = vld [vmem:[%s1386_s6 + $0x4] ss:$0 sps:$4 sm:$0xff]   ;;  %v277_v7 = vld [vmem:[%s1386_s6] sm:$0x7]  ;;  %v1276_v21 = vld [vmem:[%s1386_s6 + $0xc] sm:$0x1e]  }
  0x11   : > { %v1270_v8 = vld [vmem:[%s1386_s6] ss:$0 sps:$4 sm:$0xff]   ;;  %v292_v9 = vshrl.u32 %v1265_v6, 16  ;;  %v294_v10 = vshll.u32 %v1265_v6, 16  ;;  %v1277_v22 = vld [vmem:[%s1386_s6 + $0x8] sm:$0x1e]  }
  0x12   : > { %1165 = vmatpush3.bf16.msra.mxu0 %v1263_v3  ;;  %v1271_v12 = vld [vmem:[%s1386_s6 + $0x8] ss:$0 sps:$4 sm:$0xee]   ;;  %v421_v13 = vshll.u32 %v1270_v8, 16  ;;  %v419_v16 = vshrl.u32 %v1270_v8, 16  ;;  %v636_v24 = vshrl.u32 %v1277_v22, 16 }
  0x13   : > { %1173 = vmatpush3.bf16.msra.mxu1 %v1264_v4  ;;  %1178 = vmatprep.subr.bf16.mxu0 %v1311_v1  ;;  %v296_v14 = vrot.slane %v294_v10, 1  ;;  %v490_v20 = vrot.slane %v1271_v12, 1  ;;  %v639_v25 = vshll.u32 %v1277_v22, 16  ;;  %v560_v28 = vshrl.u32 %v1276_v21, 16  ;;  %v699_v33 = vld [vmem:[%s1386_s6] sm:$0xe] }
  0x14   : > { %1186 = vmatprep.subr.bf16.mxu1 %v1311_v1  ;;  %v423_v19 = vrot.slane %v421_v13, 1  ;;  %v563_v29 = vshll.u32 %v1276_v21, 16  ;;  %v638_v31 = vrot.slane %v636_v24, 1  ;;  %v700_v34 = vld [vmem:[%s1386_s6 + $0x4] sm:$0x1]  ;;  %v1281_v42 = vld [vmem:[%s1493_s1 + $0x70] sm:$0xff]  }
  0x15   : > { %v297_v18 = vor.u32 %v296_v14, %v292_v9  ;;  %v641_v32 = vrot.slane %v639_v25, 2  ;;  %v562_v37 = vrot.slane %v560_v28, 1  ;;  %v1111_v39 = vcombine.low %v699_v33, %v700_v34  ;;  %v1274_v40 = vld [vmem:[%s1493_s1 + $0x40] sm:$0xff]   ;;  %v1278_v46 = vld [vmem:[%s1493_s1 + $0x68] sm:$0xff]  }
  0x16   : > { %1175 = vmatmul.mubr.msk.bf16.vlgmr.msra.gmra.mxu1 %vm310_vm1, %v277_v7  ;;  %v424_v30 = vor.u32 %v423_v19, %v419_v16  ;;  %v565_v38 = vrot.slane %v563_v29, 2  ;;  %v1283_v41 = vld [vmem:[%s1386_s6 + $0x4] sm:$0x1c]   ;;  %v844_v53 = vld [vmem:[%s1386_s6] sm:$0xc] }
  0x17   : > { %1187 = vmatpush3.bf16.msra.mxu1 %v1267_v5  ;;  %1190 = vmatprep.mubr.msk.bf16.mxu1 %vm1312_vm0, %v1311_v1  ;;  %v642_v35 = vor.u32 %v641_v32, %v638_v31  ;;  %v712_v44 = vshrl.u32 %v1111_v39, 16  ;;  %v715_v45 = vshll.u32 %v1111_v39, 16  ;;  %v787_v47 = vrot.slane %v1283_v41, 2  ;;  %v1280_v50 = vld [vmem:[%s1493_s1 + $0x60] sm:$0xff]   ;;  %v1284_v52 = vld [vmem:[%s1493_s1 + $0x88] sm:$0xff]  }
  0x18   : > { %1188 = vmatprep.subr.bf16.mxu1 %v1311_v1  ;;  %1167 = vmatmul.mubr.msk.bf16.vlgmr.msra.gmra.mxu0 %vm310_vm1, %v297_v18  ;;  %v566_v43 = vor.u32 %v565_v38, %v562_v37  ;;  %v1127_v54 = vcombine.low %v844_v53, %v700_v34  ;;  %v1285_v55 = vld [vmem:[%s1493_s1 + $0x80] sm:$0xff]  }
  0x19   : > { %1179 = vmatpush3.bf16.msra.mxu0 %v1266_v15  ;;  %1182 = vmatprep.mubr.msk.bf16.mxu0 %vm1312_vm0, %v1311_v1  ;;  %v714_v48 = vrot.slane %v712_v44, 1  ;;  %v717_v49 = vrot.slane %v715_v45, 2  ;;  %v1131_v33 = vld [vmem:[%s1494_s2] ss:$0 sm:$0xff] }
  0x1a   : > { %1180 = vmatprep.subr.bf16.mxu0 %v1311_v1  ;;  %v853_v56 = vrot.slane %v1127_v54, 2 }
  0x1b   : > { %1189 = vmatpush3.bf16.msra.mxu1 %v1269_v11  ;;  %v718_v51 = vor.u32 %v717_v49, %v714_v48 }
  0x1c   : > { %1202 = vmatprep.subr.bf16.mxu1 %v1311_v1 }
  0x1d   : > { %1181 = vmatpush3.bf16.msra.mxu0 %v1268_v23 }
  0x1e   : > { %1191 = vmatmul.mubr.msk.bf16.vlgmr.msra.gmra.mxu1 %vm310_vm1, %v490_v20  ;;  %1194 = vmatprep.subr.bf16.mxu0 %v1311_v1 }
  0x1f   : > { %1203 = vmatpush3.bf16.msra.mxu1 %v1273_v17  ;;  %1206 = vmatprep.mubr.msk.bf16.mxu1 %vm1312_vm0, %v1311_v1 }
  0x20   : > { %1204 = vmatprep.subr.bf16.mxu1 %v1311_v1  ;;  %1183 = vmatmul.mubr.msk.bf16.vlgmr.msra.gmra.mxu0 %vm310_vm1, %v424_v30 }
  0x21   : > { %1195 = vmatpush3.bf16.msra.mxu0 %v1272_v26  ;;  %1198 = vmatprep.mubr.msk.bf16.mxu0 %vm1312_vm0, %v1311_v1 }
  0x22   : > { %1196 = vmatprep.subr.bf16.mxu0 %v1311_v1 }
  0x23   : > { %1205 = vmatpush3.bf16.msra.mxu1 %v1275_v27 }
  0x24   : > { %1218 = vmatprep.subr.bf16.mxu1 %v1311_v1 }
  0x25   : > { %1197 = vmatpush3.bf16.msra.mxu0 %v1274_v40 }
  0x26   : > { %1207 = vmatmul.mubr.msk.bf16.vlgmr.msra.gmra.mxu1 %vm310_vm1, %v642_v35  ;;  %1210 = vmatprep.subr.bf16.mxu0 %v1311_v1  ;;  %v1132_v35 = vld [vmem:[%s1495_s3] ss:$0 sm:$0xff] }
  0x27   : > { %1219 = vmatpush3.bf16.msra.mxu1 %v1279_v36  ;;  %1222 = vmatprep.mubr.msk.bf16.mxu1 %vm1312_vm0, %v1311_v1 }
  0x28   : > { %1220 = vmatprep.subr.bf16.mxu1 %v1311_v1  ;;  %1199 = vmatmul.mubr.msk.bf16.vlgmr.msra.gmra.mxu0 %vm310_vm1, %v566_v43 }
  0x29   : > { %1211 = vmatpush3.bf16.msra.mxu0 %v1278_v46  ;;  %1214 = vmatprep.mubr.msk.bf16.mxu0 %vm1312_vm0, %v1311_v1 }
  0x2a   : > { %1212 = vmatprep.subr.bf16.mxu0 %v1311_v1 }
  0x2b   : > { %1221 = vmatpush3.bf16.msra.mxu1 %v1281_v42 }
  0x2d   : > { %1213 = vmatpush3.bf16.msra.mxu0 %v1280_v50 }
  0x2e   : > { %1223 = vmatmul.mubr.msk.bf16.vlgmr.msra.gmra.mxu1 %vm310_vm1, %v787_v47  ;;  %1226 = vmatprep.subr.bf16.mxu0 %v1311_v1 }
  0x30   : > { %1215 = vmatmul.mubr.msk.bf16.vlgmr.msra.gmra.mxu0 %vm310_vm1, %v718_v51 }
  0x31   : > { %1227 = vmatpush3.bf16.msra.mxu0 %v1284_v52  ;;  %1230 = vmatprep.mubr.msk.bf16.mxu0 %vm1312_vm0, %v1311_v1 }
  0x32   : > { %1228 = vmatprep.subr.bf16.mxu0 %v1311_v1 }
  0x35   : > { %1229 = vmatpush3.bf16.msra.mxu0 %v1285_v55 }
  0x38   : > { %1231 = vmatmul.mubr.msk.bf16.vlgmr.msra.gmra.mxu0 %vm310_vm1, %v853_v56 }
  0xd6   : > { %v403_v57 = vpop.f32.mrf.mxu1 }
  0xd8   : > { %v1176_v58 = vpop.f32.mrf.mxu1  ;;  %v348_v61 = vpop.f32.mrf.mxu0 }
  0xd9   : > { %v404_v10 = vadd.f32 %v403_v57, %v348_v61 }
  0xda   : > { %v406_v59 = vpop.f32.mrf.mxu1  ;;  %v1168_v62 = vpop.f32.mrf.mxu0 }
  0xdc   : > { %v1177_v60 = vpop.f32.mrf.mxu1  ;;  %v351_v0 = vpop.f32.mrf.mxu0 }
  0xde   : > { %v540_v63 = vpop.f32.mrf.mxu1  ;;  %v1169_v3 = vpop.f32.mrf.mxu0 }
  0xe0   : > { %v1192_v2 = vpop.f32.mrf.mxu1  ;;  %v474_v5 = vpop.f32.mrf.mxu0 }
  0xe1   : > { %v480_v13 = vadd.f32 %v474_v5, %v404_v10 }
  0xe2   : > { %v543_v4 = vpop.f32.mrf.mxu1  ;;  %v1184_v7 = vpop.f32.mrf.mxu0 }
  0xe3   : > { %v546_v18 = vadd.f32 %v540_v63, %v480_v13 }
  0xe4   : > { %v1193_v6 = vpop.f32.mrf.mxu1  ;;  %v477_v1 = vpop.f32.mrf.mxu0 }
  0xe6   : > { %v692_v8 = vpop.f32.mrf.mxu1  ;;  %v1185_v11 = vpop.f32.mrf.mxu0 }
  0xe8   : > { %v1208_v9 = vpop.f32.mrf.mxu1  ;;  %v616_v14 = vpop.f32.mrf.mxu0 }
  0xe9   : > { %v622_v21 = vadd.f32 %v616_v14, %v546_v18 }
  0xea   : > { %v695_v12 = vpop.f32.mrf.mxu1  ;;  %v1200_v16 = vpop.f32.mrf.mxu0 }
  0xeb   : > { %v698_v26 = vadd.f32 %v692_v8, %v622_v21 }
  0xec   : > { %v1209_v15 = vpop.f32.mrf.mxu1  ;;  %v619_v19 = vpop.f32.mrf.mxu0 }
  0xee   : > { %v837_v17 = vpop.f32.mrf.mxu1  ;;  %v1201_v22 = vpop.f32.mrf.mxu0 }
  0xf0   : > { %v1224_v20 = vpop.f32.mrf.mxu1  ;;  %v768_v24 = vpop.f32.mrf.mxu0 }
  0xf1   : > { %v774_v28 = vadd.f32 %v768_v24, %v698_v26 }
  0xf2   : > { %v840_v23 = vpop.f32.mrf.mxu1  ;;  %v1216_v27 = vpop.f32.mrf.mxu0 }
  0xf3   : > { %v843_v31 = vadd.f32 %v837_v17, %v774_v28 }
  0xf4   : > { %v1225_v25 = vpop.f32.mrf.mxu1  ;;  %v771_v29 = vpop.f32.mrf.mxu0 }
  0xf6   : > { %v1217_v30 = vpop.f32.mrf.mxu0 }
  0xf8   : > { %v903_v32 = vpop.f32.mrf.mxu0 }
  0xf9   : > { %v909_v34 = vadd.f32 %v903_v32, %v843_v31 }
  0xfa   : > { %v1232_v36 = vpop.f32.mrf.mxu0 }
  0xfb   : > { %v917_v37 = vmul.f32 %v1131_v33, %v909_v34 }
  0xfc   : > { %v906_v38 = vpop.f32.mrf.mxu0 }
  0xfd   : > { %v925_v39 = vadd.f32 %v1132_v35, %v917_v37 }
  0xfe   : > { %v1233_v40 = vpop.f32.mrf.mxu0 }
  0xff   : > { %v926_v41 = vmax.f32 %v925_v39, 0.0 }
 0x101   : > { %v927_v42 = vpack.c.bf16 %v926_v41, %v926_v41 }
 0x103   : > { %929 = vst.msk [vmem:[%s275_s22] sm:$0x7] %vm928_vm2, %v927_v42 }
 0x104 PF: > { %s14_s17 = sadd.s32 1, %s1309_s17   ;;  %s1497_s15 = smov %s1305_s16 }
 0x105   : > { %p11_p5 = scmp.ge.s32.totalorder %s14_s17, 10   ;;  %s1498_s16 = smov %s1500_s18 }
 0x107   :  { %13 = sbr.rel (!%p11_p5) target bundleno = 2 (0x2), region = 83 }

// kernel: _lambda_.28
= control target key start
LH: loop header
LB: loop body
LE: loop exit
PB: predicated region body
PF: predicated region fallthrough
CT: control target
= control target key end

     0   :  { %vm64_vm0 = vcmask 523264   ;;  %s274_s1 = inlined_call_operand.vmem [shape: bf16[1,64,128], index: 1, kind: input, shape index: {}]   ;;  %s275_s0 = inlined_call_operand.vmem [shape: bf16[1,32,64], index: 0, kind: input, shape index: {}]   ;;  %s276_s2 = inlined_call_operand.vmem [shape: f32[1,128], index: 2, kind: input, shape index: {}]   ;;  %s277_s3 = inlined_call_operand.vmem [shape: f32[1,128], index: 3, kind: input, shape index: {}]   ;;  %s278_s4 = inlined_call_operand.vmem [shape: bf16[1,32,128], index: 4, kind: output, shape index: {}]  }
   0x1   :  { %v213_v0 = vld [vmem:[%s274_s1 + $0x18] sm:$0xff]   ;;  %v214_v1 = vld [vmem:[%s274_s1 + $0x10] sm:$0xff]   ;;  %v215_v2 = vld [vmem:[%s274_s1 + $0x8] sm:$0xff]  }
   0x2   :  { %201 = vmatprep.subr.bf16.mxu0 %v213_v0  ;;  %v217_v3 = vld [vmem:[%s275_s0] sm:$0xff]   ;;  %v218_v5 = vld [vmem:[%s275_s0 + $0x8] sm:$0xff]  }
   0x3   :  { %202 = vmatpush3.bf16.msra.mxu0 %v213_v0  ;;  %209 = vmatprep.mubr.msk.bf16.mxu0 %vm64_vm0, %v217_v3  ;;  %v216_v4 = vld [vmem:[%s274_s1] sm:$0xff]  }
   0x4   :  { %203 = vmatprep.subr.bf16.mxu0 %v214_v1  ;;  %v174_v7 = vld [vmem:[%s276_s2] ss:$0 sm:$0xff] }
   0x5   :  { %v175_v10 = vld [vmem:[%s277_s3] ss:$0 sm:$0xff] }
   0x7   :  { %204 = vmatpush3.bf16.msra.mxu0 %v214_v1 }
   0x8   :  { %205 = vmatprep.subr.bf16.mxu0 %v215_v2 }
   0xb   :  { %206 = vmatpush3.bf16.msra.mxu0 %v215_v2 }
   0xc   :  { %207 = vmatprep.subr.bf16.mxu0 %v216_v4 }
   0xf   :  { %208 = vmatpush3.bf16.msra.mxu0 %v216_v4 }
  0x12   :  { %210 = vmatmul.mubr.msk.bf16.vlgmr.msra.gmra.mxu0 %vm64_vm0, %v218_v5 }
  0xd2   :  { %v211_v6 = vpop.f32.mrf.mxu0 }
  0xd3   :  { %v129_v9 = vmul.f32 %v211_v6, %v174_v7 }
  0xd4   :  { %v105_v8 = vpop.f32.mrf.mxu0 }
  0xd5   :  { %v127_v12 = vmul.f32 %v174_v7, %v105_v8  ;;  %v140_v15 = vadd.f32 %v175_v10, %v129_v9 }
  0xd6   :  { %v212_v11 = vpop.f32.mrf.mxu0 }
  0xd7   :  { %v130_v13 = vmul.f32 %v212_v11, %v174_v7  ;;  %v138_v18 = vadd.f32 %v175_v10, %v127_v12 }
  0xd8   :  { %v108_v14 = vpop.f32.mrf.mxu0 }
  0xd9   :  { %v141_v16 = vadd.f32 %v175_v10, %v130_v13  ;;  %v128_v17 = vmul.f32 %v174_v7, %v108_v14 }
  0xdb   :  { %v192_v19 = vpack.c.bf16 %v141_v16, %v140_v15  ;;  %v139_v20 = vadd.f32 %v175_v10, %v128_v17 }
  0xdd   :  { %194 = vst [vmem:[%s278_s4 + $0x8] sm:$0xff] %v192_v19   ;;  %v187_v21 = vpack.c.bf16 %v139_v20, %v138_v18 }
  0xdf   :  { %188 = vst [vmem:[%s278_s4] sm:$0xff] %v187_v21  }

// kernel: _lambda_.31
= control target key start
LH: loop header
LB: loop body
LE: loop exit
PB: predicated region body
PF: predicated region fallthrough
CT: control target
= control target key end

     0   :  { %vm51_vm0 = vcmask 261120   ;;  %s281_s1 = inlined_call_operand.vmem [shape: bf16[1,32,128], index: 1, kind: input, shape index: {}]   ;;  %s282_s0 = inlined_call_operand.vmem [shape: bf16[1,32,32], index: 0, kind: input, shape index: {}]   ;;  %s283_s2 = inlined_call_operand.vmem [shape: f32[1,128], index: 2, kind: input, shape index: {}]   ;;  %s284_s3 = inlined_call_operand.vmem [shape: f32[1,128], index: 3, kind: input, shape index: {}]   ;;  %s285_s4 = inlined_call_operand.vmem [shape: bf16[1,32,128], index: 4, kind: input, shape index: {}]   ;;  %s286_s5 = inlined_call_operand.vmem [shape: bf16[1,32,128], index: 5, kind: output, shape index: {}]  }
   0x1   :  { %v217_v0 = vld [vmem:[%s281_s1 + $0x8] sm:$0xff]   ;;  %v218_v1 = vld [vmem:[%s281_s1] sm:$0xff]  }
   0x2   :  { %209 = vmatprep.subr.bf16.mxu0 %v217_v0  ;;  %v219_v2 = vld [vmem:[%s282_s0] sm:$0xff]   ;;  %v220_v3 = vld [vmem:[%s282_s0 + $0x8] sm:$0xff]  }
   0x3   :  { %210 = vmatpush3.bf16.msra.mxu0 %v217_v0  ;;  %213 = vmatprep.mubr.msk.bf16.mxu0 %vm51_vm0, %v219_v2  ;;  %v175_v4 = vld [vmem:[%s283_s2] ss:$0 sm:$0xff]  ;;  %v203_v7 = vld [vmem:[%s285_s4 + $0x8] sm:$0xff]  }
   0x4   :  { %211 = vmatprep.subr.bf16.mxu0 %v218_v1  ;;  %v176_v6 = vld [vmem:[%s284_s3] ss:$0 sm:$0xff]  ;;  %v191_v12 = vunpack.c.l.bf16 %v203_v7  ;;  %v192_v18 = vunpack.c.h.bf16 %v203_v7 }
   0x5   :  { %v186_v10 = vld [vmem:[%s285_s4] sm:$0xff]  }
   0x6   :  { %v187_v16 = vunpack.c.l.bf16 %v186_v10  ;;  %v188_v23 = vunpack.c.h.bf16 %v186_v10 }
   0x7   :  { %212 = vmatpush3.bf16.msra.mxu0 %v218_v1 }
   0xa   :  { %214 = vmatmul.mubr.msk.bf16.vlgmr.msra.gmra.mxu0 %vm51_vm0, %v220_v3 }
  0xca   :  { %v215_v5 = vpop.f32.mrf.mxu0 }
  0xcb   :  { %v116_v8 = vmul.f32 %v215_v5, %v175_v4 }
  0xcc   :  { %v92_v9 = vpop.f32.mrf.mxu0 }
  0xcd   :  { %v127_v11 = vadd.f32 %v176_v6, %v116_v8  ;;  %v114_v13 = vmul.f32 %v175_v4, %v92_v9 }
  0xce   :  { %v216_v14 = vpop.f32.mrf.mxu0 }
  0xcf   :  { %v125_v15 = vadd.f32 %v176_v6, %v114_v13  ;;  %v117_v17 = vmul.f32 %v216_v14, %v175_v4  ;;  %v139_v20 = vadd.f32 %v191_v12, %v127_v11 }
  0xd0   :  { %v95_v19 = vpop.f32.mrf.mxu0 }
  0xd1   :  { %v128_v21 = vadd.f32 %v176_v6, %v117_v17  ;;  %v115_v22 = vmul.f32 %v175_v4, %v95_v19  ;;  %v137_v24 = vadd.f32 %v187_v16, %v125_v15  ;;  %v143_v27 = vmax.f32 %v139_v20, 0.0 }
  0xd3   :  { %v140_v25 = vadd.f32 %v192_v18, %v128_v21  ;;  %v126_v26 = vadd.f32 %v176_v6, %v115_v22  ;;  %v141_v30 = vmax.f32 %v137_v24, 0.0 }
  0xd5   :  { %v144_v28 = vmax.f32 %v140_v25, 0.0  ;;  %v138_v29 = vadd.f32 %v188_v23, %v126_v26 }
  0xd7   :  { %v201_v31 = vpack.c.bf16 %v144_v28, %v143_v27  ;;  %v142_v32 = vmax.f32 %v138_v29, 0.0 }
  0xd9   :  { %204 = vst [vmem:[%s286_s5 + $0x8] sm:$0xff] %v201_v31   ;;  %v196_v33 = vpack.c.bf16 %v142_v32, %v141_v30 }
  0xdb   :  { %197 = vst [vmem:[%s286_s5] sm:$0xff] %v196_v33  }

// kernel: _lambda_.33
= control target key start
LH: loop header
LB: loop body
LE: loop exit
PB: predicated region body
PF: predicated region fallthrough
CT: control target
= control target key end

     0   :  { %s1067_s15 = smov 0   ;;  %s1069_s16 = smov 0   ;;  %s1223_s0 = inlined_call_operand.vmem [shape: bf16[2,24,128], index: 0, kind: input, shape index: {}]   ;;  %s1224_s1 = inlined_call_operand.vmem [shape: bf16[3,128,64], index: 1, kind: input, shape index: {}]   ;;  %s1225_s2 = inlined_call_operand.vmem [shape: f32[1,64], index: 2, kind: input, shape index: {}]   ;;  %s1226_s3 = inlined_call_operand.vmem [shape: f32[1,64], index: 3, kind: input, shape index: {}]   ;;  %s1227_s4 = inlined_call_operand.vmem [shape: bf16[2,16,64], index: 4, kind: output, shape index: {}]  }
   0x1   :  { %s1071_s17 = smov 0  }
   0x2 LB: > { %s33_s18 = sadd.s32 1, %s1034_s16  ;;  %p801_p0 = scmp.ge.s32.totalorder %s1038_s17, 1  ;;  %s1038_s17 = sphi %s1071_s17, %s14_s17   ;;  %s1034_s16 = sphi %s1069_s16, %s1229_s16   ;;  %s1030_s15 = sphi %s1067_s15, %s1228_s15  }
   0x3   : > { %p35_p1 = scmp.ge.s32.totalorder %s33_s18, 2  ;;  %p210_p2 = scmp.lt.s32.totalorder %s1038_s17, 3 }
   0x5   : > { %s1231_s18 = smov (%p35_p1, %s33_s18), 0  ;;  %p211_p3 = pnand %p801_p0, %p210_p2 }
   0x6   : > { %p253_p4 = scmp.lt.s32.totalorder (!%p211_p3), %s1030_s15, 1 }
   0x7   : > { %214 = sbr.rel (%p211_p3) target bundleno = 285 (0x11d), region = 36 }
   0xc   : > { %v988_v0 = vld [vmem:[%s1224_s1 + $0x78] sm:$0xff]   ;;  %v1040_v1 = vmov 0.0   ;;  %v990_v3 = vld [vmem:[%s1224_s1 + $0x70] sm:$0xff]   ;;  %vm1041_vm0 = vmmov 0   ;;  %v992_v5 = vld [vmem:[%s1224_s1 + $0x68] sm:$0xff]   ;;  %s1233_s15 = smov (!%p253_p4, %s1030_s15), 1 }
   0xd   : > { %901 = vmatprep.subr.bf16.mxu0 %v1040_v1  ;;  %921 = vmatprep.subr.bf16.mxu1 %v1040_v1  ;;  %v989_v2 = vld [vmem:[%s1224_s1 + $0x38] sm:$0xff]   ;;  %v991_v4 = vld [vmem:[%s1224_s1 + $0x30] sm:$0xff]   ;;  %v993_v6 = vld [vmem:[%s1224_s1 + $0x28] sm:$0xff]   ;;  %s961_s9 = smul.u32 12, %s1233_s15  ;;  %vm328_vm1 = vcmask 1045504   ;;  %s871_s5 = sshll.u32 %s1233_s15, 3 }
   0xe   : > { %902 = vmatpush3.bf16.msra.mxu0 %v988_v0  ;;  %917 = vmatprep.mubr.msk.bf16.mxu0 %vm1041_vm0, %v1040_v1  ;;  %v994_v7 = vld [vmem:[%s1224_s1 + $0x60] sm:$0xff]   ;;  %v996_v9 = vld [vmem:[%s1224_s1 + $0x58] sm:$0xff]   ;;  %v998_v11 = vld [vmem:[%s1224_s1 + $0x50] sm:$0xff]   ;;  %s279_s8 = scalar_lea.vmem %s1227_s4, %s871_s5  ;;  %vm658_vm2 = vcmask 519168  }
   0xf   : > { %922 = vmatpush3.bf16.msra.mxu1 %v989_v2  ;;  %903 = vmatprep.subr.bf16.mxu0 %v1040_v1  ;;  %v995_v8 = vld [vmem:[%s1224_s1 + $0x20] sm:$0xff]   ;;  %v997_v10 = vld [vmem:[%s1224_s1 + $0x18] sm:$0xff]   ;;  %s1138_s20 = scalar_lea.vmem %s1223_s0, %s961_s9  ;;  %v999_v12 = vld [vmem:[%s1224_s1 + $0x10] sm:$0xff]  }
  0x10   : > { %923 = vmatprep.subr.bf16.mxu1 %v1040_v1  ;;  %937 = vmatprep.mubr.msk.bf16.mxu1 %vm1041_vm0, %v1040_v1  ;;  %v300_v13 = vld [vmem:[%s1138_s20] sm:$0xc]  ;;  %v301_v14 = vld [vmem:[%s1138_s20 + $0x4] sm:$0xf]  ;;  %v1000_v16 = vld [vmem:[%s1224_s1 + $0x48] sm:$0xff]  }
  0x11   : > { %v1005_v15 = vld [vmem:[%s1138_s20 + $0x8] ss:$0 sps:$4 sm:$0x33]   ;;  %v821_v17 = vcombine.low %v300_v13, %v301_v14  ;;  %v1002_v19 = vld [vmem:[%s1224_s1 + $0x40] sm:$0xff]   ;;  %v1007_v25 = vld [vmem:[%s1224_s1 + $0xb8] sm:$0xff]  }
  0x12   : > { %904 = vmatpush3.bf16.msra.mxu0 %v990_v3  ;;  %v1001_v18 = vld [vmem:[%s1224_s1 + $0x8] sm:$0xff]   ;;  %v330_v21 = vrot.slane %v1005_v15, 2  ;;  %v1003_v22 = vld [vmem:[%s1224_s1] sm:$0xff]   ;;  %v1008_v26 = vld [vmem:[%s1224_s1 + $0xb0] sm:$0xff]  }
  0x13   : > { %924 = vmatpush3.bf16.msra.mxu1 %v991_v4  ;;  %905 = vmatprep.subr.bf16.mxu0 %v1040_v1  ;;  %v329_v20 = vrot.slane %v821_v17, 2  ;;  %v1006_v24 = vld [vmem:[%s1138_s20] sm:$0xff]   ;;  %v1009_v27 = vld [vmem:[%s1224_s1 + $0xa8] sm:$0xff]   ;;  %v1011_v29 = vld [vmem:[%s1224_s1 + $0x98] sm:$0xff]  }
  0x14   : > { %925 = vmatprep.subr.bf16.mxu1 %v1040_v1  ;;  %v1010_v28 = vld [vmem:[%s1224_s1 + $0xa0] sm:$0xff]   ;;  %v1012_v30 = vld [vmem:[%s1224_s1 + $0x90] sm:$0xff]   ;;  %v1013_v31 = vld [vmem:[%s1224_s1 + $0x88] sm:$0xff]  }
  0x15   : > { %v331_v23 = vsel %vm328_vm1, %v329_v20, %v330_v21  ;;  %v1014_v32 = vld [vmem:[%s1224_s1 + $0x80] sm:$0xff]   ;;  %v517_v33 = vld [vmem:[%s1138_s20 + $0x8] sm:$0xf] }
  0x16   : > { %906 = vmatpush3.bf16.msra.mxu0 %v992_v5  ;;  %v856_v34 = vcombine.low %v301_v14, %v517_v33  ;;  %v865_v45 = vld [vmem:[%s1225_s2] ss:$0 sm:$0xff] }
  0x17   : > { %926 = vmatpush3.bf16.msra.mxu1 %v993_v6  ;;  %907 = vmatprep.subr.bf16.mxu0 %v1040_v1  ;;  %v866_v47 = vld [vmem:[%s1226_s3] ss:$0 sm:$0xff] }
  0x18   : > { %927 = vmatprep.subr.bf16.mxu1 %v1040_v1 }
  0x1a   : > { %908 = vmatpush3.bf16.msra.mxu0 %v994_v7 }
  0x1b   : > { %928 = vmatpush3.bf16.msra.mxu1 %v995_v8  ;;  %909 = vmatprep.subr.bf16.mxu0 %v1040_v1 }
  0x1c   : > { %929 = vmatprep.subr.bf16.mxu1 %v1040_v1 }
  0x1e   : > { %910 = vmatpush3.bf16.msra.mxu0 %v996_v9 }
  0x1f   : > { %930 = vmatpush3.bf16.msra.mxu1 %v997_v10  ;;  %911 = vmatprep.subr.bf16.mxu0 %v1040_v1 }
  0x20   : > { %931 = vmatprep.subr.bf16.mxu1 %v1040_v1 }
  0x22   : > { %912 = vmatpush3.bf16.msra.mxu0 %v998_v11 }
  0x23   : > { %932 = vmatpush3.bf16.msra.mxu1 %v999_v12  ;;  %913 = vmatprep.subr.bf16.mxu0 %v1040_v1 }
  0x24   : > { %933 = vmatprep.subr.bf16.mxu1 %v1040_v1 }
  0x26   : > { %914 = vmatpush3.bf16.msra.mxu0 %v1000_v16 }
  0x27   : > { %934 = vmatpush3.bf16.msra.mxu1 %v1001_v18  ;;  %915 = vmatprep.subr.bf16.mxu0 %v1040_v1 }
  0x28   : > { %935 = vmatprep.subr.bf16.mxu1 %v1040_v1 }
  0x2a   : > { %916 = vmatpush3.bf16.msra.mxu0 %v1002_v19 }
  0x2b   : > { %936 = vmatpush3.bf16.msra.mxu1 %v1003_v22  ;;  %941 = vmatprep.subr.bf16.mxu0 %v1040_v1 }
  0x2d   : > { %918 = vmatmul.mubr.bf16.vlgmr.msra.gmra.mxu0 %v331_v23 }
  0x2e   : > { %938 = vmatmul.mubr.bf16.vlgmr.msra.gmra.mxu1 %v1006_v24  ;;  %942 = vmatpush3.bf16.msra.mxu0 %v1007_v25 }
  0x2f   : > { %943 = vmatprep.subr.bf16.mxu0 %v1040_v1  ;;  %957 = vmatprep.mubr.msk.bf16.mxu0 %vm1041_vm0, %v1040_v1 }
  0x32   : > { %944 = vmatpush3.bf16.msra.mxu0 %v1008_v26 }
  0x33   : > { %945 = vmatprep.subr.bf16.mxu0 %v1040_v1 }
  0x36   : > { %946 = vmatpush3.bf16.msra.mxu0 %v1009_v27 }
  0x37   : > { %947 = vmatprep.subr.bf16.mxu0 %v1040_v1 }
  0x3a   : > { %948 = vmatpush3.bf16.msra.mxu0 %v1010_v28 }
  0x3b   : > { %949 = vmatprep.subr.bf16.mxu0 %v1040_v1 }
  0x3e   : > { %950 = vmatpush3.bf16.msra.mxu0 %v1011_v29 }
  0x3f   : > { %951 = vmatprep.subr.bf16.mxu0 %v1040_v1 }
  0x42   : > { %952 = vmatpush3.bf16.msra.mxu0 %v1012_v30 }
  0x43   : > { %953 = vmatprep.subr.bf16.mxu0 %v1040_v1 }
  0x46   : > { %954 = vmatpush3.bf16.msra.mxu0 %v1013_v31 }
  0x47   : > { %955 = vmatprep.subr.bf16.mxu0 %v1040_v1 }
  0x4a   : > { %956 = vmatpush3.bf16.msra.mxu0 %v1014_v32 }
  0x4d   : > { %958 = vmatmul.mubr.bf16.vlgmr.msra.gmra.mxu0 %v856_v34 }
  0xed   : > { %v415_v35 = vpop.f32.mrf.mxu0 }
  0xee   : > { %v510_v36 = vpop.f32.mrf.mxu1 }
  0xef   : > { %v919_v37 = vpop.f32.mrf.mxu0  ;;  %v511_v43 = vadd.f32 %v510_v36, %v415_v35 }
  0xf0   : > { %v939_v38 = vpop.f32.mrf.mxu1 }
  0xf1   : > { %v418_v39 = vpop.f32.mrf.mxu0 }
  0xf2   : > { %v513_v40 = vpop.f32.mrf.mxu1 }
  0xf3   : > { %v920_v41 = vpop.f32.mrf.mxu0  ;;  %v514_v49 = vadd.f32 %v513_v40, %v418_v39 }
  0xf4   : > { %v940_v42 = vpop.f32.mrf.mxu1 }
 0x10d   : > { %v621_v44 = vpop.f32.mrf.mxu0 }
 0x10e   : > { %v628_v46 = vadd.f32 %v621_v44, %v511_v43 }
 0x10f   : > { %v959_v48 = vpop.f32.mrf.mxu0 }
 0x110   : > { %v637_v50 = vmul.f32 %v865_v45, %v628_v46 }
 0x111   : > { %v624_v51 = vpop.f32.mrf.mxu0 }
 0x112   : > { %v646_v52 = vadd.f32 %v866_v47, %v637_v50  ;;  %v629_v53 = vadd.f32 %v624_v51, %v514_v49 }
 0x113   : > { %v960_v54 = vpop.f32.mrf.mxu0 }
 0x114   : > { %v648_v55 = vmax.f32 %v646_v52, 0.0  ;;  %v638_v56 = vmul.f32 %v865_v45, %v629_v53 }
 0x116   : > { %v872_v57 = vpack.c.bf16 %v648_v55, %v648_v55  ;;  %v647_v58 = vadd.f32 %v866_v47, %v638_v56 }
 0x118   : > { %659 = vst.msk [vmem:[%s279_s8] sm:$0xf] %vm658_vm2, %v872_v57  ;;  %v649_v59 = vmax.f32 %v647_v58, 0.0 }
 0x11a   : > { %v873_v60 = vpack.c.bf16 %v649_v59, %v649_v59 }
 0x11c   : > { %660 = vst.msk [vmem:[%s279_s8 + $0x4] sm:$0xf] %vm658_vm2, %v873_v60 }
 0x11d PF: > { %s14_s17 = sadd.s32 1, %s1038_s17   ;;  %s1228_s15 = smov %s1034_s16 }
 0x11e   : > { %p11_p5 = scmp.ge.s32.totalorder %s14_s17, 4   ;;  %s1229_s16 = smov %s1231_s18 }
 0x120   :  { %13 = sbr.rel (!%p11_p5) target bundleno = 2 (0x2), region = 77 }

// kernel: _lambda_.32
= control target key start
LH: loop header
LB: loop body
LE: loop exit
PB: predicated region body
PF: predicated region fallthrough
CT: control target
= control target key end

     0   :  { %v240_v1 = vmov 0   ;;  %v158_v18 = vlaneseq  ;;  %s326_s1 = inlined_call_operand.vmem [shape: bf16[1,128,256], index: 1, kind: input, shape index: {}]   ;;  %s327_s0 = inlined_call_operand.vmem [shape: bf16[1,8,128], index: 0, kind: input, shape index: {}]   ;;  %s328_s2 = inlined_call_operand.vmem [shape: f32[1,256], index: 2, kind: input, shape index: {}]   ;;  %s329_s3 = inlined_call_operand.vmem [shape: f32[1,256], index: 3, kind: input, shape index: {}]   ;;  %s330_s4 = inlined_call_operand.vmem [shape: bf16[1,8,256], index: 4, kind: output, shape index: {}]  }
   0x1   :  { %v216_v0 = vld [vmem:[%s326_s1 + $0x74] ss:$8 sps:$4 sm:$0xff]   ;;  %147 = vmatprep.mubr.bf16.mxu0 %v240_v1  ;;  %v218_v2 = vld [vmem:[%s326_s1 + $0x70] ss:$8 sps:$4 sm:$0xff]   ;;  %v219_v3 = vld [vmem:[%s326_s1 + $0x64] ss:$8 sps:$4 sm:$0xff]  }
   0x2   :  { %115 = vmatprep.subr.bf16.mxu0 %v216_v0  ;;  %v221_v4 = vld [vmem:[%s326_s1 + $0x60] ss:$8 sps:$4 sm:$0xff]   ;;  %v222_v5 = vld [vmem:[%s326_s1 + $0x54] ss:$8 sps:$4 sm:$0xff]   ;;  %v224_v6 = vld [vmem:[%s326_s1 + $0x50] ss:$8 sps:$4 sm:$0xff]  }
   0x3   :  { %116 = vmatpush1.bf16.msra.mxu0 %v218_v2  ;;  %v225_v7 = vld [vmem:[%s326_s1 + $0x44] ss:$8 sps:$4 sm:$0xff]   ;;  %v227_v8 = vld [vmem:[%s326_s1 + $0x40] ss:$8 sps:$4 sm:$0xff]   ;;  %v228_v9 = vld [vmem:[%s326_s1 + $0x34] ss:$8 sps:$4 sm:$0xff]  }
   0x4   :  { %117 = vmatprep.subr.bf16.mxu0 %v219_v3  ;;  %v230_v10 = vld [vmem:[%s326_s1 + $0x30] ss:$8 sps:$4 sm:$0xff]   ;;  %v231_v11 = vld [vmem:[%s326_s1 + $0x24] ss:$8 sps:$4 sm:$0xff]   ;;  %v233_v12 = vld [vmem:[%s326_s1 + $0x20] ss:$8 sps:$4 sm:$0xff]  }
   0x5   :  { %v234_v13 = vld [vmem:[%s326_s1 + $0x14] ss:$8 sps:$4 sm:$0xff]   ;;  %v236_v14 = vld [vmem:[%s326_s1 + $0x10] ss:$8 sps:$4 sm:$0xff]   ;;  %v237_v15 = vld [vmem:[%s326_s1 + $0x4] ss:$8 sps:$4 sm:$0xff]  }
   0x6   :  { %v239_v16 = vld [vmem:[%s326_s1] ss:$8 sps:$4 sm:$0xff]   ;;  %v159_v19 = vshrl.u32 %v158_v18, 7 }
   0x7   :  { %118 = vmatpush1.bf16.msra.mxu0 %v221_v4  ;;  %v18_v17 = vld [vmem:[%s327_s0] sm:$0xf] }
   0x8   :  { %119 = vmatprep.subr.bf16.mxu0 %v222_v5  ;;  %v160_v20 = vsub.s32 0, %v159_v19  ;;  %v156_v21 = vld [vmem:[%s328_s2] sm:$0x3]  ;;  %v164_v22 = vsub.s32 1, %v159_v19 }
   0x9   :  { %v170_v24 = vld [vmem:[%s329_s3] sm:$0x3] }
   0xa   :  { %v161_v23 = vrot.slane %v156_v21, %v160_v20  ;;  %v165_v25 = vrot.slane %v156_v21, %v164_v22  ;;  %v175_v28 = vrot.slane %v170_v24, %v160_v20  ;;  %v179_v29 = vrot.slane %v170_v24, %v164_v22 }
   0xb   :  { %120 = vmatpush1.bf16.msra.mxu0 %v224_v6 }
   0xc   :  { %121 = vmatprep.subr.bf16.mxu0 %v225_v7 }
   0xf   :  { %122 = vmatpush1.bf16.msra.mxu0 %v227_v8 }
  0x10   :  { %123 = vmatprep.subr.bf16.mxu0 %v228_v9 }
  0x13   :  { %124 = vmatpush1.bf16.msra.mxu0 %v230_v10 }
  0x14   :  { %125 = vmatprep.subr.bf16.mxu0 %v231_v11 }
  0x17   :  { %126 = vmatpush1.bf16.msra.mxu0 %v233_v12 }
  0x18   :  { %127 = vmatprep.subr.bf16.mxu0 %v234_v13 }
  0x1b   :  { %128 = vmatpush1.bf16.msra.mxu0 %v236_v14 }
  0x1c   :  { %129 = vmatprep.subr.bf16.mxu0 %v237_v15 }
  0x1f   :  { %130 = vmatpush1.bf16.msra.mxu0 %v239_v16 }
  0x22   :  { %148 = vmatmul.mubr.bf16.vlgmr.msra.gmra.mxu0 %v18_v17 }
  0xe2   :  { %v149_v26 = vpop.f32.mrf.mxu0 }
  0xe3   :  { %v168_v27 = vmul.f32 %v161_v23, %v149_v26 }
  0xe4   :  { %v151_v30 = vpop.f32.mrf.mxu0 }
  0xe5   :  { %v169_v31 = vmul.f32 %v165_v25, %v151_v30  ;;  %v182_v33 = vadd.f32 %v175_v28, %v168_v27 }
  0xe6   :  { %v153_v32 = vpop.f32.mrf.mxu0 }
  0xe7   :  { %v183_v34 = vadd.f32 %v179_v29, %v169_v31 }
  0xe8   :  { %v154_v35 = vpop.f32.mrf.mxu0 }
  0xe9   :  { %v214_v36 = vpack.c.bf16 %v183_v34, %v182_v33 }
  0xeb   :  { %192 = vst [vmem:[%s330_s4] sm:$0xff] %v214_v36 }

// kernel: _lambda_.34
= control target key start
LH: loop header
LB: loop body
LE: loop exit
PB: predicated region body
PF: predicated region fallthrough
CT: control target
= control target key end

     0   :  { %s1564_s15 = smov 0   ;;  %s1566_s16 = smov 0   ;;  %s1789_s0 = inlined_call_operand.vmem [shape: bf16[8,16,64], index: 0, kind: input, shape index: {}]   ;;  %s1790_s1 = inlined_call_operand.vmem [shape: bf16[9,64,64], index: 1, kind: input, shape index: {}]   ;;  %s1791_s2 = inlined_call_operand.vmem [shape: f32[1,64], index: 2, kind: input, shape index: {}]   ;;  %s1792_s3 = inlined_call_operand.vmem [shape: f32[1,64], index: 3, kind: input, shape index: {}]   ;;  %s1793_s4 = inlined_call_operand.vmem [shape: bf16[8,2,64], index: 4, kind: output, shape index: {}]  }
   0x1   :  { %s1568_s17 = smov 0  }
   0x2 LB: > { %s33_s18 = sadd.s32 1, %s1531_s16  ;;  %p1167_p0 = scmp.ge.s32.totalorder %s1535_s17, 1  ;;  %s1535_s17 = sphi %s1568_s17, %s14_s17   ;;  %s1531_s16 = sphi %s1566_s16, %s1795_s16   ;;  %s1527_s15 = sphi %s1564_s15, %s1794_s15  }
   0x3   : > { %p35_p1 = scmp.ge.s32.totalorder %s33_s18, 8  ;;  %p210_p2 = scmp.lt.s32.totalorder %s1535_s17, 9 }
   0x5   : > { %s1797_s18 = smov (%p35_p1, %s33_s18), 0  ;;  %p211_p3 = pnand %p1167_p0, %p210_p2 }
   0x6   : > { %p250_p4 = scmp.lt.s32.totalorder (!%p211_p3), %s1527_s15, 7 }
   0x7   : > { %214 = sbr.rel (%p211_p3) target bundleno = 297 (0x129), region = 36 }
   0xc   : > { %v1470_v0 = vld [vmem:[%s1790_s1 + $0x38] sm:$0xff]   ;;  %v1537_v1 = vmov 0.0   ;;  %v1472_v3 = vld [vmem:[%s1790_s1 + $0x30] sm:$0xff]   ;;  %vm1538_vm0 = vmmov 0   ;;  %s1799_s15 = smov (!%p250_p4, %s1527_s15), 7  ;;  %v1474_v5 = vld [vmem:[%s1790_s1 + $0x28] sm:$0xff]  }
   0xd   : > { %1336 = vmatprep.subr.bf16.mxu0 %v1537_v1  ;;  %1348 = vmatprep.subr.bf16.mxu1 %v1537_v1  ;;  %v1471_v2 = vld [vmem:[%s1790_s1 + $0x18] sm:$0xff]   ;;  %v1473_v4 = vld [vmem:[%s1790_s1 + $0x10] sm:$0xff]   ;;  %s1290_s29 = sshll.u32 %s1799_s15, 3  ;;  %v1475_v6 = vld [vmem:[%s1790_s1 + $0x8] sm:$0xff]   ;;  %vm322_vm1 = vcmask 523264   ;;  %s273_s11 = scalar_lea.vmem %s1793_s4, %s1799_s15  ;;  %vm1040_vm2 = vcmask 516096  }
   0xe   : > { %1337 = vmatpush3.bf16.msra.mxu0 %v1470_v0  ;;  %1344 = vmatprep.mubr.msk.bf16.mxu0 %vm1538_vm0, %v1537_v1  ;;  %s1615_s8 = scalar_lea.vmem %s1789_s0, %s1290_s29  ;;  %v1476_v8 = vld [vmem:[%s1790_s1 + $0x20] sm:$0xff]   ;;  %v1479_v11 = vld [vmem:[%s1790_s1 + $0x58] sm:$0xff]   ;;  %v1481_v15 = vld [vmem:[%s1790_s1 + $0x50] sm:$0xff]  }
   0xf   : > { %1349 = vmatpush3.bf16.msra.mxu1 %v1471_v2  ;;  %1338 = vmatprep.subr.bf16.mxu0 %v1537_v1  ;;  %v1478_v7 = vld [vmem:[%s1615_s8] ss:$0 sps:$4 sm:$0x44]   ;;  %v1480_v13 = vld [vmem:[%s1790_s1 + $0x78] sm:$0xff]   ;;  %v1482_v16 = vld [vmem:[%s1790_s1 + $0x70] sm:$0xff]  }
  0x10   : > { %1350 = vmatprep.subr.bf16.mxu1 %v1537_v1  ;;  %1356 = vmatprep.mubr.msk.bf16.mxu1 %vm1538_vm0, %v1537_v1  ;;  %v1477_v9 = vld [vmem:[%s1790_s1] sm:$0xff]   ;;  %v297_v10 = vrot.slane %v1478_v7, 2  ;;  %v1483_v18 = vld [vmem:[%s1790_s1 + $0x48] sm:$0xff]   ;;  %v1488_v25 = vld [vmem:[%s1790_s1 + $0x98] sm:$0xff]  }
  0x11   : > { %v275_v12 = vld [vmem:[%s1615_s8] sm:$0x1]  ;;  %v1484_v19 = vld [vmem:[%s1790_s1 + $0x68] sm:$0xff]   ;;  %v521_v26 = vld [vmem:[%s1615_s8 + $0x4] sm:$0x1] }
  0x12   : > { %1339 = vmatpush3.bf16.msra.mxu0 %v1472_v3  ;;  %v1487_v14 = vld [vmem:[%s1615_s8] ss:$0 sps:$4 sm:$0x33]   ;;  %v1489_v27 = vld [vmem:[%s1790_s1 + $0xb8] sm:$0xff]   ;;  %v1490_v29 = vld [vmem:[%s1790_s1 + $0x90] sm:$0xff]  }
  0x13   : > { %1351 = vmatpush3.bf16.msra.mxu1 %v1473_v4  ;;  %1340 = vmatprep.subr.bf16.mxu0 %v1537_v1  ;;  %v449_v17 = vshll.u32 %v1487_v14, 16  ;;  %v447_v20 = vshrl.u32 %v1487_v14, 16  ;;  %v1485_v22 = vld [vmem:[%s1790_s1 + $0x40] sm:$0xff]   ;;  %v1491_v30 = vld [vmem:[%s1790_s1 + $0xb0] sm:$0xff]   ;;  %v1492_v31 = vld [vmem:[%s1790_s1 + $0x88] sm:$0xff]  }
  0x14   : > { %1352 = vmatprep.subr.bf16.mxu1 %v1537_v1  ;;  %v1486_v23 = vld [vmem:[%s1790_s1 + $0x60] sm:$0xff]   ;;  %v1493_v33 = vld [vmem:[%s1790_s1 + $0xa8] sm:$0xff]   ;;  %v1497_v40 = vld [vmem:[%s1790_s1 + $0xd8] sm:$0xff]  }
  0x15   : > { %v451_v21 = vrot.slane %v449_v17, 1  ;;  %v1498_v28 = vld [vmem:[%s1615_s8 + $0x4] ss:$0 sps:$4 sm:$0x33]   ;;  %v1499_v42 = vld [vmem:[%s1790_s1 + $0xf8] sm:$0xff]   ;;  %v1500_v43 = vld [vmem:[%s1790_s1 + $0xd0] sm:$0xff]  }
  0x16   : > { %1341 = vmatpush3.bf16.msra.mxu0 %v1474_v5  ;;  %v697_v32 = vshll.u32 %v1498_v28, 16  ;;  %v1496_v34 = vld [vmem:[%s1615_s8 + $0x4] ss:$0 sps:$4 sm:$0x44]   ;;  %v695_v36 = vshrl.u32 %v1498_v28, 16  ;;  %v1501_v44 = vld [vmem:[%s1790_s1 + $0xf0] sm:$0xff]  }
  0x17   : > { %1353 = vmatpush3.bf16.msra.mxu1 %v1475_v6  ;;  %1342 = vmatprep.subr.bf16.mxu0 %v1537_v1  ;;  %v452_v24 = vor.u32 %v451_v21, %v447_v20  ;;  %v1494_v35 = vld [vmem:[%s1790_s1 + $0x80] sm:$0xff]   ;;  %v612_v39 = vrot.slane %v1496_v34, 2  ;;  %v1502_v45 = vld [vmem:[%s1790_s1 + $0xc8] sm:$0xff]   ;;  %v1507_v52 = vld [vmem:[%s1790_s1 + $0x118] sm:$0xff]  }
  0x18   : > { %1354 = vmatprep.subr.bf16.mxu1 %v1537_v1  ;;  %v699_v37 = vrot.slane %v697_v32, 1  ;;  %v1495_v38 = vld [vmem:[%s1790_s1 + $0xa0] sm:$0xff]   ;;  %v1503_v46 = vld [vmem:[%s1790_s1 + $0xe8] sm:$0xff]   ;;  %v1509_v55 = vld [vmem:[%s1790_s1 + $0x110] sm:$0xff]  }
  0x19   : > { %v1506_v47 = vld [vmem:[%s1615_s8] ss:$0 sps:$4 sm:$0x22]   ;;  %v1510_v58 = vld [vmem:[%s1790_s1 + $0x108] sm:$0xff]  }
  0x1a   : > { %1343 = vmatpush3.bf16.msra.mxu0 %v1476_v8  ;;  %v700_v41 = vor.u32 %v699_v37, %v695_v36  ;;  %v1504_v48 = vld [vmem:[%s1790_s1 + $0xc0] sm:$0xff]   ;;  %v782_v51 = vrot.slane %v1506_v47, 1 }
  0x1b   : > { %1355 = vmatpush3.bf16.msra.mxu1 %v1477_v9  ;;  %1360 = vmatprep.subr.bf16.mxu0 %v1537_v1  ;;  %v1508_v49 = vld [vmem:[%s1615_s8] ss:$0 sps:$4 sm:$0x88]  }
  0x1c   : > { %1372 = vmatprep.subr.bf16.mxu1 %v1537_v1  ;;  %v1505_v50 = vld [vmem:[%s1790_s1 + $0xe0] sm:$0xff]   ;;  %v864_v53 = vrot.slane %v1508_v49, 3 }
  0x1d   : > { %1345 = vmatmul.mubr.msk.bf16.vlgmr.msra.gmra.mxu0 %vm322_vm1, %v297_v10  ;;  %v1512_v54 = vld [vmem:[%s1615_s8] ss:$0 sps:$4 sm:$0x66]  }
  0x1e   : > { %1357 = vmatmul.mubr.msk.bf16.vlgmr.msra.gmra.mxu1 %vm322_vm1, %v275_v12  ;;  %1361 = vmatpush3.bf16.msra.mxu0 %v1479_v11  ;;  %v947_v56 = vshrl.u32 %v1512_v54, 16  ;;  %v950_v57 = vshll.u32 %v1512_v54, 16  ;;  %v1511_v61 = vld [vmem:[%s1790_s1 + $0x100] sm:$0xff]  }
  0x1f   : > { %1373 = vmatpush3.bf16.msra.mxu1 %v1480_v13  ;;  %1362 = vmatprep.subr.bf16.mxu0 %v1537_v1 }
  0x20   : > { %1374 = vmatprep.subr.bf16.mxu1 %v1537_v1  ;;  %1368 = vmatprep.mubr.msk.bf16.mxu0 %vm1538_vm0, %v1537_v1  ;;  %v949_v59 = vrot.slane %v947_v56, 1  ;;  %v952_v60 = vrot.slane %v950_v57, 2 }
  0x21   : > { %1380 = vmatprep.mubr.msk.bf16.mxu1 %vm1538_vm0, %v1537_v1 }
  0x22   : > { %1363 = vmatpush3.bf16.msra.mxu0 %v1481_v15  ;;  %v953_v62 = vor.u32 %v952_v60, %v949_v59 }
  0x23   : > { %1375 = vmatpush3.bf16.msra.mxu1 %v1482_v16  ;;  %1364 = vmatprep.subr.bf16.mxu0 %v1537_v1 }
  0x24   : > { %1376 = vmatprep.subr.bf16.mxu1 %v1537_v1 }
  0x26   : > { %1365 = vmatpush3.bf16.msra.mxu0 %v1483_v18 }
  0x27   : > { %1377 = vmatpush3.bf16.msra.mxu1 %v1484_v19  ;;  %1366 = vmatprep.subr.bf16.mxu0 %v1537_v1 }
  0x28   : > { %1378 = vmatprep.subr.bf16.mxu1 %v1537_v1 }
  0x2a   : > { %1367 = vmatpush3.bf16.msra.mxu0 %v1485_v22 }
  0x2b   : > { %1379 = vmatpush3.bf16.msra.mxu1 %v1486_v23  ;;  %1384 = vmatprep.subr.bf16.mxu0 %v1537_v1 }
  0x2c   : > { %1396 = vmatprep.subr.bf16.mxu1 %v1537_v1 }
  0x2d   : > { %1369 = vmatmul.mubr.msk.bf16.vlgmr.msra.gmra.mxu0 %vm322_vm1, %v452_v24 }
  0x2e   : > { %1385 = vmatpush3.bf16.msra.mxu0 %v1488_v25  ;;  %1381 = vmatmul.mubr.msk.bf16.vlgmr.msra.gmra.mxu1 %vm322_vm1, %v521_v26 }
  0x2f   : > { %1397 = vmatpush3.bf16.msra.mxu1 %v1489_v27  ;;  %1386 = vmatprep.subr.bf16.mxu0 %v1537_v1 }
  0x30   : > { %1398 = vmatprep.subr.bf16.mxu1 %v1537_v1  ;;  %1392 = vmatprep.mubr.msk.bf16.mxu0 %vm1538_vm0, %v1537_v1 }
  0x31   : > { %1404 = vmatprep.mubr.msk.bf16.mxu1 %vm1538_vm0, %v1537_v1 }
  0x32   : > { %1387 = vmatpush3.bf16.msra.mxu0 %v1490_v29 }
  0x33   : > { %1399 = vmatpush3.bf16.msra.mxu1 %v1491_v30  ;;  %1388 = vmatprep.subr.bf16.mxu0 %v1537_v1 }
  0x34   : > { %1400 = vmatprep.subr.bf16.mxu1 %v1537_v1 }
  0x36   : > { %1389 = vmatpush3.bf16.msra.mxu0 %v1492_v31 }
  0x37   : > { %1401 = vmatpush3.bf16.msra.mxu1 %v1493_v33  ;;  %1390 = vmatprep.subr.bf16.mxu0 %v1537_v1 }
  0x38   : > { %1402 = vmatprep.subr.bf16.mxu1 %v1537_v1 }
  0x3a   : > { %1391 = vmatpush3.bf16.msra.mxu0 %v1494_v35 }
  0x3b   : > { %1403 = vmatpush3.bf16.msra.mxu1 %v1495_v38  ;;  %1408 = vmatprep.subr.bf16.mxu0 %v1537_v1 }
  0x3c   : > { %1420 = vmatprep.subr.bf16.mxu1 %v1537_v1 }
  0x3d   : > { %1393 = vmatmul.mubr.msk.bf16.vlgmr.msra.gmra.mxu0 %vm322_vm1, %v612_v39  ;;  %v1286_v39 = vld [vmem:[%s1791_s2] ss:$0 sm:$0xff] }
  0x3e   : > { %1409 = vmatpush3.bf16.msra.mxu0 %v1497_v40  ;;  %1405 = vmatmul.mubr.msk.bf16.vlgmr.msra.gmra.mxu1 %vm322_vm1, %v700_v41  ;;  %v1287_v41 = vld [vmem:[%s1792_s3] ss:$0 sm:$0xff] }
  0x3f   : > { %1421 = vmatpush3.bf16.msra.mxu1 %v1499_v42  ;;  %1410 = vmatprep.subr.bf16.mxu0 %v1537_v1 }
  0x40   : > { %1422 = vmatprep.subr.bf16.mxu1 %v1537_v1  ;;  %1416 = vmatprep.mubr.msk.bf16.mxu0 %vm1538_vm0, %v1537_v1 }
  0x41   : > { %1428 = vmatprep.mubr.msk.bf16.mxu1 %vm1538_vm0, %v1537_v1 }
  0x42   : > { %1411 = vmatpush3.bf16.msra.mxu0 %v1500_v43 }
  0x43   : > { %1423 = vmatpush3.bf16.msra.mxu1 %v1501_v44  ;;  %1412 = vmatprep.subr.bf16.mxu0 %v1537_v1 }
  0x44   : > { %1424 = vmatprep.subr.bf16.mxu1 %v1537_v1 }
  0x46   : > { %1413 = vmatpush3.bf16.msra.mxu0 %v1502_v45 }
  0x47   : > { %1425 = vmatpush3.bf16.msra.mxu1 %v1503_v46  ;;  %1414 = vmatprep.subr.bf16.mxu0 %v1537_v1 }
  0x48   : > { %1426 = vmatprep.subr.bf16.mxu1 %v1537_v1 }
  0x4a   : > { %1415 = vmatpush3.bf16.msra.mxu0 %v1504_v48 }
  0x4b   : > { %1427 = vmatpush3.bf16.msra.mxu1 %v1505_v50  ;;  %1432 = vmatprep.subr.bf16.mxu0 %v1537_v1 }
  0x4d   : > { %1417 = vmatmul.mubr.msk.bf16.vlgmr.msra.gmra.mxu0 %vm322_vm1, %v782_v51 }
  0x4e   : > { %1433 = vmatpush3.bf16.msra.mxu0 %v1507_v52  ;;  %1429 = vmatmul.mubr.msk.bf16.vlgmr.msra.gmra.mxu1 %vm322_vm1, %v864_v53 }
  0x4f   : > { %1434 = vmatprep.subr.bf16.mxu0 %v1537_v1  ;;  %1440 = vmatprep.mubr.msk.bf16.mxu0 %vm1538_vm0, %v1537_v1 }
  0x52   : > { %1435 = vmatpush3.bf16.msra.mxu0 %v1509_v55 }
  0x53   : > { %1436 = vmatprep.subr.bf16.mxu0 %v1537_v1 }
  0x56   : > { %1437 = vmatpush3.bf16.msra.mxu0 %v1510_v58 }
  0x57   : > { %1438 = vmatprep.subr.bf16.mxu0 %v1537_v1 }
  0x5a   : > { %1439 = vmatpush3.bf16.msra.mxu0 %v1511_v61 }
  0x5d   : > { %1441 = vmatmul.mubr.msk.bf16.vlgmr.msra.gmra.mxu0 %vm322_vm1, %v953_v62 }
  0xdd   : > { %v360_v63 = vpop.f32.mrf.mxu0 }
  0xde   : > { %v427_v0 = vpop.f32.mrf.mxu1 }
  0xdf   : > { %v1346_v2 = vpop.f32.mrf.mxu0  ;;  %v428_v23 = vadd.f32 %v427_v0, %v360_v63 }
  0xe0   : > { %v1358_v3 = vpop.f32.mrf.mxu1 }
  0xe1   : > { %v363_v4 = vpop.f32.mrf.mxu0 }
  0xe2   : > { %v430_v5 = vpop.f32.mrf.mxu1 }
  0xe3   : > { %v1347_v6 = vpop.f32.mrf.mxu0 }
  0xe4   : > { %v1359_v7 = vpop.f32.mrf.mxu1 }
  0xed   : > { %v514_v8 = vpop.f32.mrf.mxu0 }
  0xee   : > { %v592_v9 = vpop.f32.mrf.mxu1  ;;  %v520_v24 = vadd.f32 %v514_v8, %v428_v23 }
  0xef   : > { %v1370_v10 = vpop.f32.mrf.mxu0 }
  0xf0   : > { %v1382_v11 = vpop.f32.mrf.mxu1  ;;  %v598_v28 = vadd.f32 %v592_v9, %v520_v24 }
  0xf1   : > { %v517_v12 = vpop.f32.mrf.mxu0 }
  0xf2   : > { %v595_v13 = vpop.f32.mrf.mxu1 }
  0xf3   : > { %v1371_v14 = vpop.f32.mrf.mxu0 }
  0xf4   : > { %v1383_v1 = vpop.f32.mrf.mxu1 }
  0xfd   : > { %v674_v15 = vpop.f32.mrf.mxu0 }
  0xfe   : > { %v762_v16 = vpop.f32.mrf.mxu1  ;;  %v680_v31 = vadd.f32 %v674_v15, %v598_v28 }
  0xff   : > { %v1394_v17 = vpop.f32.mrf.mxu0 }
 0x100   : > { %v1406_v18 = vpop.f32.mrf.mxu1  ;;  %v768_v35 = vadd.f32 %v762_v16, %v680_v31 }
 0x101   : > { %v677_v19 = vpop.f32.mrf.mxu0 }
 0x102   : > { %v765_v20 = vpop.f32.mrf.mxu1 }
 0x103   : > { %v1395_v21 = vpop.f32.mrf.mxu0 }
 0x104   : > { %v1407_v22 = vpop.f32.mrf.mxu1 }
 0x10d   : > { %v844_v25 = vpop.f32.mrf.mxu0 }
 0x10e   : > { %v926_v26 = vpop.f32.mrf.mxu1  ;;  %v850_v36 = vadd.f32 %v844_v25, %v768_v35 }
 0x10f   : > { %v1418_v27 = vpop.f32.mrf.mxu0 }
 0x110   : > { %v1430_v29 = vpop.f32.mrf.mxu1  ;;  %v932_v37 = vadd.f32 %v926_v26, %v850_v36 }
 0x111   : > { %v847_v30 = vpop.f32.mrf.mxu0 }
 0x112   : > { %v929_v32 = vpop.f32.mrf.mxu1 }
 0x113   : > { %v1419_v33 = vpop.f32.mrf.mxu0 }
 0x114   : > { %v1431_v34 = vpop.f32.mrf.mxu1 }
 0x11d   : > { %v1015_v38 = vpop.f32.mrf.mxu0 }
 0x11e   : > { %v1021_v40 = vadd.f32 %v1015_v38, %v932_v37 }
 0x11f   : > { %v1442_v42 = vpop.f32.mrf.mxu0 }
 0x120   : > { %v1029_v43 = vmul.f32 %v1286_v39, %v1021_v40 }
 0x121   : > { %v1018_v44 = vpop.f32.mrf.mxu0 }
 0x122   : > { %v1037_v45 = vadd.f32 %v1287_v41, %v1029_v43 }
 0x123   : > { %v1443_v46 = vpop.f32.mrf.mxu0 }
 0x124   : > { %v1038_v47 = vmax.f32 %v1037_v45, 0.0 }
 0x126   : > { %v1039_v48 = vpack.c.bf16 %v1038_v47, %v1038_v47 }
 0x128   : > { %1041 = vst.msk [vmem:[%s273_s11] sm:$0x1] %vm1040_vm2, %v1039_v48 }
 0x129 PF: > { %s14_s17 = sadd.s32 1, %s1535_s17   ;;  %s1794_s15 = smov %s1531_s16 }
 0x12a   : > { %p11_p5 = scmp.ge.s32.totalorder %s14_s17, 10   ;;  %s1795_s16 = smov %s1797_s18 }
 0x12c   :  { %13 = sbr.rel (!%p11_p5) target bundleno = 2 (0x2), region = 83 }

// kernel: _lambda_.35
= control target key start
LH: loop header
LB: loop body
LE: loop exit
PB: predicated region body
PF: predicated region fallthrough
CT: control target
= control target key end

     0   :  { %v187_v1 = vmov 0   ;;  %vm70_vm0 = vcmask 523264   ;;  %v117_v10 = vlaneseq  ;;  %s257_s1 = inlined_call_operand.vmem [shape: bf16[1,64,256], index: 1, kind: input, shape index: {}]   ;;  %s258_s0 = inlined_call_operand.vmem [shape: bf16[1,8,64], index: 0, kind: input, shape index: {}]   ;;  %s259_s2 = inlined_call_operand.vmem [shape: f32[1,256], index: 2, kind: input, shape index: {}]   ;;  %s260_s3 = inlined_call_operand.vmem [shape: f32[1,256], index: 3, kind: input, shape index: {}]   ;;  %s261_s4 = inlined_call_operand.vmem [shape: bf16[1,8,256], index: 4, kind: input, shape index: {}]   ;;  %s262_s5 = inlined_call_operand.vmem [shape: bf16[1,8,256], index: 5, kind: output, shape index: {}]  }
   0x1   :  { %v175_v0 = vld [vmem:[%s257_s1 + $0x34] ss:$8 sps:$4 sm:$0xff]   ;;  %106 = vmatprep.mubr.bf16.mxu0 %v187_v1  ;;  %v177_v2 = vld [vmem:[%s257_s1 + $0x30] ss:$8 sps:$4 sm:$0xff]   ;;  %v178_v3 = vld [vmem:[%s257_s1 + $0x24] ss:$8 sps:$4 sm:$0xff]  }
   0x2   :  { %82 = vmatprep.subr.bf16.mxu0 %v175_v0  ;;  %v180_v4 = vld [vmem:[%s257_s1 + $0x20] ss:$8 sps:$4 sm:$0xff]   ;;  %v181_v5 = vld [vmem:[%s257_s1 + $0x14] ss:$8 sps:$4 sm:$0xff]   ;;  %v183_v6 = vld [vmem:[%s257_s1 + $0x10] ss:$8 sps:$4 sm:$0xff]  }
   0x3   :  { %83 = vmatpush1.bf16.msra.mxu0 %v177_v2  ;;  %v184_v7 = vld [vmem:[%s257_s1 + $0x4] ss:$8 sps:$4 sm:$0xff]   ;;  %v186_v8 = vld [vmem:[%s257_s1] ss:$8 sps:$4 sm:$0xff]   ;;  %v118_v11 = vshrl.u32 %v117_v10, 7 }
   0x4   :  { %84 = vmatprep.subr.bf16.mxu0 %v178_v3  ;;  %v21_v9 = vld [vmem:[%s258_s0] sm:$0xf] }
   0x5   :  { %v119_v12 = vsub.s32 0, %v118_v11  ;;  %v115_v13 = vld [vmem:[%s259_s2] sm:$0x3]  ;;  %v123_v14 = vsub.s32 1, %v118_v11 }
   0x6   :  { %v129_v15 = vld [vmem:[%s260_s3] sm:$0x3] }
   0x7   :  { %85 = vmatpush1.bf16.msra.mxu0 %v180_v4  ;;  %v120_v16 = vrot.slane %v115_v13, %v119_v12  ;;  %v143_v17 = vld [vmem:[%s261_s4] sm:$0xff]  ;;  %v134_v18 = vrot.slane %v129_v15, %v119_v12  ;;  %v124_v19 = vrot.slane %v115_v13, %v123_v14  ;;  %v138_v23 = vrot.slane %v129_v15, %v123_v14 }
   0x8   :  { %86 = vmatprep.subr.bf16.mxu0 %v181_v5  ;;  %v144_v22 = vunpack.c.l.bf16 %v143_v17  ;;  %v145_v27 = vunpack.c.h.bf16 %v143_v17 }
   0xb   :  { %87 = vmatpush1.bf16.msra.mxu0 %v183_v6 }
   0xc   :  { %88 = vmatprep.subr.bf16.mxu0 %v184_v7 }
   0xf   :  { %89 = vmatpush1.bf16.msra.mxu0 %v186_v8 }
  0x12   :  { %171 = vmatmul.mubr.msk.bf16.vlgmr.msra.gmra.mxu0 %vm70_vm0, %v21_v9 }
  0xd2   :  { %v108_v20 = vpop.f32.mrf.mxu0 }
  0xd3   :  { %v127_v21 = vmul.f32 %v120_v16, %v108_v20 }
  0xd4   :  { %v110_v24 = vpop.f32.mrf.mxu0 }
  0xd5   :  { %v141_v25 = vadd.f32 %v134_v18, %v127_v21  ;;  %v128_v26 = vmul.f32 %v124_v19, %v110_v24 }
  0xd6   :  { %v112_v28 = vpop.f32.mrf.mxu0 }
  0xd7   :  { %v146_v29 = vadd.f32 %v144_v22, %v141_v25  ;;  %v142_v30 = vadd.f32 %v138_v23, %v128_v26 }
  0xd8   :  { %v113_v31 = vpop.f32.mrf.mxu0 }
  0xd9   :  { %v147_v32 = vadd.f32 %v145_v27, %v142_v30  ;;  %v148_v33 = vmax.f32 %v146_v29, 0.0 }
  0xdb   :  { %v149_v34 = vmax.f32 %v147_v32, 0.0 }
  0xdd   :  { %v173_v35 = vpack.c.bf16 %v149_v34, %v148_v33 }
  0xdf   :  { %158 = vst [vmem:[%s262_s5] sm:$0xff] %v173_v35 }

</bundles_post_ra>
